<compile_context>
chip_gen: v7x
topology: tpu7x:2x2x1
jax: 0.10.0
libtpu: 0.0.40
codegen_flags: <defaults>
</compile_context>

<pallas_src>
import functools

import jax
import jax.numpy as jnp
from jax.experimental import pallas as pl
from jax.experimental.pallas import tpu as pltpu


# -------------------- dimensions / padding --------------------

DIMS = [10000, 5000, 1000, 100, 10]


def _pad_to(n, m):
    return ((n + m - 1) // m) * m


# fc1/fc2 feature dims padded to multiples of 512 (big tiled layers),
# fc3/fc4 dims padded to multiples of 128 (single-block fused kernel).
PAD_DIMS = [_pad_to(d, 512) for d in DIMS[:3]] + [_pad_to(d, 128) for d in DIMS[3:]]

_VMEM_LIMIT_BYTES = 32 * 1024 * 1024      # safe on v5e/v6e/v7x
_MAX_W_TILE_BYTES = 4 * 1024 * 1024       # per-buffer weight tile cap (bf16)


def _choose_tn(n):
    """Largest of 512/256/128 dividing n, preferring an even tile count (v7x)."""
    for tn in (512, 256, 128):
        if n % tn == 0 and (n // tn) % 2 == 0:
            return tn
    for tn in (512, 256, 128):
        if n % tn == 0:
            return tn
    return n


def _choose_tk(k, tn, bytes_per_el=2, max_tile_bytes=_MAX_W_TILE_BYTES):
    """Largest multiple of 256 dividing k with weight tile <= max_tile_bytes."""
    best = 0
    t = 256
    while t <= k:
        if k % t == 0 and t * tn * bytes_per_el <= max_tile_bytes:
            best = t
        t += 256
    if best == 0:
        t = 128
        while t <= k:
            if k % t == 0 and t * tn * bytes_per_el <= max_tile_bytes:
                best = t
            t += 128
    return best if best else k


# -------------------- kernels --------------------

def _linear_kernel(x_ref, w_ref, b_ref, o_ref, *, apply_relu):
    """One (j, k) grid step of y = x @ W + b (+ ReLU).

    Grid: (j over N tiles -> parallel, k over K tiles -> arbitrary/reduction).
    The f32 output block is resident across k and used as the accumulator.
    """
    k = pl.program_id(1)

    @pl.when(k == 0)
    def _():
        o_ref[...] = jnp.zeros_like(o_ref)

    o_ref[...] += jnp.dot(
        x_ref[...], w_ref[...], preferred_element_type=jnp.float32
    )

    @pl.when(k == pl.num_programs(1) - 1)
    def _():
        y = o_ref[...] + b_ref[...]        # (1, tn) bias broadcasts over rows
        if apply_relu:
            y = jnp.maximum(y, 0.0)
        o_ref[...] = y


def _head_kernel(x_ref, w3_ref, b3_ref, w4_ref, b4_ref, o_ref):
    """Fused fc3 (+ReLU) and fc4 in one single-step kernel (tiny weights)."""
    h = jnp.dot(x_ref[...], w3_ref[...], preferred_element_type=jnp.float32)
    h = jnp.maximum(h + b3_ref[...], 0.0)
    y = jnp.dot(h.astype(w4_ref.dtype), w4_ref[...],
                preferred_element_type=jnp.float32)
    o_ref[...] = y + b4_ref[...]


# -------------------- pallas_call wrappers --------------------

def pallas_linear(x, w, b, *, apply_relu):
    """x: (M, K) bf16, w: (K, N) bf16, b: (N,) f32  ->  (M, N) f32."""
    M, K = x.shape
    Kw, N = w.shape
    assert K == Kw and b.shape == (N,)
    tn = _choose_tn(N)
    tk = _choose_tk(K, tn)
    assert K % tk == 0 and N % tn == 0

    kernel = functools.partial(_linear_kernel, apply_relu=apply_relu)
    b2 = b.reshape(1, N).astype(jnp.float32)

    return pl.pallas_call(
        kernel,
        out_shape=jax.ShapeDtypeStruct((M, N), jnp.float32),
        grid_spec=pltpu.PrefetchScalarGridSpec(
            num_scalar_prefetch=0,
            grid=(N // tn, K // tk),
            in_specs=[
                pl.BlockSpec((M, tk), lambda j, k: (0, k)),   # x tile (bf16)
                pl.BlockSpec((tk, tn), lambda j, k: (k, j)),  # W tile (bf16)
                pl.BlockSpec((1, tn), lambda j, k: (0, j)),   # bias tile (f32)
            ],
            out_specs=pl.BlockSpec((M, tn), lambda j, k: (0, j)),
        ),
        compiler_params=pltpu.CompilerParams(
            dimension_semantics=("parallel", "arbitrary"),
            vmem_limit_bytes=_VMEM_LIMIT_BYTES,
        ),
    )(x, w, b2)


def pallas_head(x, w3, b3, w4, b4):
    """Fused fc3+fc4: x (M, K3) bf16 -> (M, N4) f32, single grid step."""
    M, K3 = x.shape
    K3w, N3 = w3.shape
    N3w, N4 = w4.shape
    assert K3 == K3w and N3 == N3w
    b3_2 = b3.reshape(1, N3).astype(jnp.float32)
    b4_2 = b4.reshape(1, N4).astype(jnp.float32)

    return pl.pallas_call(
        _head_kernel,
        out_shape=jax.ShapeDtypeStruct((M, N4), jnp.float32),
        grid_spec=pltpu.PrefetchScalarGridSpec(
            num_scalar_prefetch=0,
            grid=(1,),
            in_specs=[
                pl.BlockSpec((M, K3), lambda i: (0, 0)),
                pl.BlockSpec((K3, N3), lambda i: (0, 0)),
                pl.BlockSpec((1, N3), lambda i: (0, 0)),
                pl.BlockSpec((N3, N4), lambda i: (0, 0)),
                pl.BlockSpec((1, N4), lambda i: (0, 0)),
            ],
            out_specs=pl.BlockSpec((M, N4), lambda i: (0, 0)),
        ),
        compiler_params=pltpu.CompilerParams(
            dimension_semantics=("arbitrary",),
            vmem_limit_bytes=_VMEM_LIMIT_BYTES,
        ),
    )(x, w3, b3_2, w4, b4_2)


# -------------------- parameter setup (deterministic, in-script) --------------------

def init_params(key):
    """Deterministic init matching nn.Linear shapes: W (out,in) -> stored as (in,out)."""
    params = []
    for i in range(len(DIMS) - 1):
        fan_in, fan_out = DIMS[i], DIMS[i + 1]
        key, kw, kb = jax.random.split(key, 3)
        bound = 1.0 / jnp.sqrt(fan_in)
        w = jax.random.uniform(
            kw, (fan_in, fan_out), jnp.float32, minval=-bound, maxval=bound
        )
        b = jax.random.uniform(
            kb, (fan_out,), jnp.float32, minval=-bound, maxval=bound
        )
        params.append((w, b))
    return params


def pad_params(params):
    """Zero-pad to PAD_DIMS; weights cast to bf16, biases kept f32."""
    padded = []
    for i, (w, b) in enumerate(params):
        kin_p, kout_p = PAD_DIMS[i], PAD_DIMS[i + 1]
        wp = jnp.zeros((kin_p, kout_p), jnp.float32).at[: w.shape[0], : w.shape[1]].set(w)
        bp = jnp.zeros((kout_p,), jnp.float32).at[: b.shape[0]].set(b)
        padded.append((wp.astype(jnp.bfloat16), bp))
    return padded


# -------------------- forward pass --------------------

@jax.jit
def larger_net_forward(x, padded_params):
    """x: (batch, 10000) float32 -> (batch, 10) float32."""
    batch, in_dim = x.shape
    m_pad = _pad_to(max(batch, 8), 8)
    k_pad = PAD_DIMS[0]

    h = jnp.zeros((m_pad, k_pad), jnp.bfloat16).at[:batch, :in_dim].set(
        x.astype(jnp.bfloat16)
    )

    (w1, b1), (w2, b2), (w3, b3), (w4, b4) = padded_params

    h = pallas_linear(h, w1, b1, apply_relu=True)                        # (M, 5120) f32
    h = pallas_linear(h.astype(jnp.bfloat16), w2, b2, apply_relu=True)   # (M, 1024) f32
    out = pallas_head(h.astype(jnp.bfloat16), w3, b3, w4, b4)            # (M, 128)  f32

    return out[:batch, : DIMS[-1]]


if __name__ == "__main__":
    key = jax.random.PRNGKey(0)
    key, kx = jax.random.split(key)

    batch = 2  # input feature dim fixed at 10000 by fc1
    x = jax.random.normal(kx, (batch, DIMS[0]), jnp.float32)

    params = init_params(jax.random.PRNGKey(0))
    padded_params = pad_params(params)

    out = larger_net_forward(x, padded_params)
    out = jax.block_until_ready(out)

    assert out.shape == (batch, 10), out.shape
    assert jnp.all(jnp.isfinite(out))

    # Loose reference check (bf16 weight stream vs f32 reference -> small error).
    ref = x
    for i, (w, b) in enumerate(params):
        ref = ref @ w + b
        if i < len(params) - 1:
            ref = jnp.maximum(ref, 0.0)
    assert jnp.allclose(out, ref, rtol=1e-1, atol=1e-1), float(
        jnp.max(jnp.abs(out - ref))
    )

    print("KERNEL_OK")
</pallas_src>

<mosaic_0001>
module attributes {stable_mosaic.version = 11 : i64} {
  func.func @_linear_kernel(%arg0: i32, %arg1: i32, %arg2: memref<8x2560xbf16, #tpu.memory_space<vmem>>, %arg3: memref<2560x512xbf16, #tpu.memory_space<vmem>>, %arg4: memref<1x512xf32, #tpu.memory_space<vmem>>, %arg5: memref<8x512xf32, #tpu.memory_space<vmem>>) attributes {dimension_semantics = [#tpu.dimension_semantics<parallel>, #tpu.dimension_semantics<arbitrary>], iteration_bounds = array<i64: 10, 4>, scalar_prefetch = 0 : i64, scratch_operands = 0 : i64, tpu.core_type = #tpu.core_type<tc>, window_params = [{transform_indices = @transform_0, window_bounds = array<i64: 8, 2560>}, {transform_indices = @transform_1, window_bounds = array<i64: 2560, 512>}, {transform_indices = @transform_2, window_bounds = array<i64: 1, 512>}, {transform_indices = @transform_3, window_bounds = array<i64: 8, 512>}]} {
    %c0_i32 = arith.constant 0 : i32
    %0 = arith.cmpi eq, %arg1, %c0_i32 : i32
    %1 = arith.extui %0 : i1 to i32
    %c0_i32_0 = arith.constant 0 : i32
    %2 = arith.cmpi ne, %1, %c0_i32_0 : i32
    scf.if %2 {
      %cst_9 = arith.constant 0.000000e+00 : f32
      %12 = vector.broadcast %cst_9 : f32 to vector<8x512xf32>
      %c0_10 = arith.constant 0 : index
      %c0_11 = arith.constant 0 : index
      %13 = vector.load %arg5[%c0_10, %c0_11] : memref<8x512xf32, #tpu.memory_space<vmem>>, vector<8x512xf32>
      tpu.vector_store %arg5[%c0_10, %c0_11], %12 {strides = array<i32>} : memref<8x512xf32, #tpu.memory_space<vmem>>, vector<8x512xf32>,
    } else {
    }
    %c0 = arith.constant 0 : index
    %c0_1 = arith.constant 0 : index
    %3 = vector.load %arg5[%c0, %c0_1] : memref<8x512xf32, #tpu.memory_space<vmem>>, vector<8x512xf32>
    %c0_2 = arith.constant 0 : index
    %c0_3 = arith.constant 0 : index
    %4 = vector.load %arg2[%c0_2, %c0_3] : memref<8x2560xbf16, #tpu.memory_space<vmem>>, vector<8x2560xbf16>
    %c0_4 = arith.constant 0 : index
    %c0_5 = arith.constant 0 : index
    %5 = vector.load %arg3[%c0_4, %c0_5] : memref<2560x512xbf16, #tpu.memory_space<vmem>>, vector<2560x512xbf16>
    %cst = arith.constant dense<0.000000e+00> : vector<8x512xf32>
    %6 = tpu.matmul %4, %5, %cst {dimension_numbers = #tpu.dot_dimension_numbers<[1], [0], [0], [1], [0, 0, 1, 1], [], []>} : vector<8x2560xbf16>, vector<2560x512xbf16>, vector<8x512xf32> -> vector<8x512xf32>
    %7 = arith.addf %3, %6 : vector<8x512xf32>
    %c0_6 = arith.constant 0 : index
    %c0_7 = arith.constant 0 : index
    %8 = vector.load %arg5[%c0_6, %c0_7] : memref<8x512xf32, #tpu.memory_space<vmem>>, vector<8x512xf32>
    tpu.vector_store %arg5[%c0_6, %c0_7], %7 {strides = array<i32>} : memref<8x512xf32, #tpu.memory_space<vmem>>, vector<8x512xf32>,
    %c3_i32 = arith.constant 3 : i32
    %9 = arith.cmpi eq, %arg1, %c3_i32 : i32
    %10 = arith.extui %9 : i1 to i32
    %c0_i32_8 = arith.constant 0 : i32
    %11 = arith.cmpi ne, %10, %c0_i32_8 : i32
    scf.if %11 {
      %c0_9 = arith.constant 0 : index
      %c0_10 = arith.constant 0 : index
      %12 = vector.load %arg5[%c0_9, %c0_10] : memref<8x512xf32, #tpu.memory_space<vmem>>, vector<8x512xf32>
      %c0_11 = arith.constant 0 : index
      %c0_12 = arith.constant 0 : index
      %13 = vector.load %arg4[%c0_11, %c0_12] : memref<1x512xf32, #tpu.memory_space<vmem>>, vector<1x512xf32>
      %14 = vector.broadcast %13 : vector<1x512xf32> to vector<8x512xf32>
      %15 = arith.addf %12, %14 : vector<8x512xf32>
      %cst_13 = arith.constant 0.000000e+00 : f32
      %16 = vector.broadcast %cst_13 : f32 to vector<8x512xf32>
      %17 = arith.maximumf %15, %16 : vector<8x512xf32>
      %c0_14 = arith.constant 0 : index
      %c0_15 = arith.constant 0 : index
      %18 = vector.load %arg5[%c0_14, %c0_15] : memref<8x512xf32, #tpu.memory_space<vmem>>, vector<8x512xf32>
      tpu.vector_store %arg5[%c0_14, %c0_15], %17 {strides = array<i32>} : memref<8x512xf32, #tpu.memory_space<vmem>>, vector<8x512xf32>,
    } else {
    }
    return
  }
  func.func @transform_0(%arg0: i32, %arg1: i32) -> (i32, i32) {
    %c0_i32 = arith.constant 0 : i32
    %c0_i32_0 = arith.constant 0 : i32
    return %c0_i32, %arg1 : i32, i32
  }
  func.func @transform_1(%arg0: i32, %arg1: i32) -> (i32, i32) {
    %c0_i32 = arith.constant 0 : i32
    return %arg1, %arg0 : i32, i32
  }
  func.func @transform_2(%arg0: i32, %arg1: i32) -> (i32, i32) {
    %c0_i32 = arith.constant 0 : i32
    %c0_i32_0 = arith.constant 0 : i32
    return %c0_i32, %arg0 : i32, i32
  }
  func.func @transform_3(%arg0: i32, %arg1: i32) -> (i32, i32) {
    %c0_i32 = arith.constant 0 : i32
    %c0_i32_0 = arith.constant 0 : i32
    return %c0_i32, %arg0 : i32, i32
  }
}

module attributes {stable_mosaic.version = 11 : i64} {
  func.func @_head_kernel(%arg0: i32, %arg1: memref<8x1024xbf16, #tpu.memory_space<vmem>>, %arg2: memref<1024x128xbf16, #tpu.memory_space<vmem>>, %arg3: memref<1x128xf32, #tpu.memory_space<vmem>>, %arg4: memref<128x128xbf16, #tpu.memory_space<vmem>>, %arg5: memref<1x128xf32, #tpu.memory_space<vmem>>, %arg6: memref<8x128xf32, #tpu.memory_space<vmem>>) attributes {dimension_semantics = [#tpu.dimension_semantics<arbitrary>], iteration_bounds = array<i64: 1>, scalar_prefetch = 0 : i64, scratch_operands = 0 : i64, tpu.core_type = #tpu.core_type<tc>, window_params = [{pipeline_mode = #tpu.pipeline_mode<synchronous>, transform_indices = @transform_0, window_bounds = array<i64: 8, 1024>}, {pipeline_mode = #tpu.pipeline_mode<synchronous>, transform_indices = @transform_1, window_bounds = array<i64: 1024, 128>}, {pipeline_mode = #tpu.pipeline_mode<synchronous>, transform_indices = @transform_2, window_bounds = array<i64: 1, 128>}, {pipeline_mode = #tpu.pipeline_mode<synchronous>, transform_indices = @transform_3, window_bounds = array<i64: 128, 128>}, {pipeline_mode = #tpu.pipeline_mode<synchronous>, transform_indices = @transform_4, window_bounds = array<i64: 1, 128>}, {pipeline_mode = #tpu.pipeline_mode<synchronous>, transform_indices = @transform_5, window_bounds = array<i64: 8, 128>}]} {
    %c0 = arith.constant 0 : index
    %c0_0 = arith.constant 0 : index
    %0 = vector.load %arg1[%c0, %c0_0] : memref<8x1024xbf16, #tpu.memory_space<vmem>>, vector<8x1024xbf16>
    %c0_1 = arith.constant 0 : index
    %c0_2 = arith.constant 0 : index
    %1 = vector.load %arg2[%c0_1, %c0_2] : memref<1024x128xbf16, #tpu.memory_space<vmem>>, vector<1024x128xbf16>
    %cst = arith.constant dense<0.000000e+00> : vector<8x128xf32>
    %2 = tpu.matmul %0, %1, %cst {dimension_numbers = #tpu.dot_dimension_numbers<[1], [0], [0], [1], [0, 0, 1, 1], [], []>} : vector<8x1024xbf16>, vector<1024x128xbf16>, vector<8x128xf32> -> vector<8x128xf32>
    %c0_3 = arith.constant 0 : index
    %c0_4 = arith.constant 0 : index
    %3 = vector.load %arg3[%c0_3, %c0_4] : memref<1x128xf32, #tpu.memory_space<vmem>>, vector<1x128xf32>
    %4 = vector.broadcast %3 : vector<1x128xf32> to vector<8x128xf32>
    %5 = arith.addf %2, %4 : vector<8x128xf32>
    %cst_5 = arith.constant 0.000000e+00 : f32
    %6 = vector.broadcast %cst_5 : f32 to vector<8x128xf32>
    %7 = arith.maximumf %5, %6 : vector<8x128xf32>
    %8 = arith.truncf %7 : vector<8x128xf32> to vector<8x128xbf16>
    %c0_6 = arith.constant 0 : index
    %c0_7 = arith.constant 0 : index
    %9 = vector.load %arg4[%c0_6, %c0_7] : memref<128x128xbf16, #tpu.memory_space<vmem>>, vector<128x128xbf16>
    %cst_8 = arith.constant dense<0.000000e+00> : vector<8x128xf32>
    %10 = tpu.matmul %8, %9, %cst_8 {dimension_numbers = #tpu.dot_dimension_numbers<[1], [0], [0], [1], [0, 0, 1, 1], [], []>} : vector<8x128xbf16>, vector<128x128xbf16>, vector<8x128xf32> -> vector<8x128xf32>
    %c0_9 = arith.constant 0 : index
    %c0_10 = arith.constant 0 : index
    %11 = vector.load %arg5[%c0_9, %c0_10] : memref<1x128xf32, #tpu.memory_space<vmem>>, vector<1x128xf32>
    %12 = vector.broadcast %11 : vector<1x128xf32> to vector<8x128xf32>
    %13 = arith.addf %10, %12 : vector<8x128xf32>
    %c0_11 = arith.constant 0 : index
    %c0_12 = arith.constant 0 : index
    %14 = vector.load %arg6[%c0_11, %c0_12] : memref<8x128xf32, #tpu.memory_space<vmem>>, vector<8x128xf32>
    tpu.vector_store %arg6[%c0_11, %c0_12], %13 {strides = array<i32>} : memref<8x128xf32, #tpu.memory_space<vmem>>, vector<8x128xf32>,
    return
  }
  func.func @transform_0(%arg0: i32) -> (i32, i32) {
    %c0_i32 = arith.constant 0 : i32
    %c0_i32_0 = arith.constant 0 : i32
    %c0_i32_1 = arith.constant 0 : i32
    return %c0_i32, %c0_i32_0 : i32, i32
  }
  func.func @transform_1(%arg0: i32) -> (i32, i32) {
    %c0_i32 = arith.constant 0 : i32
    %c0_i32_0 = arith.constant 0 : i32
    %c0_i32_1 = arith.constant 0 : i32
    return %c0_i32, %c0_i32_0 : i32, i32
  }
  func.func @transform_2(%arg0: i32) -> (i32, i32) {
    %c0_i32 = arith.constant 0 : i32
    %c0_i32_0 = arith.constant 0 : i32
    %c0_i32_1 = arith.constant 0 : i32
    return %c0_i32, %c0_i32_0 : i32, i32
  }
  func.func @transform_3(%arg0: i32) -> (i32, i32) {
    %c0_i32 = arith.constant 0 : i32
    %c0_i32_0 = arith.constant 0 : i32
    %c0_i32_1 = arith.constant 0 : i32
    return %c0_i32, %c0_i32_0 : i32, i32
  }
  func.func @transform_4(%arg0: i32) -> (i32, i32) {
    %c0_i32 = arith.constant 0 : i32
    %c0_i32_0 = arith.constant 0 : i32
    %c0_i32_1 = arith.constant 0 : i32
    return %c0_i32, %c0_i32_0 : i32, i32
  }
  func.func @transform_5(%arg0: i32) -> (i32, i32) {
    %c0_i32 = arith.constant 0 : i32
    %c0_i32_0 = arith.constant 0 : i32
    %c0_i32_1 = arith.constant 0 : i32
    return %c0_i32, %c0_i32_0 : i32, i32
  }
}

module attributes {stable_mosaic.version = 11 : i64} {
  func.func @_linear_kernel(%arg0: i32, %arg1: i32, %arg2: memref<8x2560xbf16, #tpu.memory_space<vmem>>, %arg3: memref<2560x512xbf16, #tpu.memory_space<vmem>>, %arg4: memref<1x512xf32, #tpu.memory_space<vmem>>, %arg5: memref<8x512xf32, #tpu.memory_space<vmem>>) attributes {dimension_semantics = [#tpu.dimension_semantics<parallel>, #tpu.dimension_semantics<arbitrary>], iteration_bounds = array<i64: 2, 2>, scalar_prefetch = 0 : i64, scratch_operands = 0 : i64, tpu.core_type = #tpu.core_type<tc>, window_params = [{transform_indices = @transform_0, window_bounds = array<i64: 8, 2560>}, {transform_indices = @transform_1, window_bounds = array<i64: 2560, 512>}, {transform_indices = @transform_2, window_bounds = array<i64: 1, 512>}, {transform_indices = @transform_3, window_bounds = array<i64: 8, 512>}]} {
    %c0_i32 = arith.constant 0 : i32
    %0 = arith.cmpi eq, %arg1, %c0_i32 : i32
    %1 = arith.extui %0 : i1 to i32
    %c0_i32_0 = arith.constant 0 : i32
    %2 = arith.cmpi ne, %1, %c0_i32_0 : i32
    scf.if %2 {
      %cst_9 = arith.constant 0.000000e+00 : f32
      %12 = vector.broadcast %cst_9 : f32 to vector<8x512xf32>
      %c0_10 = arith.constant 0 : index
      %c0_11 = arith.constant 0 : index
      %13 = vector.load %arg5[%c0_10, %c0_11] : memref<8x512xf32, #tpu.memory_space<vmem>>, vector<8x512xf32>
      tpu.vector_store %arg5[%c0_10, %c0_11], %12 {strides = array<i32>} : memref<8x512xf32, #tpu.memory_space<vmem>>, vector<8x512xf32>,
    } else {
    }
    %c0 = arith.constant 0 : index
    %c0_1 = arith.constant 0 : index
    %3 = vector.load %arg5[%c0, %c0_1] : memref<8x512xf32, #tpu.memory_space<vmem>>, vector<8x512xf32>
    %c0_2 = arith.constant 0 : index
    %c0_3 = arith.constant 0 : index
    %4 = vector.load %arg2[%c0_2, %c0_3] : memref<8x2560xbf16, #tpu.memory_space<vmem>>, vector<8x2560xbf16>
    %c0_4 = arith.constant 0 : index
    %c0_5 = arith.constant 0 : index
    %5 = vector.load %arg3[%c0_4, %c0_5] : memref<2560x512xbf16, #tpu.memory_space<vmem>>, vector<2560x512xbf16>
    %cst = arith.constant dense<0.000000e+00> : vector<8x512xf32>
    %6 = tpu.matmul %4, %5, %cst {dimension_numbers = #tpu.dot_dimension_numbers<[1], [0], [0], [1], [0, 0, 1, 1], [], []>} : vector<8x2560xbf16>, vector<2560x512xbf16>, vector<8x512xf32> -> vector<8x512xf32>
    %7 = arith.addf %3, %6 : vector<8x512xf32>
    %c0_6 = arith.constant 0 : index
    %c0_7 = arith.constant 0 : index
    %8 = vector.load %arg5[%c0_6, %c0_7] : memref<8x512xf32, #tpu.memory_space<vmem>>, vector<8x512xf32>
    tpu.vector_store %arg5[%c0_6, %c0_7], %7 {strides = array<i32>} : memref<8x512xf32, #tpu.memory_space<vmem>>, vector<8x512xf32>,
    %c1_i32 = arith.constant 1 : i32
    %9 = arith.cmpi eq, %arg1, %c1_i32 : i32
    %10 = arith.extui %9 : i1 to i32
    %c0_i32_8 = arith.constant 0 : i32
    %11 = arith.cmpi ne, %10, %c0_i32_8 : i32
    scf.if %11 {
      %c0_9 = arith.constant 0 : index
      %c0_10 = arith.constant 0 : index
      %12 = vector.load %arg5[%c0_9, %c0_10] : memref<8x512xf32, #tpu.memory_space<vmem>>, vector<8x512xf32>
      %c0_11 = arith.constant 0 : index
      %c0_12 = arith.constant 0 : index
      %13 = vector.load %arg4[%c0_11, %c0_12] : memref<1x512xf32, #tpu.memory_space<vmem>>, vector<1x512xf32>
      %14 = vector.broadcast %13 : vector<1x512xf32> to vector<8x512xf32>
      %15 = arith.addf %12, %14 : vector<8x512xf32>
      %cst_13 = arith.constant 0.000000e+00 : f32
      %16 = vector.broadcast %cst_13 : f32 to vector<8x512xf32>
      %17 = arith.maximumf %15, %16 : vector<8x512xf32>
      %c0_14 = arith.constant 0 : index
      %c0_15 = arith.constant 0 : index
      %18 = vector.load %arg5[%c0_14, %c0_15] : memref<8x512xf32, #tpu.memory_space<vmem>>, vector<8x512xf32>
      tpu.vector_store %arg5[%c0_14, %c0_15], %17 {strides = array<i32>} : memref<8x512xf32, #tpu.memory_space<vmem>>, vector<8x512xf32>,
    } else {
    }
    return
  }
  func.func @transform_0(%arg0: i32, %arg1: i32) -> (i32, i32) {
    %c0_i32 = arith.constant 0 : i32
    %c0_i32_0 = arith.constant 0 : i32
    return %c0_i32, %arg1 : i32, i32
  }
  func.func @transform_1(%arg0: i32, %arg1: i32) -> (i32, i32) {
    %c0_i32 = arith.constant 0 : i32
    return %arg1, %arg0 : i32, i32
  }
  func.func @transform_2(%arg0: i32, %arg1: i32) -> (i32, i32) {
    %c0_i32 = arith.constant 0 : i32
    %c0_i32_0 = arith.constant 0 : i32
    return %c0_i32, %arg0 : i32, i32
  }
  func.func @transform_3(%arg0: i32, %arg1: i32) -> (i32, i32) {
    %c0_i32 = arith.constant 0 : i32
    %c0_i32_0 = arith.constant 0 : i32
    return %c0_i32, %arg0 : i32, i32
  }
}

</mosaic_0001>

<bundles_post_ra>
// kernel: larger_net_forward.5
= control target key start
LH: loop header
LB: loop body
LE: loop exit
PB: predicated region body
PF: predicated region fallthrough
CT: control target
= control target key end

     0   :  { %vm1132_vm0 = vmmov 0   ;;  %s1400_s1 = inlined_call_operand.vmem [shape: bf16[1024,128], index: 1, kind: input, shape index: {}]   ;;  %s1401_s0 = inlined_call_operand.vmem [shape: bf16[8,1024], index: 0, kind: input, shape index: {}]   ;;  %s1402_s3 = inlined_call_operand.vmem [shape: bf16[128,128], index: 3, kind: input, shape index: {}]   ;;  %s1403_s2 = inlined_call_operand.vmem [shape: f32[1,128], index: 2, kind: input, shape index: {}]   ;;  %s1404_s4 = inlined_call_operand.vmem [shape: f32[1,128], index: 4, kind: input, shape index: {}]   ;;  %s1405_s5 = inlined_call_operand.vmem [shape: f32[8,128], index: 5, kind: output, shape index: {}]  }
   0x1   :  { %v1051_v0 = vld [vmem:[%s1400_s1 + $0x40] sm:$0xff]   ;;  %v1055_v4 = vld [vmem:[%s1400_s1 + $0x48] sm:$0xff]   ;;  %v1059_v8 = vld [vmem:[%s1400_s1 + $0x50] sm:$0xff]  }
   0x2   :  { %v1052_v1 = vld [vmem:[%s1400_s1 + $0xc0] sm:$0xff]   ;;  %932 = vmatprep.subr.bf16.mxu0 %v1051_v0  ;;  %v1056_v5 = vld [vmem:[%s1400_s1 + $0xc8] sm:$0xff]   ;;  %v1060_v9 = vld [vmem:[%s1400_s1 + $0xd0] sm:$0xff]  }
   0x3   :  { %v1053_v2 = vld [vmem:[%s1400_s1] sm:$0xff]   ;;  %954 = vmatprep.subr.bf16.mxu1 %v1052_v1  ;;  %v1057_v6 = vld [vmem:[%s1400_s1 + $0x8] sm:$0xff]   ;;  %v1061_v10 = vld [vmem:[%s1400_s1 + $0x10] sm:$0xff]  }
   0x4   :  { %v1054_v3 = vld [vmem:[%s1400_s1 + $0x80] sm:$0xff]   ;;  %933 = vmatpush3.bf16.msra.mxu0 %v1053_v2  ;;  %v1058_v7 = vld [vmem:[%s1400_s1 + $0x88] sm:$0xff]   ;;  %v1062_v11 = vld [vmem:[%s1400_s1 + $0x90] sm:$0xff]  }
   0x5   :  { %955 = vmatpush3.bf16.msra.mxu1 %v1054_v3  ;;  %934 = vmatprep.subr.bf16.mxu0 %v1055_v4  ;;  %v1063_v12 = vld [vmem:[%s1400_s1 + $0x58] sm:$0xff]   ;;  %v1067_v16 = vld [vmem:[%s1400_s1 + $0x60] sm:$0xff]   ;;  %v1071_v20 = vld [vmem:[%s1400_s1 + $0x68] sm:$0xff]  }
   0x6   :  { %956 = vmatprep.subr.bf16.mxu1 %v1056_v5  ;;  %v1064_v13 = vld [vmem:[%s1400_s1 + $0xd8] sm:$0xff]   ;;  %v1068_v17 = vld [vmem:[%s1400_s1 + $0xe0] sm:$0xff]   ;;  %v1072_v21 = vld [vmem:[%s1400_s1 + $0xe8] sm:$0xff]  }
   0x7   :  { %v1065_v14 = vld [vmem:[%s1400_s1 + $0x18] sm:$0xff]   ;;  %v1069_v18 = vld [vmem:[%s1400_s1 + $0x20] sm:$0xff]   ;;  %v1073_v22 = vld [vmem:[%s1400_s1 + $0x28] sm:$0xff]  }
   0x8   :  { %935 = vmatpush3.bf16.msra.mxu0 %v1057_v6  ;;  %v1066_v15 = vld [vmem:[%s1400_s1 + $0x98] sm:$0xff]   ;;  %v1070_v19 = vld [vmem:[%s1400_s1 + $0xa0] sm:$0xff]   ;;  %v1074_v23 = vld [vmem:[%s1400_s1 + $0xa8] sm:$0xff]  }
   0x9   :  { %957 = vmatpush3.bf16.msra.mxu1 %v1058_v7  ;;  %936 = vmatprep.subr.bf16.mxu0 %v1059_v8  ;;  %v1075_v24 = vld [vmem:[%s1400_s1 + $0x70] sm:$0xff]   ;;  %v1079_v28 = vld [vmem:[%s1400_s1 + $0x78] sm:$0xff]   ;;  %v21_v32 = vld [vmem:[%s1401_s0] sm:$0xff] }
   0xa   :  { %958 = vmatprep.subr.bf16.mxu1 %v1060_v9  ;;  %v1076_v25 = vld [vmem:[%s1400_s1 + $0xf0] sm:$0xff]   ;;  %v1080_v29 = vld [vmem:[%s1400_s1 + $0xf8] sm:$0xff]   ;;  %v22_v33 = vld [vmem:[%s1401_s0 + $0x8] sm:$0xff]  ;;  %v851_v34 = vcombine.low %v21_v32, %v21_v32  ;;  %v852_v35 = vcombine.high %v21_v32, %v21_v32 }
   0xb   :  { %v1077_v26 = vld [vmem:[%s1400_s1 + $0x30] sm:$0xff]   ;;  %v1081_v30 = vld [vmem:[%s1400_s1 + $0x38] sm:$0xff]   ;;  %v853_v36 = vcombine.low %v22_v33, %v22_v33  ;;  %v854_v37 = vcombine.high %v22_v33, %v22_v33  ;;  %v1087_v38 = vld [vmem:[%s1400_s1 + $0x140] sm:$0xff]  }
   0xc   :  { %937 = vmatpush3.bf16.msra.mxu0 %v1061_v10  ;;  %v1078_v27 = vld [vmem:[%s1400_s1 + $0xb0] sm:$0xff]   ;;  %v1082_v31 = vld [vmem:[%s1400_s1 + $0xb8] sm:$0xff]   ;;  %v1088_v39 = vld [vmem:[%s1400_s1 + $0x1c0] sm:$0xff]   ;;  %604 = vmatprep.mubr.bf16.mxu0 %v852_v35 }
   0xd   :  { %959 = vmatpush3.bf16.msra.mxu1 %v1062_v11  ;;  %938 = vmatprep.subr.bf16.mxu0 %v1063_v12  ;;  %v1089_v40 = vld [vmem:[%s1400_s1 + $0x100] sm:$0xff]   ;;  %v1091_v42 = vld [vmem:[%s1400_s1 + $0x148] sm:$0xff]   ;;  %v1095_v46 = vld [vmem:[%s1400_s1 + $0x150] sm:$0xff]   ;;  %v1131_v12 = vmov 0.0  }
   0xe   :  { %960 = vmatprep.subr.bf16.mxu1 %v1064_v13  ;;  %644 = vmatprep.mubr.bf16.mxu1 %v854_v37  ;;  %v1090_v41 = vld [vmem:[%s1400_s1 + $0x180] sm:$0xff]   ;;  %v1092_v43 = vld [vmem:[%s1400_s1 + $0x1c8] sm:$0xff]   ;;  %v1096_v47 = vld [vmem:[%s1400_s1 + $0x1d0] sm:$0xff]  }
   0xf   :  { %v1093_v44 = vld [vmem:[%s1400_s1 + $0x108] sm:$0xff]   ;;  %v1097_v48 = vld [vmem:[%s1400_s1 + $0x110] sm:$0xff]   ;;  %v1099_v50 = vld [vmem:[%s1400_s1 + $0x158] sm:$0xff]  }
  0x10   :  { %939 = vmatpush3.bf16.msra.mxu0 %v1065_v14  ;;  %v1094_v45 = vld [vmem:[%s1400_s1 + $0x188] sm:$0xff]   ;;  %v1098_v49 = vld [vmem:[%s1400_s1 + $0x190] sm:$0xff]   ;;  %v1100_v51 = vld [vmem:[%s1400_s1 + $0x1d8] sm:$0xff]  }
  0x11   :  { %961 = vmatpush3.bf16.msra.mxu1 %v1066_v15  ;;  %940 = vmatprep.subr.bf16.mxu0 %v1067_v16  ;;  %v1101_v52 = vld [vmem:[%s1400_s1 + $0x118] sm:$0xff]   ;;  %v1103_v54 = vld [vmem:[%s1400_s1 + $0x160] sm:$0xff]   ;;  %v1107_v58 = vld [vmem:[%s1400_s1 + $0x168] sm:$0xff]  }
  0x12   :  { %962 = vmatprep.subr.bf16.mxu1 %v1068_v17  ;;  %v1102_v53 = vld [vmem:[%s1400_s1 + $0x198] sm:$0xff]   ;;  %v1104_v55 = vld [vmem:[%s1400_s1 + $0x1e0] sm:$0xff]   ;;  %v1108_v59 = vld [vmem:[%s1400_s1 + $0x1e8] sm:$0xff]  }
  0x13   :  { %v1105_v56 = vld [vmem:[%s1400_s1 + $0x120] sm:$0xff]   ;;  %v1109_v60 = vld [vmem:[%s1400_s1 + $0x128] sm:$0xff]   ;;  %v1111_v62 = vld [vmem:[%s1400_s1 + $0x170] sm:$0xff]  }
  0x14   :  { %941 = vmatpush3.bf16.msra.mxu0 %v1069_v18  ;;  %v1106_v57 = vld [vmem:[%s1400_s1 + $0x1a0] sm:$0xff]   ;;  %v1110_v61 = vld [vmem:[%s1400_s1 + $0x1a8] sm:$0xff]   ;;  %v1112_v63 = vld [vmem:[%s1400_s1 + $0x1f0] sm:$0xff]  }
  0x15   :  { %963 = vmatpush3.bf16.msra.mxu1 %v1070_v19  ;;  %942 = vmatprep.subr.bf16.mxu0 %v1071_v20  ;;  %v1113_v0 = vld [vmem:[%s1400_s1 + $0x130] sm:$0xff]   ;;  %v1115_v2 = vld [vmem:[%s1400_s1 + $0x178] sm:$0xff]   ;;  %v1123_v13 = vld [vmem:[%s1402_s3] sm:$0xff]  }
  0x16   :  { %964 = vmatprep.subr.bf16.mxu1 %v1072_v21  ;;  %v1114_v1 = vld [vmem:[%s1400_s1 + $0x1b0] sm:$0xff]   ;;  %v1116_v3 = vld [vmem:[%s1400_s1 + $0x1f8] sm:$0xff]   ;;  %v1124_v14 = vld [vmem:[%s1402_s3 + $0x8] sm:$0xff]  }
  0x17   :  { %v1117_v4 = vld [vmem:[%s1400_s1 + $0x138] sm:$0xff]   ;;  %v23_v6 = vld [vmem:[%s1401_s0 + $0x10] sm:$0xff]  ;;  %v1127_v17 = vld [vmem:[%s1402_s3 + $0x20] sm:$0xff]  }
  0x18   :  { %943 = vmatpush3.bf16.msra.mxu0 %v1073_v22  ;;  %v1118_v5 = vld [vmem:[%s1400_s1 + $0x1b8] sm:$0xff]   ;;  %v855_v7 = vcombine.low %v23_v6, %v23_v6  ;;  %v856_v8 = vcombine.high %v23_v6, %v23_v6  ;;  %v1125_v15 = vld [vmem:[%s1402_s3 + $0x10] sm:$0xff]   ;;  %v1128_v18 = vld [vmem:[%s1402_s3 + $0x28] sm:$0xff]  }
  0x19   :  { %965 = vmatpush3.bf16.msra.mxu1 %v1074_v23  ;;  %944 = vmatprep.subr.bf16.mxu0 %v1075_v24  ;;  %v24_v9 = vld [vmem:[%s1401_s0 + $0x18] sm:$0xff]  ;;  %v1129_v19 = vld [vmem:[%s1402_s3 + $0x30] sm:$0xff]   ;;  %v850_v23 = vld [vmem:[%s1403_s2] ss:$0 sm:$0xff] }
  0x1a   :  { %966 = vmatprep.subr.bf16.mxu1 %v1076_v25  ;;  %v857_v10 = vcombine.low %v24_v9, %v24_v9  ;;  %v858_v11 = vcombine.high %v24_v9, %v24_v9  ;;  %v1126_v16 = vld [vmem:[%s1402_s3 + $0x18] sm:$0xff]  }
  0x1b   :  { %v1130_v20 = vld [vmem:[%s1402_s3 + $0x38] sm:$0xff]  }
  0x1c   :  { %945 = vmatpush3.bf16.msra.mxu0 %v1077_v26 }
  0x1d   :  { %967 = vmatpush3.bf16.msra.mxu1 %v1078_v27  ;;  %946 = vmatprep.subr.bf16.mxu0 %v1079_v28 }
  0x1e   :  { %968 = vmatprep.subr.bf16.mxu1 %v1080_v29 }
  0x20   :  { %947 = vmatpush3.bf16.msra.mxu0 %v1081_v30 }
  0x21   :  { %969 = vmatpush3.bf16.msra.mxu1 %v1082_v31  ;;  %976 = vmatprep.subr.bf16.mxu0 %v1087_v38 }
  0x22   :  { %998 = vmatprep.subr.bf16.mxu1 %v1088_v39 }
  0x23   :  { %605 = vmatmul.mubr.bf16.vlgmr.msra.gmra.mrb[0].mxu0 %v851_v34 }
  0x24   :  { %645 = vmatmul.mubr.bf16.vlgmr.msra.gmra.mrb[0].mxu1 %v853_v36  ;;  %977 = vmatpush3.bf16.msra.mxu0 %v1089_v40 }
  0x25   :  { %999 = vmatpush3.bf16.msra.mxu1 %v1090_v41  ;;  %978 = vmatprep.subr.bf16.mxu0 %v1091_v42 }
  0x26   :  { %1000 = vmatprep.subr.bf16.mxu1 %v1092_v43  ;;  %684 = vmatprep.mubr.bf16.mxu0 %v856_v8 }
  0x27   :  { %724 = vmatprep.mubr.bf16.mxu1 %v858_v11 }
  0x28   :  { %979 = vmatpush3.bf16.msra.mxu0 %v1093_v44 }
  0x29   :  { %1001 = vmatpush3.bf16.msra.mxu1 %v1094_v45  ;;  %980 = vmatprep.subr.bf16.mxu0 %v1095_v46 }
  0x2a   :  { %1002 = vmatprep.subr.bf16.mxu1 %v1096_v47 }
  0x2c   :  { %981 = vmatpush3.bf16.msra.mxu0 %v1097_v48  ;;  %v923_v48 = vld [vmem:[%s1404_s4] ss:$0 sm:$0xff] }
  0x2d   :  { %1003 = vmatpush3.bf16.msra.mxu1 %v1098_v49  ;;  %982 = vmatprep.subr.bf16.mxu0 %v1099_v50 }
  0x2e   :  { %1004 = vmatprep.subr.bf16.mxu1 %v1100_v51 }
  0x30   :  { %983 = vmatpush3.bf16.msra.mxu0 %v1101_v52 }
  0x31   :  { %1005 = vmatpush3.bf16.msra.mxu1 %v1102_v53  ;;  %984 = vmatprep.subr.bf16.mxu0 %v1103_v54 }
  0x32   :  { %1006 = vmatprep.subr.bf16.mxu1 %v1104_v55 }
  0x34   :  { %985 = vmatpush3.bf16.msra.mxu0 %v1105_v56 }
  0x35   :  { %1007 = vmatpush3.bf16.msra.mxu1 %v1106_v57  ;;  %986 = vmatprep.subr.bf16.mxu0 %v1107_v58 }
  0x36   :  { %1008 = vmatprep.subr.bf16.mxu1 %v1108_v59 }
  0x38   :  { %987 = vmatpush3.bf16.msra.mxu0 %v1109_v60 }
  0x39   :  { %1009 = vmatpush3.bf16.msra.mxu1 %v1110_v61  ;;  %988 = vmatprep.subr.bf16.mxu0 %v1111_v62 }
  0x3a   :  { %1010 = vmatprep.subr.bf16.mxu1 %v1112_v63 }
  0x3c   :  { %989 = vmatpush3.bf16.msra.mxu0 %v1113_v0 }
  0x3d   :  { %1011 = vmatpush3.bf16.msra.mxu1 %v1114_v1  ;;  %990 = vmatprep.subr.bf16.mxu0 %v1115_v2 }
  0x3e   :  { %1012 = vmatprep.subr.bf16.mxu1 %v1116_v3 }
  0x40   :  { %991 = vmatpush3.bf16.msra.mxu0 %v1117_v4 }
  0x41   :  { %1013 = vmatpush3.bf16.msra.mxu1 %v1118_v5  ;;  %1029 = vmatprep.subr.bf16.mxu0 %v1131_v12 }
  0x43   :  { %685 = vmatmul.mubr.bf16.vlgmr.msra.gmra.mrb[4].mxu0 %v855_v7 }
  0x44   :  { %725 = vmatmul.mubr.bf16.vlgmr.msra.gmra.mrb[4].mxu1 %v857_v10  ;;  %1030 = vmatpush3.bf16.msra.mxu0 %v1123_v13 }
  0x45   :  { %1031 = vmatprep.subr.bf16.mxu0 %v1131_v12  ;;  %1045 = vmatprep.mubr.msk.bf16.mxu0 %vm1132_vm0, %v1131_v12 }
  0x48   :  { %1032 = vmatpush3.bf16.msra.mxu0 %v1124_v14 }
  0x49   :  { %1033 = vmatprep.subr.bf16.mxu0 %v1131_v12 }
  0x4c   :  { %1034 = vmatpush3.bf16.msra.mxu0 %v1125_v15 }
  0x4d   :  { %1035 = vmatprep.subr.bf16.mxu0 %v1131_v12 }
  0x50   :  { %1036 = vmatpush3.bf16.msra.mxu0 %v1126_v16 }
  0x51   :  { %1037 = vmatprep.subr.bf16.mxu0 %v1131_v12 }
  0x54   :  { %1038 = vmatpush3.bf16.msra.mxu0 %v1127_v17 }
  0x55   :  { %1039 = vmatprep.subr.bf16.mxu0 %v1131_v12 }
  0x58   :  { %1040 = vmatpush3.bf16.msra.mxu0 %v1128_v18 }
  0x59   :  { %1041 = vmatprep.subr.bf16.mxu0 %v1131_v12 }
  0x5c   :  { %1042 = vmatpush3.bf16.msra.mxu0 %v1129_v19 }
  0x5d   :  { %1043 = vmatprep.subr.bf16.mxu0 %v1131_v12 }
  0x60   :  { %1044 = vmatpush3.bf16.msra.mxu0 %v1130_v20 }
  0xf6   :  { %v948_v21 = vpop.f32.mrb[0].mxu0 }
  0xf7   :  { %v970_v22 = vpop.f32.mrb[0].mxu1  ;;  %v949_v24 = vpop.f32.mrb[1].mxu0 }
  0xf8   :  { %v971_v25 = vpop.f32.mrb[1].mxu1  ;;  %v950_v26 = vadd.f32 %v949_v24, %v948_v21  ;;  %v951_v28 = vpop.f32.mrb[2].mxu0 }
  0xf9   :  { %v972_v27 = vadd.f32 %v971_v25, %v970_v22  ;;  %v973_v29 = vpop.f32.mrb[2].mxu1  ;;  %v952_v30 = vpop.f32.mrb[3].mxu0 }
  0xfa   :  { %v974_v31 = vpop.f32.mrb[3].mxu1  ;;  %v607_v32 = vadd.f32 %v950_v26, %v850_v23 }
  0xfc   :  { %v647_v33 = vadd.f32 %v972_v27, %v607_v32 }
 0x116   :  { %v992_v34 = vpop.f32.mrb[4].mxu0 }
 0x117   :  { %v1014_v35 = vpop.f32.mrb[4].mxu1  ;;  %v993_v36 = vpop.f32.mrb[5].mxu0 }
 0x118   :  { %v1015_v37 = vpop.f32.mrb[5].mxu1  ;;  %v994_v38 = vadd.f32 %v993_v36, %v992_v34  ;;  %v995_v40 = vpop.f32.mrb[6].mxu0 }
 0x119   :  { %v1016_v39 = vadd.f32 %v1015_v37, %v1014_v35  ;;  %v1017_v41 = vpop.f32.mrb[6].mxu1  ;;  %v996_v42 = vpop.f32.mrb[7].mxu0 }
 0x11a   :  { %v1018_v43 = vpop.f32.mrb[7].mxu1  ;;  %v687_v44 = vadd.f32 %v994_v38, %v647_v33 }
 0x11c   :  { %v727_v45 = vadd.f32 %v1016_v39, %v687_v44 }
 0x11e   :  { %v732_v46 = vmax.f32 %v727_v45, 0.0 }
 0x120   :  { %v733_v47 = vpack.c.bf16 %v732_v46, %v732_v46 }
 0x122   :  { %1046 = vmatmul.mubr.bf16.vlgmr.msra.gmra.mrb[8].mxu0 %v733_v47 }
 0x1f5   :  { %v839_v49 = vpop.f32.mrb[8].mxu0 }
 0x1f6   :  { %v840_v50 = vadd.f32 %v923_v48, %v839_v49  ;;  %v1047_v51 = vpop.f32.mrb[9].mxu0 }
 0x1f7   :  { %v842_v52 = vpop.f32.mrb[10].mxu0 }
 0x1f8   :  { %845 = vst [vmem:[%s1405_s5] sm:$0xff] %v840_v50  ;;  %v1048_v53 = vpop.f32.mrb[11].mxu0 }

// kernel: larger_net_forward.3
= control target key start
LH: loop header
LB: loop body
LE: loop exit
PB: predicated region body
PF: predicated region fallthrough
CT: control target
= control target key end

     0   :  { %s8243_s0 = inlined_call_operand.vmem [shape: bf16[8,10240], index: 0, kind: input, shape index: {}]   ;;  %s8244_s1 = inlined_call_operand.hbm [shape: bf16[10240,5120], index: 1, kind: input, shape index: {}]   ;;  %s8245_s2 = inlined_call_operand.hbm [shape: f32[1,5120], index: 2, kind: input, shape index: {}]   ;;  %s8246_s3 = inlined_call_operand.vmem [shape: f32[8,5120], index: 3, kind: output, shape index: {}]  }
   0x1   :  { %8252 = sst [smem:[#allocation9_spill]] %s8244_s1 }
   0x2   :  { %8 = vsyncpa [#allocation3], 0 }
   0x3   :  { %10 = vsyncpa [#allocation3 + $0x1], 0 }
   0x4   :  { %11 = vsyncpa [#allocation5], 0 }
   0x5   :  { %13 = vsyncpa [#allocation5 + $0x1], 0  ;;  %s7140_s12 = smov 0   ;;  %s7142_s13 = smov 0  }
   0x6   :  { %s7144_s14 = smov 0   ;;  %s7146_s15 = smov 0  }
   0x7   :  { %s7148_s16 = smov 0   ;;  %s7150_s17 = smov 0  }
   0x8   :  { %s7152_s18 = smov 0   ;;  %s7154_s19 = smov 0  }
   0x9   :  { %s7156_s20 = smov 0   ;;  %s7158_s21 = smov 0  }
   0xa   :  { %s7160_s22 = smov 0  }
   0xb LB: > { %s28_s23 = sadd.s32 1, %s7104_s20  ;;  %p73_p1 = scmp.ne.s32.totalorder %s7092_s17, %s7088_s16  ;;  %s7112_s22 = sphi %s7160_s22, %s19_s22   ;;  %s7108_s21 = sphi %s7158_s21, %s8278_s21   ;;  %s7104_s20 = sphi %s7156_s20, %s8277_s20   ;;  %s7100_s19 = sphi %s7154_s19, %s8276_s19   ;;  %s7096_s18 = sphi %s7152_s18, %s8275_s18   ;;  %s7092_s17 = sphi %s7150_s17, %s8274_s17   ;;  %s7088_s16 = sphi %s7148_s16, %s8273_s16   ;;  %s7084_s15 = sphi %s7146_s15, %s8272_s15   ;;  %s7080_s14 = sphi %s7144_s14, %s8271_s14   ;;  %s7076_s13 = sphi %s7142_s13, %s8270_s13   ;;  %s7072_s12 = sphi %s7140_s12, %s8269_s12  }
   0xc   : > { %p7199_p0 = scmp.ge.s32.totalorder %s28_s23, 4  ;;  %p8248_p2 = scmp.eq.s32.totalorder %s7112_s22, 0 }
   0xd   : > { %p8247_p3 = scmp.lt.s32.totalorder %s7112_s22, 40  ;;  %s164_s26 = sand.u32 1, %s7092_s17  }
   0xe   : > { %p75_p4 = por %p8248_p2, %p73_p1  ;;  %s5870_s27 = smul.u32 5120, %s164_s26 }
   0xf   : > { %s5195_s28 = sshll.u32 %s7108_s21, 2  ;;  %s5885_s30 = smul.u32 12800, %s7104_s20 }
  0x10   : > { %p7213_p5 = pnand %p8247_p3, %p75_p4  ;;  %s168_s4 = scalar_lea.vmem [#allocation2], %s5870_s27 }
  0x11   : > { %s178_s5 = sshll.u32 %s168_s4, 4  ;;  %s175_s6 = sadd.s32 %s5885_s30, %s5195_s28  ;;  %s7218_s5 = int_to_ptr.vmem [resolvable:$true] %s178_s5 }
  0x12   : > { %s5196_s7 = sshll.u32 %s175_s6, 6  ;;  %s8255_s1 = sld [smem:[#allocation9_spill]] }
  0x13   : > { %s7226_s11 = scalar_lea.sflag [#allocation3], %s164_s26  ;;  %p6960_p8 = pneg %p7213_p5 }
  0x18   : > { %s7223_s10 = scalar_lea.hbm %s8255_s1, %s5196_s7  ;;  %s6963_s30 = scalar_lea.hbm %s8255_s1, 3276800 }
  0x19   : > { %s6958_s24 = scalar_lea.hbm %s7223_s10, 81920  ;;  %p6964_p11 = scmp.lt.u32.totalorder %s7223_s10, %s8255_s1 }
  0x1a   : > { %p6959_p7 = scmp.ne.s32.totalorder %s7223_s10, %s6958_s24  ;;  %p6965_p12 = scmp.lt.u32.totalorder %s6963_s30, %s6958_s24 }
  0x1b   : > { %p6967_p1 = scmp.lt.u32.totalorder %s6958_s24, %s7223_s10 }
  0x1c   : > { %p6961_p9 = pnand %p6960_p8, %p6959_p7  ;;  %p6966_p13 = por %p6965_p12, %p6964_p11 }
  0x1e   : > { %p6962_p10 = pneg %p6961_p9  ;;  %p6968_p4 = por %p6967_p1, %p6966_p13 }
  0x20   : > { %p6969_p3 = pnand %p6968_p4, %p6962_p10 }
  0x22   : > { %6972 = shalt.err (!%p6969_p3)
}
  0x23   : > { %s6973_s26 = scalar_lea.vmem %s7218_s5, 81920  ;;  %s7114_s7 = smov [#allocation2]  }
  0x24   : > { %p6974_p7 = scmp.ne.s32.totalorder %s7218_s5, %s6973_s26  ;;  %s6978_s8 = sshll.u32 %s7114_s7, 4  ;;  %s6979_s8 = int_to_ptr.vmem [resolvable:$false] %s6978_s8 }
  0x25   : > { %s6980_s9 = scalar_lea.vmem %s6979_s8, 163840  ;;  %p6981_p6 = scmp.lt.s32.totalorder %s7218_s5, %s6979_s8 }
  0x26   : > { %p6976_p9 = pnand %p6974_p7, %p6960_p8  ;;  %p6982_p11 = scmp.lt.s32.totalorder %s6980_s9, %s6973_s26 }
  0x28   : > { %p6977_p2 = pneg %p6976_p9  ;;  %p6983_p12 = por %p6982_p11, %p6981_p6 }
  0x2a   : > { %p6984_p13 = pnand %p6983_p12, %p6977_p2 }
  0x2c   : > { %6987 = shalt.err (!%p6984_p13)
}
  0x2d   : > { %s7115_s24 = smov 2560   ;;  %s7116_s27 = smov 256  }
  0x2e   : > { %s7117_s28 = smov 16   ;;  %p205_p2 = scmp.lt.s32.totalorder %s7112_s22, 41 }
  0x2f   : > { %5880 = dma.hbm_to_vmem [thread:$0]  (!%p7213_p5), %s7223_s10, 81920, %s7218_s5, %s7226_s11, %s7115_s24, %s7116_s27, %s7117_s28  }
  0x30   : > { %p8256_p3 = scmp.ge.s32.totalorder %s7112_s22, 1  ;;  %s5191_s4 = sadd.s32 4294967295, %s7112_s22  }
  0x31   : > { %s31_s6 = sadd.s32 1, %s7108_s21  ;;  %s8280_s23 = smov (%p7199_p0, %s28_s23), 0 }
  0x32   : > { %p7257_p6 = pnand %p8256_p3, %p205_p2  ;;  %s8282_s6 = smov (!%p7199_p0, %s31_s6), %s7108_s21 }
  0x33   : > { %s61_s29 = ssub.s32 %s7104_s20, %s8280_s23  ;;  %p79_p5 = scmp.ne.s32.totalorder %s7088_s16, %s7084_s15 }
  0x34   : > { %p33_p8 = scmp.ge.s32.totalorder %s8282_s6, 10  ;;  %p80_p10 = scmp.eq.s32.totalorder %s5191_s4, 0 }
  0x35   : > { %s92_s5 = sadd.s32 1, %s7080_s14  ;;  %p99_p1 = scmp.ne.s32.totalorder %s7080_s14, %s7076_s13 }
  0x36   : > { %s8284_s6 = smov (%p33_p8, %s8282_s6), 0  ;;  %p7281_p4 = por %p80_p10, %p79_p5 }
  0x37   : > { %8258 = sst [smem:[#allocation8_spill]] %s8284_s6  ;;  %p8260_p7 = scmp.eq.s32.totalorder %s7112_s22, 0 }
  0x38   : > { %s8259_s10 = scalar_select %p7281_p4, 1, 0 }
  0x39   : > { %p7287_p0 = por %p99_p1, %p8260_p7  ;;  %s62_s15 = ssub.s32 %s7108_s21, %s8284_s6 }
  0x3a   : > { %p105_p9 = scmp.ne.s32.totalorder %s7076_s13, %s7072_s12  ;;  %s63_s11 = sor.u32 %s62_s15, %s61_s29 }
  0x3b   : > { %p90_p11 = scmp.eq.s32.totalorder %s62_s15, 0  ;;  %p64_p12 = scmp.eq.s32.totalorder %s63_s11, 0 }
  0x3c   : > { %p7295_p13 = por %p105_p9, %p80_p10  ;;  %s8263_s8 = sadd.s32 1, %s7092_s17 }
  0x3d   : > { %s7300_s7 = scalar_select %p90_p11, %s7080_s14, %s92_s5  }
  0x3e   : > { %s8262_s26 = scalar_select %p7295_p13, 1, 0 }
  0x3f   : > { %s7305_s9 = scalar_select %p64_p12, %s7092_s17, %s8263_s8  }
  0x40   : > { %s188_s24 = sand.u32 1, %s7080_s14   ;;  %s5869_s27 = sshll.u32 %s7108_s21, 6 }
  0x41   : > { %s5197_s28 = sshll.u32 %s188_s24, 2  ;;  %s7312_s6 = scalar_lea.hbm %s8245_s2, %s5869_s27 }
  0x42   : > { %s192_s12 = scalar_lea.vmem [#allocation4], %s5197_s28  ;;  %p8264_p2 = scmp.lt.s32.totalorder %s7112_s22, 40 }
  0x43   : > { %s200_s29 = sshll.u32 %s192_s12, 4  ;;  %s189_s15 = scalar_lea.sflag [#allocation5], %s188_s24  ;;  %s7322_s29 = int_to_ptr.vmem [resolvable:$true] %s200_s29 }
  0x44   : > { %p7318_p3 = pnand %p8264_p2, %p7287_p0  ;;  %s6988_s1 = scalar_lea.hbm %s7312_s6, 64 }
  0x45   : > { %p6989_p5 = scmp.ne.s32.totalorder %s7312_s6, %s6988_s1  ;;  %s6993_s8 = scalar_lea.hbm %s8245_s2, 640 }
  0x46   : > { %p6990_p8 = pneg %p7318_p3  ;;  %p6994_p7 = scmp.lt.u32.totalorder %s7312_s6, %s8245_s2 }
  0x47   : > { %p6995_p0 = scmp.lt.u32.totalorder %s6993_s8, %s6988_s1  ;;  %p6997_p11 = scmp.lt.u32.totalorder %s6988_s1, %s7312_s6 }
  0x48   : > { %p6991_p10 = pnand %p6990_p8, %p6989_p5 }
  0x49   : > { %p6996_p9 = por %p6995_p0, %p6994_p7 }
  0x4a   : > { %p6992_p1 = pneg %p6991_p10 }
  0x4b   : > { %p6998_p12 = por %p6997_p11, %p6996_p9 }
  0x4d   : > { %p6999_p2 = pnand %p6998_p12, %p6992_p1 }
  0x4f   : > { %7002 = shalt.err (!%p6999_p2)
}
  0x50   : > { %s7003_s24 = scalar_lea.vmem %s7322_s29, 64  ;;  %s7118_s4 = smov [#allocation4]  }
  0x51   : > { %p7004_p5 = scmp.ne.s32.totalorder %s7322_s29, %s7003_s24  ;;  %s7008_s12 = sshll.u32 %s7118_s4, 4  ;;  %s7009_s12 = int_to_ptr.vmem [resolvable:$false] %s7008_s12 }
  0x52   : > { %s7010_s11 = scalar_lea.vmem %s7009_s12, 128  ;;  %p7011_p4 = scmp.lt.s32.totalorder %s7322_s29, %s7009_s12 }
  0x53   : > { %p7006_p10 = pnand %p7004_p5, %p6990_p8  ;;  %p7012_p7 = scmp.lt.s32.totalorder %s7010_s11, %s7003_s24 }
  0x55   : > { %p7007_p13 = pneg %p7006_p10  ;;  %p7013_p0 = por %p7012_p7, %p7011_p4 }
  0x57   : > { %p7014_p9 = pnand %p7013_p0, %p7007_p13 }
  0x59   : > { %7017 = shalt.err (!%p7014_p9)
}
  0x5a   : > { %5883 = dma.hbm_to_vmem [thread:$0]  (!%p7318_p3), %s7312_s6, 64, %s7322_s29, %s189_s15  }
  0x5b   : > { %209 = sbr.rel (%p7257_p6) target bundleno = 986 (0x3da), region = 32  ;;  %s211_s1 = sand.u32 (!%p7257_p6), 1, %s7088_s16  }
  0x5c   : > { %s5872_s25 = smul.u32 (!%p7257_p6), 5120, %s211_s1  ;;  %s212_s8 = scalar_lea.sflag (!%p7257_p6), [#allocation3], %s211_s1 }
  0x5d   : > { %p8266_p8 = scmp.ne.s32.totalorder (!%p7257_p6), %s8259_s10, 0 }
  0x5e   : > { %s7352_s27 = scalar_lea.vmem (!%p7257_p6), [#allocation2], %s5872_s25 }
  0x62   : > { %7063 = dma.done.wait (%p8266_p8), %s212_s8, 81920  }
  0x63   : > { %7065 = vsyncadd (%p8266_p8), %s212_s8, 4294885376  ;;  %s220_s5 = sand.u32 1, %s7076_s13   ;;  %p8267_p6 = scmp.ne.s32.totalorder %s8262_s26, 0 }
  0x64   : > { %s7359_s28 = sshll.u32 %s220_s5, 2  ;;  %s221_s30 = scalar_lea.sflag [#allocation5], %s220_s5 }
  0x65   : > { %s224_s6 = scalar_lea.vmem [#allocation4], %s7359_s28 }
  0x66   : > { %7067 = dma.done.wait (%p8267_p6), %s221_s30, 64  }
  0x67   : > { %7069 = vsyncadd (%p8267_p6), %s221_s30, 4294967232  ;;  %s257_s29 = smul.u32 20, %s7096_s18  ;;  %s5203_s15 = sshll.u32 %s7100_s19, 2 }
  0x68   : > { %p267_p4 = scmp.lt.s32.totalorder %s5203_s15, 39  ;;  %p5205_p3 = scmp.ne.s32.totalorder %s7096_s18, 0 }
  0x69   : > { %p258_p13 = scmp.lt.s32.totalorder %s257_s29, 79  ;;  %v7119_v0 = vmov (!%p5205_p3), 0.0  }
  0x6a   : > { %s8286_s15 = smov (!%p267_p4, %s5203_s15), 39  ;;  %275 = sbr.rel (%p5205_p3) target bundleno = 113 (0x71), region = 44 }
  0x6b   : > { %s8288_s29 = smov (!%p258_p13, %s257_s29), 79  ;;  %s5204_s10 = sshll.u32 %s8286_s15, 3 }
  0x6c   : > { %s5202_s24 = sshll.u32 %s8288_s29, 2  ;;  %s7371_s11 = scalar_lea.vmem %s8246_s3, %s5204_s10 }
  0x6d   : > { %s7376_s26 = scalar_lea.vmem %s8243_s0, %s5202_s24  ;;  %276 = vst [vmem:[%s7371_s11] sm:$0xff] (!%p5205_p3), %v7119_v0  ;;  %277 = vst [vmem:[%s7371_s11 + $0x8] sm:$0xff] (!%p5205_p3), %v7119_v0 }
  0x6e   : > { %278 = vst [vmem:[%s7371_s11 + $0x10] sm:$0xff] (!%p5205_p3), %v7119_v0  ;;  %279 = vst [vmem:[%s7371_s11 + $0x18] sm:$0xff] (!%p5205_p3), %v7119_v0 }
  0x71 PF: > { %v5978_v1 = vld [vmem:[%s7352_s27 + $0x4] ss:$16 sps:$4 sm:$0xff]   ;;  %v5982_v3 = vld [vmem:[%s7352_s27] ss:$16 sps:$4 sm:$0xff]   ;;  %v285_v49 = vld [vmem:[%s7376_s26 + $0x8] sm:$0xff]  ;;  %p5866_p1 = scmp.ne.s32.totalorder %s7096_s18, 3 }
  0x72   : > { %v5980_v2 = vld [vmem:[%s7352_s27 + $0x204] ss:$16 sps:$4 sm:$0xff]   ;;  %4204 = vmatprep.subr.bf16.mxu0 %v5978_v1  ;;  %v5983_v4 = vld [vmem:[%s7352_s27 + $0x200] ss:$16 sps:$4 sm:$0xff]   ;;  %v7435_v52 = vcombine.high %v285_v49, %v285_v49 }
  0x73   : > { %4245 = vmatprep.subr.bf16.mxu1 %v5980_v2  ;;  %v5984_v5 = vld [vmem:[%s7352_s27 + $0x24] ss:$16 sps:$4 sm:$0xff]   ;;  %4205 = vmatpush1.bf16.msra.mxu0 %v5982_v3  ;;  %v5988_v7 = vld [vmem:[%s7352_s27 + $0x20] ss:$16 sps:$4 sm:$0xff]  }
  0x74   : > { %4246 = vmatpush1.bf16.msra.mxu1 %v5983_v4  ;;  %v5986_v6 = vld [vmem:[%s7352_s27 + $0x224] ss:$16 sps:$4 sm:$0xff]   ;;  %4206 = vmatprep.subr.bf16.mxu0 %v5984_v5  ;;  %v5989_v8 = vld [vmem:[%s7352_s27 + $0x220] ss:$16 sps:$4 sm:$0xff]  }
  0x75   : > { %4247 = vmatprep.subr.bf16.mxu1 %v5986_v6  ;;  %v5990_v9 = vld [vmem:[%s7352_s27 + $0x44] ss:$16 sps:$4 sm:$0xff]   ;;  %v5994_v11 = vld [vmem:[%s7352_s27 + $0x40] ss:$16 sps:$4 sm:$0xff]   ;;  %4277 = vmatprep.mubr.bf16.mxu1 %v7435_v52 }
  0x76   : > { %v5992_v10 = vld [vmem:[%s7352_s27 + $0x244] ss:$16 sps:$4 sm:$0xff]   ;;  %v5995_v12 = vld [vmem:[%s7352_s27 + $0x240] ss:$16 sps:$4 sm:$0xff]  }
  0x77   : > { %4207 = vmatpush1.bf16.msra.mxu0 %v5988_v7  ;;  %v5996_v13 = vld [vmem:[%s7352_s27 + $0x64] ss:$16 sps:$4 sm:$0xff]   ;;  %v6000_v15 = vld [vmem:[%s7352_s27 + $0x60] ss:$16 sps:$4 sm:$0xff]  }
  0x78   : > { %4248 = vmatpush1.bf16.msra.mxu1 %v5989_v8  ;;  %4208 = vmatprep.subr.bf16.mxu0 %v5990_v9  ;;  %v5998_v14 = vld [vmem:[%s7352_s27 + $0x264] ss:$16 sps:$4 sm:$0xff]   ;;  %v6001_v16 = vld [vmem:[%s7352_s27 + $0x260] ss:$16 sps:$4 sm:$0xff]   ;;  %v7459_v8 = vcombine.low %v285_v49, %v285_v49 }
  0x79   : > { %4249 = vmatprep.subr.bf16.mxu1 %v5992_v10  ;;  %v6002_v17 = vld [vmem:[%s7352_s27 + $0x84] ss:$16 sps:$4 sm:$0xff]   ;;  %v6006_v19 = vld [vmem:[%s7352_s27 + $0x80] ss:$16 sps:$4 sm:$0xff]  }
  0x7a   : > { %v6004_v18 = vld [vmem:[%s7352_s27 + $0x284] ss:$16 sps:$4 sm:$0xff]   ;;  %v6007_v20 = vld [vmem:[%s7352_s27 + $0x280] ss:$16 sps:$4 sm:$0xff]  }
  0x7b   : > { %4209 = vmatpush1.bf16.msra.mxu0 %v5994_v11  ;;  %v6008_v21 = vld [vmem:[%s7352_s27 + $0xa4] ss:$16 sps:$4 sm:$0xff]   ;;  %v6012_v23 = vld [vmem:[%s7352_s27 + $0xa0] ss:$16 sps:$4 sm:$0xff]  }
  0x7c   : > { %4250 = vmatpush1.bf16.msra.mxu1 %v5995_v12  ;;  %4210 = vmatprep.subr.bf16.mxu0 %v5996_v13  ;;  %v6010_v22 = vld [vmem:[%s7352_s27 + $0x2a4] ss:$16 sps:$4 sm:$0xff]   ;;  %v6013_v24 = vld [vmem:[%s7352_s27 + $0x2a0] ss:$16 sps:$4 sm:$0xff]  }
  0x7d   : > { %4251 = vmatprep.subr.bf16.mxu1 %v5998_v14  ;;  %v6014_v25 = vld [vmem:[%s7352_s27 + $0xc4] ss:$16 sps:$4 sm:$0xff]   ;;  %v6018_v27 = vld [vmem:[%s7352_s27 + $0xc0] ss:$16 sps:$4 sm:$0xff]  }
  0x7e   : > { %v6016_v26 = vld [vmem:[%s7352_s27 + $0x2c4] ss:$16 sps:$4 sm:$0xff]   ;;  %v6019_v28 = vld [vmem:[%s7352_s27 + $0x2c0] ss:$16 sps:$4 sm:$0xff]  }
  0x7f   : > { %4211 = vmatpush1.bf16.msra.mxu0 %v6000_v15  ;;  %v6020_v29 = vld [vmem:[%s7352_s27 + $0xe4] ss:$16 sps:$4 sm:$0xff]   ;;  %v6024_v31 = vld [vmem:[%s7352_s27 + $0xe0] ss:$16 sps:$4 sm:$0xff]  }
  0x80   : > { %4252 = vmatpush1.bf16.msra.mxu1 %v6001_v16  ;;  %4212 = vmatprep.subr.bf16.mxu0 %v6002_v17  ;;  %v6022_v30 = vld [vmem:[%s7352_s27 + $0x2e4] ss:$16 sps:$4 sm:$0xff]   ;;  %v6025_v32 = vld [vmem:[%s7352_s27 + $0x2e0] ss:$16 sps:$4 sm:$0xff]  }
  0x81   : > { %4253 = vmatprep.subr.bf16.mxu1 %v6004_v18  ;;  %v6026_v33 = vld [vmem:[%s7352_s27 + $0x104] ss:$16 sps:$4 sm:$0xff]   ;;  %v6030_v35 = vld [vmem:[%s7352_s27 + $0x100] ss:$16 sps:$4 sm:$0xff]  }
  0x82   : > { %v6028_v34 = vld [vmem:[%s7352_s27 + $0x304] ss:$16 sps:$4 sm:$0xff]   ;;  %v6031_v36 = vld [vmem:[%s7352_s27 + $0x300] ss:$16 sps:$4 sm:$0xff]  }
  0x83   : > { %4213 = vmatpush1.bf16.msra.mxu0 %v6006_v19  ;;  %v6032_v37 = vld [vmem:[%s7352_s27 + $0x124] ss:$16 sps:$4 sm:$0xff]   ;;  %v6036_v39 = vld [vmem:[%s7352_s27 + $0x120] ss:$16 sps:$4 sm:$0xff]  }
  0x84   : > { %4254 = vmatpush1.bf16.msra.mxu1 %v6007_v20  ;;  %4214 = vmatprep.subr.bf16.mxu0 %v6008_v21  ;;  %v6034_v38 = vld [vmem:[%s7352_s27 + $0x324] ss:$16 sps:$4 sm:$0xff]   ;;  %v6037_v40 = vld [vmem:[%s7352_s27 + $0x320] ss:$16 sps:$4 sm:$0xff]  }
  0x85   : > { %4255 = vmatprep.subr.bf16.mxu1 %v6010_v22  ;;  %v6038_v41 = vld [vmem:[%s7352_s27 + $0x144] ss:$16 sps:$4 sm:$0xff]   ;;  %v6042_v43 = vld [vmem:[%s7352_s27 + $0x140] ss:$16 sps:$4 sm:$0xff]  }
  0x86   : > { %v6040_v42 = vld [vmem:[%s7352_s27 + $0x344] ss:$16 sps:$4 sm:$0xff]   ;;  %v6043_v44 = vld [vmem:[%s7352_s27 + $0x340] ss:$16 sps:$4 sm:$0xff]  }
  0x87   : > { %4215 = vmatpush1.bf16.msra.mxu0 %v6012_v23  ;;  %v6044_v45 = vld [vmem:[%s7352_s27 + $0x164] ss:$16 sps:$4 sm:$0xff]   ;;  %v6048_v50 = vld [vmem:[%s7352_s27 + $0x160] ss:$16 sps:$4 sm:$0xff]  }
  0x88   : > { %4256 = vmatpush1.bf16.msra.mxu1 %v6013_v24  ;;  %4216 = vmatprep.subr.bf16.mxu0 %v6014_v25  ;;  %v6046_v46 = vld [vmem:[%s7352_s27 + $0x364] ss:$16 sps:$4 sm:$0xff]   ;;  %v6049_v51 = vld [vmem:[%s7352_s27 + $0x360] ss:$16 sps:$4 sm:$0xff]  }
  0x89   : > { %4257 = vmatprep.subr.bf16.mxu1 %v6016_v26  ;;  %v284_v47 = vld [vmem:[%s7376_s26] sm:$0xff] }
  0x8a   : > { %v7430_v48 = vcombine.high %v284_v47, %v284_v47  ;;  %v6050_v53 = vld [vmem:[%s7352_s27 + $0x184] ss:$16 sps:$4 sm:$0xff]   ;;  %v6054_v55 = vld [vmem:[%s7352_s27 + $0x180] ss:$16 sps:$4 sm:$0xff]   ;;  %v7457_v7 = vcombine.low %v284_v47, %v284_v47 }
  0x8b   : > { %4217 = vmatpush1.bf16.msra.mxu0 %v6018_v27  ;;  %v6052_v54 = vld [vmem:[%s7352_s27 + $0x384] ss:$16 sps:$4 sm:$0xff]   ;;  %v6055_v56 = vld [vmem:[%s7352_s27 + $0x380] ss:$16 sps:$4 sm:$0xff]  }
  0x8c   : > { %4258 = vmatpush1.bf16.msra.mxu1 %v6019_v28  ;;  %4218 = vmatprep.subr.bf16.mxu0 %v6020_v29  ;;  %v6056_v57 = vld [vmem:[%s7352_s27 + $0x1a4] ss:$16 sps:$4 sm:$0xff]   ;;  %v6060_v59 = vld [vmem:[%s7352_s27 + $0x1a0] ss:$16 sps:$4 sm:$0xff]  }
  0x8d   : > { %4259 = vmatprep.subr.bf16.mxu1 %v6022_v30  ;;  %4236 = vmatprep.mubr.bf16.mxu0 %v7430_v48  ;;  %v6058_v58 = vld [vmem:[%s7352_s27 + $0x3a4] ss:$16 sps:$4 sm:$0xff]   ;;  %v6061_v60 = vld [vmem:[%s7352_s27 + $0x3a0] ss:$16 sps:$4 sm:$0xff]  }
  0x8e   : > { %v6062_v61 = vld [vmem:[%s7352_s27 + $0x1c4] ss:$16 sps:$4 sm:$0xff]   ;;  %v6066_v63 = vld [vmem:[%s7352_s27 + $0x1c0] ss:$16 sps:$4 sm:$0xff]  }
  0x8f   : > { %4219 = vmatpush1.bf16.msra.mxu0 %v6024_v31  ;;  %v6064_v62 = vld [vmem:[%s7352_s27 + $0x3c4] ss:$16 sps:$4 sm:$0xff]   ;;  %v6067_v0 = vld [vmem:[%s7352_s27 + $0x3c0] ss:$16 sps:$4 sm:$0xff]  }
  0x90   : > { %4260 = vmatpush1.bf16.msra.mxu1 %v6025_v32  ;;  %4220 = vmatprep.subr.bf16.mxu0 %v6026_v33  ;;  %v6068_v1 = vld [vmem:[%s7352_s27 + $0x1e4] ss:$16 sps:$4 sm:$0xff]   ;;  %v6072_v3 = vld [vmem:[%s7352_s27 + $0x1e0] ss:$16 sps:$4 sm:$0xff]  }
  0x91   : > { %4261 = vmatprep.subr.bf16.mxu1 %v6028_v34  ;;  %v6070_v2 = vld [vmem:[%s7352_s27 + $0x3e4] ss:$16 sps:$4 sm:$0xff]   ;;  %v6073_v4 = vld [vmem:[%s7352_s27 + $0x3e0] ss:$16 sps:$4 sm:$0xff]   ;;  %v7491_v34 = vld [vmem:[%s7376_s26 + $0x18] sm:$0xff] }
  0x92   : > { %v6080_v5 = vld [vmem:[%s7352_s27 + $0x404] ss:$16 sps:$4 sm:$0xff]   ;;  %v6078_v9 = vld [vmem:[%s7352_s27 + $0x400] ss:$16 sps:$4 sm:$0xff]  }
  0x93   : > { %4221 = vmatpush1.bf16.msra.mxu0 %v6030_v35  ;;  %v6083_v6 = vld [vmem:[%s7352_s27 + $0x604] ss:$16 sps:$4 sm:$0xff]   ;;  %v6081_v10 = vld [vmem:[%s7352_s27 + $0x600] ss:$16 sps:$4 sm:$0xff]  }
  0x94   : > { %4262 = vmatpush1.bf16.msra.mxu1 %v6031_v36  ;;  %4222 = vmatprep.subr.bf16.mxu0 %v6032_v37  ;;  %v6086_v11 = vld [vmem:[%s7352_s27 + $0x424] ss:$16 sps:$4 sm:$0xff]   ;;  %v6084_v13 = vld [vmem:[%s7352_s27 + $0x420] ss:$16 sps:$4 sm:$0xff]  }
  0x95   : > { %4263 = vmatprep.subr.bf16.mxu1 %v6034_v38  ;;  %v6089_v12 = vld [vmem:[%s7352_s27 + $0x624] ss:$16 sps:$4 sm:$0xff]   ;;  %v6087_v14 = vld [vmem:[%s7352_s27 + $0x620] ss:$16 sps:$4 sm:$0xff]   ;;  %v7501_v38 = vcombine.high %v7491_v34, %v7491_v34 }
  0x96   : > { %v6092_v15 = vld [vmem:[%s7352_s27 + $0x444] ss:$16 sps:$4 sm:$0xff]   ;;  %v6090_v17 = vld [vmem:[%s7352_s27 + $0x440] ss:$16 sps:$4 sm:$0xff]  }
  0x97   : > { %4223 = vmatpush1.bf16.msra.mxu0 %v6036_v39  ;;  %v6095_v16 = vld [vmem:[%s7352_s27 + $0x644] ss:$16 sps:$4 sm:$0xff]   ;;  %v6093_v18 = vld [vmem:[%s7352_s27 + $0x640] ss:$16 sps:$4 sm:$0xff]  }
  0x98   : > { %4264 = vmatpush1.bf16.msra.mxu1 %v6037_v40  ;;  %4224 = vmatprep.subr.bf16.mxu0 %v6038_v41  ;;  %v6098_v19 = vld [vmem:[%s7352_s27 + $0x464] ss:$16 sps:$4 sm:$0xff]   ;;  %v6096_v21 = vld [vmem:[%s7352_s27 + $0x460] ss:$16 sps:$4 sm:$0xff]  }
  0x99   : > { %4265 = vmatprep.subr.bf16.mxu1 %v6040_v42  ;;  %v6101_v20 = vld [vmem:[%s7352_s27 + $0x664] ss:$16 sps:$4 sm:$0xff]   ;;  %v6099_v22 = vld [vmem:[%s7352_s27 + $0x660] ss:$16 sps:$4 sm:$0xff]  }
  0x9a   : > { %v6104_v23 = vld [vmem:[%s7352_s27 + $0x484] ss:$16 sps:$4 sm:$0xff]   ;;  %v6102_v25 = vld [vmem:[%s7352_s27 + $0x480] ss:$16 sps:$4 sm:$0xff]  }
  0x9b   : > { %4225 = vmatpush1.bf16.msra.mxu0 %v6042_v43  ;;  %v6107_v24 = vld [vmem:[%s7352_s27 + $0x684] ss:$16 sps:$4 sm:$0xff]   ;;  %v6105_v26 = vld [vmem:[%s7352_s27 + $0x680] ss:$16 sps:$4 sm:$0xff]  }
  0x9c   : > { %4266 = vmatpush1.bf16.msra.mxu1 %v6043_v44  ;;  %4226 = vmatprep.subr.bf16.mxu0 %v6044_v45  ;;  %v6110_v27 = vld [vmem:[%s7352_s27 + $0x4a4] ss:$16 sps:$4 sm:$0xff]   ;;  %v6108_v29 = vld [vmem:[%s7352_s27 + $0x4a0] ss:$16 sps:$4 sm:$0xff]  }
  0x9d   : > { %4267 = vmatprep.subr.bf16.mxu1 %v6046_v46  ;;  %v6113_v28 = vld [vmem:[%s7352_s27 + $0x6a4] ss:$16 sps:$4 sm:$0xff]   ;;  %v6111_v30 = vld [vmem:[%s7352_s27 + $0x6a0] ss:$16 sps:$4 sm:$0xff]  }
  0x9e   : > { %v6116_v31 = vld [vmem:[%s7352_s27 + $0x4c4] ss:$16 sps:$4 sm:$0xff]   ;;  %v6114_v35 = vld [vmem:[%s7352_s27 + $0x4c0] ss:$16 sps:$4 sm:$0xff]  }
  0x9f   : > { %4227 = vmatpush1.bf16.msra.mxu0 %v6048_v50  ;;  %v6119_v32 = vld [vmem:[%s7352_s27 + $0x6c4] ss:$16 sps:$4 sm:$0xff]   ;;  %v6117_v36 = vld [vmem:[%s7352_s27 + $0x6c0] ss:$16 sps:$4 sm:$0xff]  }
  0xa0   : > { %4268 = vmatpush1.bf16.msra.mxu1 %v6049_v51  ;;  %4228 = vmatprep.subr.bf16.mxu0 %v6050_v53  ;;  %v7488_v33 = vld [vmem:[%s7376_s26 + $0x10] sm:$0xff] }
  0xa1   : > { %4269 = vmatprep.subr.bf16.mxu1 %v6052_v54  ;;  %v7497_v37 = vcombine.high %v7488_v33, %v7488_v33  ;;  %v6122_v39 = vld [vmem:[%s7352_s27 + $0x4e4] ss:$16 sps:$4 sm:$0xff]   ;;  %v6120_v41 = vld [vmem:[%s7352_s27 + $0x4e0] ss:$16 sps:$4 sm:$0xff]  }
  0xa2   : > { %v6125_v40 = vld [vmem:[%s7352_s27 + $0x6e4] ss:$16 sps:$4 sm:$0xff]   ;;  %v6123_v42 = vld [vmem:[%s7352_s27 + $0x6e0] ss:$16 sps:$4 sm:$0xff]  }
  0xa3   : > { %4229 = vmatpush1.bf16.msra.mxu0 %v6054_v55  ;;  %v6128_v43 = vld [vmem:[%s7352_s27 + $0x504] ss:$16 sps:$4 sm:$0xff]   ;;  %v6126_v45 = vld [vmem:[%s7352_s27 + $0x500] ss:$16 sps:$4 sm:$0xff]  }
  0xa4   : > { %4270 = vmatpush1.bf16.msra.mxu1 %v6055_v56  ;;  %4230 = vmatprep.subr.bf16.mxu0 %v6056_v57  ;;  %v6131_v44 = vld [vmem:[%s7352_s27 + $0x704] ss:$16 sps:$4 sm:$0xff]   ;;  %v6129_v46 = vld [vmem:[%s7352_s27 + $0x700] ss:$16 sps:$4 sm:$0xff]  }
  0xa5   : > { %4271 = vmatprep.subr.bf16.mxu1 %v6058_v58  ;;  %v6134_v47 = vld [vmem:[%s7352_s27 + $0x524] ss:$16 sps:$4 sm:$0xff]   ;;  %v6132_v50 = vld [vmem:[%s7352_s27 + $0x520] ss:$16 sps:$4 sm:$0xff]  }
  0xa6   : > { %v6137_v49 = vld [vmem:[%s7352_s27 + $0x724] ss:$16 sps:$4 sm:$0xff]   ;;  %v6135_v51 = vld [vmem:[%s7352_s27 + $0x720] ss:$16 sps:$4 sm:$0xff]  }
  0xa7   : > { %4231 = vmatpush1.bf16.msra.mxu0 %v6060_v59  ;;  %v6140_v53 = vld [vmem:[%s7352_s27 + $0x544] ss:$16 sps:$4 sm:$0xff]   ;;  %v6138_v55 = vld [vmem:[%s7352_s27 + $0x540] ss:$16 sps:$4 sm:$0xff]  }
  0xa8   : > { %4272 = vmatpush1.bf16.msra.mxu1 %v6061_v60  ;;  %4232 = vmatprep.subr.bf16.mxu0 %v6062_v61  ;;  %v6143_v54 = vld [vmem:[%s7352_s27 + $0x744] ss:$16 sps:$4 sm:$0xff]   ;;  %v6141_v56 = vld [vmem:[%s7352_s27 + $0x740] ss:$16 sps:$4 sm:$0xff]  }
  0xa9   : > { %4273 = vmatprep.subr.bf16.mxu1 %v6064_v62  ;;  %v6146_v57 = vld [vmem:[%s7352_s27 + $0x564] ss:$16 sps:$4 sm:$0xff]   ;;  %v6144_v59 = vld [vmem:[%s7352_s27 + $0x560] ss:$16 sps:$4 sm:$0xff]  }
  0xaa   : > { %v6149_v58 = vld [vmem:[%s7352_s27 + $0x764] ss:$16 sps:$4 sm:$0xff]   ;;  %v6147_v60 = vld [vmem:[%s7352_s27 + $0x760] ss:$16 sps:$4 sm:$0xff]  }
  0xab   : > { %4233 = vmatpush1.bf16.msra.mxu0 %v6066_v63  ;;  %v6152_v61 = vld [vmem:[%s7352_s27 + $0x584] ss:$16 sps:$4 sm:$0xff]   ;;  %v6150_v63 = vld [vmem:[%s7352_s27 + $0x580] ss:$16 sps:$4 sm:$0xff]  }
  0xac   : > { %4274 = vmatpush1.bf16.msra.mxu1 %v6067_v0  ;;  %4234 = vmatprep.subr.bf16.mxu0 %v6068_v1  ;;  %v6155_v62 = vld [vmem:[%s7352_s27 + $0x784] ss:$16 sps:$4 sm:$0xff]   ;;  %v6153_v0 = vld [vmem:[%s7352_s27 + $0x780] ss:$16 sps:$4 sm:$0xff]  }
  0xad   : > { %4275 = vmatprep.subr.bf16.mxu1 %v6070_v2  ;;  %v6158_v1 = vld [vmem:[%s7352_s27 + $0x5a4] ss:$16 sps:$4 sm:$0xff]  }
  0xae   : > { %v6161_v2 = vld [vmem:[%s7352_s27 + $0x7a4] ss:$16 sps:$4 sm:$0xff]  }
  0xaf   : > { %4235 = vmatpush1.bf16.msra.mxu0 %v6072_v3  ;;  %v6156_v3 = vld [vmem:[%s7352_s27 + $0x5a0] ss:$16 sps:$4 sm:$0xff]  }
  0xb0   : > { %4276 = vmatpush1.bf16.msra.mxu1 %v6073_v4  ;;  %4286 = vmatprep.subr.bf16.mxu0 %v6080_v5  ;;  %v6159_v4 = vld [vmem:[%s7352_s27 + $0x7a0] ss:$16 sps:$4 sm:$0xff]   ;;  %v6164_v5 = vld [vmem:[%s7352_s27 + $0x5c4] ss:$16 sps:$4 sm:$0xff]  }
  0xb1   : > { %4327 = vmatprep.subr.bf16.mxu1 %v6083_v6  ;;  %v6167_v6 = vld [vmem:[%s7352_s27 + $0x7c4] ss:$16 sps:$4 sm:$0xff]  }
  0xb2   : > { %4237 = vmatmul.mubr.bf16.vlgmr.msra.gmra.mrb[0].mxu0 %v7457_v7 }
  0xb3   : > { %4278 = vmatmul.mubr.bf16.vlgmr.msra.gmra.mrb[0].mxu1 %v7459_v8  ;;  %4287 = vmatpush1.bf16.msra.mxu0 %v6078_v9  ;;  %v6162_v9 = vld [vmem:[%s7352_s27 + $0x5c0] ss:$16 sps:$4 sm:$0xff]  }
  0xb4   : > { %4328 = vmatpush1.bf16.msra.mxu1 %v6081_v10  ;;  %4288 = vmatprep.subr.bf16.mxu0 %v6086_v11  ;;  %v6165_v10 = vld [vmem:[%s7352_s27 + $0x7c0] ss:$16 sps:$4 sm:$0xff]   ;;  %v6170_v11 = vld [vmem:[%s7352_s27 + $0x5e4] ss:$16 sps:$4 sm:$0xff]  }
  0xb5   : > { %4329 = vmatprep.subr.bf16.mxu1 %v6089_v12  ;;  %4318 = vmatprep.mubr.bf16.mxu0 %v7497_v37  ;;  %v6173_v12 = vld [vmem:[%s7352_s27 + $0x7e4] ss:$16 sps:$4 sm:$0xff]  }
  0xb6   : > { %4359 = vmatprep.mubr.bf16.mxu1 %v7501_v38 }
  0xb7   : > { %4289 = vmatpush1.bf16.msra.mxu0 %v6084_v13  ;;  %v6168_v13 = vld [vmem:[%s7352_s27 + $0x5e0] ss:$16 sps:$4 sm:$0xff]  }
  0xb8   : > { %4330 = vmatpush1.bf16.msra.mxu1 %v6087_v14  ;;  %4290 = vmatprep.subr.bf16.mxu0 %v6092_v15  ;;  %v6171_v14 = vld [vmem:[%s7352_s27 + $0x7e0] ss:$16 sps:$4 sm:$0xff]   ;;  %v6180_v15 = vld [vmem:[%s7352_s27 + $0x804] ss:$16 sps:$4 sm:$0xff]  }
  0xb9   : > { %4331 = vmatprep.subr.bf16.mxu1 %v6095_v16  ;;  %v6183_v16 = vld [vmem:[%s7352_s27 + $0xa04] ss:$16 sps:$4 sm:$0xff]  }
  0xbb   : > { %4291 = vmatpush1.bf16.msra.mxu0 %v6090_v17  ;;  %v7545_v17 = vcombine.low %v7488_v33, %v7488_v33  ;;  %v6198_v33 = vld [vmem:[%s7352_s27 + $0x864] ss:$16 sps:$4 sm:$0xff]  }
  0xbc   : > { %4332 = vmatpush1.bf16.msra.mxu1 %v6093_v18  ;;  %4292 = vmatprep.subr.bf16.mxu0 %v6098_v19  ;;  %v7549_v18 = vcombine.low %v7491_v34, %v7491_v34  ;;  %v6178_v19 = vld [vmem:[%s7352_s27 + $0x800] ss:$16 sps:$4 sm:$0xff]   ;;  %v6201_v34 = vld [vmem:[%s7352_s27 + $0xa64] ss:$16 sps:$4 sm:$0xff]  }
  0xbd   : > { %4333 = vmatprep.subr.bf16.mxu1 %v6101_v20  ;;  %v6181_v20 = vld [vmem:[%s7352_s27 + $0xa00] ss:$16 sps:$4 sm:$0xff]  }
  0xbf   : > { %4293 = vmatpush1.bf16.msra.mxu0 %v6096_v21  ;;  %v6186_v21 = vld [vmem:[%s7352_s27 + $0x824] ss:$16 sps:$4 sm:$0xff]  }
  0xc0   : > { %4334 = vmatpush1.bf16.msra.mxu1 %v6099_v22  ;;  %4294 = vmatprep.subr.bf16.mxu0 %v6104_v23  ;;  %v6189_v22 = vld [vmem:[%s7352_s27 + $0xa24] ss:$16 sps:$4 sm:$0xff]  }
  0xc1   : > { %4335 = vmatprep.subr.bf16.mxu1 %v6107_v24  ;;  %v7556_v23 = vld [vmem:[%s7376_s26 + $0x20] sm:$0xff]  ;;  %v7559_v24 = vld [vmem:[%s7376_s26 + $0x28] sm:$0xff] }
  0xc3   : > { %4295 = vmatpush1.bf16.msra.mxu0 %v6102_v25  ;;  %v7563_v25 = vcombine.high %v7556_v23, %v7556_v23 }
  0xc4   : > { %4336 = vmatpush1.bf16.msra.mxu1 %v6105_v26  ;;  %4296 = vmatprep.subr.bf16.mxu0 %v6110_v27  ;;  %v7567_v26 = vcombine.high %v7559_v24, %v7559_v24  ;;  %v6184_v27 = vld [vmem:[%s7352_s27 + $0x820] ss:$16 sps:$4 sm:$0xff]  }
  0xc5   : > { %4337 = vmatprep.subr.bf16.mxu1 %v6113_v28  ;;  %v6187_v28 = vld [vmem:[%s7352_s27 + $0xa20] ss:$16 sps:$4 sm:$0xff]  }
  0xc7   : > { %4297 = vmatpush1.bf16.msra.mxu0 %v6108_v29  ;;  %v6192_v29 = vld [vmem:[%s7352_s27 + $0x844] ss:$16 sps:$4 sm:$0xff]  }
  0xc8   : > { %4338 = vmatpush1.bf16.msra.mxu1 %v6111_v30  ;;  %4298 = vmatprep.subr.bf16.mxu0 %v6116_v31  ;;  %v6195_v30 = vld [vmem:[%s7352_s27 + $0xa44] ss:$16 sps:$4 sm:$0xff]   ;;  %v6190_v31 = vld [vmem:[%s7352_s27 + $0x840] ss:$16 sps:$4 sm:$0xff]  }
  0xc9   : > { %4339 = vmatprep.subr.bf16.mxu1 %v6119_v32  ;;  %v6193_v32 = vld [vmem:[%s7352_s27 + $0xa40] ss:$16 sps:$4 sm:$0xff]  }
  0xcb   : > { %4299 = vmatpush1.bf16.msra.mxu0 %v6114_v35  ;;  %v6196_v35 = vld [vmem:[%s7352_s27 + $0x860] ss:$16 sps:$4 sm:$0xff]  }
  0xcc   : > { %4340 = vmatpush1.bf16.msra.mxu1 %v6117_v36  ;;  %4300 = vmatprep.subr.bf16.mxu0 %v6122_v39  ;;  %v6199_v36 = vld [vmem:[%s7352_s27 + $0xa60] ss:$16 sps:$4 sm:$0xff]   ;;  %v6204_v39 = vld [vmem:[%s7352_s27 + $0x884] ss:$16 sps:$4 sm:$0xff]  }
  0xcd   : > { %4341 = vmatprep.subr.bf16.mxu1 %v6125_v40  ;;  %v6207_v40 = vld [vmem:[%s7352_s27 + $0xa84] ss:$16 sps:$4 sm:$0xff]  }
  0xcf   : > { %4301 = vmatpush1.bf16.msra.mxu0 %v6120_v41  ;;  %v6202_v41 = vld [vmem:[%s7352_s27 + $0x880] ss:$16 sps:$4 sm:$0xff]  }
  0xd0   : > { %4342 = vmatpush1.bf16.msra.mxu1 %v6123_v42  ;;  %4302 = vmatprep.subr.bf16.mxu0 %v6128_v43  ;;  %v6205_v42 = vld [vmem:[%s7352_s27 + $0xa80] ss:$16 sps:$4 sm:$0xff]   ;;  %v6210_v43 = vld [vmem:[%s7352_s27 + $0x8a4] ss:$16 sps:$4 sm:$0xff]  }
  0xd1   : > { %4343 = vmatprep.subr.bf16.mxu1 %v6131_v44  ;;  %v6213_v44 = vld [vmem:[%s7352_s27 + $0xaa4] ss:$16 sps:$4 sm:$0xff]  }
  0xd3   : > { %4303 = vmatpush1.bf16.msra.mxu0 %v6126_v45  ;;  %v6208_v45 = vld [vmem:[%s7352_s27 + $0x8a0] ss:$16 sps:$4 sm:$0xff]  }
  0xd4   : > { %4344 = vmatpush1.bf16.msra.mxu1 %v6129_v46  ;;  %4304 = vmatprep.subr.bf16.mxu0 %v6134_v47  ;;  %v6211_v46 = vld [vmem:[%s7352_s27 + $0xaa0] ss:$16 sps:$4 sm:$0xff]   ;;  %v6216_v47 = vld [vmem:[%s7352_s27 + $0x8c4] ss:$16 sps:$4 sm:$0xff]  }
  0xd5   : > { %4345 = vmatprep.subr.bf16.mxu1 %v6137_v49  ;;  %v6219_v49 = vld [vmem:[%s7352_s27 + $0xac4] ss:$16 sps:$4 sm:$0xff]  }
  0xd7   : > { %4305 = vmatpush1.bf16.msra.mxu0 %v6132_v50  ;;  %v6214_v50 = vld [vmem:[%s7352_s27 + $0x8c0] ss:$16 sps:$4 sm:$0xff]  }
  0xd8   : > { %4346 = vmatpush1.bf16.msra.mxu1 %v6135_v51  ;;  %4306 = vmatprep.subr.bf16.mxu0 %v6140_v53  ;;  %v6217_v51 = vld [vmem:[%s7352_s27 + $0xac0] ss:$16 sps:$4 sm:$0xff]   ;;  %v6222_v53 = vld [vmem:[%s7352_s27 + $0x8e4] ss:$16 sps:$4 sm:$0xff]  }
  0xd9   : > { %4347 = vmatprep.subr.bf16.mxu1 %v6143_v54  ;;  %v6225_v54 = vld [vmem:[%s7352_s27 + $0xae4] ss:$16 sps:$4 sm:$0xff]  }
  0xdb   : > { %4307 = vmatpush1.bf16.msra.mxu0 %v6138_v55  ;;  %v6220_v55 = vld [vmem:[%s7352_s27 + $0x8e0] ss:$16 sps:$4 sm:$0xff]  }
  0xdc   : > { %4348 = vmatpush1.bf16.msra.mxu1 %v6141_v56  ;;  %4308 = vmatprep.subr.bf16.mxu0 %v6146_v57  ;;  %v6223_v56 = vld [vmem:[%s7352_s27 + $0xae0] ss:$16 sps:$4 sm:$0xff]   ;;  %v6228_v57 = vld [vmem:[%s7352_s27 + $0x904] ss:$16 sps:$4 sm:$0xff]  }
  0xdd   : > { %4349 = vmatprep.subr.bf16.mxu1 %v6149_v58  ;;  %v6231_v58 = vld [vmem:[%s7352_s27 + $0xb04] ss:$16 sps:$4 sm:$0xff]  }
  0xdf   : > { %4309 = vmatpush1.bf16.msra.mxu0 %v6144_v59  ;;  %v6226_v59 = vld [vmem:[%s7352_s27 + $0x900] ss:$16 sps:$4 sm:$0xff]  }
  0xe0   : > { %4350 = vmatpush1.bf16.msra.mxu1 %v6147_v60  ;;  %4310 = vmatprep.subr.bf16.mxu0 %v6152_v61  ;;  %v6229_v60 = vld [vmem:[%s7352_s27 + $0xb00] ss:$16 sps:$4 sm:$0xff]   ;;  %v6234_v61 = vld [vmem:[%s7352_s27 + $0x924] ss:$16 sps:$4 sm:$0xff]  }
  0xe1   : > { %4351 = vmatprep.subr.bf16.mxu1 %v6155_v62  ;;  %v6237_v62 = vld [vmem:[%s7352_s27 + $0xb24] ss:$16 sps:$4 sm:$0xff]  }
  0xe3   : > { %4311 = vmatpush1.bf16.msra.mxu0 %v6150_v63  ;;  %v6232_v63 = vld [vmem:[%s7352_s27 + $0x920] ss:$16 sps:$4 sm:$0xff]  }
  0xe4   : > { %4352 = vmatpush1.bf16.msra.mxu1 %v6153_v0  ;;  %4312 = vmatprep.subr.bf16.mxu0 %v6158_v1  ;;  %v6235_v0 = vld [vmem:[%s7352_s27 + $0xb20] ss:$16 sps:$4 sm:$0xff]   ;;  %v6240_v1 = vld [vmem:[%s7352_s27 + $0x944] ss:$16 sps:$4 sm:$0xff]  }
  0xe5   : > { %4353 = vmatprep.subr.bf16.mxu1 %v6161_v2  ;;  %v6243_v2 = vld [vmem:[%s7352_s27 + $0xb44] ss:$16 sps:$4 sm:$0xff]  }
  0xe7   : > { %4313 = vmatpush1.bf16.msra.mxu0 %v6156_v3  ;;  %v6238_v3 = vld [vmem:[%s7352_s27 + $0x940] ss:$16 sps:$4 sm:$0xff]  }
  0xe8   : > { %4354 = vmatpush1.bf16.msra.mxu1 %v6159_v4  ;;  %4314 = vmatprep.subr.bf16.mxu0 %v6164_v5  ;;  %v6241_v4 = vld [vmem:[%s7352_s27 + $0xb40] ss:$16 sps:$4 sm:$0xff]   ;;  %v6246_v5 = vld [vmem:[%s7352_s27 + $0x964] ss:$16 sps:$4 sm:$0xff]  }
  0xe9   : > { %4355 = vmatprep.subr.bf16.mxu1 %v6167_v6  ;;  %v6249_v6 = vld [vmem:[%s7352_s27 + $0xb64] ss:$16 sps:$4 sm:$0xff]  }
  0xeb   : > { %4315 = vmatpush1.bf16.msra.mxu0 %v6162_v9  ;;  %v6244_v9 = vld [vmem:[%s7352_s27 + $0x960] ss:$16 sps:$4 sm:$0xff]  }
  0xec   : > { %4356 = vmatpush1.bf16.msra.mxu1 %v6165_v10  ;;  %4316 = vmatprep.subr.bf16.mxu0 %v6170_v11  ;;  %v6247_v10 = vld [vmem:[%s7352_s27 + $0xb60] ss:$16 sps:$4 sm:$0xff]   ;;  %v6252_v11 = vld [vmem:[%s7352_s27 + $0x984] ss:$16 sps:$4 sm:$0xff]  }
  0xed   : > { %4357 = vmatprep.subr.bf16.mxu1 %v6173_v12  ;;  %v6255_v12 = vld [vmem:[%s7352_s27 + $0xb84] ss:$16 sps:$4 sm:$0xff]  }
  0xef   : > { %4317 = vmatpush1.bf16.msra.mxu0 %v6168_v13  ;;  %v6250_v13 = vld [vmem:[%s7352_s27 + $0x980] ss:$16 sps:$4 sm:$0xff]  }
  0xf0   : > { %4358 = vmatpush1.bf16.msra.mxu1 %v6171_v14  ;;  %4368 = vmatprep.subr.bf16.mxu0 %v6180_v15  ;;  %v6253_v14 = vld [vmem:[%s7352_s27 + $0xb80] ss:$16 sps:$4 sm:$0xff]   ;;  %v6258_v15 = vld [vmem:[%s7352_s27 + $0x9a4] ss:$16 sps:$4 sm:$0xff]  }
  0xf1   : > { %4409 = vmatprep.subr.bf16.mxu1 %v6183_v16  ;;  %v6261_v16 = vld [vmem:[%s7352_s27 + $0xba4] ss:$16 sps:$4 sm:$0xff]  }
  0xf2   : > { %4319 = vmatmul.mubr.bf16.vlgmr.msra.gmra.mrb[4].mxu0 %v7545_v17 }
  0xf3   : > { %4360 = vmatmul.mubr.bf16.vlgmr.msra.gmra.mrb[4].mxu1 %v7549_v18  ;;  %4369 = vmatpush1.bf16.msra.mxu0 %v6178_v19  ;;  %v6256_v19 = vld [vmem:[%s7352_s27 + $0x9a0] ss:$16 sps:$4 sm:$0xff]  }
  0xf4   : > { %4410 = vmatpush1.bf16.msra.mxu1 %v6181_v20  ;;  %4370 = vmatprep.subr.bf16.mxu0 %v6186_v21  ;;  %v6259_v20 = vld [vmem:[%s7352_s27 + $0xba0] ss:$16 sps:$4 sm:$0xff]   ;;  %v6264_v21 = vld [vmem:[%s7352_s27 + $0x9c4] ss:$16 sps:$4 sm:$0xff]  }
  0xf5   : > { %4411 = vmatprep.subr.bf16.mxu1 %v6189_v22  ;;  %4400 = vmatprep.mubr.bf16.mxu0 %v7563_v25  ;;  %v6267_v22 = vld [vmem:[%s7352_s27 + $0xbc4] ss:$16 sps:$4 sm:$0xff]  }
  0xf6   : > { %4441 = vmatprep.mubr.bf16.mxu1 %v7567_v26 }
  0xf7   : > { %4371 = vmatpush1.bf16.msra.mxu0 %v6184_v27  ;;  %v6262_v27 = vld [vmem:[%s7352_s27 + $0x9c0] ss:$16 sps:$4 sm:$0xff]  }
  0xf8   : > { %4412 = vmatpush1.bf16.msra.mxu1 %v6187_v28  ;;  %4372 = vmatprep.subr.bf16.mxu0 %v6192_v29  ;;  %v6265_v28 = vld [vmem:[%s7352_s27 + $0xbc0] ss:$16 sps:$4 sm:$0xff]   ;;  %v6270_v29 = vld [vmem:[%s7352_s27 + $0x9e4] ss:$16 sps:$4 sm:$0xff]  }
  0xf9   : > { %4413 = vmatprep.subr.bf16.mxu1 %v6195_v30  ;;  %v6273_v30 = vld [vmem:[%s7352_s27 + $0xbe4] ss:$16 sps:$4 sm:$0xff]  }
  0xfb   : > { %4373 = vmatpush1.bf16.msra.mxu0 %v6190_v31  ;;  %v6268_v31 = vld [vmem:[%s7352_s27 + $0x9e0] ss:$16 sps:$4 sm:$0xff]  }
  0xfc   : > { %4414 = vmatpush1.bf16.msra.mxu1 %v6193_v32  ;;  %4374 = vmatprep.subr.bf16.mxu0 %v6198_v33  ;;  %v6271_v32 = vld [vmem:[%s7352_s27 + $0xbe0] ss:$16 sps:$4 sm:$0xff]   ;;  %v6280_v33 = vld [vmem:[%s7352_s27 + $0xc04] ss:$16 sps:$4 sm:$0xff]  }
  0xfd   : > { %4415 = vmatprep.subr.bf16.mxu1 %v6201_v34  ;;  %v6283_v34 = vld [vmem:[%s7352_s27 + $0xe04] ss:$16 sps:$4 sm:$0xff]  }
  0xff   : > { %4375 = vmatpush1.bf16.msra.mxu0 %v6196_v35  ;;  %v6278_v35 = vld [vmem:[%s7352_s27 + $0xc00] ss:$16 sps:$4 sm:$0xff]  }
 0x100   : > { %4416 = vmatpush1.bf16.msra.mxu1 %v6199_v36  ;;  %4376 = vmatprep.subr.bf16.mxu0 %v6204_v39  ;;  %v6281_v36 = vld [vmem:[%s7352_s27 + $0xe00] ss:$16 sps:$4 sm:$0xff]   ;;  %v7637_v39 = vcombine.low %v7556_v23, %v7556_v23 }
 0x101   : > { %4417 = vmatprep.subr.bf16.mxu1 %v6207_v40  ;;  %v7641_v40 = vcombine.low %v7559_v24, %v7559_v24 }
 0x103   : > { %4377 = vmatpush1.bf16.msra.mxu0 %v6202_v41  ;;  %v7644_v41 = vld [vmem:[%s7376_s26 + $0x30] sm:$0xff] }
 0x104   : > { %4418 = vmatpush1.bf16.msra.mxu1 %v6205_v42  ;;  %4378 = vmatprep.subr.bf16.mxu0 %v6210_v43  ;;  %v7647_v42 = vld [vmem:[%s7376_s26 + $0x38] sm:$0xff]  ;;  %v6286_v43 = vld [vmem:[%s7352_s27 + $0xc24] ss:$16 sps:$4 sm:$0xff]   ;;  %v7653_v23 = vcombine.high %v7644_v41, %v7644_v41 }
 0x105   : > { %4419 = vmatprep.subr.bf16.mxu1 %v6213_v44  ;;  %v6289_v44 = vld [vmem:[%s7352_s27 + $0xe24] ss:$16 sps:$4 sm:$0xff]   ;;  %v7657_v24 = vcombine.high %v7647_v42, %v7647_v42 }
 0x107   : > { %4379 = vmatpush1.bf16.msra.mxu0 %v6208_v45  ;;  %v6284_v45 = vld [vmem:[%s7352_s27 + $0xc20] ss:$16 sps:$4 sm:$0xff]  }
 0x108   : > { %4420 = vmatpush1.bf16.msra.mxu1 %v6211_v46  ;;  %4380 = vmatprep.subr.bf16.mxu0 %v6216_v47  ;;  %v6287_v46 = vld [vmem:[%s7352_s27 + $0xe20] ss:$16 sps:$4 sm:$0xff]   ;;  %v6292_v47 = vld [vmem:[%s7352_s27 + $0xc44] ss:$16 sps:$4 sm:$0xff]  }
 0x109   : > { %4421 = vmatprep.subr.bf16.mxu1 %v6219_v49  ;;  %v6295_v49 = vld [vmem:[%s7352_s27 + $0xe44] ss:$16 sps:$4 sm:$0xff]  }
 0x10b   : > { %4381 = vmatpush1.bf16.msra.mxu0 %v6214_v50  ;;  %v6290_v50 = vld [vmem:[%s7352_s27 + $0xc40] ss:$16 sps:$4 sm:$0xff]  }
 0x10c   : > { %4422 = vmatpush1.bf16.msra.mxu1 %v6217_v51  ;;  %4382 = vmatprep.subr.bf16.mxu0 %v6222_v53  ;;  %v6293_v51 = vld [vmem:[%s7352_s27 + $0xe40] ss:$16 sps:$4 sm:$0xff]   ;;  %v6298_v53 = vld [vmem:[%s7352_s27 + $0xc64] ss:$16 sps:$4 sm:$0xff]  }
 0x10d   : > { %4423 = vmatprep.subr.bf16.mxu1 %v6225_v54  ;;  %v6301_v54 = vld [vmem:[%s7352_s27 + $0xe64] ss:$16 sps:$4 sm:$0xff]  }
 0x10f   : > { %4383 = vmatpush1.bf16.msra.mxu0 %v6220_v55  ;;  %v6296_v55 = vld [vmem:[%s7352_s27 + $0xc60] ss:$16 sps:$4 sm:$0xff]  }
 0x110   : > { %4424 = vmatpush1.bf16.msra.mxu1 %v6223_v56  ;;  %4384 = vmatprep.subr.bf16.mxu0 %v6228_v57  ;;  %v6299_v56 = vld [vmem:[%s7352_s27 + $0xe60] ss:$16 sps:$4 sm:$0xff]   ;;  %v6304_v57 = vld [vmem:[%s7352_s27 + $0xc84] ss:$16 sps:$4 sm:$0xff]  }
 0x111   : > { %4425 = vmatprep.subr.bf16.mxu1 %v6231_v58  ;;  %v6307_v58 = vld [vmem:[%s7352_s27 + $0xe84] ss:$16 sps:$4 sm:$0xff]  }
 0x113   : > { %4385 = vmatpush1.bf16.msra.mxu0 %v6226_v59  ;;  %v6302_v59 = vld [vmem:[%s7352_s27 + $0xc80] ss:$16 sps:$4 sm:$0xff]  }
 0x114   : > { %4426 = vmatpush1.bf16.msra.mxu1 %v6229_v60  ;;  %4386 = vmatprep.subr.bf16.mxu0 %v6234_v61  ;;  %v6305_v60 = vld [vmem:[%s7352_s27 + $0xe80] ss:$16 sps:$4 sm:$0xff]   ;;  %v6310_v61 = vld [vmem:[%s7352_s27 + $0xca4] ss:$16 sps:$4 sm:$0xff]  }
 0x115   : > { %4427 = vmatprep.subr.bf16.mxu1 %v6237_v62  ;;  %v6313_v62 = vld [vmem:[%s7352_s27 + $0xea4] ss:$16 sps:$4 sm:$0xff]  }
 0x117   : > { %4387 = vmatpush1.bf16.msra.mxu0 %v6232_v63  ;;  %v6308_v63 = vld [vmem:[%s7352_s27 + $0xca0] ss:$16 sps:$4 sm:$0xff]  }
 0x118   : > { %4428 = vmatpush1.bf16.msra.mxu1 %v6235_v0  ;;  %4388 = vmatprep.subr.bf16.mxu0 %v6240_v1  ;;  %v6311_v0 = vld [vmem:[%s7352_s27 + $0xea0] ss:$16 sps:$4 sm:$0xff]   ;;  %v6316_v1 = vld [vmem:[%s7352_s27 + $0xcc4] ss:$16 sps:$4 sm:$0xff]  }
 0x119   : > { %4429 = vmatprep.subr.bf16.mxu1 %v6243_v2  ;;  %v6319_v2 = vld [vmem:[%s7352_s27 + $0xec4] ss:$16 sps:$4 sm:$0xff]  }
 0x11b   : > { %4389 = vmatpush1.bf16.msra.mxu0 %v6238_v3  ;;  %v6314_v3 = vld [vmem:[%s7352_s27 + $0xcc0] ss:$16 sps:$4 sm:$0xff]  }
 0x11c   : > { %4430 = vmatpush1.bf16.msra.mxu1 %v6241_v4  ;;  %4390 = vmatprep.subr.bf16.mxu0 %v6246_v5  ;;  %v6317_v4 = vld [vmem:[%s7352_s27 + $0xec0] ss:$16 sps:$4 sm:$0xff]   ;;  %v6322_v5 = vld [vmem:[%s7352_s27 + $0xce4] ss:$16 sps:$4 sm:$0xff]  }
 0x11d   : > { %4431 = vmatprep.subr.bf16.mxu1 %v6249_v6  ;;  %v6325_v6 = vld [vmem:[%s7352_s27 + $0xee4] ss:$16 sps:$4 sm:$0xff]  }
 0x11f   : > { %4391 = vmatpush1.bf16.msra.mxu0 %v6244_v9  ;;  %v6320_v9 = vld [vmem:[%s7352_s27 + $0xce0] ss:$16 sps:$4 sm:$0xff]  }
 0x120   : > { %4432 = vmatpush1.bf16.msra.mxu1 %v6247_v10  ;;  %4392 = vmatprep.subr.bf16.mxu0 %v6252_v11  ;;  %v6323_v10 = vld [vmem:[%s7352_s27 + $0xee0] ss:$16 sps:$4 sm:$0xff]   ;;  %v6328_v11 = vld [vmem:[%s7352_s27 + $0xd04] ss:$16 sps:$4 sm:$0xff]  }
 0x121   : > { %4433 = vmatprep.subr.bf16.mxu1 %v6255_v12  ;;  %v6331_v12 = vld [vmem:[%s7352_s27 + $0xf04] ss:$16 sps:$4 sm:$0xff]  }
 0x123   : > { %4393 = vmatpush1.bf16.msra.mxu0 %v6250_v13  ;;  %v6326_v13 = vld [vmem:[%s7352_s27 + $0xd00] ss:$16 sps:$4 sm:$0xff]  }
 0x124   : > { %4434 = vmatpush1.bf16.msra.mxu1 %v6253_v14  ;;  %4394 = vmatprep.subr.bf16.mxu0 %v6258_v15  ;;  %v6329_v14 = vld [vmem:[%s7352_s27 + $0xf00] ss:$16 sps:$4 sm:$0xff]   ;;  %v6334_v15 = vld [vmem:[%s7352_s27 + $0xd24] ss:$16 sps:$4 sm:$0xff]  }
 0x125   : > { %4435 = vmatprep.subr.bf16.mxu1 %v6261_v16  ;;  %v6337_v16 = vld [vmem:[%s7352_s27 + $0xf24] ss:$16 sps:$4 sm:$0xff]  }
 0x127   : > { %4395 = vmatpush1.bf16.msra.mxu0 %v6256_v19  ;;  %v6332_v19 = vld [vmem:[%s7352_s27 + $0xd20] ss:$16 sps:$4 sm:$0xff]  }
 0x128   : > { %4436 = vmatpush1.bf16.msra.mxu1 %v6259_v20  ;;  %4396 = vmatprep.subr.bf16.mxu0 %v6264_v21  ;;  %v6335_v20 = vld [vmem:[%s7352_s27 + $0xf20] ss:$16 sps:$4 sm:$0xff]   ;;  %v6340_v21 = vld [vmem:[%s7352_s27 + $0xd44] ss:$16 sps:$4 sm:$0xff]  }
 0x129   : > { %4437 = vmatprep.subr.bf16.mxu1 %v6267_v22  ;;  %v6343_v22 = vld [vmem:[%s7352_s27 + $0xf44] ss:$16 sps:$4 sm:$0xff]  }
 0x12b   : > { %4397 = vmatpush1.bf16.msra.mxu0 %v6262_v27  ;;  %v6338_v27 = vld [vmem:[%s7352_s27 + $0xd40] ss:$16 sps:$4 sm:$0xff]  }
 0x12c   : > { %4438 = vmatpush1.bf16.msra.mxu1 %v6265_v28  ;;  %4398 = vmatprep.subr.bf16.mxu0 %v6270_v29  ;;  %v6341_v28 = vld [vmem:[%s7352_s27 + $0xf40] ss:$16 sps:$4 sm:$0xff]   ;;  %v6346_v29 = vld [vmem:[%s7352_s27 + $0xd64] ss:$16 sps:$4 sm:$0xff]  }
 0x12d   : > { %4439 = vmatprep.subr.bf16.mxu1 %v6273_v30  ;;  %v6349_v30 = vld [vmem:[%s7352_s27 + $0xf64] ss:$16 sps:$4 sm:$0xff]  }
 0x12f   : > { %4399 = vmatpush1.bf16.msra.mxu0 %v6268_v31  ;;  %v6344_v31 = vld [vmem:[%s7352_s27 + $0xd60] ss:$16 sps:$4 sm:$0xff]  }
 0x130   : > { %4440 = vmatpush1.bf16.msra.mxu1 %v6271_v32  ;;  %4450 = vmatprep.subr.bf16.mxu0 %v6280_v33  ;;  %v6347_v32 = vld [vmem:[%s7352_s27 + $0xf60] ss:$16 sps:$4 sm:$0xff]   ;;  %v6352_v33 = vld [vmem:[%s7352_s27 + $0xd84] ss:$16 sps:$4 sm:$0xff]  }
 0x131   : > { %4491 = vmatprep.subr.bf16.mxu1 %v6283_v34  ;;  %v6355_v34 = vld [vmem:[%s7352_s27 + $0xf84] ss:$16 sps:$4 sm:$0xff]  }
 0x132   : > { %4401 = vmatmul.mubr.bf16.vlgmr.msra.gmra.mrb[8].mxu0 %v7637_v39 }
 0x133   : > { %4442 = vmatmul.mubr.bf16.vlgmr.msra.gmra.mrb[8].mxu1 %v7641_v40  ;;  %4451 = vmatpush1.bf16.msra.mxu0 %v6278_v35  ;;  %v6350_v35 = vld [vmem:[%s7352_s27 + $0xd80] ss:$16 sps:$4 sm:$0xff]  }
 0x134   : > { %4492 = vmatpush1.bf16.msra.mxu1 %v6281_v36  ;;  %4452 = vmatprep.subr.bf16.mxu0 %v6286_v43  ;;  %v6353_v36 = vld [vmem:[%s7352_s27 + $0xf80] ss:$16 sps:$4 sm:$0xff]   ;;  %v6358_v43 = vld [vmem:[%s7352_s27 + $0xda4] ss:$16 sps:$4 sm:$0xff]  }
 0x135   : > { %4493 = vmatprep.subr.bf16.mxu1 %v6289_v44  ;;  %4482 = vmatprep.mubr.bf16.mxu0 %v7653_v23  ;;  %v6361_v44 = vld [vmem:[%s7352_s27 + $0xfa4] ss:$16 sps:$4 sm:$0xff]  }
 0x136   : > { %4523 = vmatprep.mubr.bf16.mxu1 %v7657_v24 }
 0x137   : > { %4453 = vmatpush1.bf16.msra.mxu0 %v6284_v45  ;;  %v6356_v45 = vld [vmem:[%s7352_s27 + $0xda0] ss:$16 sps:$4 sm:$0xff]  }
 0x138   : > { %4494 = vmatpush1.bf16.msra.mxu1 %v6287_v46  ;;  %4454 = vmatprep.subr.bf16.mxu0 %v6292_v47  ;;  %v6359_v46 = vld [vmem:[%s7352_s27 + $0xfa0] ss:$16 sps:$4 sm:$0xff]   ;;  %v6364_v47 = vld [vmem:[%s7352_s27 + $0xdc4] ss:$16 sps:$4 sm:$0xff]  }
 0x139   : > { %4495 = vmatprep.subr.bf16.mxu1 %v6295_v49  ;;  %v6367_v49 = vld [vmem:[%s7352_s27 + $0xfc4] ss:$16 sps:$4 sm:$0xff]  }
 0x13b   : > { %4455 = vmatpush1.bf16.msra.mxu0 %v6290_v50  ;;  %v6362_v50 = vld [vmem:[%s7352_s27 + $0xdc0] ss:$16 sps:$4 sm:$0xff]  }
 0x13c   : > { %4496 = vmatpush1.bf16.msra.mxu1 %v6293_v51  ;;  %4456 = vmatprep.subr.bf16.mxu0 %v6298_v53  ;;  %v6365_v51 = vld [vmem:[%s7352_s27 + $0xfc0] ss:$16 sps:$4 sm:$0xff]   ;;  %v6370_v53 = vld [vmem:[%s7352_s27 + $0xde4] ss:$16 sps:$4 sm:$0xff]  }
 0x13d   : > { %4497 = vmatprep.subr.bf16.mxu1 %v6301_v54  ;;  %v6373_v54 = vld [vmem:[%s7352_s27 + $0xfe4] ss:$16 sps:$4 sm:$0xff]  }
 0x13f   : > { %4457 = vmatpush1.bf16.msra.mxu0 %v6296_v55  ;;  %v6368_v55 = vld [vmem:[%s7352_s27 + $0xde0] ss:$16 sps:$4 sm:$0xff]  }
 0x140   : > { %4498 = vmatpush1.bf16.msra.mxu1 %v6299_v56  ;;  %4458 = vmatprep.subr.bf16.mxu0 %v6304_v57  ;;  %v6371_v56 = vld [vmem:[%s7352_s27 + $0xfe0] ss:$16 sps:$4 sm:$0xff]   ;;  %v6380_v57 = vld [vmem:[%s7352_s27 + $0x1004] ss:$16 sps:$4 sm:$0xff]  }
 0x141   : > { %4499 = vmatprep.subr.bf16.mxu1 %v6307_v58  ;;  %v6383_v58 = vld [vmem:[%s7352_s27 + $0x1204] ss:$16 sps:$4 sm:$0xff]  }
 0x143   : > { %4459 = vmatpush1.bf16.msra.mxu0 %v6302_v59  ;;  %v7724_v59 = vld [vmem:[%s7376_s26 + $0x40] sm:$0xff] }
 0x144   : > { %4500 = vmatpush1.bf16.msra.mxu1 %v6305_v60  ;;  %4460 = vmatprep.subr.bf16.mxu0 %v6310_v61  ;;  %v7728_v60 = vcombine.low %v7644_v41, %v7644_v41  ;;  %v7732_v61 = vcombine.low %v7647_v42, %v7647_v42  ;;  %v7743_v41 = vcombine.high %v7724_v59, %v7724_v59 }
 0x145   : > { %4501 = vmatprep.subr.bf16.mxu1 %v6313_v62  ;;  %v7735_v62 = vld [vmem:[%s7376_s26 + $0x48] sm:$0xff] }
 0x146   : > { %v7747_v42 = vcombine.high %v7735_v62, %v7735_v62 }
 0x147   : > { %4461 = vmatpush1.bf16.msra.mxu0 %v6308_v63  ;;  %v6378_v63 = vld [vmem:[%s7352_s27 + $0x1000] ss:$16 sps:$4 sm:$0xff]  }
 0x148   : > { %4502 = vmatpush1.bf16.msra.mxu1 %v6311_v0  ;;  %4462 = vmatprep.subr.bf16.mxu0 %v6316_v1  ;;  %v6381_v0 = vld [vmem:[%s7352_s27 + $0x1200] ss:$16 sps:$4 sm:$0xff]   ;;  %v6386_v1 = vld [vmem:[%s7352_s27 + $0x1024] ss:$16 sps:$4 sm:$0xff]  }
 0x149   : > { %4503 = vmatprep.subr.bf16.mxu1 %v6319_v2  ;;  %v6389_v2 = vld [vmem:[%s7352_s27 + $0x1224] ss:$16 sps:$4 sm:$0xff]  }
 0x14b   : > { %4463 = vmatpush1.bf16.msra.mxu0 %v6314_v3  ;;  %v6384_v3 = vld [vmem:[%s7352_s27 + $0x1020] ss:$16 sps:$4 sm:$0xff]  }
 0x14c   : > { %4504 = vmatpush1.bf16.msra.mxu1 %v6317_v4  ;;  %4464 = vmatprep.subr.bf16.mxu0 %v6322_v5  ;;  %v6387_v4 = vld [vmem:[%s7352_s27 + $0x1220] ss:$16 sps:$4 sm:$0xff]   ;;  %v6392_v5 = vld [vmem:[%s7352_s27 + $0x1044] ss:$16 sps:$4 sm:$0xff]  }
 0x14d   : > { %4505 = vmatprep.subr.bf16.mxu1 %v6325_v6  ;;  %v6395_v6 = vld [vmem:[%s7352_s27 + $0x1244] ss:$16 sps:$4 sm:$0xff]  }
 0x14f   : > { %4465 = vmatpush1.bf16.msra.mxu0 %v6320_v9  ;;  %v6390_v9 = vld [vmem:[%s7352_s27 + $0x1040] ss:$16 sps:$4 sm:$0xff]  }
 0x150   : > { %4506 = vmatpush1.bf16.msra.mxu1 %v6323_v10  ;;  %4466 = vmatprep.subr.bf16.mxu0 %v6328_v11  ;;  %v6393_v10 = vld [vmem:[%s7352_s27 + $0x1240] ss:$16 sps:$4 sm:$0xff]   ;;  %v6398_v11 = vld [vmem:[%s7352_s27 + $0x1064] ss:$16 sps:$4 sm:$0xff]  }
 0x151   : > { %4507 = vmatprep.subr.bf16.mxu1 %v6331_v12  ;;  %v6401_v12 = vld [vmem:[%s7352_s27 + $0x1264] ss:$16 sps:$4 sm:$0xff]  }
 0x153   : > { %4467 = vmatpush1.bf16.msra.mxu0 %v6326_v13  ;;  %v6396_v13 = vld [vmem:[%s7352_s27 + $0x1060] ss:$16 sps:$4 sm:$0xff]  }
 0x154   : > { %4508 = vmatpush1.bf16.msra.mxu1 %v6329_v14  ;;  %4468 = vmatprep.subr.bf16.mxu0 %v6334_v15  ;;  %v6399_v14 = vld [vmem:[%s7352_s27 + $0x1260] ss:$16 sps:$4 sm:$0xff]   ;;  %v6404_v15 = vld [vmem:[%s7352_s27 + $0x1084] ss:$16 sps:$4 sm:$0xff]  }
 0x155   : > { %4509 = vmatprep.subr.bf16.mxu1 %v6337_v16  ;;  %v6407_v16 = vld [vmem:[%s7352_s27 + $0x1284] ss:$16 sps:$4 sm:$0xff]  }
 0x157   : > { %4469 = vmatpush1.bf16.msra.mxu0 %v6332_v19  ;;  %v6402_v19 = vld [vmem:[%s7352_s27 + $0x1080] ss:$16 sps:$4 sm:$0xff]  }
 0x158   : > { %4510 = vmatpush1.bf16.msra.mxu1 %v6335_v20  ;;  %4470 = vmatprep.subr.bf16.mxu0 %v6340_v21  ;;  %v6405_v20 = vld [vmem:[%s7352_s27 + $0x1280] ss:$16 sps:$4 sm:$0xff]   ;;  %v6410_v21 = vld [vmem:[%s7352_s27 + $0x10a4] ss:$16 sps:$4 sm:$0xff]  }
 0x159   : > { %4511 = vmatprep.subr.bf16.mxu1 %v6343_v22  ;;  %v6413_v22 = vld [vmem:[%s7352_s27 + $0x12a4] ss:$16 sps:$4 sm:$0xff]  }
 0x15b   : > { %4471 = vmatpush1.bf16.msra.mxu0 %v6338_v27  ;;  %v6408_v27 = vld [vmem:[%s7352_s27 + $0x10a0] ss:$16 sps:$4 sm:$0xff]  }
 0x15c   : > { %4512 = vmatpush1.bf16.msra.mxu1 %v6341_v28  ;;  %4472 = vmatprep.subr.bf16.mxu0 %v6346_v29  ;;  %v6411_v28 = vld [vmem:[%s7352_s27 + $0x12a0] ss:$16 sps:$4 sm:$0xff]   ;;  %v6416_v29 = vld [vmem:[%s7352_s27 + $0x10c4] ss:$16 sps:$4 sm:$0xff]  }
 0x15d   : > { %4513 = vmatprep.subr.bf16.mxu1 %v6349_v30  ;;  %v6419_v30 = vld [vmem:[%s7352_s27 + $0x12c4] ss:$16 sps:$4 sm:$0xff]  }
 0x15f   : > { %4473 = vmatpush1.bf16.msra.mxu0 %v6344_v31 }
 0x160   : > { %4514 = vmatpush1.bf16.msra.mxu1 %v6347_v32  ;;  %4474 = vmatprep.subr.bf16.mxu0 %v6352_v33  ;;  %v6414_v33 = vld [vmem:[%s7352_s27 + $0x10c0] ss:$16 sps:$4 sm:$0xff]  }
 0x161   : > { %4515 = vmatprep.subr.bf16.mxu1 %v6355_v34  ;;  %v6417_v34 = vld [vmem:[%s7352_s27 + $0x12c0] ss:$16 sps:$4 sm:$0xff]  }
 0x163   : > { %4475 = vmatpush1.bf16.msra.mxu0 %v6350_v35 }
 0x164   : > { %4516 = vmatpush1.bf16.msra.mxu1 %v6353_v36  ;;  %4476 = vmatprep.subr.bf16.mxu0 %v6358_v43 }
 0x165   : > { %4517 = vmatprep.subr.bf16.mxu1 %v6361_v44 }
 0x167   : > { %4477 = vmatpush1.bf16.msra.mxu0 %v6356_v45 }
 0x168   : > { %4518 = vmatpush1.bf16.msra.mxu1 %v6359_v46  ;;  %4478 = vmatprep.subr.bf16.mxu0 %v6364_v47 }
 0x169   : > { %4519 = vmatprep.subr.bf16.mxu1 %v6367_v49 }
 0x16b   : > { %4479 = vmatpush1.bf16.msra.mxu0 %v6362_v50  ;;  %v6422_v50 = vld [vmem:[%s7352_s27 + $0x10e4] ss:$16 sps:$4 sm:$0xff]  }
 0x16c   : > { %4520 = vmatpush1.bf16.msra.mxu1 %v6365_v51  ;;  %4480 = vmatprep.subr.bf16.mxu0 %v6370_v53  ;;  %v6425_v51 = vld [vmem:[%s7352_s27 + $0x12e4] ss:$16 sps:$4 sm:$0xff]   ;;  %v6420_v53 = vld [vmem:[%s7352_s27 + $0x10e0] ss:$16 sps:$4 sm:$0xff]  }
 0x16d   : > { %4521 = vmatprep.subr.bf16.mxu1 %v6373_v54  ;;  %v6423_v54 = vld [vmem:[%s7352_s27 + $0x12e0] ss:$16 sps:$4 sm:$0xff]  }
 0x16f   : > { %4481 = vmatpush1.bf16.msra.mxu0 %v6368_v55  ;;  %v6428_v55 = vld [vmem:[%s7352_s27 + $0x1104] ss:$16 sps:$4 sm:$0xff]  }
 0x170   : > { %4522 = vmatpush1.bf16.msra.mxu1 %v6371_v56  ;;  %4532 = vmatprep.subr.bf16.mxu0 %v6380_v57  ;;  %v6431_v56 = vld [vmem:[%s7352_s27 + $0x1304] ss:$16 sps:$4 sm:$0xff]   ;;  %v6426_v57 = vld [vmem:[%s7352_s27 + $0x1100] ss:$16 sps:$4 sm:$0xff]  }
 0x171   : > { %4573 = vmatprep.subr.bf16.mxu1 %v6383_v58  ;;  %v6429_v58 = vld [vmem:[%s7352_s27 + $0x1300] ss:$16 sps:$4 sm:$0xff]  }
 0x172   : > { %4483 = vmatmul.mubr.bf16.vlgmr.msra.gmra.mrb[12].mxu0 %v7728_v60 }
 0x173   : > { %4524 = vmatmul.mubr.bf16.vlgmr.msra.gmra.mrb[12].mxu1 %v7732_v61  ;;  %4533 = vmatpush1.bf16.msra.mxu0 %v6378_v63  ;;  %v6434_v63 = vld [vmem:[%s7352_s27 + $0x1124] ss:$16 sps:$4 sm:$0xff]  }
 0x174   : > { %4574 = vmatpush1.bf16.msra.mxu1 %v6381_v0  ;;  %4534 = vmatprep.subr.bf16.mxu0 %v6386_v1  ;;  %v6437_v0 = vld [vmem:[%s7352_s27 + $0x1324] ss:$16 sps:$4 sm:$0xff]   ;;  %v6432_v1 = vld [vmem:[%s7352_s27 + $0x1120] ss:$16 sps:$4 sm:$0xff]  }
 0x175   : > { %4575 = vmatprep.subr.bf16.mxu1 %v6389_v2  ;;  %4564 = vmatprep.mubr.bf16.mxu0 %v7743_v41  ;;  %v6435_v2 = vld [vmem:[%s7352_s27 + $0x1320] ss:$16 sps:$4 sm:$0xff]  }
 0x176   : > { %4605 = vmatprep.mubr.bf16.mxu1 %v7747_v42 }
 0x177   : > { %4535 = vmatpush1.bf16.msra.mxu0 %v6384_v3  ;;  %v6440_v3 = vld [vmem:[%s7352_s27 + $0x1144] ss:$16 sps:$4 sm:$0xff]  }
 0x178   : > { %4576 = vmatpush1.bf16.msra.mxu1 %v6387_v4  ;;  %4536 = vmatprep.subr.bf16.mxu0 %v6392_v5  ;;  %v6443_v4 = vld [vmem:[%s7352_s27 + $0x1344] ss:$16 sps:$4 sm:$0xff]   ;;  %v6438_v5 = vld [vmem:[%s7352_s27 + $0x1140] ss:$16 sps:$4 sm:$0xff]  }
 0x179   : > { %4577 = vmatprep.subr.bf16.mxu1 %v6395_v6  ;;  %v6441_v6 = vld [vmem:[%s7352_s27 + $0x1340] ss:$16 sps:$4 sm:$0xff]  }
 0x17b   : > { %4537 = vmatpush1.bf16.msra.mxu0 %v6390_v9  ;;  %v6446_v9 = vld [vmem:[%s7352_s27 + $0x1164] ss:$16 sps:$4 sm:$0xff]  }
 0x17c   : > { %4578 = vmatpush1.bf16.msra.mxu1 %v6393_v10  ;;  %4538 = vmatprep.subr.bf16.mxu0 %v6398_v11  ;;  %v6449_v10 = vld [vmem:[%s7352_s27 + $0x1364] ss:$16 sps:$4 sm:$0xff]   ;;  %v6444_v11 = vld [vmem:[%s7352_s27 + $0x1160] ss:$16 sps:$4 sm:$0xff]  }
 0x17d   : > { %4579 = vmatprep.subr.bf16.mxu1 %v6401_v12  ;;  %v6447_v12 = vld [vmem:[%s7352_s27 + $0x1360] ss:$16 sps:$4 sm:$0xff]  }
 0x17f   : > { %4539 = vmatpush1.bf16.msra.mxu0 %v6396_v13  ;;  %v6452_v13 = vld [vmem:[%s7352_s27 + $0x1184] ss:$16 sps:$4 sm:$0xff]  }
 0x180   : > { %4580 = vmatpush1.bf16.msra.mxu1 %v6399_v14  ;;  %4540 = vmatprep.subr.bf16.mxu0 %v6404_v15  ;;  %v6455_v14 = vld [vmem:[%s7352_s27 + $0x1384] ss:$16 sps:$4 sm:$0xff]   ;;  %v6450_v15 = vld [vmem:[%s7352_s27 + $0x1180] ss:$16 sps:$4 sm:$0xff]  }
 0x181   : > { %4581 = vmatprep.subr.bf16.mxu1 %v6407_v16  ;;  %v6453_v16 = vld [vmem:[%s7352_s27 + $0x1380] ss:$16 sps:$4 sm:$0xff]  }
 0x183   : > { %4541 = vmatpush1.bf16.msra.mxu0 %v6402_v19  ;;  %v6458_v19 = vld [vmem:[%s7352_s27 + $0x11a4] ss:$16 sps:$4 sm:$0xff]  }
 0x184   : > { %4582 = vmatpush1.bf16.msra.mxu1 %v6405_v20  ;;  %4542 = vmatprep.subr.bf16.mxu0 %v6410_v21  ;;  %v6461_v20 = vld [vmem:[%s7352_s27 + $0x13a4] ss:$16 sps:$4 sm:$0xff]   ;;  %v6456_v21 = vld [vmem:[%s7352_s27 + $0x11a0] ss:$16 sps:$4 sm:$0xff]  }
 0x185   : > { %4583 = vmatprep.subr.bf16.mxu1 %v6413_v22  ;;  %v4238_v31 = vpop.f32.mrb[0].mxu0  ;;  %v6459_v22 = vld [vmem:[%s7352_s27 + $0x13a0] ss:$16 sps:$4 sm:$0xff]  }
 0x186   : > { %v4279_v32 = vpop.f32.mrb[0].mxu1  ;;  %v4240_v36 = vpop.f32.mrb[1].mxu0 }
 0x187   : > { %v7775_v35 = vadd.f32 %v4279_v32, %v4238_v31  ;;  %v4281_v43 = vpop.f32.mrb[1].mxu1  ;;  %v4242_v45 = vpop.f32.mrb[2].mxu0  ;;  %4543 = vmatpush1.bf16.msra.mxu0 %v6408_v27  ;;  %v6464_v27 = vld [vmem:[%s7352_s27 + $0x11c4] ss:$16 sps:$4 sm:$0xff]  }
 0x188   : > { %v7777_v44 = vadd.f32 %v4281_v43, %v4240_v36  ;;  %v4283_v46 = vpop.f32.mrb[2].mxu1  ;;  %4584 = vmatpush1.bf16.msra.mxu1 %v6411_v28  ;;  %v4243_v47 = vpop.f32.mrb[3].mxu0  ;;  %4544 = vmatprep.subr.bf16.mxu0 %v6416_v29  ;;  %v6467_v28 = vld [vmem:[%s7352_s27 + $0x13c4] ss:$16 sps:$4 sm:$0xff]   ;;  %v6462_v29 = vld [vmem:[%s7352_s27 + $0x11c0] ss:$16 sps:$4 sm:$0xff]  }
 0x189   : > { %v4284_v49 = vpop.f32.mrb[3].mxu1  ;;  %4585 = vmatprep.subr.bf16.mxu1 %v6419_v30  ;;  %v6465_v30 = vld [vmem:[%s7352_s27 + $0x13c0] ss:$16 sps:$4 sm:$0xff]   ;;  %v6470_v31 = vld [vmem:[%s7352_s27 + $0x11e4] ss:$16 sps:$4 sm:$0xff]   ;;  %v7821_v47 = vcombine.low %v7724_v59, %v7724_v59 }
 0x18a   : > { %v6473_v32 = vld [vmem:[%s7352_s27 + $0x13e4] ss:$16 sps:$4 sm:$0xff]   ;;  %v6480_v36 = vld [vmem:[%s7352_s27 + $0xc] ss:$16 sps:$4 sm:$0xff]   ;;  %v6478_v45 = vld [vmem:[%s7352_s27 + $0x8] ss:$16 sps:$4 sm:$0xff]   ;;  %v7825_v49 = vcombine.low %v7735_v62, %v7735_v62 }
 0x18b   : > { %4545 = vmatpush1.bf16.msra.mxu0 %v6414_v33  ;;  %v6468_v33 = vld [vmem:[%s7352_s27 + $0x11e0] ss:$16 sps:$4 sm:$0xff]   ;;  %v6483_v43 = vld [vmem:[%s7352_s27 + $0x20c] ss:$16 sps:$4 sm:$0xff]   ;;  %v6481_v46 = vld [vmem:[%s7352_s27 + $0x208] ss:$16 sps:$4 sm:$0xff]  }
 0x18c   : > { %4586 = vmatpush1.bf16.msra.mxu1 %v6417_v34  ;;  %4546 = vmatprep.subr.bf16.mxu0 %v6422_v50  ;;  %v6471_v34 = vld [vmem:[%s7352_s27 + $0x13e0] ss:$16 sps:$4 sm:$0xff]   ;;  %v6486_v50 = vld [vmem:[%s7352_s27 + $0x2c] ss:$16 sps:$4 sm:$0xff]   ;;  %v6484_v59 = vld [vmem:[%s7352_s27 + $0x28] ss:$16 sps:$4 sm:$0xff]  }
 0x18d   : > { %4587 = vmatprep.subr.bf16.mxu1 %v6425_v51  ;;  %v6489_v51 = vld [vmem:[%s7352_s27 + $0x22c] ss:$16 sps:$4 sm:$0xff]   ;;  %v6487_v62 = vld [vmem:[%s7352_s27 + $0x228] ss:$16 sps:$4 sm:$0xff]  }
 0x18f   : > { %4547 = vmatpush1.bf16.msra.mxu0 %v6420_v53  ;;  %v6492_v53 = vld [vmem:[%s7352_s27 + $0x4c] ss:$16 sps:$4 sm:$0xff]  }
 0x190   : > { %4588 = vmatpush1.bf16.msra.mxu1 %v6423_v54  ;;  %4548 = vmatprep.subr.bf16.mxu0 %v6428_v55  ;;  %v6495_v54 = vld [vmem:[%s7352_s27 + $0x24c] ss:$16 sps:$4 sm:$0xff]   ;;  %v6490_v55 = vld [vmem:[%s7352_s27 + $0x48] ss:$16 sps:$4 sm:$0xff]  }
 0x191   : > { %4589 = vmatprep.subr.bf16.mxu1 %v6431_v56  ;;  %v6493_v56 = vld [vmem:[%s7352_s27 + $0x248] ss:$16 sps:$4 sm:$0xff]  }
 0x193   : > { %4549 = vmatpush1.bf16.msra.mxu0 %v6426_v57  ;;  %v6498_v57 = vld [vmem:[%s7352_s27 + $0x6c] ss:$16 sps:$4 sm:$0xff]  }
 0x194   : > { %4590 = vmatpush1.bf16.msra.mxu1 %v6429_v58  ;;  %4550 = vmatprep.subr.bf16.mxu0 %v6434_v63  ;;  %v6501_v58 = vld [vmem:[%s7352_s27 + $0x26c] ss:$16 sps:$4 sm:$0xff]   ;;  %v6499_v63 = vld [vmem:[%s7352_s27 + $0x268] ss:$16 sps:$4 sm:$0xff]  }
 0x195   : > { %4591 = vmatprep.subr.bf16.mxu1 %v6437_v0  ;;  %v6507_v0 = vld [vmem:[%s7352_s27 + $0x28c] ss:$16 sps:$4 sm:$0xff]  }
 0x197   : > { %4551 = vmatpush1.bf16.msra.mxu0 %v6432_v1  ;;  %v6502_v1 = vld [vmem:[%s7352_s27 + $0x88] ss:$16 sps:$4 sm:$0xff]  }
 0x198   : > { %4592 = vmatpush1.bf16.msra.mxu1 %v6435_v2  ;;  %4552 = vmatprep.subr.bf16.mxu0 %v6440_v3  ;;  %v6505_v2 = vld [vmem:[%s7352_s27 + $0x288] ss:$16 sps:$4 sm:$0xff]   ;;  %v6510_v3 = vld [vmem:[%s7352_s27 + $0xac] ss:$16 sps:$4 sm:$0xff]  }
 0x199   : > { %4593 = vmatprep.subr.bf16.mxu1 %v6443_v4  ;;  %v6513_v4 = vld [vmem:[%s7352_s27 + $0x2ac] ss:$16 sps:$4 sm:$0xff]  }
 0x19b   : > { %4553 = vmatpush1.bf16.msra.mxu0 %v6438_v5  ;;  %v6508_v5 = vld [vmem:[%s7352_s27 + $0xa8] ss:$16 sps:$4 sm:$0xff]  }
 0x19c   : > { %4594 = vmatpush1.bf16.msra.mxu1 %v6441_v6  ;;  %4554 = vmatprep.subr.bf16.mxu0 %v6446_v9  ;;  %v6511_v6 = vld [vmem:[%s7352_s27 + $0x2a8] ss:$16 sps:$4 sm:$0xff]   ;;  %v6516_v9 = vld [vmem:[%s7352_s27 + $0xcc] ss:$16 sps:$4 sm:$0xff]  }
 0x19d   : > { %4595 = vmatprep.subr.bf16.mxu1 %v6449_v10  ;;  %v6519_v10 = vld [vmem:[%s7352_s27 + $0x2cc] ss:$16 sps:$4 sm:$0xff]  }
 0x19f   : > { %4555 = vmatpush1.bf16.msra.mxu0 %v6444_v11 }
 0x1a0   : > { %4596 = vmatpush1.bf16.msra.mxu1 %v6447_v12  ;;  %4556 = vmatprep.subr.bf16.mxu0 %v6452_v13  ;;  %v6514_v13 = vld [vmem:[%s7352_s27 + $0xc8] ss:$16 sps:$4 sm:$0xff]  }
 0x1a1   : > { %4597 = vmatprep.subr.bf16.mxu1 %v6455_v14  ;;  %v6517_v14 = vld [vmem:[%s7352_s27 + $0x2c8] ss:$16 sps:$4 sm:$0xff]  }
 0x1a3   : > { %4557 = vmatpush1.bf16.msra.mxu0 %v6450_v15 }
 0x1a4   : > { %4598 = vmatpush1.bf16.msra.mxu1 %v6453_v16  ;;  %4558 = vmatprep.subr.bf16.mxu0 %v6458_v19 }
 0x1a5   : > { %4599 = vmatprep.subr.bf16.mxu1 %v6461_v20 }
 0x1a7   : > { %4559 = vmatpush1.bf16.msra.mxu0 %v6456_v21 }
 0x1a8   : > { %4600 = vmatpush1.bf16.msra.mxu1 %v6459_v22  ;;  %4560 = vmatprep.subr.bf16.mxu0 %v6464_v27 }
 0x1a9   : > { %4601 = vmatprep.subr.bf16.mxu1 %v6467_v28 }
 0x1ab   : > { %4561 = vmatpush1.bf16.msra.mxu0 %v6462_v29 }
 0x1ac   : > { %4602 = vmatpush1.bf16.msra.mxu1 %v6465_v30  ;;  %4562 = vmatprep.subr.bf16.mxu0 %v6470_v31  ;;  %v6525_v30 = vld [vmem:[%s7352_s27 + $0x2ec] ss:$16 sps:$4 sm:$0xff]  }
 0x1ad   : > { %4603 = vmatprep.subr.bf16.mxu1 %v6473_v32  ;;  %v6523_v32 = vld [vmem:[%s7352_s27 + $0x2e8] ss:$16 sps:$4 sm:$0xff]  }
 0x1af   : > { %4563 = vmatpush1.bf16.msra.mxu0 %v6468_v33  ;;  %v6528_v33 = vld [vmem:[%s7352_s27 + $0x10c] ss:$16 sps:$4 sm:$0xff]  }
 0x1b0   : > { %4604 = vmatpush1.bf16.msra.mxu1 %v6471_v34  ;;  %4614 = vmatprep.subr.bf16.mxu0 %v6480_v36  ;;  %v6531_v34 = vld [vmem:[%s7352_s27 + $0x30c] ss:$16 sps:$4 sm:$0xff]   ;;  %v6526_v36 = vld [vmem:[%s7352_s27 + $0x108] ss:$16 sps:$4 sm:$0xff]  }
 0x1b1   : > { %4655 = vmatprep.subr.bf16.mxu1 %v6483_v43  ;;  %v6529_v43 = vld [vmem:[%s7352_s27 + $0x308] ss:$16 sps:$4 sm:$0xff]  }
 0x1b2   : > { %4565 = vmatmul.mubr.bf16.vlgmr.msra.gmra.mrb[16].mxu0 %v7821_v47 }
 0x1b3   : > { %4606 = vmatmul.mubr.bf16.vlgmr.msra.gmra.mrb[16].mxu1 %v7825_v49  ;;  %4615 = vmatpush1.bf16.msra.mxu0 %v6478_v45  ;;  %v6534_v45 = vld [vmem:[%s7352_s27 + $0x12c] ss:$16 sps:$4 sm:$0xff]  }
 0x1b4   : > { %4656 = vmatpush1.bf16.msra.mxu1 %v6481_v46  ;;  %4616 = vmatprep.subr.bf16.mxu0 %v6486_v50  ;;  %v6537_v46 = vld [vmem:[%s7352_s27 + $0x32c] ss:$16 sps:$4 sm:$0xff]   ;;  %v6532_v50 = vld [vmem:[%s7352_s27 + $0x128] ss:$16 sps:$4 sm:$0xff]  }
 0x1b5   : > { %4657 = vmatprep.subr.bf16.mxu1 %v6489_v51  ;;  %4646 = vmatprep.mubr.bf16.mxu0 %v7430_v48  ;;  %v6496_v48 = vld [vmem:[%s7352_s27 + $0x68] ss:$16 sps:$4 sm:$0xff]  }
 0x1b6   : > { %4687 = vmatprep.mubr.bf16.mxu1 %v7435_v52  ;;  %v6504_v52 = vld [vmem:[%s7352_s27 + $0x8c] ss:$16 sps:$4 sm:$0xff]   ;;  %v6535_v51 = vld [vmem:[%s7352_s27 + $0x328] ss:$16 sps:$4 sm:$0xff]  }
 0x1b7   : > { %4617 = vmatpush1.bf16.msra.mxu0 %v6484_v59  ;;  %v6540_v59 = vld [vmem:[%s7352_s27 + $0x14c] ss:$16 sps:$4 sm:$0xff]  }
 0x1b8   : > { %4658 = vmatpush1.bf16.msra.mxu1 %v6487_v62  ;;  %4618 = vmatprep.subr.bf16.mxu0 %v6492_v53  ;;  %v6543_v62 = vld [vmem:[%s7352_s27 + $0x34c] ss:$16 sps:$4 sm:$0xff]   ;;  %v6538_v53 = vld [vmem:[%s7352_s27 + $0x148] ss:$16 sps:$4 sm:$0xff]  }
 0x1b9   : > { %4659 = vmatprep.subr.bf16.mxu1 %v6495_v54  ;;  %v6541_v54 = vld [vmem:[%s7352_s27 + $0x348] ss:$16 sps:$4 sm:$0xff]  }
 0x1bb   : > { %4619 = vmatpush1.bf16.msra.mxu0 %v6490_v55  ;;  %v6546_v55 = vld [vmem:[%s7352_s27 + $0x16c] ss:$16 sps:$4 sm:$0xff]  }
 0x1bc   : > { %4660 = vmatpush1.bf16.msra.mxu1 %v6493_v56  ;;  %4620 = vmatprep.subr.bf16.mxu0 %v6498_v57  ;;  %v6549_v56 = vld [vmem:[%s7352_s27 + $0x36c] ss:$16 sps:$4 sm:$0xff]   ;;  %v6544_v57 = vld [vmem:[%s7352_s27 + $0x168] ss:$16 sps:$4 sm:$0xff]  }
 0x1bd   : > { %4661 = vmatprep.subr.bf16.mxu1 %v6501_v58  ;;  %v6547_v58 = vld [vmem:[%s7352_s27 + $0x368] ss:$16 sps:$4 sm:$0xff]  }
 0x1bf   : > { %4621 = vmatpush1.bf16.msra.mxu0 %v6496_v48  ;;  %v6552_v48 = vld [vmem:[%s7352_s27 + $0x18c] ss:$16 sps:$4 sm:$0xff]  }
 0x1c0   : > { %4662 = vmatpush1.bf16.msra.mxu1 %v6499_v63  ;;  %4622 = vmatprep.subr.bf16.mxu0 %v6504_v52  ;;  %v6555_v63 = vld [vmem:[%s7352_s27 + $0x38c] ss:$16 sps:$4 sm:$0xff]   ;;  %v6550_v52 = vld [vmem:[%s7352_s27 + $0x188] ss:$16 sps:$4 sm:$0xff]  }
 0x1c1   : > { %4663 = vmatprep.subr.bf16.mxu1 %v6507_v0  ;;  %v6553_v0 = vld [vmem:[%s7352_s27 + $0x388] ss:$16 sps:$4 sm:$0xff]  }
 0x1c3   : > { %4623 = vmatpush1.bf16.msra.mxu0 %v6502_v1  ;;  %v6558_v1 = vld [vmem:[%s7352_s27 + $0x1ac] ss:$16 sps:$4 sm:$0xff]  }
 0x1c4   : > { %4664 = vmatpush1.bf16.msra.mxu1 %v6505_v2  ;;  %4624 = vmatprep.subr.bf16.mxu0 %v6510_v3  ;;  %v6561_v2 = vld [vmem:[%s7352_s27 + $0x3ac] ss:$16 sps:$4 sm:$0xff]   ;;  %v6556_v3 = vld [vmem:[%s7352_s27 + $0x1a8] ss:$16 sps:$4 sm:$0xff]  }
 0x1c5   : > { %4665 = vmatprep.subr.bf16.mxu1 %v6513_v4  ;;  %v4320_v11 = vpop.f32.mrb[4].mxu0  ;;  %v6559_v4 = vld [vmem:[%s7352_s27 + $0x3a8] ss:$16 sps:$4 sm:$0xff]  }
 0x1c6   : > { %v4361_v12 = vpop.f32.mrb[4].mxu1  ;;  %v4321_v15 = vadd.f32 %v4320_v11, %v7775_v35  ;;  %v4322_v16 = vpop.f32.mrb[5].mxu0  ;;  %v6522_v35 = vld [vmem:[%s7352_s27 + $0xec] ss:$16 sps:$4 sm:$0xff]  }
 0x1c7   : > { %v4363_v19 = vpop.f32.mrb[5].mxu1  ;;  %v4323_v20 = vadd.f32 %v4322_v16, %v7777_v44  ;;  %v4324_v21 = vpop.f32.mrb[6].mxu0  ;;  %4625 = vmatpush1.bf16.msra.mxu0 %v6508_v5  ;;  %v6520_v44 = vld [vmem:[%s7352_s27 + $0xe8] ss:$16 sps:$4 sm:$0xff]   ;;  %v6564_v5 = vld [vmem:[%s7352_s27 + $0x1cc] ss:$16 sps:$4 sm:$0xff]  }
 0x1c8   : > { %v4365_v22 = vpop.f32.mrb[6].mxu1  ;;  %4666 = vmatpush1.bf16.msra.mxu1 %v6511_v6  ;;  %v7857_v27 = vadd.f32 %v4361_v12, %v4321_v15  ;;  %v4325_v28 = vpop.f32.mrb[7].mxu0  ;;  %4626 = vmatprep.subr.bf16.mxu0 %v6516_v9  ;;  %v6567_v6 = vld [vmem:[%s7352_s27 + $0x3cc] ss:$16 sps:$4 sm:$0xff]   ;;  %v6562_v9 = vld [vmem:[%s7352_s27 + $0x1c8] ss:$16 sps:$4 sm:$0xff]  }
 0x1c9   : > { %v4366_v29 = vpop.f32.mrb[7].mxu1  ;;  %4667 = vmatprep.subr.bf16.mxu1 %v6519_v10  ;;  %v7861_v31 = vadd.f32 %v4363_v19, %v4323_v20  ;;  %v6565_v10 = vld [vmem:[%s7352_s27 + $0x3c8] ss:$16 sps:$4 sm:$0xff]   ;;  %v6570_v11 = vld [vmem:[%s7352_s27 + $0x1ec] ss:$16 sps:$4 sm:$0xff]  }
 0x1ca   : > { %v6573_v12 = vld [vmem:[%s7352_s27 + $0x3ec] ss:$16 sps:$4 sm:$0xff]   ;;  %v6574_v19 = vld [vmem:[%s7352_s27 + $0x408] ss:$16 sps:$4 sm:$0xff]  }
 0x1cb   : > { %4627 = vmatpush1.bf16.msra.mxu0 %v6514_v13  ;;  %v6568_v13 = vld [vmem:[%s7352_s27 + $0x1e8] ss:$16 sps:$4 sm:$0xff]   ;;  %v6576_v15 = vld [vmem:[%s7352_s27 + $0x40c] ss:$16 sps:$4 sm:$0xff]  }
 0x1cc   : > { %4668 = vmatpush1.bf16.msra.mxu1 %v6517_v14  ;;  %4628 = vmatprep.subr.bf16.mxu0 %v6522_v35  ;;  %v6571_v14 = vld [vmem:[%s7352_s27 + $0x3e8] ss:$16 sps:$4 sm:$0xff]   ;;  %v6579_v16 = vld [vmem:[%s7352_s27 + $0x60c] ss:$16 sps:$4 sm:$0xff]  }
 0x1cd   : > { %4669 = vmatprep.subr.bf16.mxu1 %v6525_v30  ;;  %v6577_v20 = vld [vmem:[%s7352_s27 + $0x608] ss:$16 sps:$4 sm:$0xff]   ;;  %v6582_v21 = vld [vmem:[%s7352_s27 + $0x42c] ss:$16 sps:$4 sm:$0xff]  }
 0x1ce   : > { %v6585_v22 = vld [vmem:[%s7352_s27 + $0x62c] ss:$16 sps:$4 sm:$0xff]   ;;  %v6580_v28 = vld [vmem:[%s7352_s27 + $0x428] ss:$16 sps:$4 sm:$0xff]  }
 0x1cf   : > { %4629 = vmatpush1.bf16.msra.mxu0 %v6520_v44  ;;  %v6583_v29 = vld [vmem:[%s7352_s27 + $0x628] ss:$16 sps:$4 sm:$0xff]   ;;  %v6588_v35 = vld [vmem:[%s7352_s27 + $0x44c] ss:$16 sps:$4 sm:$0xff]  }
 0x1d0   : > { %4670 = vmatpush1.bf16.msra.mxu1 %v6523_v32  ;;  %4630 = vmatprep.subr.bf16.mxu0 %v6528_v33  ;;  %v6591_v30 = vld [vmem:[%s7352_s27 + $0x64c] ss:$16 sps:$4 sm:$0xff]   ;;  %v6592_v33 = vld [vmem:[%s7352_s27 + $0x468] ss:$16 sps:$4 sm:$0xff]  }
 0x1d1   : > { %4671 = vmatprep.subr.bf16.mxu1 %v6531_v34  ;;  %v6594_v44 = vld [vmem:[%s7352_s27 + $0x46c] ss:$16 sps:$4 sm:$0xff]  }
 0x1d2   : > { %v6597_v32 = vld [vmem:[%s7352_s27 + $0x66c] ss:$16 sps:$4 sm:$0xff]  }
 0x1d3   : > { %4631 = vmatpush1.bf16.msra.mxu0 %v6526_v36  ;;  %v6603_v34 = vld [vmem:[%s7352_s27 + $0x68c] ss:$16 sps:$4 sm:$0xff]   ;;  %v6598_v36 = vld [vmem:[%s7352_s27 + $0x488] ss:$16 sps:$4 sm:$0xff]  }
 0x1d4   : > { %4672 = vmatpush1.bf16.msra.mxu1 %v6529_v43  ;;  %4632 = vmatprep.subr.bf16.mxu0 %v6534_v45  ;;  %v6601_v43 = vld [vmem:[%s7352_s27 + $0x688] ss:$16 sps:$4 sm:$0xff]   ;;  %v6606_v45 = vld [vmem:[%s7352_s27 + $0x4ac] ss:$16 sps:$4 sm:$0xff]  }
 0x1d5   : > { %4673 = vmatprep.subr.bf16.mxu1 %v6537_v46  ;;  %v6609_v46 = vld [vmem:[%s7352_s27 + $0x6ac] ss:$16 sps:$4 sm:$0xff]  }
 0x1d7   : > { %4633 = vmatpush1.bf16.msra.mxu0 %v6532_v50  ;;  %v6604_v50 = vld [vmem:[%s7352_s27 + $0x4a8] ss:$16 sps:$4 sm:$0xff]  }
 0x1d8   : > { %4674 = vmatpush1.bf16.msra.mxu1 %v6535_v51  ;;  %4634 = vmatprep.subr.bf16.mxu0 %v6540_v59  ;;  %v6607_v51 = vld [vmem:[%s7352_s27 + $0x6a8] ss:$16 sps:$4 sm:$0xff]   ;;  %v6612_v59 = vld [vmem:[%s7352_s27 + $0x4cc] ss:$16 sps:$4 sm:$0xff]  }
 0x1d9   : > { %4675 = vmatprep.subr.bf16.mxu1 %v6543_v62  ;;  %v6615_v62 = vld [vmem:[%s7352_s27 + $0x6cc] ss:$16 sps:$4 sm:$0xff]  }
 0x1db   : > { %4635 = vmatpush1.bf16.msra.mxu0 %v6538_v53 }
 0x1dc   : > { %4676 = vmatpush1.bf16.msra.mxu1 %v6541_v54  ;;  %4636 = vmatprep.subr.bf16.mxu0 %v6546_v55 }
 0x1dd   : > { %4677 = vmatprep.subr.bf16.mxu1 %v6549_v56 }
 0x1df   : > { %4637 = vmatpush1.bf16.msra.mxu0 %v6544_v57 }
 0x1e0   : > { %4678 = vmatpush1.bf16.msra.mxu1 %v6547_v58  ;;  %4638 = vmatprep.subr.bf16.mxu0 %v6552_v48 }
 0x1e1   : > { %4679 = vmatprep.subr.bf16.mxu1 %v6555_v63 }
 0x1e3   : > { %4639 = vmatpush1.bf16.msra.mxu0 %v6550_v52  ;;  %v6610_v52 = vld [vmem:[%s7352_s27 + $0x4c8] ss:$16 sps:$4 sm:$0xff]  }
 0x1e4   : > { %4680 = vmatpush1.bf16.msra.mxu1 %v6553_v0  ;;  %4640 = vmatprep.subr.bf16.mxu0 %v6558_v1  ;;  %v6613_v0 = vld [vmem:[%s7352_s27 + $0x6c8] ss:$16 sps:$4 sm:$0xff]  }
 0x1e5   : > { %4681 = vmatprep.subr.bf16.mxu1 %v6561_v2 }
 0x1e7   : > { %4641 = vmatpush1.bf16.msra.mxu0 %v6556_v3 }
 0x1e8   : > { %4682 = vmatpush1.bf16.msra.mxu1 %v6559_v4  ;;  %4642 = vmatprep.subr.bf16.mxu0 %v6564_v5  ;;  %v6616_v5 = vld [vmem:[%s7352_s27 + $0x4e8] ss:$16 sps:$4 sm:$0xff]  }
 0x1e9   : > { %4683 = vmatprep.subr.bf16.mxu1 %v6567_v6  ;;  %v6619_v6 = vld [vmem:[%s7352_s27 + $0x6e8] ss:$16 sps:$4 sm:$0xff]  }
 0x1eb   : > { %4643 = vmatpush1.bf16.msra.mxu0 %v6562_v9  ;;  %v6624_v9 = vld [vmem:[%s7352_s27 + $0x50c] ss:$16 sps:$4 sm:$0xff]  }
 0x1ec   : > { %4684 = vmatpush1.bf16.msra.mxu1 %v6565_v10  ;;  %4644 = vmatprep.subr.bf16.mxu0 %v6570_v11  ;;  %v6627_v10 = vld [vmem:[%s7352_s27 + $0x70c] ss:$16 sps:$4 sm:$0xff]   ;;  %v6622_v11 = vld [vmem:[%s7352_s27 + $0x508] ss:$16 sps:$4 sm:$0xff]  }
 0x1ed   : > { %4685 = vmatprep.subr.bf16.mxu1 %v6573_v12  ;;  %v6625_v12 = vld [vmem:[%s7352_s27 + $0x708] ss:$16 sps:$4 sm:$0xff]  }
 0x1ef   : > { %4645 = vmatpush1.bf16.msra.mxu0 %v6568_v13  ;;  %v6630_v13 = vld [vmem:[%s7352_s27 + $0x52c] ss:$16 sps:$4 sm:$0xff]  }
 0x1f0   : > { %4686 = vmatpush1.bf16.msra.mxu1 %v6571_v14  ;;  %4696 = vmatprep.subr.bf16.mxu0 %v6576_v15  ;;  %v6633_v14 = vld [vmem:[%s7352_s27 + $0x72c] ss:$16 sps:$4 sm:$0xff]   ;;  %v6628_v15 = vld [vmem:[%s7352_s27 + $0x528] ss:$16 sps:$4 sm:$0xff]  }
 0x1f1   : > { %4737 = vmatprep.subr.bf16.mxu1 %v6579_v16  ;;  %v6631_v16 = vld [vmem:[%s7352_s27 + $0x728] ss:$16 sps:$4 sm:$0xff]  }
 0x1f2   : > { %4647 = vmatmul.mubr.bf16.vlgmr.msra.gmra.mrb[20].mxu0 %v7457_v7  ;;  %v6586_v7 = vld [vmem:[%s7352_s27 + $0x448] ss:$16 sps:$4 sm:$0xff]  }
 0x1f3   : > { %4688 = vmatmul.mubr.bf16.vlgmr.msra.gmra.mrb[20].mxu1 %v7459_v8  ;;  %4697 = vmatpush1.bf16.msra.mxu0 %v6574_v19  ;;  %v6589_v8 = vld [vmem:[%s7352_s27 + $0x648] ss:$16 sps:$4 sm:$0xff]   ;;  %v6636_v19 = vld [vmem:[%s7352_s27 + $0x54c] ss:$16 sps:$4 sm:$0xff]  }
 0x1f4   : > { %4738 = vmatpush1.bf16.msra.mxu1 %v6577_v20  ;;  %4698 = vmatprep.subr.bf16.mxu0 %v6582_v21  ;;  %v6639_v20 = vld [vmem:[%s7352_s27 + $0x74c] ss:$16 sps:$4 sm:$0xff]   ;;  %v6634_v21 = vld [vmem:[%s7352_s27 + $0x548] ss:$16 sps:$4 sm:$0xff]  }
 0x1f5   : > { %4739 = vmatprep.subr.bf16.mxu1 %v6585_v22  ;;  %4728 = vmatprep.mubr.bf16.mxu0 %v7497_v37  ;;  %v6595_v37 = vld [vmem:[%s7352_s27 + $0x668] ss:$16 sps:$4 sm:$0xff]  }
 0x1f6   : > { %4769 = vmatprep.mubr.bf16.mxu1 %v7501_v38  ;;  %v6600_v38 = vld [vmem:[%s7352_s27 + $0x48c] ss:$16 sps:$4 sm:$0xff]   ;;  %v6637_v22 = vld [vmem:[%s7352_s27 + $0x748] ss:$16 sps:$4 sm:$0xff]  }
 0x1f7   : > { %4699 = vmatpush1.bf16.msra.mxu0 %v6580_v28  ;;  %v6642_v28 = vld [vmem:[%s7352_s27 + $0x56c] ss:$16 sps:$4 sm:$0xff]  }
 0x1f8   : > { %4740 = vmatpush1.bf16.msra.mxu1 %v6583_v29  ;;  %4700 = vmatprep.subr.bf16.mxu0 %v6588_v35  ;;  %v6645_v29 = vld [vmem:[%s7352_s27 + $0x76c] ss:$16 sps:$4 sm:$0xff]   ;;  %v6640_v35 = vld [vmem:[%s7352_s27 + $0x568] ss:$16 sps:$4 sm:$0xff]  }
 0x1f9   : > { %4741 = vmatprep.subr.bf16.mxu1 %v6591_v30  ;;  %v6643_v30 = vld [vmem:[%s7352_s27 + $0x768] ss:$16 sps:$4 sm:$0xff]  }
 0x1fb   : > { %4701 = vmatpush1.bf16.msra.mxu0 %v6586_v7  ;;  %v6648_v7 = vld [vmem:[%s7352_s27 + $0x58c] ss:$16 sps:$4 sm:$0xff]  }
 0x1fc   : > { %4742 = vmatpush1.bf16.msra.mxu1 %v6589_v8  ;;  %4702 = vmatprep.subr.bf16.mxu0 %v6594_v44  ;;  %v6651_v8 = vld [vmem:[%s7352_s27 + $0x78c] ss:$16 sps:$4 sm:$0xff]   ;;  %v6646_v44 = vld [vmem:[%s7352_s27 + $0x588] ss:$16 sps:$4 sm:$0xff]  }
 0x1fd   : > { %4743 = vmatprep.subr.bf16.mxu1 %v6597_v32  ;;  %v6649_v32 = vld [vmem:[%s7352_s27 + $0x788] ss:$16 sps:$4 sm:$0xff]  }
 0x1ff   : > { %4703 = vmatpush1.bf16.msra.mxu0 %v6592_v33  ;;  %v6654_v33 = vld [vmem:[%s7352_s27 + $0x5ac] ss:$16 sps:$4 sm:$0xff]  }
 0x200   : > { %4744 = vmatpush1.bf16.msra.mxu1 %v6595_v37  ;;  %4704 = vmatprep.subr.bf16.mxu0 %v6600_v38  ;;  %v6657_v37 = vld [vmem:[%s7352_s27 + $0x7ac] ss:$16 sps:$4 sm:$0xff]   ;;  %v6652_v38 = vld [vmem:[%s7352_s27 + $0x5a8] ss:$16 sps:$4 sm:$0xff]  }
 0x201   : > { %4745 = vmatprep.subr.bf16.mxu1 %v6603_v34  ;;  %v6655_v34 = vld [vmem:[%s7352_s27 + $0x7a8] ss:$16 sps:$4 sm:$0xff]  }
 0x203   : > { %4705 = vmatpush1.bf16.msra.mxu0 %v6598_v36  ;;  %v6660_v36 = vld [vmem:[%s7352_s27 + $0x5cc] ss:$16 sps:$4 sm:$0xff]  }
 0x204   : > { %4746 = vmatpush1.bf16.msra.mxu1 %v6601_v43  ;;  %4706 = vmatprep.subr.bf16.mxu0 %v6606_v45  ;;  %v6663_v43 = vld [vmem:[%s7352_s27 + $0x7cc] ss:$16 sps:$4 sm:$0xff]   ;;  %v6658_v45 = vld [vmem:[%s7352_s27 + $0x5c8] ss:$16 sps:$4 sm:$0xff]  }
 0x205   : > { %4747 = vmatprep.subr.bf16.mxu1 %v6609_v46  ;;  %v4402_v53 = vpop.f32.mrb[8].mxu0  ;;  %v6661_v46 = vld [vmem:[%s7352_s27 + $0x7c8] ss:$16 sps:$4 sm:$0xff]  }
 0x206   : > { %v4443_v54 = vpop.f32.mrb[8].mxu1  ;;  %v4403_v55 = vadd.f32 %v4402_v53, %v7857_v27  ;;  %v4404_v56 = vpop.f32.mrb[9].mxu0  ;;  %v6618_v27 = vld [vmem:[%s7352_s27 + $0x4ec] ss:$16 sps:$4 sm:$0xff]  }
 0x207   : > { %v4445_v57 = vpop.f32.mrb[9].mxu1  ;;  %v4405_v58 = vadd.f32 %v4404_v56, %v7861_v31  ;;  %v4406_v48 = vpop.f32.mrb[10].mxu0  ;;  %4707 = vmatpush1.bf16.msra.mxu0 %v6604_v50  ;;  %v6621_v31 = vld [vmem:[%s7352_s27 + $0x6ec] ss:$16 sps:$4 sm:$0xff]   ;;  %v6673_v56 = vld [vmem:[%s7352_s27 + $0xa08] ss:$16 sps:$4 sm:$0xff]  }
 0x208   : > { %v4447_v63 = vpop.f32.mrb[10].mxu1  ;;  %4748 = vmatpush1.bf16.msra.mxu1 %v6607_v51  ;;  %v7931_v1 = vadd.f32 %v4443_v54, %v4403_v55  ;;  %v4407_v2 = vpop.f32.mrb[11].mxu0  ;;  %4708 = vmatprep.subr.bf16.mxu0 %v6612_v59  ;;  %v6666_v50 = vld [vmem:[%s7352_s27 + $0x5ec] ss:$16 sps:$4 sm:$0xff]   ;;  %v6664_v59 = vld [vmem:[%s7352_s27 + $0x5e8] ss:$16 sps:$4 sm:$0xff]  }
 0x209   : > { %v4448_v3 = vpop.f32.mrb[11].mxu1  ;;  %4749 = vmatprep.subr.bf16.mxu1 %v6615_v62  ;;  %v7935_v4 = vadd.f32 %v4445_v57, %v4405_v58  ;;  %v6669_v51 = vld [vmem:[%s7352_s27 + $0x7ec] ss:$16 sps:$4 sm:$0xff]   ;;  %v6667_v62 = vld [vmem:[%s7352_s27 + $0x7e8] ss:$16 sps:$4 sm:$0xff]  }
 0x20a   : > { %v6672_v53 = vld [vmem:[%s7352_s27 + $0x80c] ss:$16 sps:$4 sm:$0xff]   ;;  %v6670_v55 = vld [vmem:[%s7352_s27 + $0x808] ss:$16 sps:$4 sm:$0xff]  }
 0x20b   : > { %4709 = vmatpush1.bf16.msra.mxu0 %v6610_v52  ;;  %v6675_v54 = vld [vmem:[%s7352_s27 + $0xa0c] ss:$16 sps:$4 sm:$0xff]   ;;  %v6676_v48 = vld [vmem:[%s7352_s27 + $0x828] ss:$16 sps:$4 sm:$0xff]  }
 0x20c   : > { %4750 = vmatpush1.bf16.msra.mxu1 %v6613_v0  ;;  %4710 = vmatprep.subr.bf16.mxu0 %v6618_v27  ;;  %v6678_v57 = vld [vmem:[%s7352_s27 + $0x82c] ss:$16 sps:$4 sm:$0xff]   ;;  %v6679_v63 = vld [vmem:[%s7352_s27 + $0xa28] ss:$16 sps:$4 sm:$0xff]  }
 0x20d   : > { %4751 = vmatprep.subr.bf16.mxu1 %v6621_v31  ;;  %v6681_v58 = vld [vmem:[%s7352_s27 + $0xa2c] ss:$16 sps:$4 sm:$0xff]   ;;  %v6688_v27 = vld [vmem:[%s7352_s27 + $0x868] ss:$16 sps:$4 sm:$0xff]  }
 0x20e   : > { %v6684_v52 = vld [vmem:[%s7352_s27 + $0x84c] ss:$16 sps:$4 sm:$0xff]  }
 0x20f   : > { %4711 = vmatpush1.bf16.msra.mxu0 %v6616_v5  ;;  %v6687_v0 = vld [vmem:[%s7352_s27 + $0xa4c] ss:$16 sps:$4 sm:$0xff]   ;;  %v6694_v5 = vld [vmem:[%s7352_s27 + $0x888] ss:$16 sps:$4 sm:$0xff]  }
 0x210   : > { %4752 = vmatpush1.bf16.msra.mxu1 %v6619_v6  ;;  %4712 = vmatprep.subr.bf16.mxu0 %v6624_v9  ;;  %v6690_v2 = vld [vmem:[%s7352_s27 + $0x86c] ss:$16 sps:$4 sm:$0xff]   ;;  %v6697_v6 = vld [vmem:[%s7352_s27 + $0xa88] ss:$16 sps:$4 sm:$0xff]  }
 0x211   : > { %4753 = vmatprep.subr.bf16.mxu1 %v6627_v10  ;;  %v6693_v3 = vld [vmem:[%s7352_s27 + $0xa6c] ss:$16 sps:$4 sm:$0xff]  }
 0x212   : > { %v6699_v31 = vld [vmem:[%s7352_s27 + $0xa8c] ss:$16 sps:$4 sm:$0xff]  }
 0x213   : > { %4713 = vmatpush1.bf16.msra.mxu0 %v6622_v11  ;;  %v6702_v9 = vld [vmem:[%s7352_s27 + $0x8ac] ss:$16 sps:$4 sm:$0xff]   ;;  %v6700_v11 = vld [vmem:[%s7352_s27 + $0x8a8] ss:$16 sps:$4 sm:$0xff]  }
 0x214   : > { %4754 = vmatpush1.bf16.msra.mxu1 %v6625_v12  ;;  %4714 = vmatprep.subr.bf16.mxu0 %v6630_v13  ;;  %v6705_v10 = vld [vmem:[%s7352_s27 + $0xaac] ss:$16 sps:$4 sm:$0xff]   ;;  %v6703_v12 = vld [vmem:[%s7352_s27 + $0xaa8] ss:$16 sps:$4 sm:$0xff]  }
 0x215   : > { %4755 = vmatprep.subr.bf16.mxu1 %v6633_v14  ;;  %v6708_v13 = vld [vmem:[%s7352_s27 + $0x8cc] ss:$16 sps:$4 sm:$0xff]  }
 0x216   : > { %v6711_v14 = vld [vmem:[%s7352_s27 + $0xacc] ss:$16 sps:$4 sm:$0xff]  }
 0x217   : > { %4715 = vmatpush1.bf16.msra.mxu0 %v6628_v15 }
 0x218   : > { %4756 = vmatpush1.bf16.msra.mxu1 %v6631_v16  ;;  %4716 = vmatprep.subr.bf16.mxu0 %v6636_v19 }
 0x219   : > { %4757 = vmatprep.subr.bf16.mxu1 %v6639_v20 }
 0x21b   : > { %4717 = vmatpush1.bf16.msra.mxu0 %v6634_v21 }
 0x21c   : > { %4758 = vmatpush1.bf16.msra.mxu1 %v6637_v22  ;;  %4718 = vmatprep.subr.bf16.mxu0 %v6642_v28 }
 0x21d   : > { %4759 = vmatprep.subr.bf16.mxu1 %v6645_v29 }
 0x21f   : > { %4719 = vmatpush1.bf16.msra.mxu0 %v6640_v35  ;;  %v6706_v35 = vld [vmem:[%s7352_s27 + $0x8c8] ss:$16 sps:$4 sm:$0xff]  }
 0x220   : > { %4760 = vmatpush1.bf16.msra.mxu1 %v6643_v30  ;;  %4720 = vmatprep.subr.bf16.mxu0 %v6648_v7  ;;  %v6709_v30 = vld [vmem:[%s7352_s27 + $0xac8] ss:$16 sps:$4 sm:$0xff]  }
 0x221   : > { %4761 = vmatprep.subr.bf16.mxu1 %v6651_v8 }
 0x223   : > { %4721 = vmatpush1.bf16.msra.mxu0 %v6646_v44 }
 0x224   : > { %4762 = vmatpush1.bf16.msra.mxu1 %v6649_v32  ;;  %4722 = vmatprep.subr.bf16.mxu0 %v6654_v33  ;;  %v6712_v33 = vld [vmem:[%s7352_s27 + $0x8e8] ss:$16 sps:$4 sm:$0xff]  }
 0x225   : > { %4763 = vmatprep.subr.bf16.mxu1 %v6657_v37  ;;  %v6715_v37 = vld [vmem:[%s7352_s27 + $0xae8] ss:$16 sps:$4 sm:$0xff]  }
 0x227   : > { %4723 = vmatpush1.bf16.msra.mxu0 %v6652_v38  ;;  %v6720_v38 = vld [vmem:[%s7352_s27 + $0x90c] ss:$16 sps:$4 sm:$0xff]  }
 0x228   : > { %4764 = vmatpush1.bf16.msra.mxu1 %v6655_v34  ;;  %4724 = vmatprep.subr.bf16.mxu0 %v6660_v36  ;;  %v6723_v34 = vld [vmem:[%s7352_s27 + $0xb0c] ss:$16 sps:$4 sm:$0xff]   ;;  %v6718_v36 = vld [vmem:[%s7352_s27 + $0x908] ss:$16 sps:$4 sm:$0xff]  }
 0x229   : > { %4765 = vmatprep.subr.bf16.mxu1 %v6663_v43  ;;  %v6721_v43 = vld [vmem:[%s7352_s27 + $0xb08] ss:$16 sps:$4 sm:$0xff]  }
 0x22b   : > { %4725 = vmatpush1.bf16.msra.mxu0 %v6658_v45  ;;  %v6726_v45 = vld [vmem:[%s7352_s27 + $0x92c] ss:$16 sps:$4 sm:$0xff]  }
 0x22c   : > { %4766 = vmatpush1.bf16.msra.mxu1 %v6661_v46  ;;  %4726 = vmatprep.subr.bf16.mxu0 %v6666_v50  ;;  %v6729_v46 = vld [vmem:[%s7352_s27 + $0xb2c] ss:$16 sps:$4 sm:$0xff]   ;;  %v6724_v50 = vld [vmem:[%s7352_s27 + $0x928] ss:$16 sps:$4 sm:$0xff]  }
 0x22d   : > { %4767 = vmatprep.subr.bf16.mxu1 %v6669_v51  ;;  %v6727_v51 = vld [vmem:[%s7352_s27 + $0xb28] ss:$16 sps:$4 sm:$0xff]  }
 0x22f   : > { %4727 = vmatpush1.bf16.msra.mxu0 %v6664_v59  ;;  %v6732_v59 = vld [vmem:[%s7352_s27 + $0x94c] ss:$16 sps:$4 sm:$0xff]  }
 0x230   : > { %4768 = vmatpush1.bf16.msra.mxu1 %v6667_v62  ;;  %4778 = vmatprep.subr.bf16.mxu0 %v6672_v53  ;;  %v6735_v62 = vld [vmem:[%s7352_s27 + $0xb4c] ss:$16 sps:$4 sm:$0xff]   ;;  %v6730_v53 = vld [vmem:[%s7352_s27 + $0x948] ss:$16 sps:$4 sm:$0xff]  }
 0x231   : > { %4819 = vmatprep.subr.bf16.mxu1 %v6675_v54  ;;  %v6733_v54 = vld [vmem:[%s7352_s27 + $0xb48] ss:$16 sps:$4 sm:$0xff]  }
 0x232   : > { %4729 = vmatmul.mubr.bf16.vlgmr.msra.gmra.mrb[24].mxu0 %v7545_v17  ;;  %v6682_v17 = vld [vmem:[%s7352_s27 + $0x848] ss:$16 sps:$4 sm:$0xff]  }
 0x233   : > { %4770 = vmatmul.mubr.bf16.vlgmr.msra.gmra.mrb[24].mxu1 %v7549_v18  ;;  %4779 = vmatpush1.bf16.msra.mxu0 %v6670_v55  ;;  %v6685_v18 = vld [vmem:[%s7352_s27 + $0xa48] ss:$16 sps:$4 sm:$0xff]   ;;  %v6738_v55 = vld [vmem:[%s7352_s27 + $0x96c] ss:$16 sps:$4 sm:$0xff]  }
 0x234   : > { %4820 = vmatpush1.bf16.msra.mxu1 %v6673_v56  ;;  %4780 = vmatprep.subr.bf16.mxu0 %v6678_v57  ;;  %v6741_v56 = vld [vmem:[%s7352_s27 + $0xb6c] ss:$16 sps:$4 sm:$0xff]   ;;  %v6736_v57 = vld [vmem:[%s7352_s27 + $0x968] ss:$16 sps:$4 sm:$0xff]  }
 0x235   : > { %4821 = vmatprep.subr.bf16.mxu1 %v6681_v58  ;;  %4810 = vmatprep.mubr.bf16.mxu0 %v7563_v25  ;;  %v6691_v25 = vld [vmem:[%s7352_s27 + $0xa68] ss:$16 sps:$4 sm:$0xff]  }
 0x236   : > { %4851 = vmatprep.mubr.bf16.mxu1 %v7567_v26  ;;  %v6696_v26 = vld [vmem:[%s7352_s27 + $0x88c] ss:$16 sps:$4 sm:$0xff]   ;;  %v6739_v58 = vld [vmem:[%s7352_s27 + $0xb68] ss:$16 sps:$4 sm:$0xff]  }
 0x237   : > { %4781 = vmatpush1.bf16.msra.mxu0 %v6676_v48  ;;  %v6744_v48 = vld [vmem:[%s7352_s27 + $0x98c] ss:$16 sps:$4 sm:$0xff]  }
 0x238   : > { %4822 = vmatpush1.bf16.msra.mxu1 %v6679_v63  ;;  %4782 = vmatprep.subr.bf16.mxu0 %v6684_v52  ;;  %v6747_v63 = vld [vmem:[%s7352_s27 + $0xb8c] ss:$16 sps:$4 sm:$0xff]   ;;  %v6742_v52 = vld [vmem:[%s7352_s27 + $0x988] ss:$16 sps:$4 sm:$0xff]  }
 0x239   : > { %4823 = vmatprep.subr.bf16.mxu1 %v6687_v0  ;;  %v6745_v0 = vld [vmem:[%s7352_s27 + $0xb88] ss:$16 sps:$4 sm:$0xff]  }
 0x23b   : > { %4783 = vmatpush1.bf16.msra.mxu0 %v6682_v17  ;;  %v6750_v17 = vld [vmem:[%s7352_s27 + $0x9ac] ss:$16 sps:$4 sm:$0xff]  }
 0x23c   : > { %4824 = vmatpush1.bf16.msra.mxu1 %v6685_v18  ;;  %4784 = vmatprep.subr.bf16.mxu0 %v6690_v2  ;;  %v6753_v18 = vld [vmem:[%s7352_s27 + $0xbac] ss:$16 sps:$4 sm:$0xff]   ;;  %v6748_v2 = vld [vmem:[%s7352_s27 + $0x9a8] ss:$16 sps:$4 sm:$0xff]  }
 0x23d   : > { %4825 = vmatprep.subr.bf16.mxu1 %v6693_v3  ;;  %v6751_v3 = vld [vmem:[%s7352_s27 + $0xba8] ss:$16 sps:$4 sm:$0xff]  }
 0x23f   : > { %4785 = vmatpush1.bf16.msra.mxu0 %v6688_v27  ;;  %v6756_v27 = vld [vmem:[%s7352_s27 + $0x9cc] ss:$16 sps:$4 sm:$0xff]  }
 0x240   : > { %4826 = vmatpush1.bf16.msra.mxu1 %v6691_v25  ;;  %4786 = vmatprep.subr.bf16.mxu0 %v6696_v26  ;;  %v6759_v25 = vld [vmem:[%s7352_s27 + $0xbcc] ss:$16 sps:$4 sm:$0xff]   ;;  %v6754_v26 = vld [vmem:[%s7352_s27 + $0x9c8] ss:$16 sps:$4 sm:$0xff]  }
 0x241   : > { %4827 = vmatprep.subr.bf16.mxu1 %v6699_v31  ;;  %v6757_v31 = vld [vmem:[%s7352_s27 + $0xbc8] ss:$16 sps:$4 sm:$0xff]  }
 0x243   : > { %4787 = vmatpush1.bf16.msra.mxu0 %v6694_v5  ;;  %v6762_v5 = vld [vmem:[%s7352_s27 + $0x9ec] ss:$16 sps:$4 sm:$0xff]  }
 0x244   : > { %4828 = vmatpush1.bf16.msra.mxu1 %v6697_v6  ;;  %4788 = vmatprep.subr.bf16.mxu0 %v6702_v9  ;;  %v6765_v6 = vld [vmem:[%s7352_s27 + $0xbec] ss:$16 sps:$4 sm:$0xff]   ;;  %v6760_v9 = vld [vmem:[%s7352_s27 + $0x9e8] ss:$16 sps:$4 sm:$0xff]  }
 0x245   : > { %4829 = vmatprep.subr.bf16.mxu1 %v6705_v10  ;;  %v4484_v15 = vpop.f32.mrb[12].mxu0  ;;  %v6763_v10 = vld [vmem:[%s7352_s27 + $0xbe8] ss:$16 sps:$4 sm:$0xff]  }
 0x246   : > { %v4525_v16 = vpop.f32.mrb[12].mxu1  ;;  %v4485_v19 = vadd.f32 %v4484_v15, %v7931_v1  ;;  %v4486_v20 = vpop.f32.mrb[13].mxu0  ;;  %v6714_v1 = vld [vmem:[%s7352_s27 + $0x8ec] ss:$16 sps:$4 sm:$0xff]  }
 0x247   : > { %v4527_v21 = vpop.f32.mrb[13].mxu1  ;;  %v4487_v22 = vadd.f32 %v4486_v20, %v7935_v4  ;;  %v4488_v28 = vpop.f32.mrb[14].mxu0  ;;  %4789 = vmatpush1.bf16.msra.mxu0 %v6700_v11  ;;  %v6717_v4 = vld [vmem:[%s7352_s27 + $0xaec] ss:$16 sps:$4 sm:$0xff]   ;;  %v6775_v20 = vld [vmem:[%s7352_s27 + $0xe28] ss:$16 sps:$4 sm:$0xff]  }
 0x248   : > { %v4529_v29 = vpop.f32.mrb[14].mxu1  ;;  %4830 = vmatpush1.bf16.msra.mxu1 %v6703_v12  ;;  %v8005_v7 = vadd.f32 %v4525_v16, %v4485_v19  ;;  %v4489_v8 = vpop.f32.mrb[15].mxu0  ;;  %4790 = vmatprep.subr.bf16.mxu0 %v6708_v13  ;;  %v6768_v11 = vld [vmem:[%s7352_s27 + $0xc0c] ss:$16 sps:$4 sm:$0xff]   ;;  %v6766_v13 = vld [vmem:[%s7352_s27 + $0xc08] ss:$16 sps:$4 sm:$0xff]  }
 0x249   : > { %v4530_v44 = vpop.f32.mrb[15].mxu1  ;;  %4831 = vmatprep.subr.bf16.mxu1 %v6711_v14  ;;  %v8009_v32 = vadd.f32 %v4527_v21, %v4487_v22  ;;  %v6771_v12 = vld [vmem:[%s7352_s27 + $0xe0c] ss:$16 sps:$4 sm:$0xff]   ;;  %v6769_v14 = vld [vmem:[%s7352_s27 + $0xe08] ss:$16 sps:$4 sm:$0xff]  }
 0x24a   : > { %v6774_v15 = vld [vmem:[%s7352_s27 + $0xc2c] ss:$16 sps:$4 sm:$0xff]   ;;  %v6772_v19 = vld [vmem:[%s7352_s27 + $0xc28] ss:$16 sps:$4 sm:$0xff]  }
 0x24b   : > { %4791 = vmatpush1.bf16.msra.mxu0 %v6706_v35  ;;  %v6777_v16 = vld [vmem:[%s7352_s27 + $0xe2c] ss:$16 sps:$4 sm:$0xff]   ;;  %v6784_v35 = vld [vmem:[%s7352_s27 + $0xc68] ss:$16 sps:$4 sm:$0xff]  }
 0x24c   : > { %4832 = vmatpush1.bf16.msra.mxu1 %v6709_v30  ;;  %4792 = vmatprep.subr.bf16.mxu0 %v6714_v1  ;;  %v6780_v21 = vld [vmem:[%s7352_s27 + $0xc4c] ss:$16 sps:$4 sm:$0xff]   ;;  %v6790_v8 = vld [vmem:[%s7352_s27 + $0xc88] ss:$16 sps:$4 sm:$0xff]  }
 0x24d   : > { %4833 = vmatprep.subr.bf16.mxu1 %v6717_v4  ;;  %v6783_v22 = vld [vmem:[%s7352_s27 + $0xe4c] ss:$16 sps:$4 sm:$0xff]   ;;  %v6793_v44 = vld [vmem:[%s7352_s27 + $0xe88] ss:$16 sps:$4 sm:$0xff]  }
 0x24e   : > { %v6786_v28 = vld [vmem:[%s7352_s27 + $0xc6c] ss:$16 sps:$4 sm:$0xff]  }
 0x24f   : > { %4793 = vmatpush1.bf16.msra.mxu0 %v6712_v33  ;;  %v6789_v29 = vld [vmem:[%s7352_s27 + $0xe6c] ss:$16 sps:$4 sm:$0xff]   ;;  %v6796_v33 = vld [vmem:[%s7352_s27 + $0xca8] ss:$16 sps:$4 sm:$0xff]  }
 0x250   : > { %4834 = vmatpush1.bf16.msra.mxu1 %v6715_v37  ;;  %4794 = vmatprep.subr.bf16.mxu0 %v6720_v38  ;;  %v6795_v30 = vld [vmem:[%s7352_s27 + $0xe8c] ss:$16 sps:$4 sm:$0xff]   ;;  %v6799_v37 = vld [vmem:[%s7352_s27 + $0xea8] ss:$16 sps:$4 sm:$0xff]  }
 0x251   : > { %4835 = vmatprep.subr.bf16.mxu1 %v6723_v34  ;;  %v6798_v1 = vld [vmem:[%s7352_s27 + $0xcac] ss:$16 sps:$4 sm:$0xff]  }
 0x252   : > { %v6801_v4 = vld [vmem:[%s7352_s27 + $0xeac] ss:$16 sps:$4 sm:$0xff]  }
 0x253   : > { %4795 = vmatpush1.bf16.msra.mxu0 %v6718_v36  ;;  %v6804_v38 = vld [vmem:[%s7352_s27 + $0xccc] ss:$16 sps:$4 sm:$0xff]  }
 0x254   : > { %4836 = vmatpush1.bf16.msra.mxu1 %v6721_v43  ;;  %4796 = vmatprep.subr.bf16.mxu0 %v6726_v45  ;;  %v6807_v34 = vld [vmem:[%s7352_s27 + $0xecc] ss:$16 sps:$4 sm:$0xff]  }
 0x255   : > { %4837 = vmatprep.subr.bf16.mxu1 %v6729_v46 }
 0x257   : > { %4797 = vmatpush1.bf16.msra.mxu0 %v6724_v50 }
 0x258   : > { %4838 = vmatpush1.bf16.msra.mxu1 %v6727_v51  ;;  %4798 = vmatprep.subr.bf16.mxu0 %v6732_v59  ;;  %v6802_v51 = vld [vmem:[%s7352_s27 + $0xcc8] ss:$16 sps:$4 sm:$0xff]   ;;  %v280_v59 = vld [vmem:[%s7371_s11] sm:$0xff] }
 0x259   : > { %4839 = vmatprep.subr.bf16.mxu1 %v6735_v62 }
 0x25b   : > { %4799 = vmatpush1.bf16.msra.mxu0 %v6730_v53  ;;  %v281_v53 = vld [vmem:[%s7371_s11 + $0x8] sm:$0xff] }
 0x25c   : > { %4840 = vmatpush1.bf16.msra.mxu1 %v6733_v54  ;;  %4800 = vmatprep.subr.bf16.mxu0 %v6738_v55 }
 0x25d   : > { %4841 = vmatprep.subr.bf16.mxu1 %v6741_v56  ;;  %v6805_v56 = vld [vmem:[%s7352_s27 + $0xec8] ss:$16 sps:$4 sm:$0xff]  }
 0x25f   : > { %4801 = vmatpush1.bf16.msra.mxu0 %v6736_v57 }
 0x260   : > { %4842 = vmatpush1.bf16.msra.mxu1 %v6739_v58  ;;  %4802 = vmatprep.subr.bf16.mxu0 %v6744_v48  ;;  %v6810_v48 = vld [vmem:[%s7352_s27 + $0xcec] ss:$16 sps:$4 sm:$0xff]  }
 0x261   : > { %4843 = vmatprep.subr.bf16.mxu1 %v6747_v63  ;;  %v6813_v63 = vld [vmem:[%s7352_s27 + $0xeec] ss:$16 sps:$4 sm:$0xff]  }
 0x263   : > { %4803 = vmatpush1.bf16.msra.mxu0 %v6742_v52 }
 0x264   : > { %4844 = vmatpush1.bf16.msra.mxu1 %v6745_v0  ;;  %4804 = vmatprep.subr.bf16.mxu0 %v6750_v17  ;;  %v6808_v17 = vld [vmem:[%s7352_s27 + $0xce8] ss:$16 sps:$4 sm:$0xff]  }
 0x265   : > { %4845 = vmatprep.subr.bf16.mxu1 %v6753_v18  ;;  %v6811_v18 = vld [vmem:[%s7352_s27 + $0xee8] ss:$16 sps:$4 sm:$0xff]  }
 0x267   : > { %4805 = vmatpush1.bf16.msra.mxu0 %v6748_v2  ;;  %v6816_v2 = vld [vmem:[%s7352_s27 + $0xd0c] ss:$16 sps:$4 sm:$0xff]  }
 0x268   : > { %4846 = vmatpush1.bf16.msra.mxu1 %v6751_v3  ;;  %4806 = vmatprep.subr.bf16.mxu0 %v6756_v27  ;;  %v6819_v3 = vld [vmem:[%s7352_s27 + $0xf0c] ss:$16 sps:$4 sm:$0xff]   ;;  %v6814_v27 = vld [vmem:[%s7352_s27 + $0xd08] ss:$16 sps:$4 sm:$0xff]  }
 0x269   : > { %4847 = vmatprep.subr.bf16.mxu1 %v6759_v25  ;;  %v6817_v25 = vld [vmem:[%s7352_s27 + $0xf08] ss:$16 sps:$4 sm:$0xff]  }
 0x26b   : > { %4807 = vmatpush1.bf16.msra.mxu0 %v6754_v26  ;;  %v6822_v26 = vld [vmem:[%s7352_s27 + $0xd2c] ss:$16 sps:$4 sm:$0xff]  }
 0x26c   : > { %4848 = vmatpush1.bf16.msra.mxu1 %v6757_v31  ;;  %4808 = vmatprep.subr.bf16.mxu0 %v6762_v5  ;;  %v6825_v31 = vld [vmem:[%s7352_s27 + $0xf2c] ss:$16 sps:$4 sm:$0xff]   ;;  %v6820_v5 = vld [vmem:[%s7352_s27 + $0xd28] ss:$16 sps:$4 sm:$0xff]  }
 0x26d   : > { %4849 = vmatprep.subr.bf16.mxu1 %v6765_v6  ;;  %v6823_v6 = vld [vmem:[%s7352_s27 + $0xf28] ss:$16 sps:$4 sm:$0xff]  }
 0x26f   : > { %4809 = vmatpush1.bf16.msra.mxu0 %v6760_v9  ;;  %v6828_v9 = vld [vmem:[%s7352_s27 + $0xd4c] ss:$16 sps:$4 sm:$0xff]  }
 0x270   : > { %4850 = vmatpush1.bf16.msra.mxu1 %v6763_v10  ;;  %4860 = vmatprep.subr.bf16.mxu0 %v6768_v11  ;;  %v6831_v10 = vld [vmem:[%s7352_s27 + $0xf4c] ss:$16 sps:$4 sm:$0xff]   ;;  %v6826_v11 = vld [vmem:[%s7352_s27 + $0xd48] ss:$16 sps:$4 sm:$0xff]  }
 0x271   : > { %4901 = vmatprep.subr.bf16.mxu1 %v6771_v12  ;;  %v6829_v12 = vld [vmem:[%s7352_s27 + $0xf48] ss:$16 sps:$4 sm:$0xff]  }
 0x272   : > { %4811 = vmatmul.mubr.bf16.vlgmr.msra.gmra.mrb[28].mxu0 %v7637_v39  ;;  %v6778_v39 = vld [vmem:[%s7352_s27 + $0xc48] ss:$16 sps:$4 sm:$0xff]  }
 0x273   : > { %4852 = vmatmul.mubr.bf16.vlgmr.msra.gmra.mrb[28].mxu1 %v7641_v40  ;;  %4861 = vmatpush1.bf16.msra.mxu0 %v6766_v13  ;;  %v6781_v40 = vld [vmem:[%s7352_s27 + $0xe48] ss:$16 sps:$4 sm:$0xff]   ;;  %v6834_v13 = vld [vmem:[%s7352_s27 + $0xd6c] ss:$16 sps:$4 sm:$0xff]  }
 0x274   : > { %4902 = vmatpush1.bf16.msra.mxu1 %v6769_v14  ;;  %4862 = vmatprep.subr.bf16.mxu0 %v6774_v15  ;;  %v6837_v14 = vld [vmem:[%s7352_s27 + $0xf6c] ss:$16 sps:$4 sm:$0xff]   ;;  %v6832_v15 = vld [vmem:[%s7352_s27 + $0xd68] ss:$16 sps:$4 sm:$0xff]  }
 0x275   : > { %4903 = vmatprep.subr.bf16.mxu1 %v6777_v16  ;;  %4892 = vmatprep.mubr.bf16.mxu0 %v7653_v23  ;;  %v6787_v23 = vld [vmem:[%s7352_s27 + $0xe68] ss:$16 sps:$4 sm:$0xff]  }
 0x276   : > { %4933 = vmatprep.mubr.bf16.mxu1 %v7657_v24  ;;  %v6792_v24 = vld [vmem:[%s7352_s27 + $0xc8c] ss:$16 sps:$4 sm:$0xff]   ;;  %v6835_v16 = vld [vmem:[%s7352_s27 + $0xf68] ss:$16 sps:$4 sm:$0xff]  }
 0x277   : > { %4863 = vmatpush1.bf16.msra.mxu0 %v6772_v19  ;;  %v6840_v19 = vld [vmem:[%s7352_s27 + $0xd8c] ss:$16 sps:$4 sm:$0xff]  }
 0x278   : > { %4904 = vmatpush1.bf16.msra.mxu1 %v6775_v20  ;;  %4864 = vmatprep.subr.bf16.mxu0 %v6780_v21  ;;  %v6843_v20 = vld [vmem:[%s7352_s27 + $0xf8c] ss:$16 sps:$4 sm:$0xff]   ;;  %v6838_v21 = vld [vmem:[%s7352_s27 + $0xd88] ss:$16 sps:$4 sm:$0xff]  }
 0x279   : > { %4905 = vmatprep.subr.bf16.mxu1 %v6783_v22  ;;  %v6841_v22 = vld [vmem:[%s7352_s27 + $0xf88] ss:$16 sps:$4 sm:$0xff]  }
 0x27b   : > { %4865 = vmatpush1.bf16.msra.mxu0 %v6778_v39  ;;  %v6846_v39 = vld [vmem:[%s7352_s27 + $0xdac] ss:$16 sps:$4 sm:$0xff]  }
 0x27c   : > { %4906 = vmatpush1.bf16.msra.mxu1 %v6781_v40  ;;  %4866 = vmatprep.subr.bf16.mxu0 %v6786_v28  ;;  %v6849_v40 = vld [vmem:[%s7352_s27 + $0xfac] ss:$16 sps:$4 sm:$0xff]   ;;  %v6844_v28 = vld [vmem:[%s7352_s27 + $0xda8] ss:$16 sps:$4 sm:$0xff]  }
 0x27d   : > { %4907 = vmatprep.subr.bf16.mxu1 %v6789_v29  ;;  %v6847_v29 = vld [vmem:[%s7352_s27 + $0xfa8] ss:$16 sps:$4 sm:$0xff]  }
 0x27f   : > { %4867 = vmatpush1.bf16.msra.mxu0 %v6784_v35  ;;  %v6852_v35 = vld [vmem:[%s7352_s27 + $0xdcc] ss:$16 sps:$4 sm:$0xff]  }
 0x280   : > { %4908 = vmatpush1.bf16.msra.mxu1 %v6787_v23  ;;  %4868 = vmatprep.subr.bf16.mxu0 %v6792_v24  ;;  %v6855_v23 = vld [vmem:[%s7352_s27 + $0xfcc] ss:$16 sps:$4 sm:$0xff]   ;;  %v6850_v24 = vld [vmem:[%s7352_s27 + $0xdc8] ss:$16 sps:$4 sm:$0xff]  }
 0x281   : > { %4909 = vmatprep.subr.bf16.mxu1 %v6795_v30  ;;  %v6853_v30 = vld [vmem:[%s7352_s27 + $0xfc8] ss:$16 sps:$4 sm:$0xff]  }
 0x283   : > { %4869 = vmatpush1.bf16.msra.mxu0 %v6790_v8  ;;  %v6858_v8 = vld [vmem:[%s7352_s27 + $0xdec] ss:$16 sps:$4 sm:$0xff]  }
 0x284   : > { %4910 = vmatpush1.bf16.msra.mxu1 %v6793_v44  ;;  %4870 = vmatprep.subr.bf16.mxu0 %v6798_v1  ;;  %v6861_v44 = vld [vmem:[%s7352_s27 + $0xfec] ss:$16 sps:$4 sm:$0xff]   ;;  %v6856_v1 = vld [vmem:[%s7352_s27 + $0xde8] ss:$16 sps:$4 sm:$0xff]  }
 0x285   : > { %4911 = vmatprep.subr.bf16.mxu1 %v6801_v4  ;;  %v4566_v36 = vpop.f32.mrb[16].mxu0  ;;  %v6859_v4 = vld [vmem:[%s7352_s27 + $0xfe8] ss:$16 sps:$4 sm:$0xff]  }
 0x286   : > { %v4607_v43 = vpop.f32.mrb[16].mxu1  ;;  %v4567_v45 = vadd.f32 %v4566_v36, %v8005_v7  ;;  %v4568_v46 = vpop.f32.mrb[17].mxu0  ;;  %v6870_v36 = vld [vmem:[%s7352_s27 + $0x102c] ss:$16 sps:$4 sm:$0xff]  }
 0x287   : > { %v4609_v50 = vpop.f32.mrb[17].mxu1  ;;  %v4569_v62 = vadd.f32 %v4568_v46, %v8009_v32  ;;  %v4570_v54 = vpop.f32.mrb[18].mxu0  ;;  %4871 = vmatpush1.bf16.msra.mxu0 %v6796_v33  ;;  %v6864_v33 = vld [vmem:[%s7352_s27 + $0x100c] ss:$16 sps:$4 sm:$0xff]   ;;  %v6871_v46 = vld [vmem:[%s7352_s27 + $0x1228] ss:$16 sps:$4 sm:$0xff]  }
 0x288   : > { %v4611_v55 = vpop.f32.mrb[18].mxu1  ;;  %4912 = vmatpush1.bf16.msra.mxu1 %v6799_v37  ;;  %v4608_v57 = vadd.f32 %v4607_v43, %v4567_v45  ;;  %v4571_v58 = vpop.f32.mrb[19].mxu0  ;;  %4872 = vmatprep.subr.bf16.mxu0 %v6804_v38  ;;  %v6867_v37 = vld [vmem:[%s7352_s27 + $0x120c] ss:$16 sps:$4 sm:$0xff]   ;;  %v6862_v38 = vld [vmem:[%s7352_s27 + $0x1008] ss:$16 sps:$4 sm:$0xff]  }
 0x289   : > { %v4612_v7 = vpop.f32.mrb[19].mxu1  ;;  %4913 = vmatprep.subr.bf16.mxu1 %v6807_v34  ;;  %v4610_v32 = vadd.f32 %v4609_v50, %v4569_v62  ;;  %v6865_v34 = vld [vmem:[%s7352_s27 + $0x1208] ss:$16 sps:$4 sm:$0xff]   ;;  %v6873_v43 = vld [vmem:[%s7352_s27 + $0x122c] ss:$16 sps:$4 sm:$0xff]  }
 0x28a   : > { %v5024_v52 = vadd.f32 %v4608_v57, %v280_v59  ;;  %v6868_v45 = vld [vmem:[%s7352_s27 + $0x1028] ss:$16 sps:$4 sm:$0xff]   ;;  %v6876_v50 = vld [vmem:[%s7352_s27 + $0x104c] ss:$16 sps:$4 sm:$0xff]  }
 0x28b   : > { %v5025_v0 = vadd.f32 %v4610_v32, %v281_v53  ;;  %4873 = vmatpush1.bf16.msra.mxu0 %v6802_v51  ;;  %v6879_v51 = vld [vmem:[%s7352_s27 + $0x124c] ss:$16 sps:$4 sm:$0xff]   ;;  %v6880_v53 = vld [vmem:[%s7352_s27 + $0x1068] ss:$16 sps:$4 sm:$0xff]  }
 0x28c   : > { %4914 = vmatpush1.bf16.msra.mxu1 %v6805_v56  ;;  %5028 = vst [vmem:[%s7371_s11] sm:$0xff] %v5024_v52  ;;  %4874 = vmatprep.subr.bf16.mxu0 %v6810_v48  ;;  %v6882_v59 = vld [vmem:[%s7352_s27 + $0x106c] ss:$16 sps:$4 sm:$0xff]   ;;  %v6886_v55 = vld [vmem:[%s7352_s27 + $0x1088] ss:$16 sps:$4 sm:$0xff]  }
 0x28d   : > { %4915 = vmatprep.subr.bf16.mxu1 %v6813_v63  ;;  %5029 = vst [vmem:[%s7371_s11 + $0x8] sm:$0xff] %v5025_v0  ;;  %v6885_v62 = vld [vmem:[%s7352_s27 + $0x126c] ss:$16 sps:$4 sm:$0xff]   ;;  %v6889_v56 = vld [vmem:[%s7352_s27 + $0x1288] ss:$16 sps:$4 sm:$0xff]  }
 0x28e   : > { %v6891_v54 = vld [vmem:[%s7352_s27 + $0x128c] ss:$16 sps:$4 sm:$0xff]   ;;  %v6892_v7 = vld [vmem:[%s7352_s27 + $0x10a8] ss:$16 sps:$4 sm:$0xff]  }
 0x28f   : > { %4875 = vmatpush1.bf16.msra.mxu0 %v6808_v17  ;;  %v6894_v57 = vld [vmem:[%s7352_s27 + $0x10ac] ss:$16 sps:$4 sm:$0xff]   ;;  %v6895_v48 = vld [vmem:[%s7352_s27 + $0x12a8] ss:$16 sps:$4 sm:$0xff]  }
 0x290   : > { %4916 = vmatpush1.bf16.msra.mxu1 %v6811_v18  ;;  %4876 = vmatprep.subr.bf16.mxu0 %v6816_v2  ;;  %v6897_v58 = vld [vmem:[%s7352_s27 + $0x12ac] ss:$16 sps:$4 sm:$0xff]  }
 0x291   : > { %4917 = vmatprep.subr.bf16.mxu1 %v6819_v3  ;;  %v6900_v63 = vld [vmem:[%s7352_s27 + $0x10cc] ss:$16 sps:$4 sm:$0xff]  }
 0x292   : > { %v6903_v32 = vld [vmem:[%s7352_s27 + $0x12cc] ss:$16 sps:$4 sm:$0xff]  }
 0x293   : > { %4877 = vmatpush1.bf16.msra.mxu0 %v6814_v27 }
 0x294   : > { %4918 = vmatpush1.bf16.msra.mxu1 %v6817_v25  ;;  %4878 = vmatprep.subr.bf16.mxu0 %v6822_v26  ;;  %v6898_v26 = vld [vmem:[%s7352_s27 + $0x10c8] ss:$16 sps:$4 sm:$0xff]  }
 0x295   : > { %4919 = vmatprep.subr.bf16.mxu1 %v6825_v31  ;;  %v6901_v31 = vld [vmem:[%s7352_s27 + $0x12c8] ss:$16 sps:$4 sm:$0xff]  }
 0x297   : > { %4879 = vmatpush1.bf16.msra.mxu0 %v6820_v5 }
 0x298   : > { %4920 = vmatpush1.bf16.msra.mxu1 %v6823_v6  ;;  %4880 = vmatprep.subr.bf16.mxu0 %v6828_v9  ;;  %v6906_v9 = vld [vmem:[%s7352_s27 + $0x10ec] ss:$16 sps:$4 sm:$0xff]  }
 0x299   : > { %4921 = vmatprep.subr.bf16.mxu1 %v6831_v10  ;;  %v6909_v10 = vld [vmem:[%s7352_s27 + $0x12ec] ss:$16 sps:$4 sm:$0xff]  }
 0x29b   : > { %4881 = vmatpush1.bf16.msra.mxu0 %v6826_v11  ;;  %v6904_v11 = vld [vmem:[%s7352_s27 + $0x10e8] ss:$16 sps:$4 sm:$0xff]  }
 0x29c   : > { %4922 = vmatpush1.bf16.msra.mxu1 %v6829_v12  ;;  %4882 = vmatprep.subr.bf16.mxu0 %v6834_v13  ;;  %v6907_v12 = vld [vmem:[%s7352_s27 + $0x12e8] ss:$16 sps:$4 sm:$0xff]   ;;  %v6912_v13 = vld [vmem:[%s7352_s27 + $0x110c] ss:$16 sps:$4 sm:$0xff]  }
 0x29d   : > { %4923 = vmatprep.subr.bf16.mxu1 %v6837_v14  ;;  %v6915_v14 = vld [vmem:[%s7352_s27 + $0x130c] ss:$16 sps:$4 sm:$0xff]  }
 0x29f   : > { %4883 = vmatpush1.bf16.msra.mxu0 %v6832_v15  ;;  %v6910_v15 = vld [vmem:[%s7352_s27 + $0x1108] ss:$16 sps:$4 sm:$0xff]  }
 0x2a0   : > { %4924 = vmatpush1.bf16.msra.mxu1 %v6835_v16  ;;  %4884 = vmatprep.subr.bf16.mxu0 %v6840_v19  ;;  %v6913_v16 = vld [vmem:[%s7352_s27 + $0x1308] ss:$16 sps:$4 sm:$0xff]   ;;  %v6918_v19 = vld [vmem:[%s7352_s27 + $0x112c] ss:$16 sps:$4 sm:$0xff]  }
 0x2a1   : > { %4925 = vmatprep.subr.bf16.mxu1 %v6843_v20  ;;  %v6921_v20 = vld [vmem:[%s7352_s27 + $0x132c] ss:$16 sps:$4 sm:$0xff]  }
 0x2a3   : > { %4885 = vmatpush1.bf16.msra.mxu0 %v6838_v21  ;;  %v6916_v21 = vld [vmem:[%s7352_s27 + $0x1128] ss:$16 sps:$4 sm:$0xff]  }
 0x2a4   : > { %4926 = vmatpush1.bf16.msra.mxu1 %v6841_v22  ;;  %4886 = vmatprep.subr.bf16.mxu0 %v6846_v39  ;;  %v6919_v22 = vld [vmem:[%s7352_s27 + $0x1328] ss:$16 sps:$4 sm:$0xff]   ;;  %v6924_v39 = vld [vmem:[%s7352_s27 + $0x114c] ss:$16 sps:$4 sm:$0xff]  }
 0x2a5   : > { %4927 = vmatprep.subr.bf16.mxu1 %v6849_v40  ;;  %v6927_v40 = vld [vmem:[%s7352_s27 + $0x134c] ss:$16 sps:$4 sm:$0xff]  }
 0x2a7   : > { %4887 = vmatpush1.bf16.msra.mxu0 %v6844_v28  ;;  %v6922_v28 = vld [vmem:[%s7352_s27 + $0x1148] ss:$16 sps:$4 sm:$0xff]  }
 0x2a8   : > { %4928 = vmatpush1.bf16.msra.mxu1 %v6847_v29  ;;  %4888 = vmatprep.subr.bf16.mxu0 %v6852_v35  ;;  %v6925_v29 = vld [vmem:[%s7352_s27 + $0x1348] ss:$16 sps:$4 sm:$0xff]   ;;  %v6930_v35 = vld [vmem:[%s7352_s27 + $0x116c] ss:$16 sps:$4 sm:$0xff]  }
 0x2a9   : > { %4929 = vmatprep.subr.bf16.mxu1 %v6855_v23  ;;  %v6933_v23 = vld [vmem:[%s7352_s27 + $0x136c] ss:$16 sps:$4 sm:$0xff]  }
 0x2ab   : > { %4889 = vmatpush1.bf16.msra.mxu0 %v6850_v24  ;;  %v6928_v24 = vld [vmem:[%s7352_s27 + $0x1168] ss:$16 sps:$4 sm:$0xff]  }
 0x2ac   : > { %4930 = vmatpush1.bf16.msra.mxu1 %v6853_v30  ;;  %4890 = vmatprep.subr.bf16.mxu0 %v6858_v8  ;;  %v6931_v30 = vld [vmem:[%s7352_s27 + $0x1368] ss:$16 sps:$4 sm:$0xff]   ;;  %v6936_v8 = vld [vmem:[%s7352_s27 + $0x118c] ss:$16 sps:$4 sm:$0xff]  }
 0x2ad   : > { %4931 = vmatprep.subr.bf16.mxu1 %v6861_v44  ;;  %v6939_v44 = vld [vmem:[%s7352_s27 + $0x138c] ss:$16 sps:$4 sm:$0xff]  }
 0x2af   : > { %4891 = vmatpush1.bf16.msra.mxu0 %v6856_v1  ;;  %v6934_v1 = vld [vmem:[%s7352_s27 + $0x1188] ss:$16 sps:$4 sm:$0xff]  }
 0x2b0   : > { %4932 = vmatpush1.bf16.msra.mxu1 %v6859_v4  ;;  %4942 = vmatprep.subr.bf16.mxu0 %v6864_v33  ;;  %v6937_v4 = vld [vmem:[%s7352_s27 + $0x1388] ss:$16 sps:$4 sm:$0xff]   ;;  %v6942_v33 = vld [vmem:[%s7352_s27 + $0x11ac] ss:$16 sps:$4 sm:$0xff]  }
 0x2b1   : > { %4983 = vmatprep.subr.bf16.mxu1 %v6867_v37  ;;  %v6945_v37 = vld [vmem:[%s7352_s27 + $0x13ac] ss:$16 sps:$4 sm:$0xff]  }
 0x2b2   : > { %4893 = vmatmul.mubr.bf16.vlgmr.msra.gmra.mrb[32].mxu0 %v7728_v60  ;;  %v6874_v60 = vld [vmem:[%s7352_s27 + $0x1048] ss:$16 sps:$4 sm:$0xff]  }
 0x2b3   : > { %4934 = vmatmul.mubr.bf16.vlgmr.msra.gmra.mrb[32].mxu1 %v7732_v61  ;;  %4943 = vmatpush1.bf16.msra.mxu0 %v6862_v38  ;;  %v6877_v61 = vld [vmem:[%s7352_s27 + $0x1248] ss:$16 sps:$4 sm:$0xff]  }
 0x2b4   : > { %4984 = vmatpush1.bf16.msra.mxu1 %v6865_v34  ;;  %4944 = vmatprep.subr.bf16.mxu0 %v6870_v36  ;;  %v6940_v38 = vld [vmem:[%s7352_s27 + $0x11a8] ss:$16 sps:$4 sm:$0xff]   ;;  %v6948_v36 = vld [vmem:[%s7352_s27 + $0x11cc] ss:$16 sps:$4 sm:$0xff]  }
 0x2b5   : > { %4985 = vmatprep.subr.bf16.mxu1 %v6873_v43  ;;  %4974 = vmatprep.mubr.bf16.mxu0 %v7743_v41  ;;  %v6883_v41 = vld [vmem:[%s7352_s27 + $0x1268] ss:$16 sps:$4 sm:$0xff]   ;;  %v6951_v43 = vld [vmem:[%s7352_s27 + $0x13cc] ss:$16 sps:$4 sm:$0xff]  }
 0x2b6   : > { %5015 = vmatprep.mubr.bf16.mxu1 %v7747_v42  ;;  %v6888_v42 = vld [vmem:[%s7352_s27 + $0x108c] ss:$16 sps:$4 sm:$0xff]   ;;  %v6943_v34 = vld [vmem:[%s7352_s27 + $0x13a8] ss:$16 sps:$4 sm:$0xff]  }
 0x2b7   : > { %4945 = vmatpush1.bf16.msra.mxu0 %v6868_v45  ;;  %v6946_v45 = vld [vmem:[%s7352_s27 + $0x11c8] ss:$16 sps:$4 sm:$0xff]  }
 0x2b8   : > { %4986 = vmatpush1.bf16.msra.mxu1 %v6871_v46  ;;  %4946 = vmatprep.subr.bf16.mxu0 %v6876_v50  ;;  %v6949_v46 = vld [vmem:[%s7352_s27 + $0x13c8] ss:$16 sps:$4 sm:$0xff]   ;;  %v6954_v50 = vld [vmem:[%s7352_s27 + $0x11ec] ss:$16 sps:$4 sm:$0xff]  }
 0x2b9   : > { %4987 = vmatprep.subr.bf16.mxu1 %v6879_v51  ;;  %v6957_v51 = vld [vmem:[%s7352_s27 + $0x13ec] ss:$16 sps:$4 sm:$0xff]  }
 0x2bb   : > { %4947 = vmatpush1.bf16.msra.mxu0 %v6874_v60  ;;  %v6952_v60 = vld [vmem:[%s7352_s27 + $0x11e8] ss:$16 sps:$4 sm:$0xff]  }
 0x2bc   : > { %4988 = vmatpush1.bf16.msra.mxu1 %v6877_v61  ;;  %4948 = vmatprep.subr.bf16.mxu0 %v6882_v59  ;;  %v6955_v61 = vld [vmem:[%s7352_s27 + $0x13e8] ss:$16 sps:$4 sm:$0xff]  }
 0x2bd   : > { %4989 = vmatprep.subr.bf16.mxu1 %v6885_v62 }
 0x2bf   : > { %4949 = vmatpush1.bf16.msra.mxu0 %v6880_v53 }
 0x2c0   : > { %4990 = vmatpush1.bf16.msra.mxu1 %v6883_v41  ;;  %4950 = vmatprep.subr.bf16.mxu0 %v6888_v42 }
 0x2c1   : > { %4991 = vmatprep.subr.bf16.mxu1 %v6891_v54 }
 0x2c3   : > { %4951 = vmatpush1.bf16.msra.mxu0 %v6886_v55 }
 0x2c4   : > { %4992 = vmatpush1.bf16.msra.mxu1 %v6889_v56  ;;  %4952 = vmatprep.subr.bf16.mxu0 %v6894_v57 }
 0x2c5   : > { %4993 = vmatprep.subr.bf16.mxu1 %v6897_v58  ;;  %v4648_v52 = vpop.f32.mrb[20].mxu0 }
 0x2c6   : > { %v4689_v0 = vpop.f32.mrb[20].mxu1  ;;  %v4650_v18 = vpop.f32.mrb[21].mxu0 }
 0x2c7   : > { %v8149_v17 = vadd.f32 %v4689_v0, %v4648_v52  ;;  %v4691_v2 = vpop.f32.mrb[21].mxu1  ;;  %v4652_v27 = vpop.f32.mrb[22].mxu0  ;;  %4953 = vmatpush1.bf16.msra.mxu0 %v6892_v7 }
 0x2c8   : > { %v8151_v3 = vadd.f32 %v4691_v2, %v4650_v18  ;;  %v4693_v25 = vpop.f32.mrb[22].mxu1  ;;  %4994 = vmatpush1.bf16.msra.mxu1 %v6895_v48  ;;  %v4653_v5 = vpop.f32.mrb[23].mxu0  ;;  %4954 = vmatprep.subr.bf16.mxu0 %v6900_v63 }
 0x2c9   : > { %v4694_v6 = vpop.f32.mrb[23].mxu1  ;;  %4995 = vmatprep.subr.bf16.mxu1 %v6903_v32 }
 0x2cb   : > { %4955 = vmatpush1.bf16.msra.mxu0 %v6898_v26 }
 0x2cc   : > { %4996 = vmatpush1.bf16.msra.mxu1 %v6901_v31  ;;  %4956 = vmatprep.subr.bf16.mxu0 %v6906_v9 }
 0x2cd   : > { %4997 = vmatprep.subr.bf16.mxu1 %v6909_v10 }
 0x2cf   : > { %4957 = vmatpush1.bf16.msra.mxu0 %v6904_v11 }
 0x2d0   : > { %4998 = vmatpush1.bf16.msra.mxu1 %v6907_v12  ;;  %4958 = vmatprep.subr.bf16.mxu0 %v6912_v13 }
 0x2d1   : > { %4999 = vmatprep.subr.bf16.mxu1 %v6915_v14 }
 0x2d3   : > { %4959 = vmatpush1.bf16.msra.mxu0 %v6910_v15 }
 0x2d4   : > { %5000 = vmatpush1.bf16.msra.mxu1 %v6913_v16  ;;  %4960 = vmatprep.subr.bf16.mxu0 %v6918_v19 }
 0x2d5   : > { %5001 = vmatprep.subr.bf16.mxu1 %v6921_v20 }
 0x2d7   : > { %4961 = vmatpush1.bf16.msra.mxu0 %v6916_v21 }
 0x2d8   : > { %5002 = vmatpush1.bf16.msra.mxu1 %v6919_v22  ;;  %4962 = vmatprep.subr.bf16.mxu0 %v6924_v39 }
 0x2d9   : > { %5003 = vmatprep.subr.bf16.mxu1 %v6927_v40  ;;  %v282_v40 = vld [vmem:[%s7371_s11 + $0x10] sm:$0xff] }
 0x2db   : > { %4963 = vmatpush1.bf16.msra.mxu0 %v6922_v28 }
 0x2dc   : > { %5004 = vmatpush1.bf16.msra.mxu1 %v6925_v29  ;;  %4964 = vmatprep.subr.bf16.mxu0 %v6930_v35 }
 0x2dd   : > { %5005 = vmatprep.subr.bf16.mxu1 %v6933_v23 }
 0x2df   : > { %4965 = vmatpush1.bf16.msra.mxu0 %v6928_v24  ;;  %v283_v24 = vld [vmem:[%s7371_s11 + $0x18] sm:$0xff] }
 0x2e0   : > { %5006 = vmatpush1.bf16.msra.mxu1 %v6931_v30  ;;  %4966 = vmatprep.subr.bf16.mxu0 %v6936_v8 }
 0x2e1   : > { %5007 = vmatprep.subr.bf16.mxu1 %v6939_v44 }
 0x2e3   : > { %4967 = vmatpush1.bf16.msra.mxu0 %v6934_v1 }
 0x2e4   : > { %5008 = vmatpush1.bf16.msra.mxu1 %v6937_v4  ;;  %4968 = vmatprep.subr.bf16.mxu0 %v6942_v33  ;;  %v5042_v33 = vlaneseq (!%p5866_p1) }
 0x2e5   : > { %5009 = vmatprep.subr.bf16.mxu1 %v6945_v37 }
 0x2e6   : > { %v5043_v37 = vshrl.u32 (!%p5866_p1), %v5042_v33, 7 }
 0x2e7   : > { %4969 = vmatpush1.bf16.msra.mxu0 %v6940_v38  ;;  %v5040_v38 = vld [vmem:[%s224_s6] sm:$0xf] (!%p5866_p1) }
 0x2e8   : > { %5010 = vmatpush1.bf16.msra.mxu1 %v6943_v34  ;;  %4970 = vmatprep.subr.bf16.mxu0 %v6948_v36  ;;  %v5036_v34 = vld [vmem:[%s7371_s11] sm:$0xff] (!%p5866_p1)  ;;  %v5044_v36 = vsub.s32 (!%p5866_p1), 0, %v5043_v37 }
 0x2e9   : > { %5011 = vmatprep.subr.bf16.mxu1 %v6951_v43  ;;  %v5048_v43 = vsub.s32 (!%p5866_p1), 1, %v5043_v37 }
 0x2eb   : > { %4971 = vmatpush1.bf16.msra.mxu0 %v6946_v45  ;;  %v5052_v45 = vsub.s32 (!%p5866_p1), 2, %v5043_v37 }
 0x2ec   : > { %5012 = vmatpush1.bf16.msra.mxu1 %v6949_v46  ;;  %4972 = vmatprep.subr.bf16.mxu0 %v6954_v50  ;;  %v5056_v46 = vsub.s32 (!%p5866_p1), 3, %v5043_v37  ;;  %v5037_v50 = vld [vmem:[%s7371_s11 + $0x8] sm:$0xff] (!%p5866_p1) }
 0x2ed   : > { %5013 = vmatprep.subr.bf16.mxu1 %v6957_v51 }
 0x2ef   : > { %4973 = vmatpush1.bf16.msra.mxu0 %v6952_v60 }
 0x2f0   : > { %5014 = vmatpush1.bf16.msra.mxu1 %v6955_v61  ;;  %v5045_v61 = vrot.slane (!%p5866_p1), %v5040_v38, %v5044_v36 }
 0x2f2   : > { %4975 = vmatmul.mubr.bf16.vlgmr.msra.gmra.mrb[36].mxu0 %v7821_v47 }
 0x2f3   : > { %5016 = vmatmul.mubr.bf16.vlgmr.msra.gmra.mrb[36].mxu1 %v7825_v49 }
 0x305   : > { %v4730_v59 = vpop.f32.mrb[24].mxu0 }
 0x306   : > { %v4771_v62 = vpop.f32.mrb[24].mxu1  ;;  %v4731_v53 = vadd.f32 %v4730_v59, %v8149_v17  ;;  %v4732_v41 = vpop.f32.mrb[25].mxu0  ;;  %v5049_v59 = vrot.slane (!%p5866_p1), %v5040_v38, %v5048_v43 }
 0x307   : > { %v4773_v42 = vpop.f32.mrb[25].mxu1  ;;  %v4733_v54 = vadd.f32 %v4732_v41, %v8151_v3  ;;  %v4734_v55 = vpop.f32.mrb[26].mxu0  ;;  %v5062_v41 = vadd.f32 (!%p5866_p1), %v5045_v61, %v5036_v34 }
 0x308   : > { %v4775_v56 = vpop.f32.mrb[26].mxu1  ;;  %v4772_v57 = vadd.f32 %v4771_v62, %v4731_v53  ;;  %v4735_v58 = vpop.f32.mrb[27].mxu0  ;;  %v5053_v62 = vrot.slane (!%p5866_p1), %v5040_v38, %v5052_v45  ;;  %v5057_v53 = vrot.slane (!%p5866_p1), %v5040_v38, %v5056_v46 }
 0x309   : > { %v4776_v7 = vpop.f32.mrb[27].mxu1  ;;  %v4774_v48 = vadd.f32 %v4773_v42, %v4733_v54  ;;  %v5063_v42 = vadd.f32 (!%p5866_p1), %v5049_v59, %v5037_v50  ;;  %v5066_v56 = vmax.f32 (!%p5866_p1), %v5062_v41, 0.0 }
 0x30b   : > { %5070 = vst [vmem:[%s7371_s11] sm:$0xff] (!%p5866_p1), %v5066_v56 }
 0x345   : > { %v4812_v63 = vpop.f32.mrb[28].mxu0 }
 0x346   : > { %v4853_v32 = vpop.f32.mrb[28].mxu1  ;;  %v4813_v52 = vadd.f32 %v4812_v63, %v4772_v57  ;;  %v4814_v47 = vpop.f32.mrb[29].mxu0  ;;  %v5067_v57 = vmax.f32 (!%p5866_p1), %v5063_v42, 0.0 }
 0x347   : > { %v4855_v0 = vpop.f32.mrb[29].mxu1  ;;  %v4815_v49 = vadd.f32 %v4814_v47, %v4774_v48  ;;  %v4816_v18 = vpop.f32.mrb[30].mxu0 }
 0x348   : > { %v4857_v2 = vpop.f32.mrb[30].mxu1  ;;  %v4854_v27 = vadd.f32 %v4853_v32, %v4813_v52  ;;  %v4817_v17 = vpop.f32.mrb[31].mxu0  ;;  %5071 = vst [vmem:[%s7371_s11 + $0x8] sm:$0xff] (!%p5866_p1), %v5067_v57 }
 0x349   : > { %v4858_v25 = vpop.f32.mrb[31].mxu1  ;;  %v4856_v26 = vadd.f32 %v4855_v0, %v4815_v49 }
 0x385   : > { %v4894_v31 = vpop.f32.mrb[32].mxu0 }
 0x386   : > { %v4935_v3 = vpop.f32.mrb[32].mxu1  ;;  %v4895_v5 = vadd.f32 %v4894_v31, %v4854_v27  ;;  %v4896_v6 = vpop.f32.mrb[33].mxu0 }
 0x387   : > { %v4937_v9 = vpop.f32.mrb[33].mxu1  ;;  %v4897_v10 = vadd.f32 %v4896_v6, %v4856_v26  ;;  %v4898_v11 = vpop.f32.mrb[34].mxu0 }
 0x388   : > { %v4939_v12 = vpop.f32.mrb[34].mxu1  ;;  %v4936_v13 = vadd.f32 %v4935_v3, %v4895_v5  ;;  %v4899_v14 = vpop.f32.mrb[35].mxu0 }
 0x389   : > { %v4940_v15 = vpop.f32.mrb[35].mxu1  ;;  %v4938_v16 = vadd.f32 %v4937_v9, %v4897_v10 }
 0x3c5   : > { %v4976_v19 = vpop.f32.mrb[36].mxu0 }
 0x3c6   : > { %v5017_v20 = vpop.f32.mrb[36].mxu1  ;;  %v4977_v21 = vadd.f32 %v4976_v19, %v4936_v13  ;;  %v4978_v22 = vpop.f32.mrb[37].mxu0 }
 0x3c7   : > { %v5019_v39 = vpop.f32.mrb[37].mxu1  ;;  %v4979_v28 = vadd.f32 %v4978_v22, %v4938_v16  ;;  %v4980_v29 = vpop.f32.mrb[38].mxu0  ;;  %5035 = sbr.rel (%p5866_p1) target bundleno = 986 (0x3da), region = 48 }
 0x3c8   : > { %v5021_v35 = vpop.f32.mrb[38].mxu1  ;;  %v5018_v23 = vadd.f32 %v5017_v20, %v4977_v21  ;;  %v4981_v30 = vpop.f32.mrb[39].mxu0 }
 0x3c9   : > { %v5022_v8 = vpop.f32.mrb[39].mxu1  ;;  %v5020_v44 = vadd.f32 %v5019_v39, %v4979_v28 }
 0x3ca   : > { %v5026_v1 = vadd.f32 %v5018_v23, %v282_v40 }
 0x3cb   : > { %v5027_v4 = vadd.f32 %v5020_v44, %v283_v24 }
 0x3cc   : > { %5030 = vst [vmem:[%s7371_s11 + $0x10] sm:$0xff] %v5026_v1 }
 0x3cd   : > { %5031 = vst [vmem:[%s7371_s11 + $0x18] sm:$0xff] %v5027_v4 }
 0x3d3   : > { %v5038_v51 = vld [vmem:[%s7371_s11 + $0x10] sm:$0xff] }
 0x3d4   : > { %v5039_v60 = vld [vmem:[%s7371_s11 + $0x18] sm:$0xff]  ;;  %v5064_v54 = vadd.f32 %v5053_v62, %v5038_v51 }
 0x3d5   : > { %v5065_v55 = vadd.f32 %v5057_v53, %v5039_v60 }
 0x3d6   : > { %v5068_v58 = vmax.f32 %v5064_v54, 0.0 }
 0x3d7   : > { %v5069_v7 = vmax.f32 %v5065_v55, 0.0 }
 0x3d8   : > { %5072 = vst [vmem:[%s7371_s11 + $0x10] sm:$0xff] %v5068_v58 }
 0x3d9   : > { %5073 = vst [vmem:[%s7371_s11 + $0x18] sm:$0xff] %v5069_v7 }
 0x3da PF: > { %s19_s22 = sadd.s32 1, %s7112_s22   ;;  %s8268_s8 = sld [smem:[#allocation8_spill]] }
 0x3db   : > { %p16_p11 = scmp.ge.s32.totalorder %s19_s22, 42   ;;  %s8269_s12 = smov %s7076_s13 }
 0x3dc   : > { %s8270_s13 = smov %s7080_s14  ;;  %s8271_s14 = smov %s7300_s7 }
 0x3dd   : > { %s8272_s15 = smov %s7088_s16  ;;  %s8273_s16 = smov %s7092_s17 }
 0x3de   : > { %s8274_s17 = smov %s7305_s9  ;;  %s8275_s18 = smov %s7104_s20 }
 0x3df   : > { %s8276_s19 = smov %s7108_s21  ;;  %s8277_s20 = smov %s8280_s23 }
 0x3e0   : > { %s8278_s21 = smov %s8268_s8  ;;  %18 = sbr.rel (!%p16_p11) target bundleno = 11 (0xb), region = 96 }
 0x3e7   :  { %5096 = vsyncpa [#allocation3], 1 }
 0x3e8   :  { %5098 = vsyncpa [#allocation3 + $0x1], 1 }
 0x3e9   :  { %5099 = vsyncpa [#allocation5], 1 }
 0x3ea   :  { %5101 = vsyncpa [#allocation5 + $0x1], 1 }

// kernel: larger_net_forward.4
= control target key start
LH: loop header
LB: loop body
LE: loop exit
PB: predicated region body
PF: predicated region fallthrough
CT: control target
= control target key end

     0   :  { %s8223_s12 = smov 0   ;;  %s8225_s13 = smov 0   ;;  %s10453_s0 = inlined_call_operand.vmem [shape: bf16[8,5120], index: 0, kind: input, shape index: {}]   ;;  %s10454_s1 = inlined_call_operand.vmem [shape: bf16[5120,1024], index: 1, kind: input, shape index: {}]   ;;  %s10455_s2 = inlined_call_operand.vmem [shape: f32[1,1024], index: 2, kind: input, shape index: {}]   ;;  %s10456_s3 = inlined_call_operand.vmem [shape: f32[8,1024], index: 3, kind: output, shape index: {}]  }
   0x1   :  { %s8227_s14 = smov 0   ;;  %s8229_s15 = smov 0  }
   0x2   :  { %s8231_s16 = smov 0   ;;  %s8233_s17 = smov 0  }
   0x3   :  { %s8235_s18 = smov 0  }
   0x4 LB: > { %s22_s19 = sadd.s32 1, %s8192_s16  ;;  %s25_s20 = sadd.s32 1, %s8196_s17  ;;  %s8200_s18 = sphi %s8235_s18, %s13_s18   ;;  %s8196_s17 = sphi %s8233_s17, %s10462_s17   ;;  %s8192_s16 = sphi %s8231_s16, %s10461_s16   ;;  %s8188_s15 = sphi %s8229_s15, %s10460_s15   ;;  %s8184_s14 = sphi %s8227_s14, %s10459_s14   ;;  %s8180_s13 = sphi %s8225_s13, %s10458_s13   ;;  %s8176_s12 = sphi %s8223_s12, %s10457_s12  }
   0x5   : > { %p23_p0 = scmp.ge.s32.totalorder %s22_s19, 2  ;;  %p67_p1 = scmp.ne.s32.totalorder %s8180_s13, %s8176_s12 }
   0x6   : > { %p68_p2 = scmp.eq.s32.totalorder %s8200_s18, 0  ;;  %s60_s24 = sadd.s32 1, %s8180_s13 }
   0x7   : > { %s10464_s19 = smov (%p23_p0, %s22_s19), 0  ;;  %s10466_s20 = smov (!%p23_p0, %s25_s20), %s8196_s17 }
   0x8   : > { %p69_p3 = por %p68_p2, %p67_p1  ;;  %p27_p4 = scmp.ge.s32.totalorder %s10466_s20, 2 }
   0x9   : > { %s55_s21 = ssub.s32 %s8192_s16, %s10464_s19  ;;  %p6433_p6 = scmp.ge.s32.totalorder %s8200_s18, 4 }
   0xa   : > { %s10468_s20 = smov (%p27_p4, %s10466_s20), 0 }
   0xb   : > { %s56_s22 = ssub.s32 %s8196_s17, %s10468_s20  ;;  %145 = sbr.rel (%p6433_p6) target bundleno = 346 (0x15a), region = 16 }
   0xc   : > { %s57_s23 = sor.u32 %s56_s22, %s55_s21 }
   0xd   : > { %p58_p5 = scmp.eq.s32.totalorder %s57_s23, 0 }
   0xf   : > { %s8274_s25 = scalar_select %p58_p5, %s8180_s13, %s60_s24  }
  0x12   : > { %157 = sbr.rel (!%p69_p3) target bundleno = 346 (0x15a), region = 24  ;;  %s159_s26 = sand.u32 (%p69_p3), 1, %s8180_s13  }
  0x13   : > { %s7107_s27 = smul.u32 (%p69_p3), 5120, %s159_s26  ;;  %s6434_s28 = sshll.u32 (%p69_p3), %s8196_s17, 2 }
  0x14   : > { %s7106_s29 = smul.u32 (%p69_p3), 2560, %s8192_s16 }
  0x15   : > { %s8288_s8 = scalar_lea.vmem (%p69_p3), [#allocation2], %s7107_s27 }
  0x16   : > { %s165_s30 = sadd.s32 (%p69_p3), %s7106_s29, %s6434_s28 }
  0x17   : > { %s6436_s4 = sshll.u32 (%p69_p3), %s165_s30, 2 }
  0x18   : > { %s8283_s7 = scalar_lea.vmem (%p69_p3), %s10454_s1, %s6436_s4 }
  0x19   : > { %v180_v0 = vld [vmem:[%s8283_s7] sm:$0xff]  ;;  %v182_v1 = vld [vmem:[%s8283_s7 + $0x8] sm:$0xff] }
  0x1a   : > { %v184_v2 = vld [vmem:[%s8283_s7 + $0x20] sm:$0xff]  ;;  %181 = vst [vmem:[%s8288_s8] sm:$0xff] %v180_v0  ;;  %183 = vst [vmem:[%s8288_s8 + $0x8] sm:$0xff] %v182_v1  ;;  %v186_v3 = vld [vmem:[%s8283_s7 + $0x28] sm:$0xff] }
  0x1b   : > { %185 = vst [vmem:[%s8288_s8 + $0x10] sm:$0xff] %v184_v2  ;;  %v188_v4 = vld [vmem:[%s8283_s7 + $0x40] sm:$0xff]  ;;  %v190_v5 = vld [vmem:[%s8283_s7 + $0x48] sm:$0xff]  ;;  %187 = vst [vmem:[%s8288_s8 + $0x18] sm:$0xff] %v186_v3 }
  0x1c   : > { %189 = vst [vmem:[%s8288_s8 + $0x20] sm:$0xff] %v188_v4  ;;  %191 = vst [vmem:[%s8288_s8 + $0x28] sm:$0xff] %v190_v5  ;;  %v192_v6 = vld [vmem:[%s8283_s7 + $0x60] sm:$0xff]  ;;  %v194_v7 = vld [vmem:[%s8283_s7 + $0x68] sm:$0xff] }
  0x1d   : > { %v196_v8 = vld [vmem:[%s8283_s7 + $0x80] sm:$0xff]  ;;  %193 = vst [vmem:[%s8288_s8 + $0x30] sm:$0xff] %v192_v6  ;;  %195 = vst [vmem:[%s8288_s8 + $0x38] sm:$0xff] %v194_v7  ;;  %v198_v9 = vld [vmem:[%s8283_s7 + $0x88] sm:$0xff] }
  0x1e   : > { %197 = vst [vmem:[%s8288_s8 + $0x40] sm:$0xff] %v196_v8  ;;  %v200_v10 = vld [vmem:[%s8283_s7 + $0xa0] sm:$0xff]  ;;  %v202_v11 = vld [vmem:[%s8283_s7 + $0xa8] sm:$0xff]  ;;  %199 = vst [vmem:[%s8288_s8 + $0x48] sm:$0xff] %v198_v9 }
  0x1f   : > { %201 = vst [vmem:[%s8288_s8 + $0x50] sm:$0xff] %v200_v10  ;;  %203 = vst [vmem:[%s8288_s8 + $0x58] sm:$0xff] %v202_v11  ;;  %v204_v12 = vld [vmem:[%s8283_s7 + $0xc0] sm:$0xff]  ;;  %v206_v13 = vld [vmem:[%s8283_s7 + $0xc8] sm:$0xff] }
  0x20   : > { %v208_v14 = vld [vmem:[%s8283_s7 + $0xe0] sm:$0xff]  ;;  %205 = vst [vmem:[%s8288_s8 + $0x60] sm:$0xff] %v204_v12  ;;  %207 = vst [vmem:[%s8288_s8 + $0x68] sm:$0xff] %v206_v13  ;;  %v210_v15 = vld [vmem:[%s8283_s7 + $0xe8] sm:$0xff] }
  0x21   : > { %209 = vst [vmem:[%s8288_s8 + $0x70] sm:$0xff] %v208_v14  ;;  %v212_v16 = vld [vmem:[%s8283_s7 + $0x100] sm:$0xff]  ;;  %v214_v17 = vld [vmem:[%s8283_s7 + $0x108] sm:$0xff]  ;;  %211 = vst [vmem:[%s8288_s8 + $0x78] sm:$0xff] %v210_v15 }
  0x22   : > { %213 = vst [vmem:[%s8288_s8 + $0x80] sm:$0xff] %v212_v16  ;;  %215 = vst [vmem:[%s8288_s8 + $0x88] sm:$0xff] %v214_v17  ;;  %v216_v18 = vld [vmem:[%s8283_s7 + $0x120] sm:$0xff]  ;;  %v218_v19 = vld [vmem:[%s8283_s7 + $0x128] sm:$0xff] }
  0x23   : > { %v220_v20 = vld [vmem:[%s8283_s7 + $0x140] sm:$0xff]  ;;  %217 = vst [vmem:[%s8288_s8 + $0x90] sm:$0xff] %v216_v18  ;;  %219 = vst [vmem:[%s8288_s8 + $0x98] sm:$0xff] %v218_v19  ;;  %v222_v21 = vld [vmem:[%s8283_s7 + $0x148] sm:$0xff] }
  0x24   : > { %221 = vst [vmem:[%s8288_s8 + $0xa0] sm:$0xff] %v220_v20  ;;  %v224_v22 = vld [vmem:[%s8283_s7 + $0x160] sm:$0xff]  ;;  %v226_v23 = vld [vmem:[%s8283_s7 + $0x168] sm:$0xff]  ;;  %223 = vst [vmem:[%s8288_s8 + $0xa8] sm:$0xff] %v222_v21 }
  0x25   : > { %225 = vst [vmem:[%s8288_s8 + $0xb0] sm:$0xff] %v224_v22  ;;  %227 = vst [vmem:[%s8288_s8 + $0xb8] sm:$0xff] %v226_v23  ;;  %v228_v24 = vld [vmem:[%s8283_s7 + $0x180] sm:$0xff]  ;;  %v230_v25 = vld [vmem:[%s8283_s7 + $0x188] sm:$0xff] }
  0x26   : > { %v232_v26 = vld [vmem:[%s8283_s7 + $0x1a0] sm:$0xff]  ;;  %229 = vst [vmem:[%s8288_s8 + $0xc0] sm:$0xff] %v228_v24  ;;  %231 = vst [vmem:[%s8288_s8 + $0xc8] sm:$0xff] %v230_v25  ;;  %v234_v27 = vld [vmem:[%s8283_s7 + $0x1a8] sm:$0xff] }
  0x27   : > { %233 = vst [vmem:[%s8288_s8 + $0xd0] sm:$0xff] %v232_v26  ;;  %v236_v28 = vld [vmem:[%s8283_s7 + $0x1c0] sm:$0xff]  ;;  %v238_v29 = vld [vmem:[%s8283_s7 + $0x1c8] sm:$0xff]  ;;  %235 = vst [vmem:[%s8288_s8 + $0xd8] sm:$0xff] %v234_v27 }
  0x28   : > { %237 = vst [vmem:[%s8288_s8 + $0xe0] sm:$0xff] %v236_v28  ;;  %239 = vst [vmem:[%s8288_s8 + $0xe8] sm:$0xff] %v238_v29  ;;  %v240_v30 = vld [vmem:[%s8283_s7 + $0x1e0] sm:$0xff]  ;;  %v242_v31 = vld [vmem:[%s8283_s7 + $0x1e8] sm:$0xff] }
  0x29   : > { %v244_v32 = vld [vmem:[%s8283_s7 + $0x200] sm:$0xff]  ;;  %241 = vst [vmem:[%s8288_s8 + $0xf0] sm:$0xff] %v240_v30  ;;  %243 = vst [vmem:[%s8288_s8 + $0xf8] sm:$0xff] %v242_v31  ;;  %v246_v33 = vld [vmem:[%s8283_s7 + $0x208] sm:$0xff] }
  0x2a   : > { %245 = vst [vmem:[%s8288_s8 + $0x100] sm:$0xff] %v244_v32  ;;  %v248_v34 = vld [vmem:[%s8283_s7 + $0x220] sm:$0xff]  ;;  %v250_v35 = vld [vmem:[%s8283_s7 + $0x228] sm:$0xff]  ;;  %247 = vst [vmem:[%s8288_s8 + $0x108] sm:$0xff] %v246_v33 }
  0x2b   : > { %249 = vst [vmem:[%s8288_s8 + $0x110] sm:$0xff] %v248_v34  ;;  %251 = vst [vmem:[%s8288_s8 + $0x118] sm:$0xff] %v250_v35  ;;  %v252_v36 = vld [vmem:[%s8283_s7 + $0x240] sm:$0xff]  ;;  %v254_v37 = vld [vmem:[%s8283_s7 + $0x248] sm:$0xff] }
  0x2c   : > { %v256_v38 = vld [vmem:[%s8283_s7 + $0x260] sm:$0xff]  ;;  %253 = vst [vmem:[%s8288_s8 + $0x120] sm:$0xff] %v252_v36  ;;  %255 = vst [vmem:[%s8288_s8 + $0x128] sm:$0xff] %v254_v37  ;;  %v258_v39 = vld [vmem:[%s8283_s7 + $0x268] sm:$0xff] }
  0x2d   : > { %257 = vst [vmem:[%s8288_s8 + $0x130] sm:$0xff] %v256_v38  ;;  %v260_v40 = vld [vmem:[%s8283_s7 + $0x280] sm:$0xff]  ;;  %v262_v41 = vld [vmem:[%s8283_s7 + $0x288] sm:$0xff]  ;;  %259 = vst [vmem:[%s8288_s8 + $0x138] sm:$0xff] %v258_v39 }
  0x2e   : > { %261 = vst [vmem:[%s8288_s8 + $0x140] sm:$0xff] %v260_v40  ;;  %263 = vst [vmem:[%s8288_s8 + $0x148] sm:$0xff] %v262_v41  ;;  %v264_v42 = vld [vmem:[%s8283_s7 + $0x2a0] sm:$0xff]  ;;  %v266_v43 = vld [vmem:[%s8283_s7 + $0x2a8] sm:$0xff] }
  0x2f   : > { %v268_v44 = vld [vmem:[%s8283_s7 + $0x2c0] sm:$0xff]  ;;  %265 = vst [vmem:[%s8288_s8 + $0x150] sm:$0xff] %v264_v42  ;;  %267 = vst [vmem:[%s8288_s8 + $0x158] sm:$0xff] %v266_v43  ;;  %v270_v45 = vld [vmem:[%s8283_s7 + $0x2c8] sm:$0xff] }
  0x30   : > { %269 = vst [vmem:[%s8288_s8 + $0x160] sm:$0xff] %v268_v44  ;;  %v272_v46 = vld [vmem:[%s8283_s7 + $0x2e0] sm:$0xff]  ;;  %v274_v47 = vld [vmem:[%s8283_s7 + $0x2e8] sm:$0xff]  ;;  %271 = vst [vmem:[%s8288_s8 + $0x168] sm:$0xff] %v270_v45 }
  0x31   : > { %273 = vst [vmem:[%s8288_s8 + $0x170] sm:$0xff] %v272_v46  ;;  %275 = vst [vmem:[%s8288_s8 + $0x178] sm:$0xff] %v274_v47  ;;  %v276_v48 = vld [vmem:[%s8283_s7 + $0x300] sm:$0xff]  ;;  %v278_v49 = vld [vmem:[%s8283_s7 + $0x308] sm:$0xff] }
  0x32   : > { %v280_v50 = vld [vmem:[%s8283_s7 + $0x320] sm:$0xff]  ;;  %277 = vst [vmem:[%s8288_s8 + $0x180] sm:$0xff] %v276_v48  ;;  %279 = vst [vmem:[%s8288_s8 + $0x188] sm:$0xff] %v278_v49  ;;  %v282_v51 = vld [vmem:[%s8283_s7 + $0x328] sm:$0xff] }
  0x33   : > { %281 = vst [vmem:[%s8288_s8 + $0x190] sm:$0xff] %v280_v50  ;;  %v284_v52 = vld [vmem:[%s8283_s7 + $0x340] sm:$0xff]  ;;  %v286_v53 = vld [vmem:[%s8283_s7 + $0x348] sm:$0xff]  ;;  %283 = vst [vmem:[%s8288_s8 + $0x198] sm:$0xff] %v282_v51 }
  0x34   : > { %285 = vst [vmem:[%s8288_s8 + $0x1a0] sm:$0xff] %v284_v52  ;;  %287 = vst [vmem:[%s8288_s8 + $0x1a8] sm:$0xff] %v286_v53  ;;  %v288_v54 = vld [vmem:[%s8283_s7 + $0x360] sm:$0xff]  ;;  %v290_v55 = vld [vmem:[%s8283_s7 + $0x368] sm:$0xff] }
  0x35   : > { %v292_v56 = vld [vmem:[%s8283_s7 + $0x380] sm:$0xff]  ;;  %289 = vst [vmem:[%s8288_s8 + $0x1b0] sm:$0xff] %v288_v54  ;;  %291 = vst [vmem:[%s8288_s8 + $0x1b8] sm:$0xff] %v290_v55  ;;  %v294_v57 = vld [vmem:[%s8283_s7 + $0x388] sm:$0xff] }
  0x36   : > { %293 = vst [vmem:[%s8288_s8 + $0x1c0] sm:$0xff] %v292_v56  ;;  %v296_v58 = vld [vmem:[%s8283_s7 + $0x3a0] sm:$0xff]  ;;  %v298_v59 = vld [vmem:[%s8283_s7 + $0x3a8] sm:$0xff]  ;;  %295 = vst [vmem:[%s8288_s8 + $0x1c8] sm:$0xff] %v294_v57 }
  0x37   : > { %297 = vst [vmem:[%s8288_s8 + $0x1d0] sm:$0xff] %v296_v58  ;;  %299 = vst [vmem:[%s8288_s8 + $0x1d8] sm:$0xff] %v298_v59  ;;  %v300_v60 = vld [vmem:[%s8283_s7 + $0x3c0] sm:$0xff]  ;;  %v302_v61 = vld [vmem:[%s8283_s7 + $0x3c8] sm:$0xff] }
  0x38   : > { %v304_v62 = vld [vmem:[%s8283_s7 + $0x3e0] sm:$0xff]  ;;  %301 = vst [vmem:[%s8288_s8 + $0x1e0] sm:$0xff] %v300_v60  ;;  %303 = vst [vmem:[%s8288_s8 + $0x1e8] sm:$0xff] %v302_v61  ;;  %v306_v63 = vld [vmem:[%s8283_s7 + $0x3e8] sm:$0xff] }
  0x39   : > { %305 = vst [vmem:[%s8288_s8 + $0x1f0] sm:$0xff] %v304_v62  ;;  %v308_v0 = vld [vmem:[%s8283_s7 + $0x400] sm:$0xff]  ;;  %v310_v1 = vld [vmem:[%s8283_s7 + $0x408] sm:$0xff]  ;;  %307 = vst [vmem:[%s8288_s8 + $0x1f8] sm:$0xff] %v306_v63 }
  0x3a   : > { %309 = vst [vmem:[%s8288_s8 + $0x200] sm:$0xff] %v308_v0  ;;  %311 = vst [vmem:[%s8288_s8 + $0x208] sm:$0xff] %v310_v1  ;;  %v312_v2 = vld [vmem:[%s8283_s7 + $0x420] sm:$0xff]  ;;  %v314_v3 = vld [vmem:[%s8283_s7 + $0x428] sm:$0xff] }
  0x3b   : > { %v316_v4 = vld [vmem:[%s8283_s7 + $0x440] sm:$0xff]  ;;  %313 = vst [vmem:[%s8288_s8 + $0x210] sm:$0xff] %v312_v2  ;;  %315 = vst [vmem:[%s8288_s8 + $0x218] sm:$0xff] %v314_v3  ;;  %v318_v5 = vld [vmem:[%s8283_s7 + $0x448] sm:$0xff] }
  0x3c   : > { %317 = vst [vmem:[%s8288_s8 + $0x220] sm:$0xff] %v316_v4  ;;  %v320_v6 = vld [vmem:[%s8283_s7 + $0x460] sm:$0xff]  ;;  %v322_v7 = vld [vmem:[%s8283_s7 + $0x468] sm:$0xff]  ;;  %319 = vst [vmem:[%s8288_s8 + $0x228] sm:$0xff] %v318_v5 }
  0x3d   : > { %321 = vst [vmem:[%s8288_s8 + $0x230] sm:$0xff] %v320_v6  ;;  %323 = vst [vmem:[%s8288_s8 + $0x238] sm:$0xff] %v322_v7  ;;  %v324_v8 = vld [vmem:[%s8283_s7 + $0x480] sm:$0xff]  ;;  %v326_v9 = vld [vmem:[%s8283_s7 + $0x488] sm:$0xff] }
  0x3e   : > { %v328_v10 = vld [vmem:[%s8283_s7 + $0x4a0] sm:$0xff]  ;;  %325 = vst [vmem:[%s8288_s8 + $0x240] sm:$0xff] %v324_v8  ;;  %327 = vst [vmem:[%s8288_s8 + $0x248] sm:$0xff] %v326_v9  ;;  %v330_v11 = vld [vmem:[%s8283_s7 + $0x4a8] sm:$0xff] }
  0x3f   : > { %329 = vst [vmem:[%s8288_s8 + $0x250] sm:$0xff] %v328_v10  ;;  %v332_v12 = vld [vmem:[%s8283_s7 + $0x4c0] sm:$0xff]  ;;  %v334_v13 = vld [vmem:[%s8283_s7 + $0x4c8] sm:$0xff]  ;;  %331 = vst [vmem:[%s8288_s8 + $0x258] sm:$0xff] %v330_v11 }
  0x40   : > { %333 = vst [vmem:[%s8288_s8 + $0x260] sm:$0xff] %v332_v12  ;;  %335 = vst [vmem:[%s8288_s8 + $0x268] sm:$0xff] %v334_v13  ;;  %v336_v14 = vld [vmem:[%s8283_s7 + $0x4e0] sm:$0xff]  ;;  %v338_v15 = vld [vmem:[%s8283_s7 + $0x4e8] sm:$0xff] }
  0x41   : > { %v340_v16 = vld [vmem:[%s8283_s7 + $0x500] sm:$0xff]  ;;  %337 = vst [vmem:[%s8288_s8 + $0x270] sm:$0xff] %v336_v14  ;;  %339 = vst [vmem:[%s8288_s8 + $0x278] sm:$0xff] %v338_v15  ;;  %v342_v17 = vld [vmem:[%s8283_s7 + $0x508] sm:$0xff] }
  0x42   : > { %341 = vst [vmem:[%s8288_s8 + $0x280] sm:$0xff] %v340_v16  ;;  %v344_v18 = vld [vmem:[%s8283_s7 + $0x520] sm:$0xff]  ;;  %v346_v19 = vld [vmem:[%s8283_s7 + $0x528] sm:$0xff]  ;;  %343 = vst [vmem:[%s8288_s8 + $0x288] sm:$0xff] %v342_v17 }
  0x43   : > { %345 = vst [vmem:[%s8288_s8 + $0x290] sm:$0xff] %v344_v18  ;;  %347 = vst [vmem:[%s8288_s8 + $0x298] sm:$0xff] %v346_v19  ;;  %v348_v20 = vld [vmem:[%s8283_s7 + $0x540] sm:$0xff]  ;;  %v350_v21 = vld [vmem:[%s8283_s7 + $0x548] sm:$0xff] }
  0x44   : > { %v352_v22 = vld [vmem:[%s8283_s7 + $0x560] sm:$0xff]  ;;  %349 = vst [vmem:[%s8288_s8 + $0x2a0] sm:$0xff] %v348_v20  ;;  %351 = vst [vmem:[%s8288_s8 + $0x2a8] sm:$0xff] %v350_v21  ;;  %v354_v23 = vld [vmem:[%s8283_s7 + $0x568] sm:$0xff] }
  0x45   : > { %353 = vst [vmem:[%s8288_s8 + $0x2b0] sm:$0xff] %v352_v22  ;;  %v356_v24 = vld [vmem:[%s8283_s7 + $0x580] sm:$0xff]  ;;  %v358_v25 = vld [vmem:[%s8283_s7 + $0x588] sm:$0xff]  ;;  %355 = vst [vmem:[%s8288_s8 + $0x2b8] sm:$0xff] %v354_v23 }
  0x46   : > { %357 = vst [vmem:[%s8288_s8 + $0x2c0] sm:$0xff] %v356_v24  ;;  %359 = vst [vmem:[%s8288_s8 + $0x2c8] sm:$0xff] %v358_v25  ;;  %v360_v26 = vld [vmem:[%s8283_s7 + $0x5a0] sm:$0xff]  ;;  %v362_v27 = vld [vmem:[%s8283_s7 + $0x5a8] sm:$0xff] }
  0x47   : > { %v364_v28 = vld [vmem:[%s8283_s7 + $0x5c0] sm:$0xff]  ;;  %361 = vst [vmem:[%s8288_s8 + $0x2d0] sm:$0xff] %v360_v26  ;;  %363 = vst [vmem:[%s8288_s8 + $0x2d8] sm:$0xff] %v362_v27  ;;  %v366_v29 = vld [vmem:[%s8283_s7 + $0x5c8] sm:$0xff] }
  0x48   : > { %365 = vst [vmem:[%s8288_s8 + $0x2e0] sm:$0xff] %v364_v28  ;;  %v368_v30 = vld [vmem:[%s8283_s7 + $0x5e0] sm:$0xff]  ;;  %v370_v31 = vld [vmem:[%s8283_s7 + $0x5e8] sm:$0xff]  ;;  %367 = vst [vmem:[%s8288_s8 + $0x2e8] sm:$0xff] %v366_v29 }
  0x49   : > { %369 = vst [vmem:[%s8288_s8 + $0x2f0] sm:$0xff] %v368_v30  ;;  %371 = vst [vmem:[%s8288_s8 + $0x2f8] sm:$0xff] %v370_v31  ;;  %v372_v32 = vld [vmem:[%s8283_s7 + $0x600] sm:$0xff]  ;;  %v374_v33 = vld [vmem:[%s8283_s7 + $0x608] sm:$0xff] }
  0x4a   : > { %v376_v34 = vld [vmem:[%s8283_s7 + $0x620] sm:$0xff]  ;;  %373 = vst [vmem:[%s8288_s8 + $0x300] sm:$0xff] %v372_v32  ;;  %375 = vst [vmem:[%s8288_s8 + $0x308] sm:$0xff] %v374_v33  ;;  %v378_v35 = vld [vmem:[%s8283_s7 + $0x628] sm:$0xff] }
  0x4b   : > { %377 = vst [vmem:[%s8288_s8 + $0x310] sm:$0xff] %v376_v34  ;;  %v380_v36 = vld [vmem:[%s8283_s7 + $0x640] sm:$0xff]  ;;  %v382_v37 = vld [vmem:[%s8283_s7 + $0x648] sm:$0xff]  ;;  %379 = vst [vmem:[%s8288_s8 + $0x318] sm:$0xff] %v378_v35 }
  0x4c   : > { %381 = vst [vmem:[%s8288_s8 + $0x320] sm:$0xff] %v380_v36  ;;  %383 = vst [vmem:[%s8288_s8 + $0x328] sm:$0xff] %v382_v37  ;;  %v384_v38 = vld [vmem:[%s8283_s7 + $0x660] sm:$0xff]  ;;  %v386_v39 = vld [vmem:[%s8283_s7 + $0x668] sm:$0xff] }
  0x4d   : > { %v388_v40 = vld [vmem:[%s8283_s7 + $0x680] sm:$0xff]  ;;  %385 = vst [vmem:[%s8288_s8 + $0x330] sm:$0xff] %v384_v38  ;;  %387 = vst [vmem:[%s8288_s8 + $0x338] sm:$0xff] %v386_v39  ;;  %v390_v41 = vld [vmem:[%s8283_s7 + $0x688] sm:$0xff] }
  0x4e   : > { %389 = vst [vmem:[%s8288_s8 + $0x340] sm:$0xff] %v388_v40  ;;  %v392_v42 = vld [vmem:[%s8283_s7 + $0x6a0] sm:$0xff]  ;;  %v394_v43 = vld [vmem:[%s8283_s7 + $0x6a8] sm:$0xff]  ;;  %391 = vst [vmem:[%s8288_s8 + $0x348] sm:$0xff] %v390_v41 }
  0x4f   : > { %393 = vst [vmem:[%s8288_s8 + $0x350] sm:$0xff] %v392_v42  ;;  %395 = vst [vmem:[%s8288_s8 + $0x358] sm:$0xff] %v394_v43  ;;  %v396_v44 = vld [vmem:[%s8283_s7 + $0x6c0] sm:$0xff]  ;;  %v398_v45 = vld [vmem:[%s8283_s7 + $0x6c8] sm:$0xff] }
  0x50   : > { %v400_v46 = vld [vmem:[%s8283_s7 + $0x6e0] sm:$0xff]  ;;  %397 = vst [vmem:[%s8288_s8 + $0x360] sm:$0xff] %v396_v44  ;;  %399 = vst [vmem:[%s8288_s8 + $0x368] sm:$0xff] %v398_v45  ;;  %v402_v47 = vld [vmem:[%s8283_s7 + $0x6e8] sm:$0xff] }
  0x51   : > { %401 = vst [vmem:[%s8288_s8 + $0x370] sm:$0xff] %v400_v46  ;;  %v404_v48 = vld [vmem:[%s8283_s7 + $0x700] sm:$0xff]  ;;  %v406_v49 = vld [vmem:[%s8283_s7 + $0x708] sm:$0xff]  ;;  %403 = vst [vmem:[%s8288_s8 + $0x378] sm:$0xff] %v402_v47 }
  0x52   : > { %405 = vst [vmem:[%s8288_s8 + $0x380] sm:$0xff] %v404_v48  ;;  %407 = vst [vmem:[%s8288_s8 + $0x388] sm:$0xff] %v406_v49  ;;  %v408_v50 = vld [vmem:[%s8283_s7 + $0x720] sm:$0xff]  ;;  %v410_v51 = vld [vmem:[%s8283_s7 + $0x728] sm:$0xff] }
  0x53   : > { %v412_v52 = vld [vmem:[%s8283_s7 + $0x740] sm:$0xff]  ;;  %409 = vst [vmem:[%s8288_s8 + $0x390] sm:$0xff] %v408_v50  ;;  %411 = vst [vmem:[%s8288_s8 + $0x398] sm:$0xff] %v410_v51  ;;  %v414_v53 = vld [vmem:[%s8283_s7 + $0x748] sm:$0xff] }
  0x54   : > { %413 = vst [vmem:[%s8288_s8 + $0x3a0] sm:$0xff] %v412_v52  ;;  %v416_v54 = vld [vmem:[%s8283_s7 + $0x760] sm:$0xff]  ;;  %v418_v55 = vld [vmem:[%s8283_s7 + $0x768] sm:$0xff]  ;;  %415 = vst [vmem:[%s8288_s8 + $0x3a8] sm:$0xff] %v414_v53 }
  0x55   : > { %417 = vst [vmem:[%s8288_s8 + $0x3b0] sm:$0xff] %v416_v54  ;;  %419 = vst [vmem:[%s8288_s8 + $0x3b8] sm:$0xff] %v418_v55  ;;  %v420_v56 = vld [vmem:[%s8283_s7 + $0x780] sm:$0xff]  ;;  %v422_v57 = vld [vmem:[%s8283_s7 + $0x788] sm:$0xff] }
  0x56   : > { %v424_v58 = vld [vmem:[%s8283_s7 + $0x7a0] sm:$0xff]  ;;  %421 = vst [vmem:[%s8288_s8 + $0x3c0] sm:$0xff] %v420_v56  ;;  %423 = vst [vmem:[%s8288_s8 + $0x3c8] sm:$0xff] %v422_v57  ;;  %v426_v59 = vld [vmem:[%s8283_s7 + $0x7a8] sm:$0xff] }
  0x57   : > { %425 = vst [vmem:[%s8288_s8 + $0x3d0] sm:$0xff] %v424_v58  ;;  %v428_v60 = vld [vmem:[%s8283_s7 + $0x7c0] sm:$0xff]  ;;  %v430_v61 = vld [vmem:[%s8283_s7 + $0x7c8] sm:$0xff]  ;;  %427 = vst [vmem:[%s8288_s8 + $0x3d8] sm:$0xff] %v426_v59 }
  0x58   : > { %429 = vst [vmem:[%s8288_s8 + $0x3e0] sm:$0xff] %v428_v60  ;;  %431 = vst [vmem:[%s8288_s8 + $0x3e8] sm:$0xff] %v430_v61  ;;  %v432_v62 = vld [vmem:[%s8283_s7 + $0x7e0] sm:$0xff]  ;;  %v434_v63 = vld [vmem:[%s8283_s7 + $0x7e8] sm:$0xff] }
  0x59   : > { %v436_v0 = vld [vmem:[%s8283_s7 + $0x800] sm:$0xff]  ;;  %433 = vst [vmem:[%s8288_s8 + $0x3f0] sm:$0xff] %v432_v62  ;;  %435 = vst [vmem:[%s8288_s8 + $0x3f8] sm:$0xff] %v434_v63  ;;  %v438_v1 = vld [vmem:[%s8283_s7 + $0x808] sm:$0xff] }
  0x5a   : > { %437 = vst [vmem:[%s8288_s8 + $0x400] sm:$0xff] %v436_v0  ;;  %v440_v2 = vld [vmem:[%s8283_s7 + $0x820] sm:$0xff]  ;;  %v442_v3 = vld [vmem:[%s8283_s7 + $0x828] sm:$0xff]  ;;  %439 = vst [vmem:[%s8288_s8 + $0x408] sm:$0xff] %v438_v1 }
  0x5b   : > { %441 = vst [vmem:[%s8288_s8 + $0x410] sm:$0xff] %v440_v2  ;;  %443 = vst [vmem:[%s8288_s8 + $0x418] sm:$0xff] %v442_v3  ;;  %v444_v4 = vld [vmem:[%s8283_s7 + $0x840] sm:$0xff]  ;;  %v446_v5 = vld [vmem:[%s8283_s7 + $0x848] sm:$0xff] }
  0x5c   : > { %v448_v6 = vld [vmem:[%s8283_s7 + $0x860] sm:$0xff]  ;;  %445 = vst [vmem:[%s8288_s8 + $0x420] sm:$0xff] %v444_v4  ;;  %447 = vst [vmem:[%s8288_s8 + $0x428] sm:$0xff] %v446_v5  ;;  %v450_v7 = vld [vmem:[%s8283_s7 + $0x868] sm:$0xff] }
  0x5d   : > { %449 = vst [vmem:[%s8288_s8 + $0x430] sm:$0xff] %v448_v6  ;;  %v452_v8 = vld [vmem:[%s8283_s7 + $0x880] sm:$0xff]  ;;  %v454_v9 = vld [vmem:[%s8283_s7 + $0x888] sm:$0xff]  ;;  %451 = vst [vmem:[%s8288_s8 + $0x438] sm:$0xff] %v450_v7 }
  0x5e   : > { %453 = vst [vmem:[%s8288_s8 + $0x440] sm:$0xff] %v452_v8  ;;  %455 = vst [vmem:[%s8288_s8 + $0x448] sm:$0xff] %v454_v9  ;;  %v456_v10 = vld [vmem:[%s8283_s7 + $0x8a0] sm:$0xff]  ;;  %v458_v11 = vld [vmem:[%s8283_s7 + $0x8a8] sm:$0xff] }
  0x5f   : > { %v460_v12 = vld [vmem:[%s8283_s7 + $0x8c0] sm:$0xff]  ;;  %457 = vst [vmem:[%s8288_s8 + $0x450] sm:$0xff] %v456_v10  ;;  %459 = vst [vmem:[%s8288_s8 + $0x458] sm:$0xff] %v458_v11  ;;  %v462_v13 = vld [vmem:[%s8283_s7 + $0x8c8] sm:$0xff] }
  0x60   : > { %461 = vst [vmem:[%s8288_s8 + $0x460] sm:$0xff] %v460_v12  ;;  %v464_v14 = vld [vmem:[%s8283_s7 + $0x8e0] sm:$0xff]  ;;  %v466_v15 = vld [vmem:[%s8283_s7 + $0x8e8] sm:$0xff]  ;;  %463 = vst [vmem:[%s8288_s8 + $0x468] sm:$0xff] %v462_v13 }
  0x61   : > { %465 = vst [vmem:[%s8288_s8 + $0x470] sm:$0xff] %v464_v14  ;;  %467 = vst [vmem:[%s8288_s8 + $0x478] sm:$0xff] %v466_v15  ;;  %v468_v16 = vld [vmem:[%s8283_s7 + $0x900] sm:$0xff]  ;;  %v470_v17 = vld [vmem:[%s8283_s7 + $0x908] sm:$0xff] }
  0x62   : > { %v472_v18 = vld [vmem:[%s8283_s7 + $0x920] sm:$0xff]  ;;  %469 = vst [vmem:[%s8288_s8 + $0x480] sm:$0xff] %v468_v16  ;;  %471 = vst [vmem:[%s8288_s8 + $0x488] sm:$0xff] %v470_v17  ;;  %v474_v19 = vld [vmem:[%s8283_s7 + $0x928] sm:$0xff] }
  0x63   : > { %473 = vst [vmem:[%s8288_s8 + $0x490] sm:$0xff] %v472_v18  ;;  %v476_v20 = vld [vmem:[%s8283_s7 + $0x940] sm:$0xff]  ;;  %v478_v21 = vld [vmem:[%s8283_s7 + $0x948] sm:$0xff]  ;;  %475 = vst [vmem:[%s8288_s8 + $0x498] sm:$0xff] %v474_v19 }
  0x64   : > { %477 = vst [vmem:[%s8288_s8 + $0x4a0] sm:$0xff] %v476_v20  ;;  %479 = vst [vmem:[%s8288_s8 + $0x4a8] sm:$0xff] %v478_v21  ;;  %v480_v22 = vld [vmem:[%s8283_s7 + $0x960] sm:$0xff]  ;;  %v482_v23 = vld [vmem:[%s8283_s7 + $0x968] sm:$0xff] }
  0x65   : > { %v484_v24 = vld [vmem:[%s8283_s7 + $0x980] sm:$0xff]  ;;  %481 = vst [vmem:[%s8288_s8 + $0x4b0] sm:$0xff] %v480_v22  ;;  %483 = vst [vmem:[%s8288_s8 + $0x4b8] sm:$0xff] %v482_v23  ;;  %v486_v25 = vld [vmem:[%s8283_s7 + $0x988] sm:$0xff] }
  0x66   : > { %485 = vst [vmem:[%s8288_s8 + $0x4c0] sm:$0xff] %v484_v24  ;;  %v488_v26 = vld [vmem:[%s8283_s7 + $0x9a0] sm:$0xff]  ;;  %v490_v27 = vld [vmem:[%s8283_s7 + $0x9a8] sm:$0xff]  ;;  %487 = vst [vmem:[%s8288_s8 + $0x4c8] sm:$0xff] %v486_v25 }
  0x67   : > { %489 = vst [vmem:[%s8288_s8 + $0x4d0] sm:$0xff] %v488_v26  ;;  %491 = vst [vmem:[%s8288_s8 + $0x4d8] sm:$0xff] %v490_v27  ;;  %v492_v28 = vld [vmem:[%s8283_s7 + $0x9c0] sm:$0xff]  ;;  %v494_v29 = vld [vmem:[%s8283_s7 + $0x9c8] sm:$0xff] }
  0x68   : > { %v496_v30 = vld [vmem:[%s8283_s7 + $0x9e0] sm:$0xff]  ;;  %493 = vst [vmem:[%s8288_s8 + $0x4e0] sm:$0xff] %v492_v28  ;;  %495 = vst [vmem:[%s8288_s8 + $0x4e8] sm:$0xff] %v494_v29  ;;  %v498_v31 = vld [vmem:[%s8283_s7 + $0x9e8] sm:$0xff] }
  0x69   : > { %497 = vst [vmem:[%s8288_s8 + $0x4f0] sm:$0xff] %v496_v30  ;;  %v500_v32 = vld [vmem:[%s8283_s7 + $0xa00] sm:$0xff]  ;;  %v502_v33 = vld [vmem:[%s8283_s7 + $0xa08] sm:$0xff]  ;;  %499 = vst [vmem:[%s8288_s8 + $0x4f8] sm:$0xff] %v498_v31 }
  0x6a   : > { %501 = vst [vmem:[%s8288_s8 + $0x500] sm:$0xff] %v500_v32  ;;  %503 = vst [vmem:[%s8288_s8 + $0x508] sm:$0xff] %v502_v33  ;;  %v504_v34 = vld [vmem:[%s8283_s7 + $0xa20] sm:$0xff]  ;;  %v506_v35 = vld [vmem:[%s8283_s7 + $0xa28] sm:$0xff] }
  0x6b   : > { %v508_v36 = vld [vmem:[%s8283_s7 + $0xa40] sm:$0xff]  ;;  %505 = vst [vmem:[%s8288_s8 + $0x510] sm:$0xff] %v504_v34  ;;  %507 = vst [vmem:[%s8288_s8 + $0x518] sm:$0xff] %v506_v35  ;;  %v510_v37 = vld [vmem:[%s8283_s7 + $0xa48] sm:$0xff] }
  0x6c   : > { %509 = vst [vmem:[%s8288_s8 + $0x520] sm:$0xff] %v508_v36  ;;  %v512_v38 = vld [vmem:[%s8283_s7 + $0xa60] sm:$0xff]  ;;  %v514_v39 = vld [vmem:[%s8283_s7 + $0xa68] sm:$0xff]  ;;  %511 = vst [vmem:[%s8288_s8 + $0x528] sm:$0xff] %v510_v37 }
  0x6d   : > { %513 = vst [vmem:[%s8288_s8 + $0x530] sm:$0xff] %v512_v38  ;;  %515 = vst [vmem:[%s8288_s8 + $0x538] sm:$0xff] %v514_v39  ;;  %v516_v40 = vld [vmem:[%s8283_s7 + $0xa80] sm:$0xff]  ;;  %v518_v41 = vld [vmem:[%s8283_s7 + $0xa88] sm:$0xff] }
  0x6e   : > { %v520_v42 = vld [vmem:[%s8283_s7 + $0xaa0] sm:$0xff]  ;;  %517 = vst [vmem:[%s8288_s8 + $0x540] sm:$0xff] %v516_v40  ;;  %519 = vst [vmem:[%s8288_s8 + $0x548] sm:$0xff] %v518_v41  ;;  %v522_v43 = vld [vmem:[%s8283_s7 + $0xaa8] sm:$0xff] }
  0x6f   : > { %521 = vst [vmem:[%s8288_s8 + $0x550] sm:$0xff] %v520_v42  ;;  %v524_v44 = vld [vmem:[%s8283_s7 + $0xac0] sm:$0xff]  ;;  %v526_v45 = vld [vmem:[%s8283_s7 + $0xac8] sm:$0xff]  ;;  %523 = vst [vmem:[%s8288_s8 + $0x558] sm:$0xff] %v522_v43 }
  0x70   : > { %525 = vst [vmem:[%s8288_s8 + $0x560] sm:$0xff] %v524_v44  ;;  %527 = vst [vmem:[%s8288_s8 + $0x568] sm:$0xff] %v526_v45  ;;  %v528_v46 = vld [vmem:[%s8283_s7 + $0xae0] sm:$0xff]  ;;  %v530_v47 = vld [vmem:[%s8283_s7 + $0xae8] sm:$0xff] }
  0x71   : > { %v532_v48 = vld [vmem:[%s8283_s7 + $0xb00] sm:$0xff]  ;;  %529 = vst [vmem:[%s8288_s8 + $0x570] sm:$0xff] %v528_v46  ;;  %531 = vst [vmem:[%s8288_s8 + $0x578] sm:$0xff] %v530_v47  ;;  %v534_v49 = vld [vmem:[%s8283_s7 + $0xb08] sm:$0xff] }
  0x72   : > { %533 = vst [vmem:[%s8288_s8 + $0x580] sm:$0xff] %v532_v48  ;;  %v536_v50 = vld [vmem:[%s8283_s7 + $0xb20] sm:$0xff]  ;;  %v538_v51 = vld [vmem:[%s8283_s7 + $0xb28] sm:$0xff]  ;;  %535 = vst [vmem:[%s8288_s8 + $0x588] sm:$0xff] %v534_v49 }
  0x73   : > { %537 = vst [vmem:[%s8288_s8 + $0x590] sm:$0xff] %v536_v50  ;;  %539 = vst [vmem:[%s8288_s8 + $0x598] sm:$0xff] %v538_v51  ;;  %v540_v52 = vld [vmem:[%s8283_s7 + $0xb40] sm:$0xff]  ;;  %v542_v53 = vld [vmem:[%s8283_s7 + $0xb48] sm:$0xff] }
  0x74   : > { %v544_v54 = vld [vmem:[%s8283_s7 + $0xb60] sm:$0xff]  ;;  %541 = vst [vmem:[%s8288_s8 + $0x5a0] sm:$0xff] %v540_v52  ;;  %543 = vst [vmem:[%s8288_s8 + $0x5a8] sm:$0xff] %v542_v53  ;;  %v546_v55 = vld [vmem:[%s8283_s7 + $0xb68] sm:$0xff] }
  0x75   : > { %545 = vst [vmem:[%s8288_s8 + $0x5b0] sm:$0xff] %v544_v54  ;;  %v548_v56 = vld [vmem:[%s8283_s7 + $0xb80] sm:$0xff]  ;;  %v550_v57 = vld [vmem:[%s8283_s7 + $0xb88] sm:$0xff]  ;;  %547 = vst [vmem:[%s8288_s8 + $0x5b8] sm:$0xff] %v546_v55 }
  0x76   : > { %549 = vst [vmem:[%s8288_s8 + $0x5c0] sm:$0xff] %v548_v56  ;;  %551 = vst [vmem:[%s8288_s8 + $0x5c8] sm:$0xff] %v550_v57  ;;  %v552_v58 = vld [vmem:[%s8283_s7 + $0xba0] sm:$0xff]  ;;  %v554_v59 = vld [vmem:[%s8283_s7 + $0xba8] sm:$0xff] }
  0x77   : > { %v556_v60 = vld [vmem:[%s8283_s7 + $0xbc0] sm:$0xff]  ;;  %553 = vst [vmem:[%s8288_s8 + $0x5d0] sm:$0xff] %v552_v58  ;;  %555 = vst [vmem:[%s8288_s8 + $0x5d8] sm:$0xff] %v554_v59  ;;  %v558_v61 = vld [vmem:[%s8283_s7 + $0xbc8] sm:$0xff] }
  0x78   : > { %557 = vst [vmem:[%s8288_s8 + $0x5e0] sm:$0xff] %v556_v60  ;;  %v560_v62 = vld [vmem:[%s8283_s7 + $0xbe0] sm:$0xff]  ;;  %v562_v63 = vld [vmem:[%s8283_s7 + $0xbe8] sm:$0xff]  ;;  %559 = vst [vmem:[%s8288_s8 + $0x5e8] sm:$0xff] %v558_v61 }
  0x79   : > { %561 = vst [vmem:[%s8288_s8 + $0x5f0] sm:$0xff] %v560_v62  ;;  %563 = vst [vmem:[%s8288_s8 + $0x5f8] sm:$0xff] %v562_v63  ;;  %v564_v0 = vld [vmem:[%s8283_s7 + $0xc00] sm:$0xff]  ;;  %v566_v1 = vld [vmem:[%s8283_s7 + $0xc08] sm:$0xff] }
  0x7a   : > { %v568_v2 = vld [vmem:[%s8283_s7 + $0xc20] sm:$0xff]  ;;  %565 = vst [vmem:[%s8288_s8 + $0x600] sm:$0xff] %v564_v0  ;;  %567 = vst [vmem:[%s8288_s8 + $0x608] sm:$0xff] %v566_v1  ;;  %v570_v3 = vld [vmem:[%s8283_s7 + $0xc28] sm:$0xff] }
  0x7b   : > { %569 = vst [vmem:[%s8288_s8 + $0x610] sm:$0xff] %v568_v2  ;;  %v572_v4 = vld [vmem:[%s8283_s7 + $0xc40] sm:$0xff]  ;;  %v574_v5 = vld [vmem:[%s8283_s7 + $0xc48] sm:$0xff]  ;;  %571 = vst [vmem:[%s8288_s8 + $0x618] sm:$0xff] %v570_v3 }
  0x7c   : > { %573 = vst [vmem:[%s8288_s8 + $0x620] sm:$0xff] %v572_v4  ;;  %575 = vst [vmem:[%s8288_s8 + $0x628] sm:$0xff] %v574_v5  ;;  %v576_v6 = vld [vmem:[%s8283_s7 + $0xc60] sm:$0xff]  ;;  %v578_v7 = vld [vmem:[%s8283_s7 + $0xc68] sm:$0xff] }
  0x7d   : > { %v580_v8 = vld [vmem:[%s8283_s7 + $0xc80] sm:$0xff]  ;;  %577 = vst [vmem:[%s8288_s8 + $0x630] sm:$0xff] %v576_v6  ;;  %579 = vst [vmem:[%s8288_s8 + $0x638] sm:$0xff] %v578_v7  ;;  %v582_v9 = vld [vmem:[%s8283_s7 + $0xc88] sm:$0xff] }
  0x7e   : > { %581 = vst [vmem:[%s8288_s8 + $0x640] sm:$0xff] %v580_v8  ;;  %v584_v10 = vld [vmem:[%s8283_s7 + $0xca0] sm:$0xff]  ;;  %v586_v11 = vld [vmem:[%s8283_s7 + $0xca8] sm:$0xff]  ;;  %583 = vst [vmem:[%s8288_s8 + $0x648] sm:$0xff] %v582_v9 }
  0x7f   : > { %585 = vst [vmem:[%s8288_s8 + $0x650] sm:$0xff] %v584_v10  ;;  %587 = vst [vmem:[%s8288_s8 + $0x658] sm:$0xff] %v586_v11  ;;  %v588_v12 = vld [vmem:[%s8283_s7 + $0xcc0] sm:$0xff]  ;;  %v590_v13 = vld [vmem:[%s8283_s7 + $0xcc8] sm:$0xff] }
  0x80   : > { %v592_v14 = vld [vmem:[%s8283_s7 + $0xce0] sm:$0xff]  ;;  %589 = vst [vmem:[%s8288_s8 + $0x660] sm:$0xff] %v588_v12  ;;  %591 = vst [vmem:[%s8288_s8 + $0x668] sm:$0xff] %v590_v13  ;;  %v594_v15 = vld [vmem:[%s8283_s7 + $0xce8] sm:$0xff] }
  0x81   : > { %593 = vst [vmem:[%s8288_s8 + $0x670] sm:$0xff] %v592_v14  ;;  %v596_v16 = vld [vmem:[%s8283_s7 + $0xd00] sm:$0xff]  ;;  %v598_v17 = vld [vmem:[%s8283_s7 + $0xd08] sm:$0xff]  ;;  %595 = vst [vmem:[%s8288_s8 + $0x678] sm:$0xff] %v594_v15 }
  0x82   : > { %597 = vst [vmem:[%s8288_s8 + $0x680] sm:$0xff] %v596_v16  ;;  %599 = vst [vmem:[%s8288_s8 + $0x688] sm:$0xff] %v598_v17  ;;  %v600_v18 = vld [vmem:[%s8283_s7 + $0xd20] sm:$0xff]  ;;  %v602_v19 = vld [vmem:[%s8283_s7 + $0xd28] sm:$0xff] }
  0x83   : > { %v604_v20 = vld [vmem:[%s8283_s7 + $0xd40] sm:$0xff]  ;;  %601 = vst [vmem:[%s8288_s8 + $0x690] sm:$0xff] %v600_v18  ;;  %603 = vst [vmem:[%s8288_s8 + $0x698] sm:$0xff] %v602_v19  ;;  %v606_v21 = vld [vmem:[%s8283_s7 + $0xd48] sm:$0xff] }
  0x84   : > { %605 = vst [vmem:[%s8288_s8 + $0x6a0] sm:$0xff] %v604_v20  ;;  %v608_v22 = vld [vmem:[%s8283_s7 + $0xd60] sm:$0xff]  ;;  %v610_v23 = vld [vmem:[%s8283_s7 + $0xd68] sm:$0xff]  ;;  %607 = vst [vmem:[%s8288_s8 + $0x6a8] sm:$0xff] %v606_v21 }
  0x85   : > { %609 = vst [vmem:[%s8288_s8 + $0x6b0] sm:$0xff] %v608_v22  ;;  %611 = vst [vmem:[%s8288_s8 + $0x6b8] sm:$0xff] %v610_v23  ;;  %v612_v24 = vld [vmem:[%s8283_s7 + $0xd80] sm:$0xff]  ;;  %v614_v25 = vld [vmem:[%s8283_s7 + $0xd88] sm:$0xff] }
  0x86   : > { %v616_v26 = vld [vmem:[%s8283_s7 + $0xda0] sm:$0xff]  ;;  %613 = vst [vmem:[%s8288_s8 + $0x6c0] sm:$0xff] %v612_v24  ;;  %615 = vst [vmem:[%s8288_s8 + $0x6c8] sm:$0xff] %v614_v25  ;;  %v618_v27 = vld [vmem:[%s8283_s7 + $0xda8] sm:$0xff] }
  0x87   : > { %617 = vst [vmem:[%s8288_s8 + $0x6d0] sm:$0xff] %v616_v26  ;;  %v620_v28 = vld [vmem:[%s8283_s7 + $0xdc0] sm:$0xff]  ;;  %v622_v29 = vld [vmem:[%s8283_s7 + $0xdc8] sm:$0xff]  ;;  %619 = vst [vmem:[%s8288_s8 + $0x6d8] sm:$0xff] %v618_v27 }
  0x88   : > { %621 = vst [vmem:[%s8288_s8 + $0x6e0] sm:$0xff] %v620_v28  ;;  %623 = vst [vmem:[%s8288_s8 + $0x6e8] sm:$0xff] %v622_v29  ;;  %v624_v30 = vld [vmem:[%s8283_s7 + $0xde0] sm:$0xff]  ;;  %v626_v31 = vld [vmem:[%s8283_s7 + $0xde8] sm:$0xff] }
  0x89   : > { %v628_v32 = vld [vmem:[%s8283_s7 + $0xe00] sm:$0xff]  ;;  %625 = vst [vmem:[%s8288_s8 + $0x6f0] sm:$0xff] %v624_v30  ;;  %627 = vst [vmem:[%s8288_s8 + $0x6f8] sm:$0xff] %v626_v31  ;;  %v630_v33 = vld [vmem:[%s8283_s7 + $0xe08] sm:$0xff] }
  0x8a   : > { %629 = vst [vmem:[%s8288_s8 + $0x700] sm:$0xff] %v628_v32  ;;  %v632_v34 = vld [vmem:[%s8283_s7 + $0xe20] sm:$0xff]  ;;  %v634_v35 = vld [vmem:[%s8283_s7 + $0xe28] sm:$0xff]  ;;  %631 = vst [vmem:[%s8288_s8 + $0x708] sm:$0xff] %v630_v33 }
  0x8b   : > { %633 = vst [vmem:[%s8288_s8 + $0x710] sm:$0xff] %v632_v34  ;;  %635 = vst [vmem:[%s8288_s8 + $0x718] sm:$0xff] %v634_v35  ;;  %v636_v36 = vld [vmem:[%s8283_s7 + $0xe40] sm:$0xff]  ;;  %v638_v37 = vld [vmem:[%s8283_s7 + $0xe48] sm:$0xff] }
  0x8c   : > { %v640_v38 = vld [vmem:[%s8283_s7 + $0xe60] sm:$0xff]  ;;  %637 = vst [vmem:[%s8288_s8 + $0x720] sm:$0xff] %v636_v36  ;;  %639 = vst [vmem:[%s8288_s8 + $0x728] sm:$0xff] %v638_v37  ;;  %v642_v39 = vld [vmem:[%s8283_s7 + $0xe68] sm:$0xff] }
  0x8d   : > { %641 = vst [vmem:[%s8288_s8 + $0x730] sm:$0xff] %v640_v38  ;;  %v644_v40 = vld [vmem:[%s8283_s7 + $0xe80] sm:$0xff]  ;;  %v646_v41 = vld [vmem:[%s8283_s7 + $0xe88] sm:$0xff]  ;;  %643 = vst [vmem:[%s8288_s8 + $0x738] sm:$0xff] %v642_v39 }
  0x8e   : > { %645 = vst [vmem:[%s8288_s8 + $0x740] sm:$0xff] %v644_v40  ;;  %647 = vst [vmem:[%s8288_s8 + $0x748] sm:$0xff] %v646_v41  ;;  %v648_v42 = vld [vmem:[%s8283_s7 + $0xea0] sm:$0xff]  ;;  %v650_v43 = vld [vmem:[%s8283_s7 + $0xea8] sm:$0xff] }
  0x8f   : > { %v652_v44 = vld [vmem:[%s8283_s7 + $0xec0] sm:$0xff]  ;;  %649 = vst [vmem:[%s8288_s8 + $0x750] sm:$0xff] %v648_v42  ;;  %651 = vst [vmem:[%s8288_s8 + $0x758] sm:$0xff] %v650_v43  ;;  %v654_v45 = vld [vmem:[%s8283_s7 + $0xec8] sm:$0xff] }
  0x90   : > { %653 = vst [vmem:[%s8288_s8 + $0x760] sm:$0xff] %v652_v44  ;;  %v656_v46 = vld [vmem:[%s8283_s7 + $0xee0] sm:$0xff]  ;;  %v658_v47 = vld [vmem:[%s8283_s7 + $0xee8] sm:$0xff]  ;;  %655 = vst [vmem:[%s8288_s8 + $0x768] sm:$0xff] %v654_v45 }
  0x91   : > { %657 = vst [vmem:[%s8288_s8 + $0x770] sm:$0xff] %v656_v46  ;;  %659 = vst [vmem:[%s8288_s8 + $0x778] sm:$0xff] %v658_v47  ;;  %v660_v48 = vld [vmem:[%s8283_s7 + $0xf00] sm:$0xff]  ;;  %v662_v49 = vld [vmem:[%s8283_s7 + $0xf08] sm:$0xff] }
  0x92   : > { %v664_v50 = vld [vmem:[%s8283_s7 + $0xf20] sm:$0xff]  ;;  %661 = vst [vmem:[%s8288_s8 + $0x780] sm:$0xff] %v660_v48  ;;  %663 = vst [vmem:[%s8288_s8 + $0x788] sm:$0xff] %v662_v49  ;;  %v666_v51 = vld [vmem:[%s8283_s7 + $0xf28] sm:$0xff] }
  0x93   : > { %665 = vst [vmem:[%s8288_s8 + $0x790] sm:$0xff] %v664_v50  ;;  %v668_v52 = vld [vmem:[%s8283_s7 + $0xf40] sm:$0xff]  ;;  %v670_v53 = vld [vmem:[%s8283_s7 + $0xf48] sm:$0xff]  ;;  %667 = vst [vmem:[%s8288_s8 + $0x798] sm:$0xff] %v666_v51 }
  0x94   : > { %669 = vst [vmem:[%s8288_s8 + $0x7a0] sm:$0xff] %v668_v52  ;;  %671 = vst [vmem:[%s8288_s8 + $0x7a8] sm:$0xff] %v670_v53  ;;  %v672_v54 = vld [vmem:[%s8283_s7 + $0xf60] sm:$0xff]  ;;  %v674_v55 = vld [vmem:[%s8283_s7 + $0xf68] sm:$0xff] }
  0x95   : > { %v676_v56 = vld [vmem:[%s8283_s7 + $0xf80] sm:$0xff]  ;;  %673 = vst [vmem:[%s8288_s8 + $0x7b0] sm:$0xff] %v672_v54  ;;  %675 = vst [vmem:[%s8288_s8 + $0x7b8] sm:$0xff] %v674_v55  ;;  %v678_v57 = vld [vmem:[%s8283_s7 + $0xf88] sm:$0xff] }
  0x96   : > { %677 = vst [vmem:[%s8288_s8 + $0x7c0] sm:$0xff] %v676_v56  ;;  %v680_v58 = vld [vmem:[%s8283_s7 + $0xfa0] sm:$0xff]  ;;  %v682_v59 = vld [vmem:[%s8283_s7 + $0xfa8] sm:$0xff]  ;;  %679 = vst [vmem:[%s8288_s8 + $0x7c8] sm:$0xff] %v678_v57 }
  0x97   : > { %681 = vst [vmem:[%s8288_s8 + $0x7d0] sm:$0xff] %v680_v58  ;;  %683 = vst [vmem:[%s8288_s8 + $0x7d8] sm:$0xff] %v682_v59  ;;  %v684_v60 = vld [vmem:[%s8283_s7 + $0xfc0] sm:$0xff]  ;;  %v686_v61 = vld [vmem:[%s8283_s7 + $0xfc8] sm:$0xff] }
  0x98   : > { %v688_v62 = vld [vmem:[%s8283_s7 + $0xfe0] sm:$0xff]  ;;  %685 = vst [vmem:[%s8288_s8 + $0x7e0] sm:$0xff] %v684_v60  ;;  %687 = vst [vmem:[%s8288_s8 + $0x7e8] sm:$0xff] %v686_v61  ;;  %v690_v63 = vld [vmem:[%s8283_s7 + $0xfe8] sm:$0xff] }
  0x99   : > { %689 = vst [vmem:[%s8288_s8 + $0x7f0] sm:$0xff] %v688_v62  ;;  %v692_v0 = vld [vmem:[%s8283_s7 + $0x1000] sm:$0xff]  ;;  %v694_v1 = vld [vmem:[%s8283_s7 + $0x1008] sm:$0xff]  ;;  %691 = vst [vmem:[%s8288_s8 + $0x7f8] sm:$0xff] %v690_v63 }
  0x9a   : > { %693 = vst [vmem:[%s8288_s8 + $0x800] sm:$0xff] %v692_v0  ;;  %695 = vst [vmem:[%s8288_s8 + $0x808] sm:$0xff] %v694_v1  ;;  %v696_v2 = vld [vmem:[%s8283_s7 + $0x1020] sm:$0xff]  ;;  %v698_v3 = vld [vmem:[%s8283_s7 + $0x1028] sm:$0xff] }
  0x9b   : > { %v700_v4 = vld [vmem:[%s8283_s7 + $0x1040] sm:$0xff]  ;;  %697 = vst [vmem:[%s8288_s8 + $0x810] sm:$0xff] %v696_v2  ;;  %699 = vst [vmem:[%s8288_s8 + $0x818] sm:$0xff] %v698_v3  ;;  %v702_v5 = vld [vmem:[%s8283_s7 + $0x1048] sm:$0xff] }
  0x9c   : > { %701 = vst [vmem:[%s8288_s8 + $0x820] sm:$0xff] %v700_v4  ;;  %v704_v6 = vld [vmem:[%s8283_s7 + $0x1060] sm:$0xff]  ;;  %v706_v7 = vld [vmem:[%s8283_s7 + $0x1068] sm:$0xff]  ;;  %703 = vst [vmem:[%s8288_s8 + $0x828] sm:$0xff] %v702_v5 }
  0x9d   : > { %705 = vst [vmem:[%s8288_s8 + $0x830] sm:$0xff] %v704_v6  ;;  %707 = vst [vmem:[%s8288_s8 + $0x838] sm:$0xff] %v706_v7  ;;  %v708_v8 = vld [vmem:[%s8283_s7 + $0x1080] sm:$0xff]  ;;  %v710_v9 = vld [vmem:[%s8283_s7 + $0x1088] sm:$0xff] }
  0x9e   : > { %v712_v10 = vld [vmem:[%s8283_s7 + $0x10a0] sm:$0xff]  ;;  %709 = vst [vmem:[%s8288_s8 + $0x840] sm:$0xff] %v708_v8  ;;  %711 = vst [vmem:[%s8288_s8 + $0x848] sm:$0xff] %v710_v9  ;;  %v714_v11 = vld [vmem:[%s8283_s7 + $0x10a8] sm:$0xff] }
  0x9f   : > { %713 = vst [vmem:[%s8288_s8 + $0x850] sm:$0xff] %v712_v10  ;;  %v716_v12 = vld [vmem:[%s8283_s7 + $0x10c0] sm:$0xff]  ;;  %v718_v13 = vld [vmem:[%s8283_s7 + $0x10c8] sm:$0xff]  ;;  %715 = vst [vmem:[%s8288_s8 + $0x858] sm:$0xff] %v714_v11 }
  0xa0   : > { %717 = vst [vmem:[%s8288_s8 + $0x860] sm:$0xff] %v716_v12  ;;  %719 = vst [vmem:[%s8288_s8 + $0x868] sm:$0xff] %v718_v13  ;;  %v720_v14 = vld [vmem:[%s8283_s7 + $0x10e0] sm:$0xff]  ;;  %v722_v15 = vld [vmem:[%s8283_s7 + $0x10e8] sm:$0xff] }
  0xa1   : > { %v724_v16 = vld [vmem:[%s8283_s7 + $0x1100] sm:$0xff]  ;;  %721 = vst [vmem:[%s8288_s8 + $0x870] sm:$0xff] %v720_v14  ;;  %723 = vst [vmem:[%s8288_s8 + $0x878] sm:$0xff] %v722_v15  ;;  %v726_v17 = vld [vmem:[%s8283_s7 + $0x1108] sm:$0xff] }
  0xa2   : > { %725 = vst [vmem:[%s8288_s8 + $0x880] sm:$0xff] %v724_v16  ;;  %v728_v18 = vld [vmem:[%s8283_s7 + $0x1120] sm:$0xff]  ;;  %v730_v19 = vld [vmem:[%s8283_s7 + $0x1128] sm:$0xff]  ;;  %727 = vst [vmem:[%s8288_s8 + $0x888] sm:$0xff] %v726_v17 }
  0xa3   : > { %729 = vst [vmem:[%s8288_s8 + $0x890] sm:$0xff] %v728_v18  ;;  %731 = vst [vmem:[%s8288_s8 + $0x898] sm:$0xff] %v730_v19  ;;  %v732_v20 = vld [vmem:[%s8283_s7 + $0x1140] sm:$0xff]  ;;  %v734_v21 = vld [vmem:[%s8283_s7 + $0x1148] sm:$0xff] }
  0xa4   : > { %v736_v22 = vld [vmem:[%s8283_s7 + $0x1160] sm:$0xff]  ;;  %733 = vst [vmem:[%s8288_s8 + $0x8a0] sm:$0xff] %v732_v20  ;;  %735 = vst [vmem:[%s8288_s8 + $0x8a8] sm:$0xff] %v734_v21  ;;  %v738_v23 = vld [vmem:[%s8283_s7 + $0x1168] sm:$0xff] }
  0xa5   : > { %737 = vst [vmem:[%s8288_s8 + $0x8b0] sm:$0xff] %v736_v22  ;;  %v740_v24 = vld [vmem:[%s8283_s7 + $0x1180] sm:$0xff]  ;;  %v742_v25 = vld [vmem:[%s8283_s7 + $0x1188] sm:$0xff]  ;;  %739 = vst [vmem:[%s8288_s8 + $0x8b8] sm:$0xff] %v738_v23 }
  0xa6   : > { %741 = vst [vmem:[%s8288_s8 + $0x8c0] sm:$0xff] %v740_v24  ;;  %743 = vst [vmem:[%s8288_s8 + $0x8c8] sm:$0xff] %v742_v25  ;;  %v744_v26 = vld [vmem:[%s8283_s7 + $0x11a0] sm:$0xff]  ;;  %v746_v27 = vld [vmem:[%s8283_s7 + $0x11a8] sm:$0xff] }
  0xa7   : > { %v748_v28 = vld [vmem:[%s8283_s7 + $0x11c0] sm:$0xff]  ;;  %745 = vst [vmem:[%s8288_s8 + $0x8d0] sm:$0xff] %v744_v26  ;;  %747 = vst [vmem:[%s8288_s8 + $0x8d8] sm:$0xff] %v746_v27  ;;  %v750_v29 = vld [vmem:[%s8283_s7 + $0x11c8] sm:$0xff] }
  0xa8   : > { %749 = vst [vmem:[%s8288_s8 + $0x8e0] sm:$0xff] %v748_v28  ;;  %v752_v30 = vld [vmem:[%s8283_s7 + $0x11e0] sm:$0xff]  ;;  %v754_v31 = vld [vmem:[%s8283_s7 + $0x11e8] sm:$0xff]  ;;  %751 = vst [vmem:[%s8288_s8 + $0x8e8] sm:$0xff] %v750_v29 }
  0xa9   : > { %753 = vst [vmem:[%s8288_s8 + $0x8f0] sm:$0xff] %v752_v30  ;;  %755 = vst [vmem:[%s8288_s8 + $0x8f8] sm:$0xff] %v754_v31  ;;  %v756_v32 = vld [vmem:[%s8283_s7 + $0x1200] sm:$0xff]  ;;  %v758_v33 = vld [vmem:[%s8283_s7 + $0x1208] sm:$0xff] }
  0xaa   : > { %v760_v34 = vld [vmem:[%s8283_s7 + $0x1220] sm:$0xff]  ;;  %757 = vst [vmem:[%s8288_s8 + $0x900] sm:$0xff] %v756_v32  ;;  %759 = vst [vmem:[%s8288_s8 + $0x908] sm:$0xff] %v758_v33  ;;  %v762_v35 = vld [vmem:[%s8283_s7 + $0x1228] sm:$0xff] }
  0xab   : > { %761 = vst [vmem:[%s8288_s8 + $0x910] sm:$0xff] %v760_v34  ;;  %v764_v36 = vld [vmem:[%s8283_s7 + $0x1240] sm:$0xff]  ;;  %v766_v37 = vld [vmem:[%s8283_s7 + $0x1248] sm:$0xff]  ;;  %763 = vst [vmem:[%s8288_s8 + $0x918] sm:$0xff] %v762_v35 }
  0xac   : > { %765 = vst [vmem:[%s8288_s8 + $0x920] sm:$0xff] %v764_v36  ;;  %767 = vst [vmem:[%s8288_s8 + $0x928] sm:$0xff] %v766_v37  ;;  %v768_v38 = vld [vmem:[%s8283_s7 + $0x1260] sm:$0xff]  ;;  %v770_v39 = vld [vmem:[%s8283_s7 + $0x1268] sm:$0xff] }
  0xad   : > { %v772_v40 = vld [vmem:[%s8283_s7 + $0x1280] sm:$0xff]  ;;  %769 = vst [vmem:[%s8288_s8 + $0x930] sm:$0xff] %v768_v38  ;;  %771 = vst [vmem:[%s8288_s8 + $0x938] sm:$0xff] %v770_v39  ;;  %v774_v41 = vld [vmem:[%s8283_s7 + $0x1288] sm:$0xff] }
  0xae   : > { %773 = vst [vmem:[%s8288_s8 + $0x940] sm:$0xff] %v772_v40  ;;  %v776_v42 = vld [vmem:[%s8283_s7 + $0x12a0] sm:$0xff]  ;;  %v778_v43 = vld [vmem:[%s8283_s7 + $0x12a8] sm:$0xff]  ;;  %775 = vst [vmem:[%s8288_s8 + $0x948] sm:$0xff] %v774_v41 }
  0xaf   : > { %777 = vst [vmem:[%s8288_s8 + $0x950] sm:$0xff] %v776_v42  ;;  %779 = vst [vmem:[%s8288_s8 + $0x958] sm:$0xff] %v778_v43  ;;  %v780_v44 = vld [vmem:[%s8283_s7 + $0x12c0] sm:$0xff]  ;;  %v782_v45 = vld [vmem:[%s8283_s7 + $0x12c8] sm:$0xff] }
  0xb0   : > { %v784_v46 = vld [vmem:[%s8283_s7 + $0x12e0] sm:$0xff]  ;;  %781 = vst [vmem:[%s8288_s8 + $0x960] sm:$0xff] %v780_v44  ;;  %783 = vst [vmem:[%s8288_s8 + $0x968] sm:$0xff] %v782_v45  ;;  %v786_v47 = vld [vmem:[%s8283_s7 + $0x12e8] sm:$0xff] }
  0xb1   : > { %785 = vst [vmem:[%s8288_s8 + $0x970] sm:$0xff] %v784_v46  ;;  %v788_v48 = vld [vmem:[%s8283_s7 + $0x1300] sm:$0xff]  ;;  %v790_v49 = vld [vmem:[%s8283_s7 + $0x1308] sm:$0xff]  ;;  %787 = vst [vmem:[%s8288_s8 + $0x978] sm:$0xff] %v786_v47 }
  0xb2   : > { %789 = vst [vmem:[%s8288_s8 + $0x980] sm:$0xff] %v788_v48  ;;  %791 = vst [vmem:[%s8288_s8 + $0x988] sm:$0xff] %v790_v49  ;;  %v792_v50 = vld [vmem:[%s8283_s7 + $0x1320] sm:$0xff]  ;;  %v794_v51 = vld [vmem:[%s8283_s7 + $0x1328] sm:$0xff] }
  0xb3   : > { %v796_v52 = vld [vmem:[%s8283_s7 + $0x1340] sm:$0xff]  ;;  %793 = vst [vmem:[%s8288_s8 + $0x990] sm:$0xff] %v792_v50  ;;  %795 = vst [vmem:[%s8288_s8 + $0x998] sm:$0xff] %v794_v51  ;;  %v798_v53 = vld [vmem:[%s8283_s7 + $0x1348] sm:$0xff] }
  0xb4   : > { %797 = vst [vmem:[%s8288_s8 + $0x9a0] sm:$0xff] %v796_v52  ;;  %v800_v54 = vld [vmem:[%s8283_s7 + $0x1360] sm:$0xff]  ;;  %v802_v55 = vld [vmem:[%s8283_s7 + $0x1368] sm:$0xff]  ;;  %799 = vst [vmem:[%s8288_s8 + $0x9a8] sm:$0xff] %v798_v53 }
  0xb5   : > { %801 = vst [vmem:[%s8288_s8 + $0x9b0] sm:$0xff] %v800_v54  ;;  %803 = vst [vmem:[%s8288_s8 + $0x9b8] sm:$0xff] %v802_v55  ;;  %v804_v56 = vld [vmem:[%s8283_s7 + $0x1380] sm:$0xff]  ;;  %v806_v57 = vld [vmem:[%s8283_s7 + $0x1388] sm:$0xff] }
  0xb6   : > { %v808_v58 = vld [vmem:[%s8283_s7 + $0x13a0] sm:$0xff]  ;;  %805 = vst [vmem:[%s8288_s8 + $0x9c0] sm:$0xff] %v804_v56  ;;  %807 = vst [vmem:[%s8288_s8 + $0x9c8] sm:$0xff] %v806_v57  ;;  %v810_v59 = vld [vmem:[%s8283_s7 + $0x13a8] sm:$0xff] }
  0xb7   : > { %809 = vst [vmem:[%s8288_s8 + $0x9d0] sm:$0xff] %v808_v58  ;;  %v812_v60 = vld [vmem:[%s8283_s7 + $0x13c0] sm:$0xff]  ;;  %v814_v61 = vld [vmem:[%s8283_s7 + $0x13c8] sm:$0xff]  ;;  %811 = vst [vmem:[%s8288_s8 + $0x9d8] sm:$0xff] %v810_v59 }
  0xb8   : > { %813 = vst [vmem:[%s8288_s8 + $0x9e0] sm:$0xff] %v812_v60  ;;  %815 = vst [vmem:[%s8288_s8 + $0x9e8] sm:$0xff] %v814_v61  ;;  %v816_v62 = vld [vmem:[%s8283_s7 + $0x13e0] sm:$0xff]  ;;  %v818_v63 = vld [vmem:[%s8283_s7 + $0x13e8] sm:$0xff] }
  0xb9   : > { %v820_v0 = vld [vmem:[%s8283_s7 + $0x1400] sm:$0xff]  ;;  %817 = vst [vmem:[%s8288_s8 + $0x9f0] sm:$0xff] %v816_v62  ;;  %819 = vst [vmem:[%s8288_s8 + $0x9f8] sm:$0xff] %v818_v63  ;;  %v822_v1 = vld [vmem:[%s8283_s7 + $0x1408] sm:$0xff] }
  0xba   : > { %821 = vst [vmem:[%s8288_s8 + $0xa00] sm:$0xff] %v820_v0  ;;  %v824_v2 = vld [vmem:[%s8283_s7 + $0x1420] sm:$0xff]  ;;  %v826_v3 = vld [vmem:[%s8283_s7 + $0x1428] sm:$0xff]  ;;  %823 = vst [vmem:[%s8288_s8 + $0xa08] sm:$0xff] %v822_v1 }
  0xbb   : > { %825 = vst [vmem:[%s8288_s8 + $0xa10] sm:$0xff] %v824_v2  ;;  %827 = vst [vmem:[%s8288_s8 + $0xa18] sm:$0xff] %v826_v3  ;;  %v828_v4 = vld [vmem:[%s8283_s7 + $0x1440] sm:$0xff]  ;;  %v830_v5 = vld [vmem:[%s8283_s7 + $0x1448] sm:$0xff] }
  0xbc   : > { %v832_v6 = vld [vmem:[%s8283_s7 + $0x1460] sm:$0xff]  ;;  %829 = vst [vmem:[%s8288_s8 + $0xa20] sm:$0xff] %v828_v4  ;;  %831 = vst [vmem:[%s8288_s8 + $0xa28] sm:$0xff] %v830_v5  ;;  %v834_v7 = vld [vmem:[%s8283_s7 + $0x1468] sm:$0xff] }
  0xbd   : > { %833 = vst [vmem:[%s8288_s8 + $0xa30] sm:$0xff] %v832_v6  ;;  %v836_v8 = vld [vmem:[%s8283_s7 + $0x1480] sm:$0xff]  ;;  %v838_v9 = vld [vmem:[%s8283_s7 + $0x1488] sm:$0xff]  ;;  %835 = vst [vmem:[%s8288_s8 + $0xa38] sm:$0xff] %v834_v7 }
  0xbe   : > { %837 = vst [vmem:[%s8288_s8 + $0xa40] sm:$0xff] %v836_v8  ;;  %839 = vst [vmem:[%s8288_s8 + $0xa48] sm:$0xff] %v838_v9  ;;  %v840_v10 = vld [vmem:[%s8283_s7 + $0x14a0] sm:$0xff]  ;;  %v842_v11 = vld [vmem:[%s8283_s7 + $0x14a8] sm:$0xff] }
  0xbf   : > { %v844_v12 = vld [vmem:[%s8283_s7 + $0x14c0] sm:$0xff]  ;;  %841 = vst [vmem:[%s8288_s8 + $0xa50] sm:$0xff] %v840_v10  ;;  %843 = vst [vmem:[%s8288_s8 + $0xa58] sm:$0xff] %v842_v11  ;;  %v846_v13 = vld [vmem:[%s8283_s7 + $0x14c8] sm:$0xff] }
  0xc0   : > { %845 = vst [vmem:[%s8288_s8 + $0xa60] sm:$0xff] %v844_v12  ;;  %v848_v14 = vld [vmem:[%s8283_s7 + $0x14e0] sm:$0xff]  ;;  %v850_v15 = vld [vmem:[%s8283_s7 + $0x14e8] sm:$0xff]  ;;  %847 = vst [vmem:[%s8288_s8 + $0xa68] sm:$0xff] %v846_v13 }
  0xc1   : > { %849 = vst [vmem:[%s8288_s8 + $0xa70] sm:$0xff] %v848_v14  ;;  %851 = vst [vmem:[%s8288_s8 + $0xa78] sm:$0xff] %v850_v15  ;;  %v852_v16 = vld [vmem:[%s8283_s7 + $0x1500] sm:$0xff]  ;;  %v854_v17 = vld [vmem:[%s8283_s7 + $0x1508] sm:$0xff] }
  0xc2   : > { %v856_v18 = vld [vmem:[%s8283_s7 + $0x1520] sm:$0xff]  ;;  %853 = vst [vmem:[%s8288_s8 + $0xa80] sm:$0xff] %v852_v16  ;;  %855 = vst [vmem:[%s8288_s8 + $0xa88] sm:$0xff] %v854_v17  ;;  %v858_v19 = vld [vmem:[%s8283_s7 + $0x1528] sm:$0xff] }
  0xc3   : > { %857 = vst [vmem:[%s8288_s8 + $0xa90] sm:$0xff] %v856_v18  ;;  %v860_v20 = vld [vmem:[%s8283_s7 + $0x1540] sm:$0xff]  ;;  %v862_v21 = vld [vmem:[%s8283_s7 + $0x1548] sm:$0xff]  ;;  %859 = vst [vmem:[%s8288_s8 + $0xa98] sm:$0xff] %v858_v19 }
  0xc4   : > { %861 = vst [vmem:[%s8288_s8 + $0xaa0] sm:$0xff] %v860_v20  ;;  %863 = vst [vmem:[%s8288_s8 + $0xaa8] sm:$0xff] %v862_v21  ;;  %v864_v22 = vld [vmem:[%s8283_s7 + $0x1560] sm:$0xff]  ;;  %v866_v23 = vld [vmem:[%s8283_s7 + $0x1568] sm:$0xff] }
  0xc5   : > { %v868_v24 = vld [vmem:[%s8283_s7 + $0x1580] sm:$0xff]  ;;  %865 = vst [vmem:[%s8288_s8 + $0xab0] sm:$0xff] %v864_v22  ;;  %867 = vst [vmem:[%s8288_s8 + $0xab8] sm:$0xff] %v866_v23  ;;  %v870_v25 = vld [vmem:[%s8283_s7 + $0x1588] sm:$0xff] }
  0xc6   : > { %869 = vst [vmem:[%s8288_s8 + $0xac0] sm:$0xff] %v868_v24  ;;  %v872_v26 = vld [vmem:[%s8283_s7 + $0x15a0] sm:$0xff]  ;;  %v874_v27 = vld [vmem:[%s8283_s7 + $0x15a8] sm:$0xff]  ;;  %871 = vst [vmem:[%s8288_s8 + $0xac8] sm:$0xff] %v870_v25 }
  0xc7   : > { %873 = vst [vmem:[%s8288_s8 + $0xad0] sm:$0xff] %v872_v26  ;;  %875 = vst [vmem:[%s8288_s8 + $0xad8] sm:$0xff] %v874_v27  ;;  %v876_v28 = vld [vmem:[%s8283_s7 + $0x15c0] sm:$0xff]  ;;  %v878_v29 = vld [vmem:[%s8283_s7 + $0x15c8] sm:$0xff] }
  0xc8   : > { %v880_v30 = vld [vmem:[%s8283_s7 + $0x15e0] sm:$0xff]  ;;  %877 = vst [vmem:[%s8288_s8 + $0xae0] sm:$0xff] %v876_v28  ;;  %879 = vst [vmem:[%s8288_s8 + $0xae8] sm:$0xff] %v878_v29  ;;  %v882_v31 = vld [vmem:[%s8283_s7 + $0x15e8] sm:$0xff] }
  0xc9   : > { %881 = vst [vmem:[%s8288_s8 + $0xaf0] sm:$0xff] %v880_v30  ;;  %v884_v32 = vld [vmem:[%s8283_s7 + $0x1600] sm:$0xff]  ;;  %v886_v33 = vld [vmem:[%s8283_s7 + $0x1608] sm:$0xff]  ;;  %883 = vst [vmem:[%s8288_s8 + $0xaf8] sm:$0xff] %v882_v31 }
  0xca   : > { %885 = vst [vmem:[%s8288_s8 + $0xb00] sm:$0xff] %v884_v32  ;;  %887 = vst [vmem:[%s8288_s8 + $0xb08] sm:$0xff] %v886_v33  ;;  %v888_v34 = vld [vmem:[%s8283_s7 + $0x1620] sm:$0xff]  ;;  %v890_v35 = vld [vmem:[%s8283_s7 + $0x1628] sm:$0xff] }
  0xcb   : > { %v892_v36 = vld [vmem:[%s8283_s7 + $0x1640] sm:$0xff]  ;;  %889 = vst [vmem:[%s8288_s8 + $0xb10] sm:$0xff] %v888_v34  ;;  %891 = vst [vmem:[%s8288_s8 + $0xb18] sm:$0xff] %v890_v35  ;;  %v894_v37 = vld [vmem:[%s8283_s7 + $0x1648] sm:$0xff] }
  0xcc   : > { %893 = vst [vmem:[%s8288_s8 + $0xb20] sm:$0xff] %v892_v36  ;;  %v896_v38 = vld [vmem:[%s8283_s7 + $0x1660] sm:$0xff]  ;;  %v898_v39 = vld [vmem:[%s8283_s7 + $0x1668] sm:$0xff]  ;;  %895 = vst [vmem:[%s8288_s8 + $0xb28] sm:$0xff] %v894_v37 }
  0xcd   : > { %897 = vst [vmem:[%s8288_s8 + $0xb30] sm:$0xff] %v896_v38  ;;  %899 = vst [vmem:[%s8288_s8 + $0xb38] sm:$0xff] %v898_v39  ;;  %v900_v40 = vld [vmem:[%s8283_s7 + $0x1680] sm:$0xff]  ;;  %v902_v41 = vld [vmem:[%s8283_s7 + $0x1688] sm:$0xff] }
  0xce   : > { %v904_v42 = vld [vmem:[%s8283_s7 + $0x16a0] sm:$0xff]  ;;  %901 = vst [vmem:[%s8288_s8 + $0xb40] sm:$0xff] %v900_v40  ;;  %903 = vst [vmem:[%s8288_s8 + $0xb48] sm:$0xff] %v902_v41  ;;  %v906_v43 = vld [vmem:[%s8283_s7 + $0x16a8] sm:$0xff] }
  0xcf   : > { %905 = vst [vmem:[%s8288_s8 + $0xb50] sm:$0xff] %v904_v42  ;;  %v908_v44 = vld [vmem:[%s8283_s7 + $0x16c0] sm:$0xff]  ;;  %v910_v45 = vld [vmem:[%s8283_s7 + $0x16c8] sm:$0xff]  ;;  %907 = vst [vmem:[%s8288_s8 + $0xb58] sm:$0xff] %v906_v43 }
  0xd0   : > { %909 = vst [vmem:[%s8288_s8 + $0xb60] sm:$0xff] %v908_v44  ;;  %911 = vst [vmem:[%s8288_s8 + $0xb68] sm:$0xff] %v910_v45  ;;  %v912_v46 = vld [vmem:[%s8283_s7 + $0x16e0] sm:$0xff]  ;;  %v914_v47 = vld [vmem:[%s8283_s7 + $0x16e8] sm:$0xff] }
  0xd1   : > { %v916_v48 = vld [vmem:[%s8283_s7 + $0x1700] sm:$0xff]  ;;  %913 = vst [vmem:[%s8288_s8 + $0xb70] sm:$0xff] %v912_v46  ;;  %915 = vst [vmem:[%s8288_s8 + $0xb78] sm:$0xff] %v914_v47  ;;  %v918_v49 = vld [vmem:[%s8283_s7 + $0x1708] sm:$0xff] }
  0xd2   : > { %917 = vst [vmem:[%s8288_s8 + $0xb80] sm:$0xff] %v916_v48  ;;  %v920_v50 = vld [vmem:[%s8283_s7 + $0x1720] sm:$0xff]  ;;  %v922_v51 = vld [vmem:[%s8283_s7 + $0x1728] sm:$0xff]  ;;  %919 = vst [vmem:[%s8288_s8 + $0xb88] sm:$0xff] %v918_v49 }
  0xd3   : > { %921 = vst [vmem:[%s8288_s8 + $0xb90] sm:$0xff] %v920_v50  ;;  %923 = vst [vmem:[%s8288_s8 + $0xb98] sm:$0xff] %v922_v51  ;;  %v924_v52 = vld [vmem:[%s8283_s7 + $0x1740] sm:$0xff]  ;;  %v926_v53 = vld [vmem:[%s8283_s7 + $0x1748] sm:$0xff] }
  0xd4   : > { %v928_v54 = vld [vmem:[%s8283_s7 + $0x1760] sm:$0xff]  ;;  %925 = vst [vmem:[%s8288_s8 + $0xba0] sm:$0xff] %v924_v52  ;;  %927 = vst [vmem:[%s8288_s8 + $0xba8] sm:$0xff] %v926_v53  ;;  %v930_v55 = vld [vmem:[%s8283_s7 + $0x1768] sm:$0xff] }
  0xd5   : > { %929 = vst [vmem:[%s8288_s8 + $0xbb0] sm:$0xff] %v928_v54  ;;  %v932_v56 = vld [vmem:[%s8283_s7 + $0x1780] sm:$0xff]  ;;  %v934_v57 = vld [vmem:[%s8283_s7 + $0x1788] sm:$0xff]  ;;  %931 = vst [vmem:[%s8288_s8 + $0xbb8] sm:$0xff] %v930_v55 }
  0xd6   : > { %933 = vst [vmem:[%s8288_s8 + $0xbc0] sm:$0xff] %v932_v56  ;;  %935 = vst [vmem:[%s8288_s8 + $0xbc8] sm:$0xff] %v934_v57  ;;  %v936_v58 = vld [vmem:[%s8283_s7 + $0x17a0] sm:$0xff]  ;;  %v938_v59 = vld [vmem:[%s8283_s7 + $0x17a8] sm:$0xff] }
  0xd7   : > { %v940_v60 = vld [vmem:[%s8283_s7 + $0x17c0] sm:$0xff]  ;;  %937 = vst [vmem:[%s8288_s8 + $0xbd0] sm:$0xff] %v936_v58  ;;  %939 = vst [vmem:[%s8288_s8 + $0xbd8] sm:$0xff] %v938_v59  ;;  %v942_v61 = vld [vmem:[%s8283_s7 + $0x17c8] sm:$0xff] }
  0xd8   : > { %941 = vst [vmem:[%s8288_s8 + $0xbe0] sm:$0xff] %v940_v60  ;;  %v944_v62 = vld [vmem:[%s8283_s7 + $0x17e0] sm:$0xff]  ;;  %v946_v63 = vld [vmem:[%s8283_s7 + $0x17e8] sm:$0xff]  ;;  %943 = vst [vmem:[%s8288_s8 + $0xbe8] sm:$0xff] %v942_v61 }
  0xd9   : > { %945 = vst [vmem:[%s8288_s8 + $0xbf0] sm:$0xff] %v944_v62  ;;  %947 = vst [vmem:[%s8288_s8 + $0xbf8] sm:$0xff] %v946_v63  ;;  %v948_v0 = vld [vmem:[%s8283_s7 + $0x1800] sm:$0xff]  ;;  %v950_v1 = vld [vmem:[%s8283_s7 + $0x1808] sm:$0xff] }
  0xda   : > { %v952_v2 = vld [vmem:[%s8283_s7 + $0x1820] sm:$0xff]  ;;  %949 = vst [vmem:[%s8288_s8 + $0xc00] sm:$0xff] %v948_v0  ;;  %951 = vst [vmem:[%s8288_s8 + $0xc08] sm:$0xff] %v950_v1  ;;  %v954_v3 = vld [vmem:[%s8283_s7 + $0x1828] sm:$0xff] }
  0xdb   : > { %953 = vst [vmem:[%s8288_s8 + $0xc10] sm:$0xff] %v952_v2  ;;  %v956_v4 = vld [vmem:[%s8283_s7 + $0x1840] sm:$0xff]  ;;  %v958_v5 = vld [vmem:[%s8283_s7 + $0x1848] sm:$0xff]  ;;  %955 = vst [vmem:[%s8288_s8 + $0xc18] sm:$0xff] %v954_v3 }
  0xdc   : > { %957 = vst [vmem:[%s8288_s8 + $0xc20] sm:$0xff] %v956_v4  ;;  %959 = vst [vmem:[%s8288_s8 + $0xc28] sm:$0xff] %v958_v5  ;;  %v960_v6 = vld [vmem:[%s8283_s7 + $0x1860] sm:$0xff]  ;;  %v962_v7 = vld [vmem:[%s8283_s7 + $0x1868] sm:$0xff] }
  0xdd   : > { %v964_v8 = vld [vmem:[%s8283_s7 + $0x1880] sm:$0xff]  ;;  %961 = vst [vmem:[%s8288_s8 + $0xc30] sm:$0xff] %v960_v6  ;;  %963 = vst [vmem:[%s8288_s8 + $0xc38] sm:$0xff] %v962_v7  ;;  %v966_v9 = vld [vmem:[%s8283_s7 + $0x1888] sm:$0xff] }
  0xde   : > { %965 = vst [vmem:[%s8288_s8 + $0xc40] sm:$0xff] %v964_v8  ;;  %v968_v10 = vld [vmem:[%s8283_s7 + $0x18a0] sm:$0xff]  ;;  %v970_v11 = vld [vmem:[%s8283_s7 + $0x18a8] sm:$0xff]  ;;  %967 = vst [vmem:[%s8288_s8 + $0xc48] sm:$0xff] %v966_v9 }
  0xdf   : > { %969 = vst [vmem:[%s8288_s8 + $0xc50] sm:$0xff] %v968_v10  ;;  %971 = vst [vmem:[%s8288_s8 + $0xc58] sm:$0xff] %v970_v11  ;;  %v972_v12 = vld [vmem:[%s8283_s7 + $0x18c0] sm:$0xff]  ;;  %v974_v13 = vld [vmem:[%s8283_s7 + $0x18c8] sm:$0xff] }
  0xe0   : > { %v976_v14 = vld [vmem:[%s8283_s7 + $0x18e0] sm:$0xff]  ;;  %973 = vst [vmem:[%s8288_s8 + $0xc60] sm:$0xff] %v972_v12  ;;  %975 = vst [vmem:[%s8288_s8 + $0xc68] sm:$0xff] %v974_v13  ;;  %v978_v15 = vld [vmem:[%s8283_s7 + $0x18e8] sm:$0xff] }
  0xe1   : > { %977 = vst [vmem:[%s8288_s8 + $0xc70] sm:$0xff] %v976_v14  ;;  %v980_v16 = vld [vmem:[%s8283_s7 + $0x1900] sm:$0xff]  ;;  %v982_v17 = vld [vmem:[%s8283_s7 + $0x1908] sm:$0xff]  ;;  %979 = vst [vmem:[%s8288_s8 + $0xc78] sm:$0xff] %v978_v15 }
  0xe2   : > { %981 = vst [vmem:[%s8288_s8 + $0xc80] sm:$0xff] %v980_v16  ;;  %983 = vst [vmem:[%s8288_s8 + $0xc88] sm:$0xff] %v982_v17  ;;  %v984_v18 = vld [vmem:[%s8283_s7 + $0x1920] sm:$0xff]  ;;  %v986_v19 = vld [vmem:[%s8283_s7 + $0x1928] sm:$0xff] }
  0xe3   : > { %v988_v20 = vld [vmem:[%s8283_s7 + $0x1940] sm:$0xff]  ;;  %985 = vst [vmem:[%s8288_s8 + $0xc90] sm:$0xff] %v984_v18  ;;  %987 = vst [vmem:[%s8288_s8 + $0xc98] sm:$0xff] %v986_v19  ;;  %v990_v21 = vld [vmem:[%s8283_s7 + $0x1948] sm:$0xff] }
  0xe4   : > { %989 = vst [vmem:[%s8288_s8 + $0xca0] sm:$0xff] %v988_v20  ;;  %v992_v22 = vld [vmem:[%s8283_s7 + $0x1960] sm:$0xff]  ;;  %v994_v23 = vld [vmem:[%s8283_s7 + $0x1968] sm:$0xff]  ;;  %991 = vst [vmem:[%s8288_s8 + $0xca8] sm:$0xff] %v990_v21 }
  0xe5   : > { %993 = vst [vmem:[%s8288_s8 + $0xcb0] sm:$0xff] %v992_v22  ;;  %995 = vst [vmem:[%s8288_s8 + $0xcb8] sm:$0xff] %v994_v23  ;;  %v996_v24 = vld [vmem:[%s8283_s7 + $0x1980] sm:$0xff]  ;;  %v998_v25 = vld [vmem:[%s8283_s7 + $0x1988] sm:$0xff] }
  0xe6   : > { %v1000_v26 = vld [vmem:[%s8283_s7 + $0x19a0] sm:$0xff]  ;;  %997 = vst [vmem:[%s8288_s8 + $0xcc0] sm:$0xff] %v996_v24  ;;  %999 = vst [vmem:[%s8288_s8 + $0xcc8] sm:$0xff] %v998_v25  ;;  %v1002_v27 = vld [vmem:[%s8283_s7 + $0x19a8] sm:$0xff] }
  0xe7   : > { %1001 = vst [vmem:[%s8288_s8 + $0xcd0] sm:$0xff] %v1000_v26  ;;  %v1004_v28 = vld [vmem:[%s8283_s7 + $0x19c0] sm:$0xff]  ;;  %v1006_v29 = vld [vmem:[%s8283_s7 + $0x19c8] sm:$0xff]  ;;  %1003 = vst [vmem:[%s8288_s8 + $0xcd8] sm:$0xff] %v1002_v27 }
  0xe8   : > { %1005 = vst [vmem:[%s8288_s8 + $0xce0] sm:$0xff] %v1004_v28  ;;  %1007 = vst [vmem:[%s8288_s8 + $0xce8] sm:$0xff] %v1006_v29  ;;  %v1008_v30 = vld [vmem:[%s8283_s7 + $0x19e0] sm:$0xff]  ;;  %v1010_v31 = vld [vmem:[%s8283_s7 + $0x19e8] sm:$0xff] }
  0xe9   : > { %v1012_v32 = vld [vmem:[%s8283_s7 + $0x1a00] sm:$0xff]  ;;  %1009 = vst [vmem:[%s8288_s8 + $0xcf0] sm:$0xff] %v1008_v30  ;;  %1011 = vst [vmem:[%s8288_s8 + $0xcf8] sm:$0xff] %v1010_v31  ;;  %v1014_v33 = vld [vmem:[%s8283_s7 + $0x1a08] sm:$0xff] }
  0xea   : > { %1013 = vst [vmem:[%s8288_s8 + $0xd00] sm:$0xff] %v1012_v32  ;;  %v1016_v34 = vld [vmem:[%s8283_s7 + $0x1a20] sm:$0xff]  ;;  %v1018_v35 = vld [vmem:[%s8283_s7 + $0x1a28] sm:$0xff]  ;;  %1015 = vst [vmem:[%s8288_s8 + $0xd08] sm:$0xff] %v1014_v33 }
  0xeb   : > { %1017 = vst [vmem:[%s8288_s8 + $0xd10] sm:$0xff] %v1016_v34  ;;  %1019 = vst [vmem:[%s8288_s8 + $0xd18] sm:$0xff] %v1018_v35  ;;  %v1020_v36 = vld [vmem:[%s8283_s7 + $0x1a40] sm:$0xff]  ;;  %v1022_v37 = vld [vmem:[%s8283_s7 + $0x1a48] sm:$0xff] }
  0xec   : > { %v1024_v38 = vld [vmem:[%s8283_s7 + $0x1a60] sm:$0xff]  ;;  %1021 = vst [vmem:[%s8288_s8 + $0xd20] sm:$0xff] %v1020_v36  ;;  %1023 = vst [vmem:[%s8288_s8 + $0xd28] sm:$0xff] %v1022_v37  ;;  %v1026_v39 = vld [vmem:[%s8283_s7 + $0x1a68] sm:$0xff] }
  0xed   : > { %1025 = vst [vmem:[%s8288_s8 + $0xd30] sm:$0xff] %v1024_v38  ;;  %v1028_v40 = vld [vmem:[%s8283_s7 + $0x1a80] sm:$0xff]  ;;  %v1030_v41 = vld [vmem:[%s8283_s7 + $0x1a88] sm:$0xff]  ;;  %1027 = vst [vmem:[%s8288_s8 + $0xd38] sm:$0xff] %v1026_v39 }
  0xee   : > { %1029 = vst [vmem:[%s8288_s8 + $0xd40] sm:$0xff] %v1028_v40  ;;  %1031 = vst [vmem:[%s8288_s8 + $0xd48] sm:$0xff] %v1030_v41  ;;  %v1032_v42 = vld [vmem:[%s8283_s7 + $0x1aa0] sm:$0xff]  ;;  %v1034_v43 = vld [vmem:[%s8283_s7 + $0x1aa8] sm:$0xff] }
  0xef   : > { %v1036_v44 = vld [vmem:[%s8283_s7 + $0x1ac0] sm:$0xff]  ;;  %1033 = vst [vmem:[%s8288_s8 + $0xd50] sm:$0xff] %v1032_v42  ;;  %1035 = vst [vmem:[%s8288_s8 + $0xd58] sm:$0xff] %v1034_v43  ;;  %v1038_v45 = vld [vmem:[%s8283_s7 + $0x1ac8] sm:$0xff] }
  0xf0   : > { %1037 = vst [vmem:[%s8288_s8 + $0xd60] sm:$0xff] %v1036_v44  ;;  %v1040_v46 = vld [vmem:[%s8283_s7 + $0x1ae0] sm:$0xff]  ;;  %v1042_v47 = vld [vmem:[%s8283_s7 + $0x1ae8] sm:$0xff]  ;;  %1039 = vst [vmem:[%s8288_s8 + $0xd68] sm:$0xff] %v1038_v45 }
  0xf1   : > { %1041 = vst [vmem:[%s8288_s8 + $0xd70] sm:$0xff] %v1040_v46  ;;  %1043 = vst [vmem:[%s8288_s8 + $0xd78] sm:$0xff] %v1042_v47  ;;  %v1044_v48 = vld [vmem:[%s8283_s7 + $0x1b00] sm:$0xff]  ;;  %v1046_v49 = vld [vmem:[%s8283_s7 + $0x1b08] sm:$0xff] }
  0xf2   : > { %v1048_v50 = vld [vmem:[%s8283_s7 + $0x1b20] sm:$0xff]  ;;  %1045 = vst [vmem:[%s8288_s8 + $0xd80] sm:$0xff] %v1044_v48  ;;  %1047 = vst [vmem:[%s8288_s8 + $0xd88] sm:$0xff] %v1046_v49  ;;  %v1050_v51 = vld [vmem:[%s8283_s7 + $0x1b28] sm:$0xff] }
  0xf3   : > { %1049 = vst [vmem:[%s8288_s8 + $0xd90] sm:$0xff] %v1048_v50  ;;  %v1052_v52 = vld [vmem:[%s8283_s7 + $0x1b40] sm:$0xff]  ;;  %v1054_v53 = vld [vmem:[%s8283_s7 + $0x1b48] sm:$0xff]  ;;  %1051 = vst [vmem:[%s8288_s8 + $0xd98] sm:$0xff] %v1050_v51 }
  0xf4   : > { %1053 = vst [vmem:[%s8288_s8 + $0xda0] sm:$0xff] %v1052_v52  ;;  %1055 = vst [vmem:[%s8288_s8 + $0xda8] sm:$0xff] %v1054_v53  ;;  %v1056_v54 = vld [vmem:[%s8283_s7 + $0x1b60] sm:$0xff]  ;;  %v1058_v55 = vld [vmem:[%s8283_s7 + $0x1b68] sm:$0xff] }
  0xf5   : > { %v1060_v56 = vld [vmem:[%s8283_s7 + $0x1b80] sm:$0xff]  ;;  %1057 = vst [vmem:[%s8288_s8 + $0xdb0] sm:$0xff] %v1056_v54  ;;  %1059 = vst [vmem:[%s8288_s8 + $0xdb8] sm:$0xff] %v1058_v55  ;;  %v1062_v57 = vld [vmem:[%s8283_s7 + $0x1b88] sm:$0xff] }
  0xf6   : > { %1061 = vst [vmem:[%s8288_s8 + $0xdc0] sm:$0xff] %v1060_v56  ;;  %v1064_v58 = vld [vmem:[%s8283_s7 + $0x1ba0] sm:$0xff]  ;;  %v1066_v59 = vld [vmem:[%s8283_s7 + $0x1ba8] sm:$0xff]  ;;  %1063 = vst [vmem:[%s8288_s8 + $0xdc8] sm:$0xff] %v1062_v57 }
  0xf7   : > { %1065 = vst [vmem:[%s8288_s8 + $0xdd0] sm:$0xff] %v1064_v58  ;;  %1067 = vst [vmem:[%s8288_s8 + $0xdd8] sm:$0xff] %v1066_v59  ;;  %v1068_v60 = vld [vmem:[%s8283_s7 + $0x1bc0] sm:$0xff]  ;;  %v1070_v61 = vld [vmem:[%s8283_s7 + $0x1bc8] sm:$0xff] }
  0xf8   : > { %v1072_v62 = vld [vmem:[%s8283_s7 + $0x1be0] sm:$0xff]  ;;  %1069 = vst [vmem:[%s8288_s8 + $0xde0] sm:$0xff] %v1068_v60  ;;  %1071 = vst [vmem:[%s8288_s8 + $0xde8] sm:$0xff] %v1070_v61  ;;  %v1074_v63 = vld [vmem:[%s8283_s7 + $0x1be8] sm:$0xff] }
  0xf9   : > { %1073 = vst [vmem:[%s8288_s8 + $0xdf0] sm:$0xff] %v1072_v62  ;;  %v1076_v0 = vld [vmem:[%s8283_s7 + $0x1c00] sm:$0xff]  ;;  %v1078_v1 = vld [vmem:[%s8283_s7 + $0x1c08] sm:$0xff]  ;;  %1075 = vst [vmem:[%s8288_s8 + $0xdf8] sm:$0xff] %v1074_v63 }
  0xfa   : > { %1077 = vst [vmem:[%s8288_s8 + $0xe00] sm:$0xff] %v1076_v0  ;;  %1079 = vst [vmem:[%s8288_s8 + $0xe08] sm:$0xff] %v1078_v1  ;;  %v1080_v2 = vld [vmem:[%s8283_s7 + $0x1c20] sm:$0xff]  ;;  %v1082_v3 = vld [vmem:[%s8283_s7 + $0x1c28] sm:$0xff] }
  0xfb   : > { %v1084_v4 = vld [vmem:[%s8283_s7 + $0x1c40] sm:$0xff]  ;;  %1081 = vst [vmem:[%s8288_s8 + $0xe10] sm:$0xff] %v1080_v2  ;;  %1083 = vst [vmem:[%s8288_s8 + $0xe18] sm:$0xff] %v1082_v3  ;;  %v1086_v5 = vld [vmem:[%s8283_s7 + $0x1c48] sm:$0xff] }
  0xfc   : > { %1085 = vst [vmem:[%s8288_s8 + $0xe20] sm:$0xff] %v1084_v4  ;;  %v1088_v6 = vld [vmem:[%s8283_s7 + $0x1c60] sm:$0xff]  ;;  %v1090_v7 = vld [vmem:[%s8283_s7 + $0x1c68] sm:$0xff]  ;;  %1087 = vst [vmem:[%s8288_s8 + $0xe28] sm:$0xff] %v1086_v5 }
  0xfd   : > { %1089 = vst [vmem:[%s8288_s8 + $0xe30] sm:$0xff] %v1088_v6  ;;  %1091 = vst [vmem:[%s8288_s8 + $0xe38] sm:$0xff] %v1090_v7  ;;  %v1092_v8 = vld [vmem:[%s8283_s7 + $0x1c80] sm:$0xff]  ;;  %v1094_v9 = vld [vmem:[%s8283_s7 + $0x1c88] sm:$0xff] }
  0xfe   : > { %v1096_v10 = vld [vmem:[%s8283_s7 + $0x1ca0] sm:$0xff]  ;;  %1093 = vst [vmem:[%s8288_s8 + $0xe40] sm:$0xff] %v1092_v8  ;;  %1095 = vst [vmem:[%s8288_s8 + $0xe48] sm:$0xff] %v1094_v9  ;;  %v1098_v11 = vld [vmem:[%s8283_s7 + $0x1ca8] sm:$0xff] }
  0xff   : > { %1097 = vst [vmem:[%s8288_s8 + $0xe50] sm:$0xff] %v1096_v10  ;;  %v1100_v12 = vld [vmem:[%s8283_s7 + $0x1cc0] sm:$0xff]  ;;  %v1102_v13 = vld [vmem:[%s8283_s7 + $0x1cc8] sm:$0xff]  ;;  %1099 = vst [vmem:[%s8288_s8 + $0xe58] sm:$0xff] %v1098_v11 }
 0x100   : > { %1101 = vst [vmem:[%s8288_s8 + $0xe60] sm:$0xff] %v1100_v12  ;;  %1103 = vst [vmem:[%s8288_s8 + $0xe68] sm:$0xff] %v1102_v13  ;;  %v1104_v14 = vld [vmem:[%s8283_s7 + $0x1ce0] sm:$0xff]  ;;  %v1106_v15 = vld [vmem:[%s8283_s7 + $0x1ce8] sm:$0xff] }
 0x101   : > { %v1108_v16 = vld [vmem:[%s8283_s7 + $0x1d00] sm:$0xff]  ;;  %1105 = vst [vmem:[%s8288_s8 + $0xe70] sm:$0xff] %v1104_v14  ;;  %1107 = vst [vmem:[%s8288_s8 + $0xe78] sm:$0xff] %v1106_v15  ;;  %v1110_v17 = vld [vmem:[%s8283_s7 + $0x1d08] sm:$0xff] }
 0x102   : > { %1109 = vst [vmem:[%s8288_s8 + $0xe80] sm:$0xff] %v1108_v16  ;;  %v1112_v18 = vld [vmem:[%s8283_s7 + $0x1d20] sm:$0xff]  ;;  %v1114_v19 = vld [vmem:[%s8283_s7 + $0x1d28] sm:$0xff]  ;;  %1111 = vst [vmem:[%s8288_s8 + $0xe88] sm:$0xff] %v1110_v17 }
 0x103   : > { %1113 = vst [vmem:[%s8288_s8 + $0xe90] sm:$0xff] %v1112_v18  ;;  %1115 = vst [vmem:[%s8288_s8 + $0xe98] sm:$0xff] %v1114_v19  ;;  %v1116_v20 = vld [vmem:[%s8283_s7 + $0x1d40] sm:$0xff]  ;;  %v1118_v21 = vld [vmem:[%s8283_s7 + $0x1d48] sm:$0xff] }
 0x104   : > { %v1120_v22 = vld [vmem:[%s8283_s7 + $0x1d60] sm:$0xff]  ;;  %1117 = vst [vmem:[%s8288_s8 + $0xea0] sm:$0xff] %v1116_v20  ;;  %1119 = vst [vmem:[%s8288_s8 + $0xea8] sm:$0xff] %v1118_v21  ;;  %v1122_v23 = vld [vmem:[%s8283_s7 + $0x1d68] sm:$0xff] }
 0x105   : > { %1121 = vst [vmem:[%s8288_s8 + $0xeb0] sm:$0xff] %v1120_v22  ;;  %v1124_v24 = vld [vmem:[%s8283_s7 + $0x1d80] sm:$0xff]  ;;  %v1126_v25 = vld [vmem:[%s8283_s7 + $0x1d88] sm:$0xff]  ;;  %1123 = vst [vmem:[%s8288_s8 + $0xeb8] sm:$0xff] %v1122_v23 }
 0x106   : > { %1125 = vst [vmem:[%s8288_s8 + $0xec0] sm:$0xff] %v1124_v24  ;;  %1127 = vst [vmem:[%s8288_s8 + $0xec8] sm:$0xff] %v1126_v25  ;;  %v1128_v26 = vld [vmem:[%s8283_s7 + $0x1da0] sm:$0xff]  ;;  %v1130_v27 = vld [vmem:[%s8283_s7 + $0x1da8] sm:$0xff] }
 0x107   : > { %v1132_v28 = vld [vmem:[%s8283_s7 + $0x1dc0] sm:$0xff]  ;;  %1129 = vst [vmem:[%s8288_s8 + $0xed0] sm:$0xff] %v1128_v26  ;;  %1131 = vst [vmem:[%s8288_s8 + $0xed8] sm:$0xff] %v1130_v27  ;;  %v1134_v29 = vld [vmem:[%s8283_s7 + $0x1dc8] sm:$0xff] }
 0x108   : > { %1133 = vst [vmem:[%s8288_s8 + $0xee0] sm:$0xff] %v1132_v28  ;;  %v1136_v30 = vld [vmem:[%s8283_s7 + $0x1de0] sm:$0xff]  ;;  %v1138_v31 = vld [vmem:[%s8283_s7 + $0x1de8] sm:$0xff]  ;;  %1135 = vst [vmem:[%s8288_s8 + $0xee8] sm:$0xff] %v1134_v29 }
 0x109   : > { %1137 = vst [vmem:[%s8288_s8 + $0xef0] sm:$0xff] %v1136_v30  ;;  %1139 = vst [vmem:[%s8288_s8 + $0xef8] sm:$0xff] %v1138_v31  ;;  %v1140_v32 = vld [vmem:[%s8283_s7 + $0x1e00] sm:$0xff]  ;;  %v1142_v33 = vld [vmem:[%s8283_s7 + $0x1e08] sm:$0xff] }
 0x10a   : > { %v1144_v34 = vld [vmem:[%s8283_s7 + $0x1e20] sm:$0xff]  ;;  %1141 = vst [vmem:[%s8288_s8 + $0xf00] sm:$0xff] %v1140_v32  ;;  %1143 = vst [vmem:[%s8288_s8 + $0xf08] sm:$0xff] %v1142_v33  ;;  %v1146_v35 = vld [vmem:[%s8283_s7 + $0x1e28] sm:$0xff] }
 0x10b   : > { %1145 = vst [vmem:[%s8288_s8 + $0xf10] sm:$0xff] %v1144_v34  ;;  %v1148_v36 = vld [vmem:[%s8283_s7 + $0x1e40] sm:$0xff]  ;;  %v1150_v37 = vld [vmem:[%s8283_s7 + $0x1e48] sm:$0xff]  ;;  %1147 = vst [vmem:[%s8288_s8 + $0xf18] sm:$0xff] %v1146_v35 }
 0x10c   : > { %1149 = vst [vmem:[%s8288_s8 + $0xf20] sm:$0xff] %v1148_v36  ;;  %1151 = vst [vmem:[%s8288_s8 + $0xf28] sm:$0xff] %v1150_v37  ;;  %v1152_v38 = vld [vmem:[%s8283_s7 + $0x1e60] sm:$0xff]  ;;  %v1154_v39 = vld [vmem:[%s8283_s7 + $0x1e68] sm:$0xff] }
 0x10d   : > { %v1156_v40 = vld [vmem:[%s8283_s7 + $0x1e80] sm:$0xff]  ;;  %1153 = vst [vmem:[%s8288_s8 + $0xf30] sm:$0xff] %v1152_v38  ;;  %1155 = vst [vmem:[%s8288_s8 + $0xf38] sm:$0xff] %v1154_v39  ;;  %v1158_v41 = vld [vmem:[%s8283_s7 + $0x1e88] sm:$0xff] }
 0x10e   : > { %1157 = vst [vmem:[%s8288_s8 + $0xf40] sm:$0xff] %v1156_v40  ;;  %v1160_v42 = vld [vmem:[%s8283_s7 + $0x1ea0] sm:$0xff]  ;;  %v1162_v43 = vld [vmem:[%s8283_s7 + $0x1ea8] sm:$0xff]  ;;  %1159 = vst [vmem:[%s8288_s8 + $0xf48] sm:$0xff] %v1158_v41 }
 0x10f   : > { %1161 = vst [vmem:[%s8288_s8 + $0xf50] sm:$0xff] %v1160_v42  ;;  %1163 = vst [vmem:[%s8288_s8 + $0xf58] sm:$0xff] %v1162_v43  ;;  %v1164_v44 = vld [vmem:[%s8283_s7 + $0x1ec0] sm:$0xff]  ;;  %v1166_v45 = vld [vmem:[%s8283_s7 + $0x1ec8] sm:$0xff] }
 0x110   : > { %v1168_v46 = vld [vmem:[%s8283_s7 + $0x1ee0] sm:$0xff]  ;;  %1165 = vst [vmem:[%s8288_s8 + $0xf60] sm:$0xff] %v1164_v44  ;;  %1167 = vst [vmem:[%s8288_s8 + $0xf68] sm:$0xff] %v1166_v45  ;;  %v1170_v47 = vld [vmem:[%s8283_s7 + $0x1ee8] sm:$0xff] }
 0x111   : > { %1169 = vst [vmem:[%s8288_s8 + $0xf70] sm:$0xff] %v1168_v46  ;;  %v1172_v48 = vld [vmem:[%s8283_s7 + $0x1f00] sm:$0xff]  ;;  %v1174_v49 = vld [vmem:[%s8283_s7 + $0x1f08] sm:$0xff]  ;;  %1171 = vst [vmem:[%s8288_s8 + $0xf78] sm:$0xff] %v1170_v47 }
 0x112   : > { %1173 = vst [vmem:[%s8288_s8 + $0xf80] sm:$0xff] %v1172_v48  ;;  %1175 = vst [vmem:[%s8288_s8 + $0xf88] sm:$0xff] %v1174_v49  ;;  %v1176_v50 = vld [vmem:[%s8283_s7 + $0x1f20] sm:$0xff]  ;;  %v1178_v51 = vld [vmem:[%s8283_s7 + $0x1f28] sm:$0xff] }
 0x113   : > { %v1180_v52 = vld [vmem:[%s8283_s7 + $0x1f40] sm:$0xff]  ;;  %1177 = vst [vmem:[%s8288_s8 + $0xf90] sm:$0xff] %v1176_v50  ;;  %1179 = vst [vmem:[%s8288_s8 + $0xf98] sm:$0xff] %v1178_v51  ;;  %v1182_v53 = vld [vmem:[%s8283_s7 + $0x1f48] sm:$0xff] }
 0x114   : > { %1181 = vst [vmem:[%s8288_s8 + $0xfa0] sm:$0xff] %v1180_v52  ;;  %v1184_v54 = vld [vmem:[%s8283_s7 + $0x1f60] sm:$0xff]  ;;  %v1186_v55 = vld [vmem:[%s8283_s7 + $0x1f68] sm:$0xff]  ;;  %1183 = vst [vmem:[%s8288_s8 + $0xfa8] sm:$0xff] %v1182_v53 }
 0x115   : > { %1185 = vst [vmem:[%s8288_s8 + $0xfb0] sm:$0xff] %v1184_v54  ;;  %1187 = vst [vmem:[%s8288_s8 + $0xfb8] sm:$0xff] %v1186_v55  ;;  %v1188_v56 = vld [vmem:[%s8283_s7 + $0x1f80] sm:$0xff]  ;;  %v1190_v57 = vld [vmem:[%s8283_s7 + $0x1f88] sm:$0xff] }
 0x116   : > { %v1192_v58 = vld [vmem:[%s8283_s7 + $0x1fa0] sm:$0xff]  ;;  %1189 = vst [vmem:[%s8288_s8 + $0xfc0] sm:$0xff] %v1188_v56  ;;  %1191 = vst [vmem:[%s8288_s8 + $0xfc8] sm:$0xff] %v1190_v57  ;;  %v1194_v59 = vld [vmem:[%s8283_s7 + $0x1fa8] sm:$0xff] }
 0x117   : > { %1193 = vst [vmem:[%s8288_s8 + $0xfd0] sm:$0xff] %v1192_v58  ;;  %v1196_v60 = vld [vmem:[%s8283_s7 + $0x1fc0] sm:$0xff]  ;;  %v1198_v61 = vld [vmem:[%s8283_s7 + $0x1fc8] sm:$0xff]  ;;  %1195 = vst [vmem:[%s8288_s8 + $0xfd8] sm:$0xff] %v1194_v59 }
 0x118   : > { %1197 = vst [vmem:[%s8288_s8 + $0xfe0] sm:$0xff] %v1196_v60  ;;  %1199 = vst [vmem:[%s8288_s8 + $0xfe8] sm:$0xff] %v1198_v61  ;;  %v1200_v62 = vld [vmem:[%s8283_s7 + $0x1fe0] sm:$0xff]  ;;  %v1202_v63 = vld [vmem:[%s8283_s7 + $0x1fe8] sm:$0xff] }
 0x119   : > { %v1204_v0 = vld [vmem:[%s8283_s7 + $0x2000] sm:$0xff]  ;;  %1201 = vst [vmem:[%s8288_s8 + $0xff0] sm:$0xff] %v1200_v62  ;;  %1203 = vst [vmem:[%s8288_s8 + $0xff8] sm:$0xff] %v1202_v63  ;;  %v1206_v1 = vld [vmem:[%s8283_s7 + $0x2008] sm:$0xff] }
 0x11a   : > { %1205 = vst [vmem:[%s8288_s8 + $0x1000] sm:$0xff] %v1204_v0  ;;  %v1208_v2 = vld [vmem:[%s8283_s7 + $0x2020] sm:$0xff]  ;;  %v1210_v3 = vld [vmem:[%s8283_s7 + $0x2028] sm:$0xff]  ;;  %1207 = vst [vmem:[%s8288_s8 + $0x1008] sm:$0xff] %v1206_v1 }
 0x11b   : > { %1209 = vst [vmem:[%s8288_s8 + $0x1010] sm:$0xff] %v1208_v2  ;;  %1211 = vst [vmem:[%s8288_s8 + $0x1018] sm:$0xff] %v1210_v3  ;;  %v1212_v4 = vld [vmem:[%s8283_s7 + $0x2040] sm:$0xff]  ;;  %v1214_v5 = vld [vmem:[%s8283_s7 + $0x2048] sm:$0xff] }
 0x11c   : > { %v1216_v6 = vld [vmem:[%s8283_s7 + $0x2060] sm:$0xff]  ;;  %1213 = vst [vmem:[%s8288_s8 + $0x1020] sm:$0xff] %v1212_v4  ;;  %1215 = vst [vmem:[%s8288_s8 + $0x1028] sm:$0xff] %v1214_v5  ;;  %v1218_v7 = vld [vmem:[%s8283_s7 + $0x2068] sm:$0xff] }
 0x11d   : > { %1217 = vst [vmem:[%s8288_s8 + $0x1030] sm:$0xff] %v1216_v6  ;;  %v1220_v8 = vld [vmem:[%s8283_s7 + $0x2080] sm:$0xff]  ;;  %v1222_v9 = vld [vmem:[%s8283_s7 + $0x2088] sm:$0xff]  ;;  %1219 = vst [vmem:[%s8288_s8 + $0x1038] sm:$0xff] %v1218_v7 }
 0x11e   : > { %1221 = vst [vmem:[%s8288_s8 + $0x1040] sm:$0xff] %v1220_v8  ;;  %1223 = vst [vmem:[%s8288_s8 + $0x1048] sm:$0xff] %v1222_v9  ;;  %v1224_v10 = vld [vmem:[%s8283_s7 + $0x20a0] sm:$0xff]  ;;  %v1226_v11 = vld [vmem:[%s8283_s7 + $0x20a8] sm:$0xff] }
 0x11f   : > { %v1228_v12 = vld [vmem:[%s8283_s7 + $0x20c0] sm:$0xff]  ;;  %1225 = vst [vmem:[%s8288_s8 + $0x1050] sm:$0xff] %v1224_v10  ;;  %1227 = vst [vmem:[%s8288_s8 + $0x1058] sm:$0xff] %v1226_v11  ;;  %v1230_v13 = vld [vmem:[%s8283_s7 + $0x20c8] sm:$0xff] }
 0x120   : > { %1229 = vst [vmem:[%s8288_s8 + $0x1060] sm:$0xff] %v1228_v12  ;;  %v1232_v14 = vld [vmem:[%s8283_s7 + $0x20e0] sm:$0xff]  ;;  %v1234_v15 = vld [vmem:[%s8283_s7 + $0x20e8] sm:$0xff]  ;;  %1231 = vst [vmem:[%s8288_s8 + $0x1068] sm:$0xff] %v1230_v13 }
 0x121   : > { %1233 = vst [vmem:[%s8288_s8 + $0x1070] sm:$0xff] %v1232_v14  ;;  %1235 = vst [vmem:[%s8288_s8 + $0x1078] sm:$0xff] %v1234_v15  ;;  %v1236_v16 = vld [vmem:[%s8283_s7 + $0x2100] sm:$0xff]  ;;  %v1238_v17 = vld [vmem:[%s8283_s7 + $0x2108] sm:$0xff] }
 0x122   : > { %v1240_v18 = vld [vmem:[%s8283_s7 + $0x2120] sm:$0xff]  ;;  %1237 = vst [vmem:[%s8288_s8 + $0x1080] sm:$0xff] %v1236_v16  ;;  %1239 = vst [vmem:[%s8288_s8 + $0x1088] sm:$0xff] %v1238_v17  ;;  %v1242_v19 = vld [vmem:[%s8283_s7 + $0x2128] sm:$0xff] }
 0x123   : > { %1241 = vst [vmem:[%s8288_s8 + $0x1090] sm:$0xff] %v1240_v18  ;;  %v1244_v20 = vld [vmem:[%s8283_s7 + $0x2140] sm:$0xff]  ;;  %v1246_v21 = vld [vmem:[%s8283_s7 + $0x2148] sm:$0xff]  ;;  %1243 = vst [vmem:[%s8288_s8 + $0x1098] sm:$0xff] %v1242_v19 }
 0x124   : > { %1245 = vst [vmem:[%s8288_s8 + $0x10a0] sm:$0xff] %v1244_v20  ;;  %1247 = vst [vmem:[%s8288_s8 + $0x10a8] sm:$0xff] %v1246_v21  ;;  %v1248_v22 = vld [vmem:[%s8283_s7 + $0x2160] sm:$0xff]  ;;  %v1250_v23 = vld [vmem:[%s8283_s7 + $0x2168] sm:$0xff] }
 0x125   : > { %v1252_v24 = vld [vmem:[%s8283_s7 + $0x2180] sm:$0xff]  ;;  %1249 = vst [vmem:[%s8288_s8 + $0x10b0] sm:$0xff] %v1248_v22  ;;  %1251 = vst [vmem:[%s8288_s8 + $0x10b8] sm:$0xff] %v1250_v23  ;;  %v1254_v25 = vld [vmem:[%s8283_s7 + $0x2188] sm:$0xff] }
 0x126   : > { %1253 = vst [vmem:[%s8288_s8 + $0x10c0] sm:$0xff] %v1252_v24  ;;  %v1256_v26 = vld [vmem:[%s8283_s7 + $0x21a0] sm:$0xff]  ;;  %v1258_v27 = vld [vmem:[%s8283_s7 + $0x21a8] sm:$0xff]  ;;  %1255 = vst [vmem:[%s8288_s8 + $0x10c8] sm:$0xff] %v1254_v25 }
 0x127   : > { %1257 = vst [vmem:[%s8288_s8 + $0x10d0] sm:$0xff] %v1256_v26  ;;  %1259 = vst [vmem:[%s8288_s8 + $0x10d8] sm:$0xff] %v1258_v27  ;;  %v1260_v28 = vld [vmem:[%s8283_s7 + $0x21c0] sm:$0xff]  ;;  %v1262_v29 = vld [vmem:[%s8283_s7 + $0x21c8] sm:$0xff] }
 0x128   : > { %v1264_v30 = vld [vmem:[%s8283_s7 + $0x21e0] sm:$0xff]  ;;  %1261 = vst [vmem:[%s8288_s8 + $0x10e0] sm:$0xff] %v1260_v28  ;;  %1263 = vst [vmem:[%s8288_s8 + $0x10e8] sm:$0xff] %v1262_v29  ;;  %v1266_v31 = vld [vmem:[%s8283_s7 + $0x21e8] sm:$0xff] }
 0x129   : > { %1265 = vst [vmem:[%s8288_s8 + $0x10f0] sm:$0xff] %v1264_v30  ;;  %v1268_v32 = vld [vmem:[%s8283_s7 + $0x2200] sm:$0xff]  ;;  %v1270_v33 = vld [vmem:[%s8283_s7 + $0x2208] sm:$0xff]  ;;  %1267 = vst [vmem:[%s8288_s8 + $0x10f8] sm:$0xff] %v1266_v31 }
 0x12a   : > { %1269 = vst [vmem:[%s8288_s8 + $0x1100] sm:$0xff] %v1268_v32  ;;  %1271 = vst [vmem:[%s8288_s8 + $0x1108] sm:$0xff] %v1270_v33  ;;  %v1272_v34 = vld [vmem:[%s8283_s7 + $0x2220] sm:$0xff]  ;;  %v1274_v35 = vld [vmem:[%s8283_s7 + $0x2228] sm:$0xff] }
 0x12b   : > { %v1276_v36 = vld [vmem:[%s8283_s7 + $0x2240] sm:$0xff]  ;;  %1273 = vst [vmem:[%s8288_s8 + $0x1110] sm:$0xff] %v1272_v34  ;;  %1275 = vst [vmem:[%s8288_s8 + $0x1118] sm:$0xff] %v1274_v35  ;;  %v1278_v37 = vld [vmem:[%s8283_s7 + $0x2248] sm:$0xff] }
 0x12c   : > { %1277 = vst [vmem:[%s8288_s8 + $0x1120] sm:$0xff] %v1276_v36  ;;  %v1280_v38 = vld [vmem:[%s8283_s7 + $0x2260] sm:$0xff]  ;;  %v1282_v39 = vld [vmem:[%s8283_s7 + $0x2268] sm:$0xff]  ;;  %1279 = vst [vmem:[%s8288_s8 + $0x1128] sm:$0xff] %v1278_v37 }
 0x12d   : > { %1281 = vst [vmem:[%s8288_s8 + $0x1130] sm:$0xff] %v1280_v38  ;;  %1283 = vst [vmem:[%s8288_s8 + $0x1138] sm:$0xff] %v1282_v39  ;;  %v1284_v40 = vld [vmem:[%s8283_s7 + $0x2280] sm:$0xff]  ;;  %v1286_v41 = vld [vmem:[%s8283_s7 + $0x2288] sm:$0xff] }
 0x12e   : > { %v1288_v42 = vld [vmem:[%s8283_s7 + $0x22a0] sm:$0xff]  ;;  %1285 = vst [vmem:[%s8288_s8 + $0x1140] sm:$0xff] %v1284_v40  ;;  %1287 = vst [vmem:[%s8288_s8 + $0x1148] sm:$0xff] %v1286_v41  ;;  %v1290_v43 = vld [vmem:[%s8283_s7 + $0x22a8] sm:$0xff] }
 0x12f   : > { %1289 = vst [vmem:[%s8288_s8 + $0x1150] sm:$0xff] %v1288_v42  ;;  %v1292_v44 = vld [vmem:[%s8283_s7 + $0x22c0] sm:$0xff]  ;;  %v1294_v45 = vld [vmem:[%s8283_s7 + $0x22c8] sm:$0xff]  ;;  %1291 = vst [vmem:[%s8288_s8 + $0x1158] sm:$0xff] %v1290_v43 }
 0x130   : > { %1293 = vst [vmem:[%s8288_s8 + $0x1160] sm:$0xff] %v1292_v44  ;;  %1295 = vst [vmem:[%s8288_s8 + $0x1168] sm:$0xff] %v1294_v45  ;;  %v1296_v46 = vld [vmem:[%s8283_s7 + $0x22e0] sm:$0xff]  ;;  %v1298_v47 = vld [vmem:[%s8283_s7 + $0x22e8] sm:$0xff] }
 0x131   : > { %v1300_v48 = vld [vmem:[%s8283_s7 + $0x2300] sm:$0xff]  ;;  %1297 = vst [vmem:[%s8288_s8 + $0x1170] sm:$0xff] %v1296_v46  ;;  %1299 = vst [vmem:[%s8288_s8 + $0x1178] sm:$0xff] %v1298_v47  ;;  %v1302_v49 = vld [vmem:[%s8283_s7 + $0x2308] sm:$0xff] }
 0x132   : > { %1301 = vst [vmem:[%s8288_s8 + $0x1180] sm:$0xff] %v1300_v48  ;;  %v1304_v50 = vld [vmem:[%s8283_s7 + $0x2320] sm:$0xff]  ;;  %v1306_v51 = vld [vmem:[%s8283_s7 + $0x2328] sm:$0xff]  ;;  %1303 = vst [vmem:[%s8288_s8 + $0x1188] sm:$0xff] %v1302_v49 }
 0x133   : > { %1305 = vst [vmem:[%s8288_s8 + $0x1190] sm:$0xff] %v1304_v50  ;;  %1307 = vst [vmem:[%s8288_s8 + $0x1198] sm:$0xff] %v1306_v51  ;;  %v1308_v52 = vld [vmem:[%s8283_s7 + $0x2340] sm:$0xff]  ;;  %v1310_v53 = vld [vmem:[%s8283_s7 + $0x2348] sm:$0xff] }
 0x134   : > { %v1312_v54 = vld [vmem:[%s8283_s7 + $0x2360] sm:$0xff]  ;;  %1309 = vst [vmem:[%s8288_s8 + $0x11a0] sm:$0xff] %v1308_v52  ;;  %1311 = vst [vmem:[%s8288_s8 + $0x11a8] sm:$0xff] %v1310_v53  ;;  %v1314_v55 = vld [vmem:[%s8283_s7 + $0x2368] sm:$0xff] }
 0x135   : > { %1313 = vst [vmem:[%s8288_s8 + $0x11b0] sm:$0xff] %v1312_v54  ;;  %v1316_v56 = vld [vmem:[%s8283_s7 + $0x2380] sm:$0xff]  ;;  %v1318_v57 = vld [vmem:[%s8283_s7 + $0x2388] sm:$0xff]  ;;  %1315 = vst [vmem:[%s8288_s8 + $0x11b8] sm:$0xff] %v1314_v55 }
 0x136   : > { %1317 = vst [vmem:[%s8288_s8 + $0x11c0] sm:$0xff] %v1316_v56  ;;  %1319 = vst [vmem:[%s8288_s8 + $0x11c8] sm:$0xff] %v1318_v57  ;;  %v1320_v58 = vld [vmem:[%s8283_s7 + $0x23a0] sm:$0xff]  ;;  %v1322_v59 = vld [vmem:[%s8283_s7 + $0x23a8] sm:$0xff] }
 0x137   : > { %v1324_v60 = vld [vmem:[%s8283_s7 + $0x23c0] sm:$0xff]  ;;  %1321 = vst [vmem:[%s8288_s8 + $0x11d0] sm:$0xff] %v1320_v58  ;;  %1323 = vst [vmem:[%s8288_s8 + $0x11d8] sm:$0xff] %v1322_v59  ;;  %v1326_v61 = vld [vmem:[%s8283_s7 + $0x23c8] sm:$0xff] }
 0x138   : > { %1325 = vst [vmem:[%s8288_s8 + $0x11e0] sm:$0xff] %v1324_v60  ;;  %v1328_v62 = vld [vmem:[%s8283_s7 + $0x23e0] sm:$0xff]  ;;  %v1330_v63 = vld [vmem:[%s8283_s7 + $0x23e8] sm:$0xff]  ;;  %1327 = vst [vmem:[%s8288_s8 + $0x11e8] sm:$0xff] %v1326_v61 }
 0x139   : > { %1329 = vst [vmem:[%s8288_s8 + $0x11f0] sm:$0xff] %v1328_v62  ;;  %1331 = vst [vmem:[%s8288_s8 + $0x11f8] sm:$0xff] %v1330_v63  ;;  %v1332_v0 = vld [vmem:[%s8283_s7 + $0x2400] sm:$0xff]  ;;  %v1334_v1 = vld [vmem:[%s8283_s7 + $0x2408] sm:$0xff] }
 0x13a   : > { %v1336_v2 = vld [vmem:[%s8283_s7 + $0x2420] sm:$0xff]  ;;  %1333 = vst [vmem:[%s8288_s8 + $0x1200] sm:$0xff] %v1332_v0  ;;  %1335 = vst [vmem:[%s8288_s8 + $0x1208] sm:$0xff] %v1334_v1  ;;  %v1338_v3 = vld [vmem:[%s8283_s7 + $0x2428] sm:$0xff] }
 0x13b   : > { %1337 = vst [vmem:[%s8288_s8 + $0x1210] sm:$0xff] %v1336_v2  ;;  %v1340_v4 = vld [vmem:[%s8283_s7 + $0x2440] sm:$0xff]  ;;  %v1342_v5 = vld [vmem:[%s8283_s7 + $0x2448] sm:$0xff]  ;;  %1339 = vst [vmem:[%s8288_s8 + $0x1218] sm:$0xff] %v1338_v3 }
 0x13c   : > { %1341 = vst [vmem:[%s8288_s8 + $0x1220] sm:$0xff] %v1340_v4  ;;  %1343 = vst [vmem:[%s8288_s8 + $0x1228] sm:$0xff] %v1342_v5  ;;  %v1344_v6 = vld [vmem:[%s8283_s7 + $0x2460] sm:$0xff]  ;;  %v1346_v7 = vld [vmem:[%s8283_s7 + $0x2468] sm:$0xff] }
 0x13d   : > { %v1348_v8 = vld [vmem:[%s8283_s7 + $0x2480] sm:$0xff]  ;;  %1345 = vst [vmem:[%s8288_s8 + $0x1230] sm:$0xff] %v1344_v6  ;;  %1347 = vst [vmem:[%s8288_s8 + $0x1238] sm:$0xff] %v1346_v7  ;;  %v1350_v9 = vld [vmem:[%s8283_s7 + $0x2488] sm:$0xff] }
 0x13e   : > { %1349 = vst [vmem:[%s8288_s8 + $0x1240] sm:$0xff] %v1348_v8  ;;  %v1352_v10 = vld [vmem:[%s8283_s7 + $0x24a0] sm:$0xff]  ;;  %v1354_v11 = vld [vmem:[%s8283_s7 + $0x24a8] sm:$0xff]  ;;  %1351 = vst [vmem:[%s8288_s8 + $0x1248] sm:$0xff] %v1350_v9 }
 0x13f   : > { %1353 = vst [vmem:[%s8288_s8 + $0x1250] sm:$0xff] %v1352_v10  ;;  %1355 = vst [vmem:[%s8288_s8 + $0x1258] sm:$0xff] %v1354_v11  ;;  %v1356_v12 = vld [vmem:[%s8283_s7 + $0x24c0] sm:$0xff]  ;;  %v1358_v13 = vld [vmem:[%s8283_s7 + $0x24c8] sm:$0xff] }
 0x140   : > { %v1360_v14 = vld [vmem:[%s8283_s7 + $0x24e0] sm:$0xff]  ;;  %1357 = vst [vmem:[%s8288_s8 + $0x1260] sm:$0xff] %v1356_v12  ;;  %1359 = vst [vmem:[%s8288_s8 + $0x1268] sm:$0xff] %v1358_v13  ;;  %v1362_v15 = vld [vmem:[%s8283_s7 + $0x24e8] sm:$0xff] }
 0x141   : > { %1361 = vst [vmem:[%s8288_s8 + $0x1270] sm:$0xff] %v1360_v14  ;;  %v1364_v16 = vld [vmem:[%s8283_s7 + $0x2500] sm:$0xff]  ;;  %v1366_v17 = vld [vmem:[%s8283_s7 + $0x2508] sm:$0xff]  ;;  %1363 = vst [vmem:[%s8288_s8 + $0x1278] sm:$0xff] %v1362_v15 }
 0x142   : > { %1365 = vst [vmem:[%s8288_s8 + $0x1280] sm:$0xff] %v1364_v16  ;;  %1367 = vst [vmem:[%s8288_s8 + $0x1288] sm:$0xff] %v1366_v17  ;;  %v1368_v18 = vld [vmem:[%s8283_s7 + $0x2520] sm:$0xff]  ;;  %v1370_v19 = vld [vmem:[%s8283_s7 + $0x2528] sm:$0xff] }
 0x143   : > { %v1372_v20 = vld [vmem:[%s8283_s7 + $0x2540] sm:$0xff]  ;;  %1369 = vst [vmem:[%s8288_s8 + $0x1290] sm:$0xff] %v1368_v18  ;;  %1371 = vst [vmem:[%s8288_s8 + $0x1298] sm:$0xff] %v1370_v19  ;;  %v1374_v21 = vld [vmem:[%s8283_s7 + $0x2548] sm:$0xff] }
 0x144   : > { %1373 = vst [vmem:[%s8288_s8 + $0x12a0] sm:$0xff] %v1372_v20  ;;  %v1376_v22 = vld [vmem:[%s8283_s7 + $0x2560] sm:$0xff]  ;;  %v1378_v23 = vld [vmem:[%s8283_s7 + $0x2568] sm:$0xff]  ;;  %1375 = vst [vmem:[%s8288_s8 + $0x12a8] sm:$0xff] %v1374_v21 }
 0x145   : > { %1377 = vst [vmem:[%s8288_s8 + $0x12b0] sm:$0xff] %v1376_v22  ;;  %1379 = vst [vmem:[%s8288_s8 + $0x12b8] sm:$0xff] %v1378_v23  ;;  %v1380_v24 = vld [vmem:[%s8283_s7 + $0x2580] sm:$0xff]  ;;  %v1382_v25 = vld [vmem:[%s8283_s7 + $0x2588] sm:$0xff] }
 0x146   : > { %v1384_v26 = vld [vmem:[%s8283_s7 + $0x25a0] sm:$0xff]  ;;  %1381 = vst [vmem:[%s8288_s8 + $0x12c0] sm:$0xff] %v1380_v24  ;;  %1383 = vst [vmem:[%s8288_s8 + $0x12c8] sm:$0xff] %v1382_v25  ;;  %v1386_v27 = vld [vmem:[%s8283_s7 + $0x25a8] sm:$0xff] }
 0x147   : > { %1385 = vst [vmem:[%s8288_s8 + $0x12d0] sm:$0xff] %v1384_v26  ;;  %v1388_v28 = vld [vmem:[%s8283_s7 + $0x25c0] sm:$0xff]  ;;  %v1390_v29 = vld [vmem:[%s8283_s7 + $0x25c8] sm:$0xff]  ;;  %1387 = vst [vmem:[%s8288_s8 + $0x12d8] sm:$0xff] %v1386_v27 }
 0x148   : > { %1389 = vst [vmem:[%s8288_s8 + $0x12e0] sm:$0xff] %v1388_v28  ;;  %1391 = vst [vmem:[%s8288_s8 + $0x12e8] sm:$0xff] %v1390_v29  ;;  %v1392_v30 = vld [vmem:[%s8283_s7 + $0x25e0] sm:$0xff]  ;;  %v1394_v31 = vld [vmem:[%s8283_s7 + $0x25e8] sm:$0xff] }
 0x149   : > { %v1396_v32 = vld [vmem:[%s8283_s7 + $0x2600] sm:$0xff]  ;;  %1393 = vst [vmem:[%s8288_s8 + $0x12f0] sm:$0xff] %v1392_v30  ;;  %1395 = vst [vmem:[%s8288_s8 + $0x12f8] sm:$0xff] %v1394_v31  ;;  %v1398_v33 = vld [vmem:[%s8283_s7 + $0x2608] sm:$0xff] }
 0x14a   : > { %1397 = vst [vmem:[%s8288_s8 + $0x1300] sm:$0xff] %v1396_v32  ;;  %v1400_v34 = vld [vmem:[%s8283_s7 + $0x2620] sm:$0xff]  ;;  %v1402_v35 = vld [vmem:[%s8283_s7 + $0x2628] sm:$0xff]  ;;  %1399 = vst [vmem:[%s8288_s8 + $0x1308] sm:$0xff] %v1398_v33 }
 0x14b   : > { %1401 = vst [vmem:[%s8288_s8 + $0x1310] sm:$0xff] %v1400_v34  ;;  %1403 = vst [vmem:[%s8288_s8 + $0x1318] sm:$0xff] %v1402_v35  ;;  %v1404_v36 = vld [vmem:[%s8283_s7 + $0x2640] sm:$0xff]  ;;  %v1406_v37 = vld [vmem:[%s8283_s7 + $0x2648] sm:$0xff] }
 0x14c   : > { %v1408_v38 = vld [vmem:[%s8283_s7 + $0x2660] sm:$0xff]  ;;  %1405 = vst [vmem:[%s8288_s8 + $0x1320] sm:$0xff] %v1404_v36  ;;  %1407 = vst [vmem:[%s8288_s8 + $0x1328] sm:$0xff] %v1406_v37  ;;  %v1410_v39 = vld [vmem:[%s8283_s7 + $0x2668] sm:$0xff] }
 0x14d   : > { %1409 = vst [vmem:[%s8288_s8 + $0x1330] sm:$0xff] %v1408_v38  ;;  %v1412_v40 = vld [vmem:[%s8283_s7 + $0x2680] sm:$0xff]  ;;  %v1414_v41 = vld [vmem:[%s8283_s7 + $0x2688] sm:$0xff]  ;;  %1411 = vst [vmem:[%s8288_s8 + $0x1338] sm:$0xff] %v1410_v39 }
 0x14e   : > { %1413 = vst [vmem:[%s8288_s8 + $0x1340] sm:$0xff] %v1412_v40  ;;  %1415 = vst [vmem:[%s8288_s8 + $0x1348] sm:$0xff] %v1414_v41  ;;  %v1416_v42 = vld [vmem:[%s8283_s7 + $0x26a0] sm:$0xff]  ;;  %v1418_v43 = vld [vmem:[%s8283_s7 + $0x26a8] sm:$0xff] }
 0x14f   : > { %v1420_v44 = vld [vmem:[%s8283_s7 + $0x26c0] sm:$0xff]  ;;  %1417 = vst [vmem:[%s8288_s8 + $0x1350] sm:$0xff] %v1416_v42  ;;  %1419 = vst [vmem:[%s8288_s8 + $0x1358] sm:$0xff] %v1418_v43  ;;  %v1422_v45 = vld [vmem:[%s8283_s7 + $0x26c8] sm:$0xff] }
 0x150   : > { %1421 = vst [vmem:[%s8288_s8 + $0x1360] sm:$0xff] %v1420_v44  ;;  %v1424_v46 = vld [vmem:[%s8283_s7 + $0x26e0] sm:$0xff]  ;;  %v1426_v47 = vld [vmem:[%s8283_s7 + $0x26e8] sm:$0xff]  ;;  %1423 = vst [vmem:[%s8288_s8 + $0x1368] sm:$0xff] %v1422_v45 }
 0x151   : > { %1425 = vst [vmem:[%s8288_s8 + $0x1370] sm:$0xff] %v1424_v46  ;;  %1427 = vst [vmem:[%s8288_s8 + $0x1378] sm:$0xff] %v1426_v47  ;;  %v1428_v48 = vld [vmem:[%s8283_s7 + $0x2700] sm:$0xff]  ;;  %v1430_v49 = vld [vmem:[%s8283_s7 + $0x2708] sm:$0xff] }
 0x152   : > { %v1432_v50 = vld [vmem:[%s8283_s7 + $0x2720] sm:$0xff]  ;;  %1429 = vst [vmem:[%s8288_s8 + $0x1380] sm:$0xff] %v1428_v48  ;;  %1431 = vst [vmem:[%s8288_s8 + $0x1388] sm:$0xff] %v1430_v49  ;;  %v1434_v51 = vld [vmem:[%s8283_s7 + $0x2728] sm:$0xff] }
 0x153   : > { %1433 = vst [vmem:[%s8288_s8 + $0x1390] sm:$0xff] %v1432_v50  ;;  %v1436_v52 = vld [vmem:[%s8283_s7 + $0x2740] sm:$0xff]  ;;  %v1438_v53 = vld [vmem:[%s8283_s7 + $0x2748] sm:$0xff]  ;;  %1435 = vst [vmem:[%s8288_s8 + $0x1398] sm:$0xff] %v1434_v51 }
 0x154   : > { %1437 = vst [vmem:[%s8288_s8 + $0x13a0] sm:$0xff] %v1436_v52  ;;  %1439 = vst [vmem:[%s8288_s8 + $0x13a8] sm:$0xff] %v1438_v53  ;;  %v1440_v54 = vld [vmem:[%s8283_s7 + $0x2760] sm:$0xff]  ;;  %v1442_v55 = vld [vmem:[%s8283_s7 + $0x2768] sm:$0xff] }
 0x155   : > { %v1444_v56 = vld [vmem:[%s8283_s7 + $0x2780] sm:$0xff]  ;;  %1441 = vst [vmem:[%s8288_s8 + $0x13b0] sm:$0xff] %v1440_v54  ;;  %1443 = vst [vmem:[%s8288_s8 + $0x13b8] sm:$0xff] %v1442_v55  ;;  %v1446_v57 = vld [vmem:[%s8283_s7 + $0x2788] sm:$0xff] }
 0x156   : > { %1445 = vst [vmem:[%s8288_s8 + $0x13c0] sm:$0xff] %v1444_v56  ;;  %v1448_v58 = vld [vmem:[%s8283_s7 + $0x27a0] sm:$0xff]  ;;  %v1450_v59 = vld [vmem:[%s8283_s7 + $0x27a8] sm:$0xff]  ;;  %1447 = vst [vmem:[%s8288_s8 + $0x13c8] sm:$0xff] %v1446_v57 }
 0x157   : > { %1449 = vst [vmem:[%s8288_s8 + $0x13d0] sm:$0xff] %v1448_v58  ;;  %1451 = vst [vmem:[%s8288_s8 + $0x13d8] sm:$0xff] %v1450_v59  ;;  %v1452_v60 = vld [vmem:[%s8283_s7 + $0x27c0] sm:$0xff]  ;;  %v1454_v61 = vld [vmem:[%s8283_s7 + $0x27c8] sm:$0xff] }
 0x158   : > { %v1456_v62 = vld [vmem:[%s8283_s7 + $0x27e0] sm:$0xff]  ;;  %1453 = vst [vmem:[%s8288_s8 + $0x13e0] sm:$0xff] %v1452_v60  ;;  %1455 = vst [vmem:[%s8288_s8 + $0x13e8] sm:$0xff] %v1454_v61  ;;  %v1458_v63 = vld [vmem:[%s8283_s7 + $0x27e8] sm:$0xff] }
 0x159   : > { %1457 = vst [vmem:[%s8288_s8 + $0x13f0] sm:$0xff] %v1456_v62  ;;  %1459 = vst [vmem:[%s8288_s8 + $0x13f8] sm:$0xff] %v1458_v63 }
 0x15a PF: > { %p6437_p7 = scmp.ge.s32.totalorder %s8200_s18, 1  ;;  %p1472_p8 = scmp.lt.s32.totalorder %s8200_s18, 5 }
 0x15c   : > { %p1473_p9 = pnand %p6437_p7, %p1472_p8 }
 0x15d   : > { %s1479_s9 = sand.u32 (!%p1473_p9), 1, %s8176_s12   ;;  %s1511_s10 = smul.u32 (!%p1473_p9), 20, %s8184_s14 }
 0x15e   : > { %1476 = sbr.rel (%p1473_p9) target bundleno = 1240 (0x4d8), region = 51  ;;  %s6439_s21 = sshll.u32 (!%p1473_p9), %s8188_s15, 2 }
 0x15f   : > { %s7108_s11 = smul.u32 (!%p1473_p9), 5120, %s1479_s9  ;;  %p1512_p10 = scmp.lt.s32.totalorder (!%p1473_p9), %s1511_s10, 39 }
 0x160   : > { %p1520_p11 = scmp.lt.s32.totalorder (!%p1473_p9), %s6439_s21, 7  ;;  %p6442_p12 = scmp.ne.s32.totalorder (!%p1473_p9), %s8184_s14, 0 }
 0x161   : > { %s9589_s5 = scalar_lea.vmem (!%p1473_p9), [#allocation2], %s7108_s11 }
 0x165   : > { %s10470_s10 = smov (!%p1512_p10, %s1511_s10), 39  ;;  %s10472_s21 = smov (!%p1520_p11, %s6439_s21), 7 }
 0x166   : > { %s6438_s22 = sshll.u32 %s10470_s10, 2  ;;  %s1522_s12 = scalar_lea.vmem %s10455_s2, %s10472_s21  ;;  %v8202_v0 = vmov (!%p6442_p12), 0.0  }
 0x167   : > { %s9577_s26 = scalar_lea.vmem %s10453_s0, %s6438_s22  ;;  %s6441_s29 = sshll.u32 %s10472_s21, 3 }
 0x168   : > { %s9587_s4 = scalar_lea.vmem %s10456_s3, %s6441_s29  ;;  %1533 = sbr.rel (%p6442_p12) target bundleno = 367 (0x16f), region = 59 }
 0x169   : > { %1534 = vst [vmem:[%s9587_s4] sm:$0xff] (!%p6442_p12), %v8202_v0  ;;  %1535 = vst [vmem:[%s9587_s4 + $0x8] sm:$0xff] (!%p6442_p12), %v8202_v0 }
 0x16a   : > { %1536 = vst [vmem:[%s9587_s4 + $0x10] sm:$0xff] (!%p6442_p12), %v8202_v0  ;;  %1537 = vst [vmem:[%s9587_s4 + $0x18] sm:$0xff] (!%p6442_p12), %v8202_v0 }
 0x16f PF: > { %v7166_v1 = vld [vmem:[%s9589_s5 + $0x4] ss:$16 sps:$4 sm:$0xff]   ;;  %v7170_v3 = vld [vmem:[%s9589_s5] ss:$16 sps:$4 sm:$0xff]   ;;  %v1543_v49 = vld [vmem:[%s9577_s26 + $0x8] sm:$0xff]  ;;  %p7103_p13 = scmp.ne.s32.totalorder %s8184_s14, 1 }
 0x170   : > { %v7168_v2 = vld [vmem:[%s9589_s5 + $0x204] ss:$16 sps:$4 sm:$0xff]   ;;  %5462 = vmatprep.subr.bf16.mxu0 %v7166_v1  ;;  %v7171_v4 = vld [vmem:[%s9589_s5 + $0x200] ss:$16 sps:$4 sm:$0xff]   ;;  %v9648_v52 = vcombine.high %v1543_v49, %v1543_v49 }
 0x171   : > { %5503 = vmatprep.subr.bf16.mxu1 %v7168_v2  ;;  %v7172_v5 = vld [vmem:[%s9589_s5 + $0x24] ss:$16 sps:$4 sm:$0xff]   ;;  %5463 = vmatpush1.bf16.msra.mxu0 %v7170_v3  ;;  %v7176_v7 = vld [vmem:[%s9589_s5 + $0x20] ss:$16 sps:$4 sm:$0xff]  }
 0x172   : > { %5504 = vmatpush1.bf16.msra.mxu1 %v7171_v4  ;;  %v7174_v6 = vld [vmem:[%s9589_s5 + $0x224] ss:$16 sps:$4 sm:$0xff]   ;;  %5464 = vmatprep.subr.bf16.mxu0 %v7172_v5  ;;  %v7177_v8 = vld [vmem:[%s9589_s5 + $0x220] ss:$16 sps:$4 sm:$0xff]  }
 0x173   : > { %5505 = vmatprep.subr.bf16.mxu1 %v7174_v6  ;;  %v7178_v9 = vld [vmem:[%s9589_s5 + $0x44] ss:$16 sps:$4 sm:$0xff]   ;;  %v7182_v11 = vld [vmem:[%s9589_s5 + $0x40] ss:$16 sps:$4 sm:$0xff]   ;;  %5535 = vmatprep.mubr.bf16.mxu1 %v9648_v52 }
 0x174   : > { %v7180_v10 = vld [vmem:[%s9589_s5 + $0x244] ss:$16 sps:$4 sm:$0xff]   ;;  %v7183_v12 = vld [vmem:[%s9589_s5 + $0x240] ss:$16 sps:$4 sm:$0xff]  }
 0x175   : > { %5465 = vmatpush1.bf16.msra.mxu0 %v7176_v7  ;;  %v7184_v13 = vld [vmem:[%s9589_s5 + $0x64] ss:$16 sps:$4 sm:$0xff]   ;;  %v7188_v15 = vld [vmem:[%s9589_s5 + $0x60] ss:$16 sps:$4 sm:$0xff]  }
 0x176   : > { %5506 = vmatpush1.bf16.msra.mxu1 %v7177_v8  ;;  %5466 = vmatprep.subr.bf16.mxu0 %v7178_v9  ;;  %v7186_v14 = vld [vmem:[%s9589_s5 + $0x264] ss:$16 sps:$4 sm:$0xff]   ;;  %v7189_v16 = vld [vmem:[%s9589_s5 + $0x260] ss:$16 sps:$4 sm:$0xff]   ;;  %v9672_v8 = vcombine.low %v1543_v49, %v1543_v49 }
 0x177   : > { %5507 = vmatprep.subr.bf16.mxu1 %v7180_v10  ;;  %v7190_v17 = vld [vmem:[%s9589_s5 + $0x84] ss:$16 sps:$4 sm:$0xff]   ;;  %v7194_v19 = vld [vmem:[%s9589_s5 + $0x80] ss:$16 sps:$4 sm:$0xff]  }
 0x178   : > { %v7192_v18 = vld [vmem:[%s9589_s5 + $0x284] ss:$16 sps:$4 sm:$0xff]   ;;  %v7195_v20 = vld [vmem:[%s9589_s5 + $0x280] ss:$16 sps:$4 sm:$0xff]  }
 0x179   : > { %5467 = vmatpush1.bf16.msra.mxu0 %v7182_v11  ;;  %v7196_v21 = vld [vmem:[%s9589_s5 + $0xa4] ss:$16 sps:$4 sm:$0xff]   ;;  %v7200_v23 = vld [vmem:[%s9589_s5 + $0xa0] ss:$16 sps:$4 sm:$0xff]  }
 0x17a   : > { %5508 = vmatpush1.bf16.msra.mxu1 %v7183_v12  ;;  %5468 = vmatprep.subr.bf16.mxu0 %v7184_v13  ;;  %v7198_v22 = vld [vmem:[%s9589_s5 + $0x2a4] ss:$16 sps:$4 sm:$0xff]   ;;  %v7201_v24 = vld [vmem:[%s9589_s5 + $0x2a0] ss:$16 sps:$4 sm:$0xff]  }
 0x17b   : > { %5509 = vmatprep.subr.bf16.mxu1 %v7186_v14  ;;  %v7202_v25 = vld [vmem:[%s9589_s5 + $0xc4] ss:$16 sps:$4 sm:$0xff]   ;;  %v7206_v27 = vld [vmem:[%s9589_s5 + $0xc0] ss:$16 sps:$4 sm:$0xff]  }
 0x17c   : > { %v7204_v26 = vld [vmem:[%s9589_s5 + $0x2c4] ss:$16 sps:$4 sm:$0xff]   ;;  %v7207_v28 = vld [vmem:[%s9589_s5 + $0x2c0] ss:$16 sps:$4 sm:$0xff]  }
 0x17d   : > { %5469 = vmatpush1.bf16.msra.mxu0 %v7188_v15  ;;  %v7208_v29 = vld [vmem:[%s9589_s5 + $0xe4] ss:$16 sps:$4 sm:$0xff]   ;;  %v7212_v31 = vld [vmem:[%s9589_s5 + $0xe0] ss:$16 sps:$4 sm:$0xff]  }
 0x17e   : > { %5510 = vmatpush1.bf16.msra.mxu1 %v7189_v16  ;;  %5470 = vmatprep.subr.bf16.mxu0 %v7190_v17  ;;  %v7210_v30 = vld [vmem:[%s9589_s5 + $0x2e4] ss:$16 sps:$4 sm:$0xff]   ;;  %v7213_v32 = vld [vmem:[%s9589_s5 + $0x2e0] ss:$16 sps:$4 sm:$0xff]  }
 0x17f   : > { %5511 = vmatprep.subr.bf16.mxu1 %v7192_v18  ;;  %v7214_v33 = vld [vmem:[%s9589_s5 + $0x104] ss:$16 sps:$4 sm:$0xff]   ;;  %v7218_v35 = vld [vmem:[%s9589_s5 + $0x100] ss:$16 sps:$4 sm:$0xff]  }
 0x180   : > { %v7216_v34 = vld [vmem:[%s9589_s5 + $0x304] ss:$16 sps:$4 sm:$0xff]   ;;  %v7219_v36 = vld [vmem:[%s9589_s5 + $0x300] ss:$16 sps:$4 sm:$0xff]  }
 0x181   : > { %5471 = vmatpush1.bf16.msra.mxu0 %v7194_v19  ;;  %v7220_v37 = vld [vmem:[%s9589_s5 + $0x124] ss:$16 sps:$4 sm:$0xff]   ;;  %v7224_v39 = vld [vmem:[%s9589_s5 + $0x120] ss:$16 sps:$4 sm:$0xff]  }
 0x182   : > { %5512 = vmatpush1.bf16.msra.mxu1 %v7195_v20  ;;  %5472 = vmatprep.subr.bf16.mxu0 %v7196_v21  ;;  %v7222_v38 = vld [vmem:[%s9589_s5 + $0x324] ss:$16 sps:$4 sm:$0xff]   ;;  %v7225_v40 = vld [vmem:[%s9589_s5 + $0x320] ss:$16 sps:$4 sm:$0xff]  }
 0x183   : > { %5513 = vmatprep.subr.bf16.mxu1 %v7198_v22  ;;  %v7226_v41 = vld [vmem:[%s9589_s5 + $0x144] ss:$16 sps:$4 sm:$0xff]   ;;  %v7230_v43 = vld [vmem:[%s9589_s5 + $0x140] ss:$16 sps:$4 sm:$0xff]  }
 0x184   : > { %v7228_v42 = vld [vmem:[%s9589_s5 + $0x344] ss:$16 sps:$4 sm:$0xff]   ;;  %v7231_v44 = vld [vmem:[%s9589_s5 + $0x340] ss:$16 sps:$4 sm:$0xff]  }
 0x185   : > { %5473 = vmatpush1.bf16.msra.mxu0 %v7200_v23  ;;  %v7232_v45 = vld [vmem:[%s9589_s5 + $0x164] ss:$16 sps:$4 sm:$0xff]   ;;  %v7236_v50 = vld [vmem:[%s9589_s5 + $0x160] ss:$16 sps:$4 sm:$0xff]  }
 0x186   : > { %5514 = vmatpush1.bf16.msra.mxu1 %v7201_v24  ;;  %5474 = vmatprep.subr.bf16.mxu0 %v7202_v25  ;;  %v7234_v46 = vld [vmem:[%s9589_s5 + $0x364] ss:$16 sps:$4 sm:$0xff]   ;;  %v7237_v51 = vld [vmem:[%s9589_s5 + $0x360] ss:$16 sps:$4 sm:$0xff]  }
 0x187   : > { %5515 = vmatprep.subr.bf16.mxu1 %v7204_v26  ;;  %v1542_v47 = vld [vmem:[%s9577_s26] sm:$0xff] }
 0x188   : > { %v9643_v48 = vcombine.high %v1542_v47, %v1542_v47  ;;  %v7238_v53 = vld [vmem:[%s9589_s5 + $0x184] ss:$16 sps:$4 sm:$0xff]   ;;  %v7242_v55 = vld [vmem:[%s9589_s5 + $0x180] ss:$16 sps:$4 sm:$0xff]   ;;  %v9670_v7 = vcombine.low %v1542_v47, %v1542_v47 }
 0x189   : > { %5475 = vmatpush1.bf16.msra.mxu0 %v7206_v27  ;;  %v7240_v54 = vld [vmem:[%s9589_s5 + $0x384] ss:$16 sps:$4 sm:$0xff]   ;;  %v7243_v56 = vld [vmem:[%s9589_s5 + $0x380] ss:$16 sps:$4 sm:$0xff]  }
 0x18a   : > { %5516 = vmatpush1.bf16.msra.mxu1 %v7207_v28  ;;  %5476 = vmatprep.subr.bf16.mxu0 %v7208_v29  ;;  %v7244_v57 = vld [vmem:[%s9589_s5 + $0x1a4] ss:$16 sps:$4 sm:$0xff]   ;;  %v7248_v59 = vld [vmem:[%s9589_s5 + $0x1a0] ss:$16 sps:$4 sm:$0xff]  }
 0x18b   : > { %5517 = vmatprep.subr.bf16.mxu1 %v7210_v30  ;;  %5494 = vmatprep.mubr.bf16.mxu0 %v9643_v48  ;;  %v7246_v58 = vld [vmem:[%s9589_s5 + $0x3a4] ss:$16 sps:$4 sm:$0xff]   ;;  %v7249_v60 = vld [vmem:[%s9589_s5 + $0x3a0] ss:$16 sps:$4 sm:$0xff]  }
 0x18c   : > { %v7250_v61 = vld [vmem:[%s9589_s5 + $0x1c4] ss:$16 sps:$4 sm:$0xff]   ;;  %v7254_v63 = vld [vmem:[%s9589_s5 + $0x1c0] ss:$16 sps:$4 sm:$0xff]  }
 0x18d   : > { %5477 = vmatpush1.bf16.msra.mxu0 %v7212_v31  ;;  %v7252_v62 = vld [vmem:[%s9589_s5 + $0x3c4] ss:$16 sps:$4 sm:$0xff]   ;;  %v7255_v0 = vld [vmem:[%s9589_s5 + $0x3c0] ss:$16 sps:$4 sm:$0xff]  }
 0x18e   : > { %5518 = vmatpush1.bf16.msra.mxu1 %v7213_v32  ;;  %5478 = vmatprep.subr.bf16.mxu0 %v7214_v33  ;;  %v7256_v1 = vld [vmem:[%s9589_s5 + $0x1e4] ss:$16 sps:$4 sm:$0xff]   ;;  %v7260_v3 = vld [vmem:[%s9589_s5 + $0x1e0] ss:$16 sps:$4 sm:$0xff]  }
 0x18f   : > { %5519 = vmatprep.subr.bf16.mxu1 %v7216_v34  ;;  %v7258_v2 = vld [vmem:[%s9589_s5 + $0x3e4] ss:$16 sps:$4 sm:$0xff]   ;;  %v7261_v4 = vld [vmem:[%s9589_s5 + $0x3e0] ss:$16 sps:$4 sm:$0xff]   ;;  %v9704_v34 = vld [vmem:[%s9577_s26 + $0x18] sm:$0xff] }
 0x190   : > { %v7268_v5 = vld [vmem:[%s9589_s5 + $0x404] ss:$16 sps:$4 sm:$0xff]   ;;  %v7266_v9 = vld [vmem:[%s9589_s5 + $0x400] ss:$16 sps:$4 sm:$0xff]  }
 0x191   : > { %5479 = vmatpush1.bf16.msra.mxu0 %v7218_v35  ;;  %v7271_v6 = vld [vmem:[%s9589_s5 + $0x604] ss:$16 sps:$4 sm:$0xff]   ;;  %v7269_v10 = vld [vmem:[%s9589_s5 + $0x600] ss:$16 sps:$4 sm:$0xff]  }
 0x192   : > { %5520 = vmatpush1.bf16.msra.mxu1 %v7219_v36  ;;  %5480 = vmatprep.subr.bf16.mxu0 %v7220_v37  ;;  %v7274_v11 = vld [vmem:[%s9589_s5 + $0x424] ss:$16 sps:$4 sm:$0xff]   ;;  %v7272_v13 = vld [vmem:[%s9589_s5 + $0x420] ss:$16 sps:$4 sm:$0xff]  }
 0x193   : > { %5521 = vmatprep.subr.bf16.mxu1 %v7222_v38  ;;  %v7277_v12 = vld [vmem:[%s9589_s5 + $0x624] ss:$16 sps:$4 sm:$0xff]   ;;  %v7275_v14 = vld [vmem:[%s9589_s5 + $0x620] ss:$16 sps:$4 sm:$0xff]   ;;  %v9714_v38 = vcombine.high %v9704_v34, %v9704_v34 }
 0x194   : > { %v7280_v15 = vld [vmem:[%s9589_s5 + $0x444] ss:$16 sps:$4 sm:$0xff]   ;;  %v7278_v17 = vld [vmem:[%s9589_s5 + $0x440] ss:$16 sps:$4 sm:$0xff]  }
 0x195   : > { %5481 = vmatpush1.bf16.msra.mxu0 %v7224_v39  ;;  %v7283_v16 = vld [vmem:[%s9589_s5 + $0x644] ss:$16 sps:$4 sm:$0xff]   ;;  %v7281_v18 = vld [vmem:[%s9589_s5 + $0x640] ss:$16 sps:$4 sm:$0xff]  }
 0x196   : > { %5522 = vmatpush1.bf16.msra.mxu1 %v7225_v40  ;;  %5482 = vmatprep.subr.bf16.mxu0 %v7226_v41  ;;  %v7286_v19 = vld [vmem:[%s9589_s5 + $0x464] ss:$16 sps:$4 sm:$0xff]   ;;  %v7284_v21 = vld [vmem:[%s9589_s5 + $0x460] ss:$16 sps:$4 sm:$0xff]  }
 0x197   : > { %5523 = vmatprep.subr.bf16.mxu1 %v7228_v42  ;;  %v7289_v20 = vld [vmem:[%s9589_s5 + $0x664] ss:$16 sps:$4 sm:$0xff]   ;;  %v7287_v22 = vld [vmem:[%s9589_s5 + $0x660] ss:$16 sps:$4 sm:$0xff]  }
 0x198   : > { %v7292_v23 = vld [vmem:[%s9589_s5 + $0x484] ss:$16 sps:$4 sm:$0xff]   ;;  %v7290_v25 = vld [vmem:[%s9589_s5 + $0x480] ss:$16 sps:$4 sm:$0xff]  }
 0x199   : > { %5483 = vmatpush1.bf16.msra.mxu0 %v7230_v43  ;;  %v7295_v24 = vld [vmem:[%s9589_s5 + $0x684] ss:$16 sps:$4 sm:$0xff]   ;;  %v7293_v26 = vld [vmem:[%s9589_s5 + $0x680] ss:$16 sps:$4 sm:$0xff]  }
 0x19a   : > { %5524 = vmatpush1.bf16.msra.mxu1 %v7231_v44  ;;  %5484 = vmatprep.subr.bf16.mxu0 %v7232_v45  ;;  %v7298_v27 = vld [vmem:[%s9589_s5 + $0x4a4] ss:$16 sps:$4 sm:$0xff]   ;;  %v7296_v29 = vld [vmem:[%s9589_s5 + $0x4a0] ss:$16 sps:$4 sm:$0xff]  }
 0x19b   : > { %5525 = vmatprep.subr.bf16.mxu1 %v7234_v46  ;;  %v7301_v28 = vld [vmem:[%s9589_s5 + $0x6a4] ss:$16 sps:$4 sm:$0xff]   ;;  %v7299_v30 = vld [vmem:[%s9589_s5 + $0x6a0] ss:$16 sps:$4 sm:$0xff]  }
 0x19c   : > { %v7304_v31 = vld [vmem:[%s9589_s5 + $0x4c4] ss:$16 sps:$4 sm:$0xff]   ;;  %v7302_v35 = vld [vmem:[%s9589_s5 + $0x4c0] ss:$16 sps:$4 sm:$0xff]  }
 0x19d   : > { %5485 = vmatpush1.bf16.msra.mxu0 %v7236_v50  ;;  %v7307_v32 = vld [vmem:[%s9589_s5 + $0x6c4] ss:$16 sps:$4 sm:$0xff]   ;;  %v7305_v36 = vld [vmem:[%s9589_s5 + $0x6c0] ss:$16 sps:$4 sm:$0xff]  }
 0x19e   : > { %5526 = vmatpush1.bf16.msra.mxu1 %v7237_v51  ;;  %5486 = vmatprep.subr.bf16.mxu0 %v7238_v53  ;;  %v9701_v33 = vld [vmem:[%s9577_s26 + $0x10] sm:$0xff] }
 0x19f   : > { %5527 = vmatprep.subr.bf16.mxu1 %v7240_v54  ;;  %v9710_v37 = vcombine.high %v9701_v33, %v9701_v33  ;;  %v7310_v39 = vld [vmem:[%s9589_s5 + $0x4e4] ss:$16 sps:$4 sm:$0xff]   ;;  %v7308_v41 = vld [vmem:[%s9589_s5 + $0x4e0] ss:$16 sps:$4 sm:$0xff]  }
 0x1a0   : > { %v7313_v40 = vld [vmem:[%s9589_s5 + $0x6e4] ss:$16 sps:$4 sm:$0xff]   ;;  %v7311_v42 = vld [vmem:[%s9589_s5 + $0x6e0] ss:$16 sps:$4 sm:$0xff]  }
 0x1a1   : > { %5487 = vmatpush1.bf16.msra.mxu0 %v7242_v55  ;;  %v7316_v43 = vld [vmem:[%s9589_s5 + $0x504] ss:$16 sps:$4 sm:$0xff]   ;;  %v7314_v45 = vld [vmem:[%s9589_s5 + $0x500] ss:$16 sps:$4 sm:$0xff]  }
 0x1a2   : > { %5528 = vmatpush1.bf16.msra.mxu1 %v7243_v56  ;;  %5488 = vmatprep.subr.bf16.mxu0 %v7244_v57  ;;  %v7319_v44 = vld [vmem:[%s9589_s5 + $0x704] ss:$16 sps:$4 sm:$0xff]   ;;  %v7317_v46 = vld [vmem:[%s9589_s5 + $0x700] ss:$16 sps:$4 sm:$0xff]  }
 0x1a3   : > { %5529 = vmatprep.subr.bf16.mxu1 %v7246_v58  ;;  %v7322_v47 = vld [vmem:[%s9589_s5 + $0x524] ss:$16 sps:$4 sm:$0xff]   ;;  %v7320_v50 = vld [vmem:[%s9589_s5 + $0x520] ss:$16 sps:$4 sm:$0xff]  }
 0x1a4   : > { %v7325_v49 = vld [vmem:[%s9589_s5 + $0x724] ss:$16 sps:$4 sm:$0xff]   ;;  %v7323_v51 = vld [vmem:[%s9589_s5 + $0x720] ss:$16 sps:$4 sm:$0xff]  }
 0x1a5   : > { %5489 = vmatpush1.bf16.msra.mxu0 %v7248_v59  ;;  %v7328_v53 = vld [vmem:[%s9589_s5 + $0x544] ss:$16 sps:$4 sm:$0xff]   ;;  %v7326_v55 = vld [vmem:[%s9589_s5 + $0x540] ss:$16 sps:$4 sm:$0xff]  }
 0x1a6   : > { %5530 = vmatpush1.bf16.msra.mxu1 %v7249_v60  ;;  %5490 = vmatprep.subr.bf16.mxu0 %v7250_v61  ;;  %v7331_v54 = vld [vmem:[%s9589_s5 + $0x744] ss:$16 sps:$4 sm:$0xff]   ;;  %v7329_v56 = vld [vmem:[%s9589_s5 + $0x740] ss:$16 sps:$4 sm:$0xff]  }
 0x1a7   : > { %5531 = vmatprep.subr.bf16.mxu1 %v7252_v62  ;;  %v7334_v57 = vld [vmem:[%s9589_s5 + $0x564] ss:$16 sps:$4 sm:$0xff]   ;;  %v7332_v59 = vld [vmem:[%s9589_s5 + $0x560] ss:$16 sps:$4 sm:$0xff]  }
 0x1a8   : > { %v7337_v58 = vld [vmem:[%s9589_s5 + $0x764] ss:$16 sps:$4 sm:$0xff]   ;;  %v7335_v60 = vld [vmem:[%s9589_s5 + $0x760] ss:$16 sps:$4 sm:$0xff]  }
 0x1a9   : > { %5491 = vmatpush1.bf16.msra.mxu0 %v7254_v63  ;;  %v7340_v61 = vld [vmem:[%s9589_s5 + $0x584] ss:$16 sps:$4 sm:$0xff]   ;;  %v7338_v63 = vld [vmem:[%s9589_s5 + $0x580] ss:$16 sps:$4 sm:$0xff]  }
 0x1aa   : > { %5532 = vmatpush1.bf16.msra.mxu1 %v7255_v0  ;;  %5492 = vmatprep.subr.bf16.mxu0 %v7256_v1  ;;  %v7343_v62 = vld [vmem:[%s9589_s5 + $0x784] ss:$16 sps:$4 sm:$0xff]   ;;  %v7341_v0 = vld [vmem:[%s9589_s5 + $0x780] ss:$16 sps:$4 sm:$0xff]  }
 0x1ab   : > { %5533 = vmatprep.subr.bf16.mxu1 %v7258_v2  ;;  %v7346_v1 = vld [vmem:[%s9589_s5 + $0x5a4] ss:$16 sps:$4 sm:$0xff]  }
 0x1ac   : > { %v7349_v2 = vld [vmem:[%s9589_s5 + $0x7a4] ss:$16 sps:$4 sm:$0xff]  }
 0x1ad   : > { %5493 = vmatpush1.bf16.msra.mxu0 %v7260_v3  ;;  %v7344_v3 = vld [vmem:[%s9589_s5 + $0x5a0] ss:$16 sps:$4 sm:$0xff]  }
 0x1ae   : > { %5534 = vmatpush1.bf16.msra.mxu1 %v7261_v4  ;;  %5544 = vmatprep.subr.bf16.mxu0 %v7268_v5  ;;  %v7347_v4 = vld [vmem:[%s9589_s5 + $0x7a0] ss:$16 sps:$4 sm:$0xff]   ;;  %v7352_v5 = vld [vmem:[%s9589_s5 + $0x5c4] ss:$16 sps:$4 sm:$0xff]  }
 0x1af   : > { %5585 = vmatprep.subr.bf16.mxu1 %v7271_v6  ;;  %v7355_v6 = vld [vmem:[%s9589_s5 + $0x7c4] ss:$16 sps:$4 sm:$0xff]  }
 0x1b0   : > { %5495 = vmatmul.mubr.bf16.vlgmr.msra.gmra.mrb[0].mxu0 %v9670_v7 }
 0x1b1   : > { %5536 = vmatmul.mubr.bf16.vlgmr.msra.gmra.mrb[0].mxu1 %v9672_v8  ;;  %5545 = vmatpush1.bf16.msra.mxu0 %v7266_v9  ;;  %v7350_v9 = vld [vmem:[%s9589_s5 + $0x5c0] ss:$16 sps:$4 sm:$0xff]  }
 0x1b2   : > { %5586 = vmatpush1.bf16.msra.mxu1 %v7269_v10  ;;  %5546 = vmatprep.subr.bf16.mxu0 %v7274_v11  ;;  %v7353_v10 = vld [vmem:[%s9589_s5 + $0x7c0] ss:$16 sps:$4 sm:$0xff]   ;;  %v7358_v11 = vld [vmem:[%s9589_s5 + $0x5e4] ss:$16 sps:$4 sm:$0xff]  }
 0x1b3   : > { %5587 = vmatprep.subr.bf16.mxu1 %v7277_v12  ;;  %5576 = vmatprep.mubr.bf16.mxu0 %v9710_v37  ;;  %v7361_v12 = vld [vmem:[%s9589_s5 + $0x7e4] ss:$16 sps:$4 sm:$0xff]  }
 0x1b4   : > { %5617 = vmatprep.mubr.bf16.mxu1 %v9714_v38 }
 0x1b5   : > { %5547 = vmatpush1.bf16.msra.mxu0 %v7272_v13  ;;  %v7356_v13 = vld [vmem:[%s9589_s5 + $0x5e0] ss:$16 sps:$4 sm:$0xff]  }
 0x1b6   : > { %5588 = vmatpush1.bf16.msra.mxu1 %v7275_v14  ;;  %5548 = vmatprep.subr.bf16.mxu0 %v7280_v15  ;;  %v7359_v14 = vld [vmem:[%s9589_s5 + $0x7e0] ss:$16 sps:$4 sm:$0xff]   ;;  %v7368_v15 = vld [vmem:[%s9589_s5 + $0x804] ss:$16 sps:$4 sm:$0xff]  }
 0x1b7   : > { %5589 = vmatprep.subr.bf16.mxu1 %v7283_v16  ;;  %v7371_v16 = vld [vmem:[%s9589_s5 + $0xa04] ss:$16 sps:$4 sm:$0xff]  }
 0x1b9   : > { %5549 = vmatpush1.bf16.msra.mxu0 %v7278_v17  ;;  %v9758_v17 = vcombine.low %v9701_v33, %v9701_v33  ;;  %v7386_v33 = vld [vmem:[%s9589_s5 + $0x864] ss:$16 sps:$4 sm:$0xff]  }
 0x1ba   : > { %5590 = vmatpush1.bf16.msra.mxu1 %v7281_v18  ;;  %5550 = vmatprep.subr.bf16.mxu0 %v7286_v19  ;;  %v9762_v18 = vcombine.low %v9704_v34, %v9704_v34  ;;  %v7366_v19 = vld [vmem:[%s9589_s5 + $0x800] ss:$16 sps:$4 sm:$0xff]   ;;  %v7389_v34 = vld [vmem:[%s9589_s5 + $0xa64] ss:$16 sps:$4 sm:$0xff]  }
 0x1bb   : > { %5591 = vmatprep.subr.bf16.mxu1 %v7289_v20  ;;  %v7369_v20 = vld [vmem:[%s9589_s5 + $0xa00] ss:$16 sps:$4 sm:$0xff]  }
 0x1bd   : > { %5551 = vmatpush1.bf16.msra.mxu0 %v7284_v21  ;;  %v7374_v21 = vld [vmem:[%s9589_s5 + $0x824] ss:$16 sps:$4 sm:$0xff]  }
 0x1be   : > { %5592 = vmatpush1.bf16.msra.mxu1 %v7287_v22  ;;  %5552 = vmatprep.subr.bf16.mxu0 %v7292_v23  ;;  %v7377_v22 = vld [vmem:[%s9589_s5 + $0xa24] ss:$16 sps:$4 sm:$0xff]  }
 0x1bf   : > { %5593 = vmatprep.subr.bf16.mxu1 %v7295_v24  ;;  %v9769_v23 = vld [vmem:[%s9577_s26 + $0x20] sm:$0xff]  ;;  %v9772_v24 = vld [vmem:[%s9577_s26 + $0x28] sm:$0xff] }
 0x1c1   : > { %5553 = vmatpush1.bf16.msra.mxu0 %v7290_v25  ;;  %v9776_v25 = vcombine.high %v9769_v23, %v9769_v23 }
 0x1c2   : > { %5594 = vmatpush1.bf16.msra.mxu1 %v7293_v26  ;;  %5554 = vmatprep.subr.bf16.mxu0 %v7298_v27  ;;  %v9780_v26 = vcombine.high %v9772_v24, %v9772_v24  ;;  %v7372_v27 = vld [vmem:[%s9589_s5 + $0x820] ss:$16 sps:$4 sm:$0xff]  }
 0x1c3   : > { %5595 = vmatprep.subr.bf16.mxu1 %v7301_v28  ;;  %v7375_v28 = vld [vmem:[%s9589_s5 + $0xa20] ss:$16 sps:$4 sm:$0xff]  }
 0x1c5   : > { %5555 = vmatpush1.bf16.msra.mxu0 %v7296_v29  ;;  %v7380_v29 = vld [vmem:[%s9589_s5 + $0x844] ss:$16 sps:$4 sm:$0xff]  }
 0x1c6   : > { %5596 = vmatpush1.bf16.msra.mxu1 %v7299_v30  ;;  %5556 = vmatprep.subr.bf16.mxu0 %v7304_v31  ;;  %v7383_v30 = vld [vmem:[%s9589_s5 + $0xa44] ss:$16 sps:$4 sm:$0xff]   ;;  %v7378_v31 = vld [vmem:[%s9589_s5 + $0x840] ss:$16 sps:$4 sm:$0xff]  }
 0x1c7   : > { %5597 = vmatprep.subr.bf16.mxu1 %v7307_v32  ;;  %v7381_v32 = vld [vmem:[%s9589_s5 + $0xa40] ss:$16 sps:$4 sm:$0xff]  }
 0x1c9   : > { %5557 = vmatpush1.bf16.msra.mxu0 %v7302_v35  ;;  %v7384_v35 = vld [vmem:[%s9589_s5 + $0x860] ss:$16 sps:$4 sm:$0xff]  }
 0x1ca   : > { %5598 = vmatpush1.bf16.msra.mxu1 %v7305_v36  ;;  %5558 = vmatprep.subr.bf16.mxu0 %v7310_v39  ;;  %v7387_v36 = vld [vmem:[%s9589_s5 + $0xa60] ss:$16 sps:$4 sm:$0xff]   ;;  %v7392_v39 = vld [vmem:[%s9589_s5 + $0x884] ss:$16 sps:$4 sm:$0xff]  }
 0x1cb   : > { %5599 = vmatprep.subr.bf16.mxu1 %v7313_v40  ;;  %v7395_v40 = vld [vmem:[%s9589_s5 + $0xa84] ss:$16 sps:$4 sm:$0xff]  }
 0x1cd   : > { %5559 = vmatpush1.bf16.msra.mxu0 %v7308_v41  ;;  %v7390_v41 = vld [vmem:[%s9589_s5 + $0x880] ss:$16 sps:$4 sm:$0xff]  }
 0x1ce   : > { %5600 = vmatpush1.bf16.msra.mxu1 %v7311_v42  ;;  %5560 = vmatprep.subr.bf16.mxu0 %v7316_v43  ;;  %v7393_v42 = vld [vmem:[%s9589_s5 + $0xa80] ss:$16 sps:$4 sm:$0xff]   ;;  %v7398_v43 = vld [vmem:[%s9589_s5 + $0x8a4] ss:$16 sps:$4 sm:$0xff]  }
 0x1cf   : > { %5601 = vmatprep.subr.bf16.mxu1 %v7319_v44  ;;  %v7401_v44 = vld [vmem:[%s9589_s5 + $0xaa4] ss:$16 sps:$4 sm:$0xff]  }
 0x1d1   : > { %5561 = vmatpush1.bf16.msra.mxu0 %v7314_v45  ;;  %v7396_v45 = vld [vmem:[%s9589_s5 + $0x8a0] ss:$16 sps:$4 sm:$0xff]  }
 0x1d2   : > { %5602 = vmatpush1.bf16.msra.mxu1 %v7317_v46  ;;  %5562 = vmatprep.subr.bf16.mxu0 %v7322_v47  ;;  %v7399_v46 = vld [vmem:[%s9589_s5 + $0xaa0] ss:$16 sps:$4 sm:$0xff]   ;;  %v7404_v47 = vld [vmem:[%s9589_s5 + $0x8c4] ss:$16 sps:$4 sm:$0xff]  }
 0x1d3   : > { %5603 = vmatprep.subr.bf16.mxu1 %v7325_v49  ;;  %v7407_v49 = vld [vmem:[%s9589_s5 + $0xac4] ss:$16 sps:$4 sm:$0xff]  }
 0x1d5   : > { %5563 = vmatpush1.bf16.msra.mxu0 %v7320_v50  ;;  %v7402_v50 = vld [vmem:[%s9589_s5 + $0x8c0] ss:$16 sps:$4 sm:$0xff]  }
 0x1d6   : > { %5604 = vmatpush1.bf16.msra.mxu1 %v7323_v51  ;;  %5564 = vmatprep.subr.bf16.mxu0 %v7328_v53  ;;  %v7405_v51 = vld [vmem:[%s9589_s5 + $0xac0] ss:$16 sps:$4 sm:$0xff]   ;;  %v7410_v53 = vld [vmem:[%s9589_s5 + $0x8e4] ss:$16 sps:$4 sm:$0xff]  }
 0x1d7   : > { %5605 = vmatprep.subr.bf16.mxu1 %v7331_v54  ;;  %v7413_v54 = vld [vmem:[%s9589_s5 + $0xae4] ss:$16 sps:$4 sm:$0xff]  }
 0x1d9   : > { %5565 = vmatpush1.bf16.msra.mxu0 %v7326_v55  ;;  %v7408_v55 = vld [vmem:[%s9589_s5 + $0x8e0] ss:$16 sps:$4 sm:$0xff]  }
 0x1da   : > { %5606 = vmatpush1.bf16.msra.mxu1 %v7329_v56  ;;  %5566 = vmatprep.subr.bf16.mxu0 %v7334_v57  ;;  %v7411_v56 = vld [vmem:[%s9589_s5 + $0xae0] ss:$16 sps:$4 sm:$0xff]   ;;  %v7416_v57 = vld [vmem:[%s9589_s5 + $0x904] ss:$16 sps:$4 sm:$0xff]  }
 0x1db   : > { %5607 = vmatprep.subr.bf16.mxu1 %v7337_v58  ;;  %v7419_v58 = vld [vmem:[%s9589_s5 + $0xb04] ss:$16 sps:$4 sm:$0xff]  }
 0x1dd   : > { %5567 = vmatpush1.bf16.msra.mxu0 %v7332_v59  ;;  %v7414_v59 = vld [vmem:[%s9589_s5 + $0x900] ss:$16 sps:$4 sm:$0xff]  }
 0x1de   : > { %5608 = vmatpush1.bf16.msra.mxu1 %v7335_v60  ;;  %5568 = vmatprep.subr.bf16.mxu0 %v7340_v61  ;;  %v7417_v60 = vld [vmem:[%s9589_s5 + $0xb00] ss:$16 sps:$4 sm:$0xff]   ;;  %v7422_v61 = vld [vmem:[%s9589_s5 + $0x924] ss:$16 sps:$4 sm:$0xff]  }
 0x1df   : > { %5609 = vmatprep.subr.bf16.mxu1 %v7343_v62  ;;  %v7425_v62 = vld [vmem:[%s9589_s5 + $0xb24] ss:$16 sps:$4 sm:$0xff]  }
 0x1e1   : > { %5569 = vmatpush1.bf16.msra.mxu0 %v7338_v63  ;;  %v7420_v63 = vld [vmem:[%s9589_s5 + $0x920] ss:$16 sps:$4 sm:$0xff]  }
 0x1e2   : > { %5610 = vmatpush1.bf16.msra.mxu1 %v7341_v0  ;;  %5570 = vmatprep.subr.bf16.mxu0 %v7346_v1  ;;  %v7423_v0 = vld [vmem:[%s9589_s5 + $0xb20] ss:$16 sps:$4 sm:$0xff]   ;;  %v7428_v1 = vld [vmem:[%s9589_s5 + $0x944] ss:$16 sps:$4 sm:$0xff]  }
 0x1e3   : > { %5611 = vmatprep.subr.bf16.mxu1 %v7349_v2  ;;  %v7431_v2 = vld [vmem:[%s9589_s5 + $0xb44] ss:$16 sps:$4 sm:$0xff]  }
 0x1e5   : > { %5571 = vmatpush1.bf16.msra.mxu0 %v7344_v3  ;;  %v7426_v3 = vld [vmem:[%s9589_s5 + $0x940] ss:$16 sps:$4 sm:$0xff]  }
 0x1e6   : > { %5612 = vmatpush1.bf16.msra.mxu1 %v7347_v4  ;;  %5572 = vmatprep.subr.bf16.mxu0 %v7352_v5  ;;  %v7429_v4 = vld [vmem:[%s9589_s5 + $0xb40] ss:$16 sps:$4 sm:$0xff]   ;;  %v7434_v5 = vld [vmem:[%s9589_s5 + $0x964] ss:$16 sps:$4 sm:$0xff]  }
 0x1e7   : > { %5613 = vmatprep.subr.bf16.mxu1 %v7355_v6  ;;  %v7437_v6 = vld [vmem:[%s9589_s5 + $0xb64] ss:$16 sps:$4 sm:$0xff]  }
 0x1e9   : > { %5573 = vmatpush1.bf16.msra.mxu0 %v7350_v9  ;;  %v7432_v9 = vld [vmem:[%s9589_s5 + $0x960] ss:$16 sps:$4 sm:$0xff]  }
 0x1ea   : > { %5614 = vmatpush1.bf16.msra.mxu1 %v7353_v10  ;;  %5574 = vmatprep.subr.bf16.mxu0 %v7358_v11  ;;  %v7435_v10 = vld [vmem:[%s9589_s5 + $0xb60] ss:$16 sps:$4 sm:$0xff]   ;;  %v7440_v11 = vld [vmem:[%s9589_s5 + $0x984] ss:$16 sps:$4 sm:$0xff]  }
 0x1eb   : > { %5615 = vmatprep.subr.bf16.mxu1 %v7361_v12  ;;  %v7443_v12 = vld [vmem:[%s9589_s5 + $0xb84] ss:$16 sps:$4 sm:$0xff]  }
 0x1ed   : > { %5575 = vmatpush1.bf16.msra.mxu0 %v7356_v13  ;;  %v7438_v13 = vld [vmem:[%s9589_s5 + $0x980] ss:$16 sps:$4 sm:$0xff]  }
 0x1ee   : > { %5616 = vmatpush1.bf16.msra.mxu1 %v7359_v14  ;;  %5626 = vmatprep.subr.bf16.mxu0 %v7368_v15  ;;  %v7441_v14 = vld [vmem:[%s9589_s5 + $0xb80] ss:$16 sps:$4 sm:$0xff]   ;;  %v7446_v15 = vld [vmem:[%s9589_s5 + $0x9a4] ss:$16 sps:$4 sm:$0xff]  }
 0x1ef   : > { %5667 = vmatprep.subr.bf16.mxu1 %v7371_v16  ;;  %v7449_v16 = vld [vmem:[%s9589_s5 + $0xba4] ss:$16 sps:$4 sm:$0xff]  }
 0x1f0   : > { %5577 = vmatmul.mubr.bf16.vlgmr.msra.gmra.mrb[4].mxu0 %v9758_v17 }
 0x1f1   : > { %5618 = vmatmul.mubr.bf16.vlgmr.msra.gmra.mrb[4].mxu1 %v9762_v18  ;;  %5627 = vmatpush1.bf16.msra.mxu0 %v7366_v19  ;;  %v7444_v19 = vld [vmem:[%s9589_s5 + $0x9a0] ss:$16 sps:$4 sm:$0xff]  }
 0x1f2   : > { %5668 = vmatpush1.bf16.msra.mxu1 %v7369_v20  ;;  %5628 = vmatprep.subr.bf16.mxu0 %v7374_v21  ;;  %v7447_v20 = vld [vmem:[%s9589_s5 + $0xba0] ss:$16 sps:$4 sm:$0xff]   ;;  %v7452_v21 = vld [vmem:[%s9589_s5 + $0x9c4] ss:$16 sps:$4 sm:$0xff]  }
 0x1f3   : > { %5669 = vmatprep.subr.bf16.mxu1 %v7377_v22  ;;  %5658 = vmatprep.mubr.bf16.mxu0 %v9776_v25  ;;  %v7455_v22 = vld [vmem:[%s9589_s5 + $0xbc4] ss:$16 sps:$4 sm:$0xff]  }
 0x1f4   : > { %5699 = vmatprep.mubr.bf16.mxu1 %v9780_v26 }
 0x1f5   : > { %5629 = vmatpush1.bf16.msra.mxu0 %v7372_v27  ;;  %v7450_v27 = vld [vmem:[%s9589_s5 + $0x9c0] ss:$16 sps:$4 sm:$0xff]  }
 0x1f6   : > { %5670 = vmatpush1.bf16.msra.mxu1 %v7375_v28  ;;  %5630 = vmatprep.subr.bf16.mxu0 %v7380_v29  ;;  %v7453_v28 = vld [vmem:[%s9589_s5 + $0xbc0] ss:$16 sps:$4 sm:$0xff]   ;;  %v7458_v29 = vld [vmem:[%s9589_s5 + $0x9e4] ss:$16 sps:$4 sm:$0xff]  }
 0x1f7   : > { %5671 = vmatprep.subr.bf16.mxu1 %v7383_v30  ;;  %v7461_v30 = vld [vmem:[%s9589_s5 + $0xbe4] ss:$16 sps:$4 sm:$0xff]  }
 0x1f9   : > { %5631 = vmatpush1.bf16.msra.mxu0 %v7378_v31  ;;  %v7456_v31 = vld [vmem:[%s9589_s5 + $0x9e0] ss:$16 sps:$4 sm:$0xff]  }
 0x1fa   : > { %5672 = vmatpush1.bf16.msra.mxu1 %v7381_v32  ;;  %5632 = vmatprep.subr.bf16.mxu0 %v7386_v33  ;;  %v7459_v32 = vld [vmem:[%s9589_s5 + $0xbe0] ss:$16 sps:$4 sm:$0xff]   ;;  %v7468_v33 = vld [vmem:[%s9589_s5 + $0xc04] ss:$16 sps:$4 sm:$0xff]  }
 0x1fb   : > { %5673 = vmatprep.subr.bf16.mxu1 %v7389_v34  ;;  %v7471_v34 = vld [vmem:[%s9589_s5 + $0xe04] ss:$16 sps:$4 sm:$0xff]  }
 0x1fd   : > { %5633 = vmatpush1.bf16.msra.mxu0 %v7384_v35  ;;  %v7466_v35 = vld [vmem:[%s9589_s5 + $0xc00] ss:$16 sps:$4 sm:$0xff]  }
 0x1fe   : > { %5674 = vmatpush1.bf16.msra.mxu1 %v7387_v36  ;;  %5634 = vmatprep.subr.bf16.mxu0 %v7392_v39  ;;  %v7469_v36 = vld [vmem:[%s9589_s5 + $0xe00] ss:$16 sps:$4 sm:$0xff]   ;;  %v9850_v39 = vcombine.low %v9769_v23, %v9769_v23 }
 0x1ff   : > { %5675 = vmatprep.subr.bf16.mxu1 %v7395_v40  ;;  %v9854_v40 = vcombine.low %v9772_v24, %v9772_v24 }
 0x201   : > { %5635 = vmatpush1.bf16.msra.mxu0 %v7390_v41  ;;  %v9857_v41 = vld [vmem:[%s9577_s26 + $0x30] sm:$0xff] }
 0x202   : > { %5676 = vmatpush1.bf16.msra.mxu1 %v7393_v42  ;;  %5636 = vmatprep.subr.bf16.mxu0 %v7398_v43  ;;  %v9860_v42 = vld [vmem:[%s9577_s26 + $0x38] sm:$0xff]  ;;  %v7474_v43 = vld [vmem:[%s9589_s5 + $0xc24] ss:$16 sps:$4 sm:$0xff]   ;;  %v9866_v23 = vcombine.high %v9857_v41, %v9857_v41 }
 0x203   : > { %5677 = vmatprep.subr.bf16.mxu1 %v7401_v44  ;;  %v7477_v44 = vld [vmem:[%s9589_s5 + $0xe24] ss:$16 sps:$4 sm:$0xff]   ;;  %v9870_v24 = vcombine.high %v9860_v42, %v9860_v42 }
 0x205   : > { %5637 = vmatpush1.bf16.msra.mxu0 %v7396_v45  ;;  %v7472_v45 = vld [vmem:[%s9589_s5 + $0xc20] ss:$16 sps:$4 sm:$0xff]  }
 0x206   : > { %5678 = vmatpush1.bf16.msra.mxu1 %v7399_v46  ;;  %5638 = vmatprep.subr.bf16.mxu0 %v7404_v47  ;;  %v7475_v46 = vld [vmem:[%s9589_s5 + $0xe20] ss:$16 sps:$4 sm:$0xff]   ;;  %v7480_v47 = vld [vmem:[%s9589_s5 + $0xc44] ss:$16 sps:$4 sm:$0xff]  }
 0x207   : > { %5679 = vmatprep.subr.bf16.mxu1 %v7407_v49  ;;  %v7483_v49 = vld [vmem:[%s9589_s5 + $0xe44] ss:$16 sps:$4 sm:$0xff]  }
 0x209   : > { %5639 = vmatpush1.bf16.msra.mxu0 %v7402_v50  ;;  %v7478_v50 = vld [vmem:[%s9589_s5 + $0xc40] ss:$16 sps:$4 sm:$0xff]  }
 0x20a   : > { %5680 = vmatpush1.bf16.msra.mxu1 %v7405_v51  ;;  %5640 = vmatprep.subr.bf16.mxu0 %v7410_v53  ;;  %v7481_v51 = vld [vmem:[%s9589_s5 + $0xe40] ss:$16 sps:$4 sm:$0xff]   ;;  %v7486_v53 = vld [vmem:[%s9589_s5 + $0xc64] ss:$16 sps:$4 sm:$0xff]  }
 0x20b   : > { %5681 = vmatprep.subr.bf16.mxu1 %v7413_v54  ;;  %v7489_v54 = vld [vmem:[%s9589_s5 + $0xe64] ss:$16 sps:$4 sm:$0xff]  }
 0x20d   : > { %5641 = vmatpush1.bf16.msra.mxu0 %v7408_v55  ;;  %v7484_v55 = vld [vmem:[%s9589_s5 + $0xc60] ss:$16 sps:$4 sm:$0xff]  }
 0x20e   : > { %5682 = vmatpush1.bf16.msra.mxu1 %v7411_v56  ;;  %5642 = vmatprep.subr.bf16.mxu0 %v7416_v57  ;;  %v7487_v56 = vld [vmem:[%s9589_s5 + $0xe60] ss:$16 sps:$4 sm:$0xff]   ;;  %v7492_v57 = vld [vmem:[%s9589_s5 + $0xc84] ss:$16 sps:$4 sm:$0xff]  }
 0x20f   : > { %5683 = vmatprep.subr.bf16.mxu1 %v7419_v58  ;;  %v7495_v58 = vld [vmem:[%s9589_s5 + $0xe84] ss:$16 sps:$4 sm:$0xff]  }
 0x211   : > { %5643 = vmatpush1.bf16.msra.mxu0 %v7414_v59  ;;  %v7490_v59 = vld [vmem:[%s9589_s5 + $0xc80] ss:$16 sps:$4 sm:$0xff]  }
 0x212   : > { %5684 = vmatpush1.bf16.msra.mxu1 %v7417_v60  ;;  %5644 = vmatprep.subr.bf16.mxu0 %v7422_v61  ;;  %v7493_v60 = vld [vmem:[%s9589_s5 + $0xe80] ss:$16 sps:$4 sm:$0xff]   ;;  %v7498_v61 = vld [vmem:[%s9589_s5 + $0xca4] ss:$16 sps:$4 sm:$0xff]  }
 0x213   : > { %5685 = vmatprep.subr.bf16.mxu1 %v7425_v62  ;;  %v7501_v62 = vld [vmem:[%s9589_s5 + $0xea4] ss:$16 sps:$4 sm:$0xff]  }
 0x215   : > { %5645 = vmatpush1.bf16.msra.mxu0 %v7420_v63  ;;  %v7496_v63 = vld [vmem:[%s9589_s5 + $0xca0] ss:$16 sps:$4 sm:$0xff]  }
 0x216   : > { %5686 = vmatpush1.bf16.msra.mxu1 %v7423_v0  ;;  %5646 = vmatprep.subr.bf16.mxu0 %v7428_v1  ;;  %v7499_v0 = vld [vmem:[%s9589_s5 + $0xea0] ss:$16 sps:$4 sm:$0xff]   ;;  %v7504_v1 = vld [vmem:[%s9589_s5 + $0xcc4] ss:$16 sps:$4 sm:$0xff]  }
 0x217   : > { %5687 = vmatprep.subr.bf16.mxu1 %v7431_v2  ;;  %v7507_v2 = vld [vmem:[%s9589_s5 + $0xec4] ss:$16 sps:$4 sm:$0xff]  }
 0x219   : > { %5647 = vmatpush1.bf16.msra.mxu0 %v7426_v3  ;;  %v7502_v3 = vld [vmem:[%s9589_s5 + $0xcc0] ss:$16 sps:$4 sm:$0xff]  }
 0x21a   : > { %5688 = vmatpush1.bf16.msra.mxu1 %v7429_v4  ;;  %5648 = vmatprep.subr.bf16.mxu0 %v7434_v5  ;;  %v7505_v4 = vld [vmem:[%s9589_s5 + $0xec0] ss:$16 sps:$4 sm:$0xff]   ;;  %v7510_v5 = vld [vmem:[%s9589_s5 + $0xce4] ss:$16 sps:$4 sm:$0xff]  }
 0x21b   : > { %5689 = vmatprep.subr.bf16.mxu1 %v7437_v6  ;;  %v7513_v6 = vld [vmem:[%s9589_s5 + $0xee4] ss:$16 sps:$4 sm:$0xff]  }
 0x21d   : > { %5649 = vmatpush1.bf16.msra.mxu0 %v7432_v9  ;;  %v7508_v9 = vld [vmem:[%s9589_s5 + $0xce0] ss:$16 sps:$4 sm:$0xff]  }
 0x21e   : > { %5690 = vmatpush1.bf16.msra.mxu1 %v7435_v10  ;;  %5650 = vmatprep.subr.bf16.mxu0 %v7440_v11  ;;  %v7511_v10 = vld [vmem:[%s9589_s5 + $0xee0] ss:$16 sps:$4 sm:$0xff]   ;;  %v7516_v11 = vld [vmem:[%s9589_s5 + $0xd04] ss:$16 sps:$4 sm:$0xff]  }
 0x21f   : > { %5691 = vmatprep.subr.bf16.mxu1 %v7443_v12  ;;  %v7519_v12 = vld [vmem:[%s9589_s5 + $0xf04] ss:$16 sps:$4 sm:$0xff]  }
 0x221   : > { %5651 = vmatpush1.bf16.msra.mxu0 %v7438_v13  ;;  %v7514_v13 = vld [vmem:[%s9589_s5 + $0xd00] ss:$16 sps:$4 sm:$0xff]  }
 0x222   : > { %5692 = vmatpush1.bf16.msra.mxu1 %v7441_v14  ;;  %5652 = vmatprep.subr.bf16.mxu0 %v7446_v15  ;;  %v7517_v14 = vld [vmem:[%s9589_s5 + $0xf00] ss:$16 sps:$4 sm:$0xff]   ;;  %v7522_v15 = vld [vmem:[%s9589_s5 + $0xd24] ss:$16 sps:$4 sm:$0xff]  }
 0x223   : > { %5693 = vmatprep.subr.bf16.mxu1 %v7449_v16  ;;  %v7525_v16 = vld [vmem:[%s9589_s5 + $0xf24] ss:$16 sps:$4 sm:$0xff]  }
 0x225   : > { %5653 = vmatpush1.bf16.msra.mxu0 %v7444_v19  ;;  %v7520_v19 = vld [vmem:[%s9589_s5 + $0xd20] ss:$16 sps:$4 sm:$0xff]  }
 0x226   : > { %5694 = vmatpush1.bf16.msra.mxu1 %v7447_v20  ;;  %5654 = vmatprep.subr.bf16.mxu0 %v7452_v21  ;;  %v7523_v20 = vld [vmem:[%s9589_s5 + $0xf20] ss:$16 sps:$4 sm:$0xff]   ;;  %v7528_v21 = vld [vmem:[%s9589_s5 + $0xd44] ss:$16 sps:$4 sm:$0xff]  }
 0x227   : > { %5695 = vmatprep.subr.bf16.mxu1 %v7455_v22  ;;  %v7531_v22 = vld [vmem:[%s9589_s5 + $0xf44] ss:$16 sps:$4 sm:$0xff]  }
 0x229   : > { %5655 = vmatpush1.bf16.msra.mxu0 %v7450_v27  ;;  %v7526_v27 = vld [vmem:[%s9589_s5 + $0xd40] ss:$16 sps:$4 sm:$0xff]  }
 0x22a   : > { %5696 = vmatpush1.bf16.msra.mxu1 %v7453_v28  ;;  %5656 = vmatprep.subr.bf16.mxu0 %v7458_v29  ;;  %v7529_v28 = vld [vmem:[%s9589_s5 + $0xf40] ss:$16 sps:$4 sm:$0xff]   ;;  %v7534_v29 = vld [vmem:[%s9589_s5 + $0xd64] ss:$16 sps:$4 sm:$0xff]  }
 0x22b   : > { %5697 = vmatprep.subr.bf16.mxu1 %v7461_v30  ;;  %v7537_v30 = vld [vmem:[%s9589_s5 + $0xf64] ss:$16 sps:$4 sm:$0xff]  }
 0x22d   : > { %5657 = vmatpush1.bf16.msra.mxu0 %v7456_v31  ;;  %v7532_v31 = vld [vmem:[%s9589_s5 + $0xd60] ss:$16 sps:$4 sm:$0xff]  }
 0x22e   : > { %5698 = vmatpush1.bf16.msra.mxu1 %v7459_v32  ;;  %5708 = vmatprep.subr.bf16.mxu0 %v7468_v33  ;;  %v7535_v32 = vld [vmem:[%s9589_s5 + $0xf60] ss:$16 sps:$4 sm:$0xff]   ;;  %v7540_v33 = vld [vmem:[%s9589_s5 + $0xd84] ss:$16 sps:$4 sm:$0xff]  }
 0x22f   : > { %5749 = vmatprep.subr.bf16.mxu1 %v7471_v34  ;;  %v7543_v34 = vld [vmem:[%s9589_s5 + $0xf84] ss:$16 sps:$4 sm:$0xff]  }
 0x230   : > { %5659 = vmatmul.mubr.bf16.vlgmr.msra.gmra.mrb[8].mxu0 %v9850_v39 }
 0x231   : > { %5700 = vmatmul.mubr.bf16.vlgmr.msra.gmra.mrb[8].mxu1 %v9854_v40  ;;  %5709 = vmatpush1.bf16.msra.mxu0 %v7466_v35  ;;  %v7538_v35 = vld [vmem:[%s9589_s5 + $0xd80] ss:$16 sps:$4 sm:$0xff]  }
 0x232   : > { %5750 = vmatpush1.bf16.msra.mxu1 %v7469_v36  ;;  %5710 = vmatprep.subr.bf16.mxu0 %v7474_v43  ;;  %v7541_v36 = vld [vmem:[%s9589_s5 + $0xf80] ss:$16 sps:$4 sm:$0xff]   ;;  %v7546_v43 = vld [vmem:[%s9589_s5 + $0xda4] ss:$16 sps:$4 sm:$0xff]  }
 0x233   : > { %5751 = vmatprep.subr.bf16.mxu1 %v7477_v44  ;;  %5740 = vmatprep.mubr.bf16.mxu0 %v9866_v23  ;;  %v7549_v44 = vld [vmem:[%s9589_s5 + $0xfa4] ss:$16 sps:$4 sm:$0xff]  }
 0x234   : > { %5781 = vmatprep.mubr.bf16.mxu1 %v9870_v24 }
 0x235   : > { %5711 = vmatpush1.bf16.msra.mxu0 %v7472_v45  ;;  %v7544_v45 = vld [vmem:[%s9589_s5 + $0xda0] ss:$16 sps:$4 sm:$0xff]  }
 0x236   : > { %5752 = vmatpush1.bf16.msra.mxu1 %v7475_v46  ;;  %5712 = vmatprep.subr.bf16.mxu0 %v7480_v47  ;;  %v7547_v46 = vld [vmem:[%s9589_s5 + $0xfa0] ss:$16 sps:$4 sm:$0xff]   ;;  %v7552_v47 = vld [vmem:[%s9589_s5 + $0xdc4] ss:$16 sps:$4 sm:$0xff]  }
 0x237   : > { %5753 = vmatprep.subr.bf16.mxu1 %v7483_v49  ;;  %v7555_v49 = vld [vmem:[%s9589_s5 + $0xfc4] ss:$16 sps:$4 sm:$0xff]  }
 0x239   : > { %5713 = vmatpush1.bf16.msra.mxu0 %v7478_v50  ;;  %v7550_v50 = vld [vmem:[%s9589_s5 + $0xdc0] ss:$16 sps:$4 sm:$0xff]  }
 0x23a   : > { %5754 = vmatpush1.bf16.msra.mxu1 %v7481_v51  ;;  %5714 = vmatprep.subr.bf16.mxu0 %v7486_v53  ;;  %v7553_v51 = vld [vmem:[%s9589_s5 + $0xfc0] ss:$16 sps:$4 sm:$0xff]   ;;  %v7558_v53 = vld [vmem:[%s9589_s5 + $0xde4] ss:$16 sps:$4 sm:$0xff]  }
 0x23b   : > { %5755 = vmatprep.subr.bf16.mxu1 %v7489_v54  ;;  %v7561_v54 = vld [vmem:[%s9589_s5 + $0xfe4] ss:$16 sps:$4 sm:$0xff]  }
 0x23d   : > { %5715 = vmatpush1.bf16.msra.mxu0 %v7484_v55  ;;  %v7556_v55 = vld [vmem:[%s9589_s5 + $0xde0] ss:$16 sps:$4 sm:$0xff]  }
 0x23e   : > { %5756 = vmatpush1.bf16.msra.mxu1 %v7487_v56  ;;  %5716 = vmatprep.subr.bf16.mxu0 %v7492_v57  ;;  %v7559_v56 = vld [vmem:[%s9589_s5 + $0xfe0] ss:$16 sps:$4 sm:$0xff]   ;;  %v7568_v57 = vld [vmem:[%s9589_s5 + $0x1004] ss:$16 sps:$4 sm:$0xff]  }
 0x23f   : > { %5757 = vmatprep.subr.bf16.mxu1 %v7495_v58  ;;  %v7571_v58 = vld [vmem:[%s9589_s5 + $0x1204] ss:$16 sps:$4 sm:$0xff]  }
 0x241   : > { %5717 = vmatpush1.bf16.msra.mxu0 %v7490_v59  ;;  %v9937_v59 = vld [vmem:[%s9577_s26 + $0x40] sm:$0xff] }
 0x242   : > { %5758 = vmatpush1.bf16.msra.mxu1 %v7493_v60  ;;  %5718 = vmatprep.subr.bf16.mxu0 %v7498_v61  ;;  %v9941_v60 = vcombine.low %v9857_v41, %v9857_v41  ;;  %v9945_v61 = vcombine.low %v9860_v42, %v9860_v42  ;;  %v9956_v41 = vcombine.high %v9937_v59, %v9937_v59 }
 0x243   : > { %5759 = vmatprep.subr.bf16.mxu1 %v7501_v62  ;;  %v9948_v62 = vld [vmem:[%s9577_s26 + $0x48] sm:$0xff] }
 0x244   : > { %v9960_v42 = vcombine.high %v9948_v62, %v9948_v62 }
 0x245   : > { %5719 = vmatpush1.bf16.msra.mxu0 %v7496_v63  ;;  %v7566_v63 = vld [vmem:[%s9589_s5 + $0x1000] ss:$16 sps:$4 sm:$0xff]  }
 0x246   : > { %5760 = vmatpush1.bf16.msra.mxu1 %v7499_v0  ;;  %5720 = vmatprep.subr.bf16.mxu0 %v7504_v1  ;;  %v7569_v0 = vld [vmem:[%s9589_s5 + $0x1200] ss:$16 sps:$4 sm:$0xff]   ;;  %v7574_v1 = vld [vmem:[%s9589_s5 + $0x1024] ss:$16 sps:$4 sm:$0xff]  }
 0x247   : > { %5761 = vmatprep.subr.bf16.mxu1 %v7507_v2  ;;  %v7577_v2 = vld [vmem:[%s9589_s5 + $0x1224] ss:$16 sps:$4 sm:$0xff]  }
 0x249   : > { %5721 = vmatpush1.bf16.msra.mxu0 %v7502_v3  ;;  %v7572_v3 = vld [vmem:[%s9589_s5 + $0x1020] ss:$16 sps:$4 sm:$0xff]  }
 0x24a   : > { %5762 = vmatpush1.bf16.msra.mxu1 %v7505_v4  ;;  %5722 = vmatprep.subr.bf16.mxu0 %v7510_v5  ;;  %v7575_v4 = vld [vmem:[%s9589_s5 + $0x1220] ss:$16 sps:$4 sm:$0xff]   ;;  %v7580_v5 = vld [vmem:[%s9589_s5 + $0x1044] ss:$16 sps:$4 sm:$0xff]  }
 0x24b   : > { %5763 = vmatprep.subr.bf16.mxu1 %v7513_v6  ;;  %v7583_v6 = vld [vmem:[%s9589_s5 + $0x1244] ss:$16 sps:$4 sm:$0xff]  }
 0x24d   : > { %5723 = vmatpush1.bf16.msra.mxu0 %v7508_v9  ;;  %v7578_v9 = vld [vmem:[%s9589_s5 + $0x1040] ss:$16 sps:$4 sm:$0xff]  }
 0x24e   : > { %5764 = vmatpush1.bf16.msra.mxu1 %v7511_v10  ;;  %5724 = vmatprep.subr.bf16.mxu0 %v7516_v11  ;;  %v7581_v10 = vld [vmem:[%s9589_s5 + $0x1240] ss:$16 sps:$4 sm:$0xff]   ;;  %v7586_v11 = vld [vmem:[%s9589_s5 + $0x1064] ss:$16 sps:$4 sm:$0xff]  }
 0x24f   : > { %5765 = vmatprep.subr.bf16.mxu1 %v7519_v12  ;;  %v7589_v12 = vld [vmem:[%s9589_s5 + $0x1264] ss:$16 sps:$4 sm:$0xff]  }
 0x251   : > { %5725 = vmatpush1.bf16.msra.mxu0 %v7514_v13  ;;  %v7584_v13 = vld [vmem:[%s9589_s5 + $0x1060] ss:$16 sps:$4 sm:$0xff]  }
 0x252   : > { %5766 = vmatpush1.bf16.msra.mxu1 %v7517_v14  ;;  %5726 = vmatprep.subr.bf16.mxu0 %v7522_v15  ;;  %v7587_v14 = vld [vmem:[%s9589_s5 + $0x1260] ss:$16 sps:$4 sm:$0xff]   ;;  %v7592_v15 = vld [vmem:[%s9589_s5 + $0x1084] ss:$16 sps:$4 sm:$0xff]  }
 0x253   : > { %5767 = vmatprep.subr.bf16.mxu1 %v7525_v16  ;;  %v7595_v16 = vld [vmem:[%s9589_s5 + $0x1284] ss:$16 sps:$4 sm:$0xff]  }
 0x255   : > { %5727 = vmatpush1.bf16.msra.mxu0 %v7520_v19  ;;  %v7590_v19 = vld [vmem:[%s9589_s5 + $0x1080] ss:$16 sps:$4 sm:$0xff]  }
 0x256   : > { %5768 = vmatpush1.bf16.msra.mxu1 %v7523_v20  ;;  %5728 = vmatprep.subr.bf16.mxu0 %v7528_v21  ;;  %v7593_v20 = vld [vmem:[%s9589_s5 + $0x1280] ss:$16 sps:$4 sm:$0xff]   ;;  %v7598_v21 = vld [vmem:[%s9589_s5 + $0x10a4] ss:$16 sps:$4 sm:$0xff]  }
 0x257   : > { %5769 = vmatprep.subr.bf16.mxu1 %v7531_v22  ;;  %v7601_v22 = vld [vmem:[%s9589_s5 + $0x12a4] ss:$16 sps:$4 sm:$0xff]  }
 0x259   : > { %5729 = vmatpush1.bf16.msra.mxu0 %v7526_v27  ;;  %v7596_v27 = vld [vmem:[%s9589_s5 + $0x10a0] ss:$16 sps:$4 sm:$0xff]  }
 0x25a   : > { %5770 = vmatpush1.bf16.msra.mxu1 %v7529_v28  ;;  %5730 = vmatprep.subr.bf16.mxu0 %v7534_v29  ;;  %v7599_v28 = vld [vmem:[%s9589_s5 + $0x12a0] ss:$16 sps:$4 sm:$0xff]   ;;  %v7604_v29 = vld [vmem:[%s9589_s5 + $0x10c4] ss:$16 sps:$4 sm:$0xff]  }
 0x25b   : > { %5771 = vmatprep.subr.bf16.mxu1 %v7537_v30  ;;  %v7607_v30 = vld [vmem:[%s9589_s5 + $0x12c4] ss:$16 sps:$4 sm:$0xff]  }
 0x25d   : > { %5731 = vmatpush1.bf16.msra.mxu0 %v7532_v31 }
 0x25e   : > { %5772 = vmatpush1.bf16.msra.mxu1 %v7535_v32  ;;  %5732 = vmatprep.subr.bf16.mxu0 %v7540_v33  ;;  %v7602_v33 = vld [vmem:[%s9589_s5 + $0x10c0] ss:$16 sps:$4 sm:$0xff]  }
 0x25f   : > { %5773 = vmatprep.subr.bf16.mxu1 %v7543_v34  ;;  %v7605_v34 = vld [vmem:[%s9589_s5 + $0x12c0] ss:$16 sps:$4 sm:$0xff]  }
 0x261   : > { %5733 = vmatpush1.bf16.msra.mxu0 %v7538_v35 }
 0x262   : > { %5774 = vmatpush1.bf16.msra.mxu1 %v7541_v36  ;;  %5734 = vmatprep.subr.bf16.mxu0 %v7546_v43 }
 0x263   : > { %5775 = vmatprep.subr.bf16.mxu1 %v7549_v44 }
 0x265   : > { %5735 = vmatpush1.bf16.msra.mxu0 %v7544_v45 }
 0x266   : > { %5776 = vmatpush1.bf16.msra.mxu1 %v7547_v46  ;;  %5736 = vmatprep.subr.bf16.mxu0 %v7552_v47 }
 0x267   : > { %5777 = vmatprep.subr.bf16.mxu1 %v7555_v49 }
 0x269   : > { %5737 = vmatpush1.bf16.msra.mxu0 %v7550_v50  ;;  %v7610_v50 = vld [vmem:[%s9589_s5 + $0x10e4] ss:$16 sps:$4 sm:$0xff]  }
 0x26a   : > { %5778 = vmatpush1.bf16.msra.mxu1 %v7553_v51  ;;  %5738 = vmatprep.subr.bf16.mxu0 %v7558_v53  ;;  %v7613_v51 = vld [vmem:[%s9589_s5 + $0x12e4] ss:$16 sps:$4 sm:$0xff]   ;;  %v7608_v53 = vld [vmem:[%s9589_s5 + $0x10e0] ss:$16 sps:$4 sm:$0xff]  }
 0x26b   : > { %5779 = vmatprep.subr.bf16.mxu1 %v7561_v54  ;;  %v7611_v54 = vld [vmem:[%s9589_s5 + $0x12e0] ss:$16 sps:$4 sm:$0xff]  }
 0x26d   : > { %5739 = vmatpush1.bf16.msra.mxu0 %v7556_v55  ;;  %v7616_v55 = vld [vmem:[%s9589_s5 + $0x1104] ss:$16 sps:$4 sm:$0xff]  }
 0x26e   : > { %5780 = vmatpush1.bf16.msra.mxu1 %v7559_v56  ;;  %5790 = vmatprep.subr.bf16.mxu0 %v7568_v57  ;;  %v7619_v56 = vld [vmem:[%s9589_s5 + $0x1304] ss:$16 sps:$4 sm:$0xff]   ;;  %v7614_v57 = vld [vmem:[%s9589_s5 + $0x1100] ss:$16 sps:$4 sm:$0xff]  }
 0x26f   : > { %5831 = vmatprep.subr.bf16.mxu1 %v7571_v58  ;;  %v7617_v58 = vld [vmem:[%s9589_s5 + $0x1300] ss:$16 sps:$4 sm:$0xff]  }
 0x270   : > { %5741 = vmatmul.mubr.bf16.vlgmr.msra.gmra.mrb[12].mxu0 %v9941_v60 }
 0x271   : > { %5782 = vmatmul.mubr.bf16.vlgmr.msra.gmra.mrb[12].mxu1 %v9945_v61  ;;  %5791 = vmatpush1.bf16.msra.mxu0 %v7566_v63  ;;  %v7622_v63 = vld [vmem:[%s9589_s5 + $0x1124] ss:$16 sps:$4 sm:$0xff]  }
 0x272   : > { %5832 = vmatpush1.bf16.msra.mxu1 %v7569_v0  ;;  %5792 = vmatprep.subr.bf16.mxu0 %v7574_v1  ;;  %v7625_v0 = vld [vmem:[%s9589_s5 + $0x1324] ss:$16 sps:$4 sm:$0xff]   ;;  %v7620_v1 = vld [vmem:[%s9589_s5 + $0x1120] ss:$16 sps:$4 sm:$0xff]  }
 0x273   : > { %5833 = vmatprep.subr.bf16.mxu1 %v7577_v2  ;;  %5822 = vmatprep.mubr.bf16.mxu0 %v9956_v41  ;;  %v7623_v2 = vld [vmem:[%s9589_s5 + $0x1320] ss:$16 sps:$4 sm:$0xff]  }
 0x274   : > { %5863 = vmatprep.mubr.bf16.mxu1 %v9960_v42 }
 0x275   : > { %5793 = vmatpush1.bf16.msra.mxu0 %v7572_v3  ;;  %v7628_v3 = vld [vmem:[%s9589_s5 + $0x1144] ss:$16 sps:$4 sm:$0xff]  }
 0x276   : > { %5834 = vmatpush1.bf16.msra.mxu1 %v7575_v4  ;;  %5794 = vmatprep.subr.bf16.mxu0 %v7580_v5  ;;  %v7631_v4 = vld [vmem:[%s9589_s5 + $0x1344] ss:$16 sps:$4 sm:$0xff]   ;;  %v7626_v5 = vld [vmem:[%s9589_s5 + $0x1140] ss:$16 sps:$4 sm:$0xff]  }
 0x277   : > { %5835 = vmatprep.subr.bf16.mxu1 %v7583_v6  ;;  %v7629_v6 = vld [vmem:[%s9589_s5 + $0x1340] ss:$16 sps:$4 sm:$0xff]  }
 0x279   : > { %5795 = vmatpush1.bf16.msra.mxu0 %v7578_v9  ;;  %v7634_v9 = vld [vmem:[%s9589_s5 + $0x1164] ss:$16 sps:$4 sm:$0xff]  }
 0x27a   : > { %5836 = vmatpush1.bf16.msra.mxu1 %v7581_v10  ;;  %5796 = vmatprep.subr.bf16.mxu0 %v7586_v11  ;;  %v7637_v10 = vld [vmem:[%s9589_s5 + $0x1364] ss:$16 sps:$4 sm:$0xff]   ;;  %v7632_v11 = vld [vmem:[%s9589_s5 + $0x1160] ss:$16 sps:$4 sm:$0xff]  }
 0x27b   : > { %5837 = vmatprep.subr.bf16.mxu1 %v7589_v12  ;;  %v7635_v12 = vld [vmem:[%s9589_s5 + $0x1360] ss:$16 sps:$4 sm:$0xff]  }
 0x27d   : > { %5797 = vmatpush1.bf16.msra.mxu0 %v7584_v13  ;;  %v7640_v13 = vld [vmem:[%s9589_s5 + $0x1184] ss:$16 sps:$4 sm:$0xff]  }
 0x27e   : > { %5838 = vmatpush1.bf16.msra.mxu1 %v7587_v14  ;;  %5798 = vmatprep.subr.bf16.mxu0 %v7592_v15  ;;  %v7643_v14 = vld [vmem:[%s9589_s5 + $0x1384] ss:$16 sps:$4 sm:$0xff]   ;;  %v7638_v15 = vld [vmem:[%s9589_s5 + $0x1180] ss:$16 sps:$4 sm:$0xff]  }
 0x27f   : > { %5839 = vmatprep.subr.bf16.mxu1 %v7595_v16  ;;  %v7641_v16 = vld [vmem:[%s9589_s5 + $0x1380] ss:$16 sps:$4 sm:$0xff]  }
 0x281   : > { %5799 = vmatpush1.bf16.msra.mxu0 %v7590_v19  ;;  %v7646_v19 = vld [vmem:[%s9589_s5 + $0x11a4] ss:$16 sps:$4 sm:$0xff]  }
 0x282   : > { %5840 = vmatpush1.bf16.msra.mxu1 %v7593_v20  ;;  %5800 = vmatprep.subr.bf16.mxu0 %v7598_v21  ;;  %v7649_v20 = vld [vmem:[%s9589_s5 + $0x13a4] ss:$16 sps:$4 sm:$0xff]   ;;  %v7644_v21 = vld [vmem:[%s9589_s5 + $0x11a0] ss:$16 sps:$4 sm:$0xff]  }
 0x283   : > { %5841 = vmatprep.subr.bf16.mxu1 %v7601_v22  ;;  %v5496_v31 = vpop.f32.mrb[0].mxu0  ;;  %v7647_v22 = vld [vmem:[%s9589_s5 + $0x13a0] ss:$16 sps:$4 sm:$0xff]  }
 0x284   : > { %v5537_v32 = vpop.f32.mrb[0].mxu1  ;;  %v5498_v36 = vpop.f32.mrb[1].mxu0 }
 0x285   : > { %v9988_v35 = vadd.f32 %v5537_v32, %v5496_v31  ;;  %v5539_v43 = vpop.f32.mrb[1].mxu1  ;;  %v5500_v45 = vpop.f32.mrb[2].mxu0  ;;  %5801 = vmatpush1.bf16.msra.mxu0 %v7596_v27  ;;  %v7652_v27 = vld [vmem:[%s9589_s5 + $0x11c4] ss:$16 sps:$4 sm:$0xff]  }
 0x286   : > { %v9990_v44 = vadd.f32 %v5539_v43, %v5498_v36  ;;  %v5541_v46 = vpop.f32.mrb[2].mxu1  ;;  %5842 = vmatpush1.bf16.msra.mxu1 %v7599_v28  ;;  %v5501_v47 = vpop.f32.mrb[3].mxu0  ;;  %5802 = vmatprep.subr.bf16.mxu0 %v7604_v29  ;;  %v7655_v28 = vld [vmem:[%s9589_s5 + $0x13c4] ss:$16 sps:$4 sm:$0xff]   ;;  %v7650_v29 = vld [vmem:[%s9589_s5 + $0x11c0] ss:$16 sps:$4 sm:$0xff]  }
 0x287   : > { %v5542_v49 = vpop.f32.mrb[3].mxu1  ;;  %5843 = vmatprep.subr.bf16.mxu1 %v7607_v30  ;;  %v7653_v30 = vld [vmem:[%s9589_s5 + $0x13c0] ss:$16 sps:$4 sm:$0xff]   ;;  %v7658_v31 = vld [vmem:[%s9589_s5 + $0x11e4] ss:$16 sps:$4 sm:$0xff]   ;;  %v10034_v47 = vcombine.low %v9937_v59, %v9937_v59 }
 0x288   : > { %v7661_v32 = vld [vmem:[%s9589_s5 + $0x13e4] ss:$16 sps:$4 sm:$0xff]   ;;  %v7668_v36 = vld [vmem:[%s9589_s5 + $0xc] ss:$16 sps:$4 sm:$0xff]   ;;  %v7666_v45 = vld [vmem:[%s9589_s5 + $0x8] ss:$16 sps:$4 sm:$0xff]   ;;  %v10038_v49 = vcombine.low %v9948_v62, %v9948_v62 }
 0x289   : > { %5803 = vmatpush1.bf16.msra.mxu0 %v7602_v33  ;;  %v7656_v33 = vld [vmem:[%s9589_s5 + $0x11e0] ss:$16 sps:$4 sm:$0xff]   ;;  %v7671_v43 = vld [vmem:[%s9589_s5 + $0x20c] ss:$16 sps:$4 sm:$0xff]   ;;  %v7669_v46 = vld [vmem:[%s9589_s5 + $0x208] ss:$16 sps:$4 sm:$0xff]  }
 0x28a   : > { %5844 = vmatpush1.bf16.msra.mxu1 %v7605_v34  ;;  %5804 = vmatprep.subr.bf16.mxu0 %v7610_v50  ;;  %v7659_v34 = vld [vmem:[%s9589_s5 + $0x13e0] ss:$16 sps:$4 sm:$0xff]   ;;  %v7674_v50 = vld [vmem:[%s9589_s5 + $0x2c] ss:$16 sps:$4 sm:$0xff]   ;;  %v7672_v59 = vld [vmem:[%s9589_s5 + $0x28] ss:$16 sps:$4 sm:$0xff]  }
 0x28b   : > { %5845 = vmatprep.subr.bf16.mxu1 %v7613_v51  ;;  %v7677_v51 = vld [vmem:[%s9589_s5 + $0x22c] ss:$16 sps:$4 sm:$0xff]   ;;  %v7675_v62 = vld [vmem:[%s9589_s5 + $0x228] ss:$16 sps:$4 sm:$0xff]  }
 0x28d   : > { %5805 = vmatpush1.bf16.msra.mxu0 %v7608_v53  ;;  %v7680_v53 = vld [vmem:[%s9589_s5 + $0x4c] ss:$16 sps:$4 sm:$0xff]  }
 0x28e   : > { %5846 = vmatpush1.bf16.msra.mxu1 %v7611_v54  ;;  %5806 = vmatprep.subr.bf16.mxu0 %v7616_v55  ;;  %v7683_v54 = vld [vmem:[%s9589_s5 + $0x24c] ss:$16 sps:$4 sm:$0xff]   ;;  %v7678_v55 = vld [vmem:[%s9589_s5 + $0x48] ss:$16 sps:$4 sm:$0xff]  }
 0x28f   : > { %5847 = vmatprep.subr.bf16.mxu1 %v7619_v56  ;;  %v7681_v56 = vld [vmem:[%s9589_s5 + $0x248] ss:$16 sps:$4 sm:$0xff]  }
 0x291   : > { %5807 = vmatpush1.bf16.msra.mxu0 %v7614_v57  ;;  %v7686_v57 = vld [vmem:[%s9589_s5 + $0x6c] ss:$16 sps:$4 sm:$0xff]  }
 0x292   : > { %5848 = vmatpush1.bf16.msra.mxu1 %v7617_v58  ;;  %5808 = vmatprep.subr.bf16.mxu0 %v7622_v63  ;;  %v7689_v58 = vld [vmem:[%s9589_s5 + $0x26c] ss:$16 sps:$4 sm:$0xff]   ;;  %v7687_v63 = vld [vmem:[%s9589_s5 + $0x268] ss:$16 sps:$4 sm:$0xff]  }
 0x293   : > { %5849 = vmatprep.subr.bf16.mxu1 %v7625_v0  ;;  %v7695_v0 = vld [vmem:[%s9589_s5 + $0x28c] ss:$16 sps:$4 sm:$0xff]  }
 0x295   : > { %5809 = vmatpush1.bf16.msra.mxu0 %v7620_v1  ;;  %v7690_v1 = vld [vmem:[%s9589_s5 + $0x88] ss:$16 sps:$4 sm:$0xff]  }
 0x296   : > { %5850 = vmatpush1.bf16.msra.mxu1 %v7623_v2  ;;  %5810 = vmatprep.subr.bf16.mxu0 %v7628_v3  ;;  %v7693_v2 = vld [vmem:[%s9589_s5 + $0x288] ss:$16 sps:$4 sm:$0xff]   ;;  %v7698_v3 = vld [vmem:[%s9589_s5 + $0xac] ss:$16 sps:$4 sm:$0xff]  }
 0x297   : > { %5851 = vmatprep.subr.bf16.mxu1 %v7631_v4  ;;  %v7701_v4 = vld [vmem:[%s9589_s5 + $0x2ac] ss:$16 sps:$4 sm:$0xff]  }
 0x299   : > { %5811 = vmatpush1.bf16.msra.mxu0 %v7626_v5  ;;  %v7696_v5 = vld [vmem:[%s9589_s5 + $0xa8] ss:$16 sps:$4 sm:$0xff]  }
 0x29a   : > { %5852 = vmatpush1.bf16.msra.mxu1 %v7629_v6  ;;  %5812 = vmatprep.subr.bf16.mxu0 %v7634_v9  ;;  %v7699_v6 = vld [vmem:[%s9589_s5 + $0x2a8] ss:$16 sps:$4 sm:$0xff]   ;;  %v7704_v9 = vld [vmem:[%s9589_s5 + $0xcc] ss:$16 sps:$4 sm:$0xff]  }
 0x29b   : > { %5853 = vmatprep.subr.bf16.mxu1 %v7637_v10  ;;  %v7707_v10 = vld [vmem:[%s9589_s5 + $0x2cc] ss:$16 sps:$4 sm:$0xff]  }
 0x29d   : > { %5813 = vmatpush1.bf16.msra.mxu0 %v7632_v11 }
 0x29e   : > { %5854 = vmatpush1.bf16.msra.mxu1 %v7635_v12  ;;  %5814 = vmatprep.subr.bf16.mxu0 %v7640_v13  ;;  %v7702_v13 = vld [vmem:[%s9589_s5 + $0xc8] ss:$16 sps:$4 sm:$0xff]  }
 0x29f   : > { %5855 = vmatprep.subr.bf16.mxu1 %v7643_v14  ;;  %v7705_v14 = vld [vmem:[%s9589_s5 + $0x2c8] ss:$16 sps:$4 sm:$0xff]  }
 0x2a1   : > { %5815 = vmatpush1.bf16.msra.mxu0 %v7638_v15 }
 0x2a2   : > { %5856 = vmatpush1.bf16.msra.mxu1 %v7641_v16  ;;  %5816 = vmatprep.subr.bf16.mxu0 %v7646_v19 }
 0x2a3   : > { %5857 = vmatprep.subr.bf16.mxu1 %v7649_v20 }
 0x2a5   : > { %5817 = vmatpush1.bf16.msra.mxu0 %v7644_v21 }
 0x2a6   : > { %5858 = vmatpush1.bf16.msra.mxu1 %v7647_v22  ;;  %5818 = vmatprep.subr.bf16.mxu0 %v7652_v27 }
 0x2a7   : > { %5859 = vmatprep.subr.bf16.mxu1 %v7655_v28 }
 0x2a9   : > { %5819 = vmatpush1.bf16.msra.mxu0 %v7650_v29 }
 0x2aa   : > { %5860 = vmatpush1.bf16.msra.mxu1 %v7653_v30  ;;  %5820 = vmatprep.subr.bf16.mxu0 %v7658_v31  ;;  %v7713_v30 = vld [vmem:[%s9589_s5 + $0x2ec] ss:$16 sps:$4 sm:$0xff]  }
 0x2ab   : > { %5861 = vmatprep.subr.bf16.mxu1 %v7661_v32  ;;  %v7711_v32 = vld [vmem:[%s9589_s5 + $0x2e8] ss:$16 sps:$4 sm:$0xff]  }
 0x2ad   : > { %5821 = vmatpush1.bf16.msra.mxu0 %v7656_v33  ;;  %v7716_v33 = vld [vmem:[%s9589_s5 + $0x10c] ss:$16 sps:$4 sm:$0xff]  }
 0x2ae   : > { %5862 = vmatpush1.bf16.msra.mxu1 %v7659_v34  ;;  %5872 = vmatprep.subr.bf16.mxu0 %v7668_v36  ;;  %v7719_v34 = vld [vmem:[%s9589_s5 + $0x30c] ss:$16 sps:$4 sm:$0xff]   ;;  %v7714_v36 = vld [vmem:[%s9589_s5 + $0x108] ss:$16 sps:$4 sm:$0xff]  }
 0x2af   : > { %5913 = vmatprep.subr.bf16.mxu1 %v7671_v43  ;;  %v7717_v43 = vld [vmem:[%s9589_s5 + $0x308] ss:$16 sps:$4 sm:$0xff]  }
 0x2b0   : > { %5823 = vmatmul.mubr.bf16.vlgmr.msra.gmra.mrb[16].mxu0 %v10034_v47 }
 0x2b1   : > { %5864 = vmatmul.mubr.bf16.vlgmr.msra.gmra.mrb[16].mxu1 %v10038_v49  ;;  %5873 = vmatpush1.bf16.msra.mxu0 %v7666_v45  ;;  %v7722_v45 = vld [vmem:[%s9589_s5 + $0x12c] ss:$16 sps:$4 sm:$0xff]  }
 0x2b2   : > { %5914 = vmatpush1.bf16.msra.mxu1 %v7669_v46  ;;  %5874 = vmatprep.subr.bf16.mxu0 %v7674_v50  ;;  %v7725_v46 = vld [vmem:[%s9589_s5 + $0x32c] ss:$16 sps:$4 sm:$0xff]   ;;  %v7720_v50 = vld [vmem:[%s9589_s5 + $0x128] ss:$16 sps:$4 sm:$0xff]  }
 0x2b3   : > { %5915 = vmatprep.subr.bf16.mxu1 %v7677_v51  ;;  %5904 = vmatprep.mubr.bf16.mxu0 %v9643_v48  ;;  %v7684_v48 = vld [vmem:[%s9589_s5 + $0x68] ss:$16 sps:$4 sm:$0xff]  }
 0x2b4   : > { %5945 = vmatprep.mubr.bf16.mxu1 %v9648_v52  ;;  %v7692_v52 = vld [vmem:[%s9589_s5 + $0x8c] ss:$16 sps:$4 sm:$0xff]   ;;  %v7723_v51 = vld [vmem:[%s9589_s5 + $0x328] ss:$16 sps:$4 sm:$0xff]  }
 0x2b5   : > { %5875 = vmatpush1.bf16.msra.mxu0 %v7672_v59  ;;  %v7728_v59 = vld [vmem:[%s9589_s5 + $0x14c] ss:$16 sps:$4 sm:$0xff]  }
 0x2b6   : > { %5916 = vmatpush1.bf16.msra.mxu1 %v7675_v62  ;;  %5876 = vmatprep.subr.bf16.mxu0 %v7680_v53  ;;  %v7731_v62 = vld [vmem:[%s9589_s5 + $0x34c] ss:$16 sps:$4 sm:$0xff]   ;;  %v7726_v53 = vld [vmem:[%s9589_s5 + $0x148] ss:$16 sps:$4 sm:$0xff]  }
 0x2b7   : > { %5917 = vmatprep.subr.bf16.mxu1 %v7683_v54  ;;  %v7729_v54 = vld [vmem:[%s9589_s5 + $0x348] ss:$16 sps:$4 sm:$0xff]  }
 0x2b9   : > { %5877 = vmatpush1.bf16.msra.mxu0 %v7678_v55  ;;  %v7734_v55 = vld [vmem:[%s9589_s5 + $0x16c] ss:$16 sps:$4 sm:$0xff]  }
 0x2ba   : > { %5918 = vmatpush1.bf16.msra.mxu1 %v7681_v56  ;;  %5878 = vmatprep.subr.bf16.mxu0 %v7686_v57  ;;  %v7737_v56 = vld [vmem:[%s9589_s5 + $0x36c] ss:$16 sps:$4 sm:$0xff]   ;;  %v7732_v57 = vld [vmem:[%s9589_s5 + $0x168] ss:$16 sps:$4 sm:$0xff]  }
 0x2bb   : > { %5919 = vmatprep.subr.bf16.mxu1 %v7689_v58  ;;  %v7735_v58 = vld [vmem:[%s9589_s5 + $0x368] ss:$16 sps:$4 sm:$0xff]  }
 0x2bd   : > { %5879 = vmatpush1.bf16.msra.mxu0 %v7684_v48  ;;  %v7740_v48 = vld [vmem:[%s9589_s5 + $0x18c] ss:$16 sps:$4 sm:$0xff]  }
 0x2be   : > { %5920 = vmatpush1.bf16.msra.mxu1 %v7687_v63  ;;  %5880 = vmatprep.subr.bf16.mxu0 %v7692_v52  ;;  %v7743_v63 = vld [vmem:[%s9589_s5 + $0x38c] ss:$16 sps:$4 sm:$0xff]   ;;  %v7738_v52 = vld [vmem:[%s9589_s5 + $0x188] ss:$16 sps:$4 sm:$0xff]  }
 0x2bf   : > { %5921 = vmatprep.subr.bf16.mxu1 %v7695_v0  ;;  %v7741_v0 = vld [vmem:[%s9589_s5 + $0x388] ss:$16 sps:$4 sm:$0xff]  }
 0x2c1   : > { %5881 = vmatpush1.bf16.msra.mxu0 %v7690_v1  ;;  %v7746_v1 = vld [vmem:[%s9589_s5 + $0x1ac] ss:$16 sps:$4 sm:$0xff]  }
 0x2c2   : > { %5922 = vmatpush1.bf16.msra.mxu1 %v7693_v2  ;;  %5882 = vmatprep.subr.bf16.mxu0 %v7698_v3  ;;  %v7749_v2 = vld [vmem:[%s9589_s5 + $0x3ac] ss:$16 sps:$4 sm:$0xff]   ;;  %v7744_v3 = vld [vmem:[%s9589_s5 + $0x1a8] ss:$16 sps:$4 sm:$0xff]  }
 0x2c3   : > { %5923 = vmatprep.subr.bf16.mxu1 %v7701_v4  ;;  %v5578_v11 = vpop.f32.mrb[4].mxu0  ;;  %v7747_v4 = vld [vmem:[%s9589_s5 + $0x3a8] ss:$16 sps:$4 sm:$0xff]  }
 0x2c4   : > { %v5619_v12 = vpop.f32.mrb[4].mxu1  ;;  %v5579_v15 = vadd.f32 %v5578_v11, %v9988_v35  ;;  %v5580_v16 = vpop.f32.mrb[5].mxu0  ;;  %v7710_v35 = vld [vmem:[%s9589_s5 + $0xec] ss:$16 sps:$4 sm:$0xff]  }
 0x2c5   : > { %v5621_v19 = vpop.f32.mrb[5].mxu1  ;;  %v5581_v20 = vadd.f32 %v5580_v16, %v9990_v44  ;;  %v5582_v21 = vpop.f32.mrb[6].mxu0  ;;  %5883 = vmatpush1.bf16.msra.mxu0 %v7696_v5  ;;  %v7708_v44 = vld [vmem:[%s9589_s5 + $0xe8] ss:$16 sps:$4 sm:$0xff]   ;;  %v7752_v5 = vld [vmem:[%s9589_s5 + $0x1cc] ss:$16 sps:$4 sm:$0xff]  }
 0x2c6   : > { %v5623_v22 = vpop.f32.mrb[6].mxu1  ;;  %5924 = vmatpush1.bf16.msra.mxu1 %v7699_v6  ;;  %v10070_v27 = vadd.f32 %v5619_v12, %v5579_v15  ;;  %v5583_v28 = vpop.f32.mrb[7].mxu0  ;;  %5884 = vmatprep.subr.bf16.mxu0 %v7704_v9  ;;  %v7755_v6 = vld [vmem:[%s9589_s5 + $0x3cc] ss:$16 sps:$4 sm:$0xff]   ;;  %v7750_v9 = vld [vmem:[%s9589_s5 + $0x1c8] ss:$16 sps:$4 sm:$0xff]  }
 0x2c7   : > { %v5624_v29 = vpop.f32.mrb[7].mxu1  ;;  %5925 = vmatprep.subr.bf16.mxu1 %v7707_v10  ;;  %v10074_v31 = vadd.f32 %v5621_v19, %v5581_v20  ;;  %v7753_v10 = vld [vmem:[%s9589_s5 + $0x3c8] ss:$16 sps:$4 sm:$0xff]   ;;  %v7758_v11 = vld [vmem:[%s9589_s5 + $0x1ec] ss:$16 sps:$4 sm:$0xff]  }
 0x2c8   : > { %v7761_v12 = vld [vmem:[%s9589_s5 + $0x3ec] ss:$16 sps:$4 sm:$0xff]   ;;  %v7762_v19 = vld [vmem:[%s9589_s5 + $0x408] ss:$16 sps:$4 sm:$0xff]  }
 0x2c9   : > { %5885 = vmatpush1.bf16.msra.mxu0 %v7702_v13  ;;  %v7756_v13 = vld [vmem:[%s9589_s5 + $0x1e8] ss:$16 sps:$4 sm:$0xff]   ;;  %v7764_v15 = vld [vmem:[%s9589_s5 + $0x40c] ss:$16 sps:$4 sm:$0xff]  }
 0x2ca   : > { %5926 = vmatpush1.bf16.msra.mxu1 %v7705_v14  ;;  %5886 = vmatprep.subr.bf16.mxu0 %v7710_v35  ;;  %v7759_v14 = vld [vmem:[%s9589_s5 + $0x3e8] ss:$16 sps:$4 sm:$0xff]   ;;  %v7767_v16 = vld [vmem:[%s9589_s5 + $0x60c] ss:$16 sps:$4 sm:$0xff]  }
 0x2cb   : > { %5927 = vmatprep.subr.bf16.mxu1 %v7713_v30  ;;  %v7765_v20 = vld [vmem:[%s9589_s5 + $0x608] ss:$16 sps:$4 sm:$0xff]   ;;  %v7770_v21 = vld [vmem:[%s9589_s5 + $0x42c] ss:$16 sps:$4 sm:$0xff]  }
 0x2cc   : > { %v7773_v22 = vld [vmem:[%s9589_s5 + $0x62c] ss:$16 sps:$4 sm:$0xff]   ;;  %v7768_v28 = vld [vmem:[%s9589_s5 + $0x428] ss:$16 sps:$4 sm:$0xff]  }
 0x2cd   : > { %5887 = vmatpush1.bf16.msra.mxu0 %v7708_v44  ;;  %v7771_v29 = vld [vmem:[%s9589_s5 + $0x628] ss:$16 sps:$4 sm:$0xff]   ;;  %v7776_v35 = vld [vmem:[%s9589_s5 + $0x44c] ss:$16 sps:$4 sm:$0xff]  }
 0x2ce   : > { %5928 = vmatpush1.bf16.msra.mxu1 %v7711_v32  ;;  %5888 = vmatprep.subr.bf16.mxu0 %v7716_v33  ;;  %v7779_v30 = vld [vmem:[%s9589_s5 + $0x64c] ss:$16 sps:$4 sm:$0xff]   ;;  %v7780_v33 = vld [vmem:[%s9589_s5 + $0x468] ss:$16 sps:$4 sm:$0xff]  }
 0x2cf   : > { %5929 = vmatprep.subr.bf16.mxu1 %v7719_v34  ;;  %v7782_v44 = vld [vmem:[%s9589_s5 + $0x46c] ss:$16 sps:$4 sm:$0xff]  }
 0x2d0   : > { %v7785_v32 = vld [vmem:[%s9589_s5 + $0x66c] ss:$16 sps:$4 sm:$0xff]  }
 0x2d1   : > { %5889 = vmatpush1.bf16.msra.mxu0 %v7714_v36  ;;  %v7791_v34 = vld [vmem:[%s9589_s5 + $0x68c] ss:$16 sps:$4 sm:$0xff]   ;;  %v7786_v36 = vld [vmem:[%s9589_s5 + $0x488] ss:$16 sps:$4 sm:$0xff]  }
 0x2d2   : > { %5930 = vmatpush1.bf16.msra.mxu1 %v7717_v43  ;;  %5890 = vmatprep.subr.bf16.mxu0 %v7722_v45  ;;  %v7789_v43 = vld [vmem:[%s9589_s5 + $0x688] ss:$16 sps:$4 sm:$0xff]   ;;  %v7794_v45 = vld [vmem:[%s9589_s5 + $0x4ac] ss:$16 sps:$4 sm:$0xff]  }
 0x2d3   : > { %5931 = vmatprep.subr.bf16.mxu1 %v7725_v46  ;;  %v7797_v46 = vld [vmem:[%s9589_s5 + $0x6ac] ss:$16 sps:$4 sm:$0xff]  }
 0x2d5   : > { %5891 = vmatpush1.bf16.msra.mxu0 %v7720_v50  ;;  %v7792_v50 = vld [vmem:[%s9589_s5 + $0x4a8] ss:$16 sps:$4 sm:$0xff]  }
 0x2d6   : > { %5932 = vmatpush1.bf16.msra.mxu1 %v7723_v51  ;;  %5892 = vmatprep.subr.bf16.mxu0 %v7728_v59  ;;  %v7795_v51 = vld [vmem:[%s9589_s5 + $0x6a8] ss:$16 sps:$4 sm:$0xff]   ;;  %v7800_v59 = vld [vmem:[%s9589_s5 + $0x4cc] ss:$16 sps:$4 sm:$0xff]  }
 0x2d7   : > { %5933 = vmatprep.subr.bf16.mxu1 %v7731_v62  ;;  %v7803_v62 = vld [vmem:[%s9589_s5 + $0x6cc] ss:$16 sps:$4 sm:$0xff]  }
 0x2d9   : > { %5893 = vmatpush1.bf16.msra.mxu0 %v7726_v53 }
 0x2da   : > { %5934 = vmatpush1.bf16.msra.mxu1 %v7729_v54  ;;  %5894 = vmatprep.subr.bf16.mxu0 %v7734_v55 }
 0x2db   : > { %5935 = vmatprep.subr.bf16.mxu1 %v7737_v56 }
 0x2dd   : > { %5895 = vmatpush1.bf16.msra.mxu0 %v7732_v57 }
 0x2de   : > { %5936 = vmatpush1.bf16.msra.mxu1 %v7735_v58  ;;  %5896 = vmatprep.subr.bf16.mxu0 %v7740_v48 }
 0x2df   : > { %5937 = vmatprep.subr.bf16.mxu1 %v7743_v63 }
 0x2e1   : > { %5897 = vmatpush1.bf16.msra.mxu0 %v7738_v52  ;;  %v7798_v52 = vld [vmem:[%s9589_s5 + $0x4c8] ss:$16 sps:$4 sm:$0xff]  }
 0x2e2   : > { %5938 = vmatpush1.bf16.msra.mxu1 %v7741_v0  ;;  %5898 = vmatprep.subr.bf16.mxu0 %v7746_v1  ;;  %v7801_v0 = vld [vmem:[%s9589_s5 + $0x6c8] ss:$16 sps:$4 sm:$0xff]  }
 0x2e3   : > { %5939 = vmatprep.subr.bf16.mxu1 %v7749_v2 }
 0x2e5   : > { %5899 = vmatpush1.bf16.msra.mxu0 %v7744_v3 }
 0x2e6   : > { %5940 = vmatpush1.bf16.msra.mxu1 %v7747_v4  ;;  %5900 = vmatprep.subr.bf16.mxu0 %v7752_v5  ;;  %v7804_v5 = vld [vmem:[%s9589_s5 + $0x4e8] ss:$16 sps:$4 sm:$0xff]  }
 0x2e7   : > { %5941 = vmatprep.subr.bf16.mxu1 %v7755_v6  ;;  %v7807_v6 = vld [vmem:[%s9589_s5 + $0x6e8] ss:$16 sps:$4 sm:$0xff]  }
 0x2e9   : > { %5901 = vmatpush1.bf16.msra.mxu0 %v7750_v9  ;;  %v7812_v9 = vld [vmem:[%s9589_s5 + $0x50c] ss:$16 sps:$4 sm:$0xff]  }
 0x2ea   : > { %5942 = vmatpush1.bf16.msra.mxu1 %v7753_v10  ;;  %5902 = vmatprep.subr.bf16.mxu0 %v7758_v11  ;;  %v7815_v10 = vld [vmem:[%s9589_s5 + $0x70c] ss:$16 sps:$4 sm:$0xff]   ;;  %v7810_v11 = vld [vmem:[%s9589_s5 + $0x508] ss:$16 sps:$4 sm:$0xff]  }
 0x2eb   : > { %5943 = vmatprep.subr.bf16.mxu1 %v7761_v12  ;;  %v7813_v12 = vld [vmem:[%s9589_s5 + $0x708] ss:$16 sps:$4 sm:$0xff]  }
 0x2ed   : > { %5903 = vmatpush1.bf16.msra.mxu0 %v7756_v13  ;;  %v7818_v13 = vld [vmem:[%s9589_s5 + $0x52c] ss:$16 sps:$4 sm:$0xff]  }
 0x2ee   : > { %5944 = vmatpush1.bf16.msra.mxu1 %v7759_v14  ;;  %5954 = vmatprep.subr.bf16.mxu0 %v7764_v15  ;;  %v7821_v14 = vld [vmem:[%s9589_s5 + $0x72c] ss:$16 sps:$4 sm:$0xff]   ;;  %v7816_v15 = vld [vmem:[%s9589_s5 + $0x528] ss:$16 sps:$4 sm:$0xff]  }
 0x2ef   : > { %5995 = vmatprep.subr.bf16.mxu1 %v7767_v16  ;;  %v7819_v16 = vld [vmem:[%s9589_s5 + $0x728] ss:$16 sps:$4 sm:$0xff]  }
 0x2f0   : > { %5905 = vmatmul.mubr.bf16.vlgmr.msra.gmra.mrb[20].mxu0 %v9670_v7  ;;  %v7774_v7 = vld [vmem:[%s9589_s5 + $0x448] ss:$16 sps:$4 sm:$0xff]  }
 0x2f1   : > { %5946 = vmatmul.mubr.bf16.vlgmr.msra.gmra.mrb[20].mxu1 %v9672_v8  ;;  %5955 = vmatpush1.bf16.msra.mxu0 %v7762_v19  ;;  %v7777_v8 = vld [vmem:[%s9589_s5 + $0x648] ss:$16 sps:$4 sm:$0xff]   ;;  %v7824_v19 = vld [vmem:[%s9589_s5 + $0x54c] ss:$16 sps:$4 sm:$0xff]  }
 0x2f2   : > { %5996 = vmatpush1.bf16.msra.mxu1 %v7765_v20  ;;  %5956 = vmatprep.subr.bf16.mxu0 %v7770_v21  ;;  %v7827_v20 = vld [vmem:[%s9589_s5 + $0x74c] ss:$16 sps:$4 sm:$0xff]   ;;  %v7822_v21 = vld [vmem:[%s9589_s5 + $0x548] ss:$16 sps:$4 sm:$0xff]  }
 0x2f3   : > { %5997 = vmatprep.subr.bf16.mxu1 %v7773_v22  ;;  %5986 = vmatprep.mubr.bf16.mxu0 %v9710_v37  ;;  %v7783_v37 = vld [vmem:[%s9589_s5 + $0x668] ss:$16 sps:$4 sm:$0xff]  }
 0x2f4   : > { %6027 = vmatprep.mubr.bf16.mxu1 %v9714_v38  ;;  %v7788_v38 = vld [vmem:[%s9589_s5 + $0x48c] ss:$16 sps:$4 sm:$0xff]   ;;  %v7825_v22 = vld [vmem:[%s9589_s5 + $0x748] ss:$16 sps:$4 sm:$0xff]  }
 0x2f5   : > { %5957 = vmatpush1.bf16.msra.mxu0 %v7768_v28  ;;  %v7830_v28 = vld [vmem:[%s9589_s5 + $0x56c] ss:$16 sps:$4 sm:$0xff]  }
 0x2f6   : > { %5998 = vmatpush1.bf16.msra.mxu1 %v7771_v29  ;;  %5958 = vmatprep.subr.bf16.mxu0 %v7776_v35  ;;  %v7833_v29 = vld [vmem:[%s9589_s5 + $0x76c] ss:$16 sps:$4 sm:$0xff]   ;;  %v7828_v35 = vld [vmem:[%s9589_s5 + $0x568] ss:$16 sps:$4 sm:$0xff]  }
 0x2f7   : > { %5999 = vmatprep.subr.bf16.mxu1 %v7779_v30  ;;  %v7831_v30 = vld [vmem:[%s9589_s5 + $0x768] ss:$16 sps:$4 sm:$0xff]  }
 0x2f9   : > { %5959 = vmatpush1.bf16.msra.mxu0 %v7774_v7  ;;  %v7836_v7 = vld [vmem:[%s9589_s5 + $0x58c] ss:$16 sps:$4 sm:$0xff]  }
 0x2fa   : > { %6000 = vmatpush1.bf16.msra.mxu1 %v7777_v8  ;;  %5960 = vmatprep.subr.bf16.mxu0 %v7782_v44  ;;  %v7839_v8 = vld [vmem:[%s9589_s5 + $0x78c] ss:$16 sps:$4 sm:$0xff]   ;;  %v7834_v44 = vld [vmem:[%s9589_s5 + $0x588] ss:$16 sps:$4 sm:$0xff]  }
 0x2fb   : > { %6001 = vmatprep.subr.bf16.mxu1 %v7785_v32  ;;  %v7837_v32 = vld [vmem:[%s9589_s5 + $0x788] ss:$16 sps:$4 sm:$0xff]  }
 0x2fd   : > { %5961 = vmatpush1.bf16.msra.mxu0 %v7780_v33  ;;  %v7842_v33 = vld [vmem:[%s9589_s5 + $0x5ac] ss:$16 sps:$4 sm:$0xff]  }
 0x2fe   : > { %6002 = vmatpush1.bf16.msra.mxu1 %v7783_v37  ;;  %5962 = vmatprep.subr.bf16.mxu0 %v7788_v38  ;;  %v7845_v37 = vld [vmem:[%s9589_s5 + $0x7ac] ss:$16 sps:$4 sm:$0xff]   ;;  %v7840_v38 = vld [vmem:[%s9589_s5 + $0x5a8] ss:$16 sps:$4 sm:$0xff]  }
 0x2ff   : > { %6003 = vmatprep.subr.bf16.mxu1 %v7791_v34  ;;  %v7843_v34 = vld [vmem:[%s9589_s5 + $0x7a8] ss:$16 sps:$4 sm:$0xff]  }
 0x301   : > { %5963 = vmatpush1.bf16.msra.mxu0 %v7786_v36  ;;  %v7848_v36 = vld [vmem:[%s9589_s5 + $0x5cc] ss:$16 sps:$4 sm:$0xff]  }
 0x302   : > { %6004 = vmatpush1.bf16.msra.mxu1 %v7789_v43  ;;  %5964 = vmatprep.subr.bf16.mxu0 %v7794_v45  ;;  %v7851_v43 = vld [vmem:[%s9589_s5 + $0x7cc] ss:$16 sps:$4 sm:$0xff]   ;;  %v7846_v45 = vld [vmem:[%s9589_s5 + $0x5c8] ss:$16 sps:$4 sm:$0xff]  }
 0x303   : > { %6005 = vmatprep.subr.bf16.mxu1 %v7797_v46  ;;  %v5660_v53 = vpop.f32.mrb[8].mxu0  ;;  %v7849_v46 = vld [vmem:[%s9589_s5 + $0x7c8] ss:$16 sps:$4 sm:$0xff]  }
 0x304   : > { %v5701_v54 = vpop.f32.mrb[8].mxu1  ;;  %v5661_v55 = vadd.f32 %v5660_v53, %v10070_v27  ;;  %v5662_v56 = vpop.f32.mrb[9].mxu0  ;;  %v7806_v27 = vld [vmem:[%s9589_s5 + $0x4ec] ss:$16 sps:$4 sm:$0xff]  }
 0x305   : > { %v5703_v57 = vpop.f32.mrb[9].mxu1  ;;  %v5663_v58 = vadd.f32 %v5662_v56, %v10074_v31  ;;  %v5664_v48 = vpop.f32.mrb[10].mxu0  ;;  %5965 = vmatpush1.bf16.msra.mxu0 %v7792_v50  ;;  %v7809_v31 = vld [vmem:[%s9589_s5 + $0x6ec] ss:$16 sps:$4 sm:$0xff]   ;;  %v7861_v56 = vld [vmem:[%s9589_s5 + $0xa08] ss:$16 sps:$4 sm:$0xff]  }
 0x306   : > { %v5705_v63 = vpop.f32.mrb[10].mxu1  ;;  %6006 = vmatpush1.bf16.msra.mxu1 %v7795_v51  ;;  %v10144_v1 = vadd.f32 %v5701_v54, %v5661_v55  ;;  %v5665_v2 = vpop.f32.mrb[11].mxu0  ;;  %5966 = vmatprep.subr.bf16.mxu0 %v7800_v59  ;;  %v7854_v50 = vld [vmem:[%s9589_s5 + $0x5ec] ss:$16 sps:$4 sm:$0xff]   ;;  %v7852_v59 = vld [vmem:[%s9589_s5 + $0x5e8] ss:$16 sps:$4 sm:$0xff]  }
 0x307   : > { %v5706_v3 = vpop.f32.mrb[11].mxu1  ;;  %6007 = vmatprep.subr.bf16.mxu1 %v7803_v62  ;;  %v10148_v4 = vadd.f32 %v5703_v57, %v5663_v58  ;;  %v7857_v51 = vld [vmem:[%s9589_s5 + $0x7ec] ss:$16 sps:$4 sm:$0xff]   ;;  %v7855_v62 = vld [vmem:[%s9589_s5 + $0x7e8] ss:$16 sps:$4 sm:$0xff]  }
 0x308   : > { %v7860_v53 = vld [vmem:[%s9589_s5 + $0x80c] ss:$16 sps:$4 sm:$0xff]   ;;  %v7858_v55 = vld [vmem:[%s9589_s5 + $0x808] ss:$16 sps:$4 sm:$0xff]  }
 0x309   : > { %5967 = vmatpush1.bf16.msra.mxu0 %v7798_v52  ;;  %v7863_v54 = vld [vmem:[%s9589_s5 + $0xa0c] ss:$16 sps:$4 sm:$0xff]   ;;  %v7864_v48 = vld [vmem:[%s9589_s5 + $0x828] ss:$16 sps:$4 sm:$0xff]  }
 0x30a   : > { %6008 = vmatpush1.bf16.msra.mxu1 %v7801_v0  ;;  %5968 = vmatprep.subr.bf16.mxu0 %v7806_v27  ;;  %v7866_v57 = vld [vmem:[%s9589_s5 + $0x82c] ss:$16 sps:$4 sm:$0xff]   ;;  %v7867_v63 = vld [vmem:[%s9589_s5 + $0xa28] ss:$16 sps:$4 sm:$0xff]  }
 0x30b   : > { %6009 = vmatprep.subr.bf16.mxu1 %v7809_v31  ;;  %v7869_v58 = vld [vmem:[%s9589_s5 + $0xa2c] ss:$16 sps:$4 sm:$0xff]   ;;  %v7876_v27 = vld [vmem:[%s9589_s5 + $0x868] ss:$16 sps:$4 sm:$0xff]  }
 0x30c   : > { %v7872_v52 = vld [vmem:[%s9589_s5 + $0x84c] ss:$16 sps:$4 sm:$0xff]  }
 0x30d   : > { %5969 = vmatpush1.bf16.msra.mxu0 %v7804_v5  ;;  %v7875_v0 = vld [vmem:[%s9589_s5 + $0xa4c] ss:$16 sps:$4 sm:$0xff]   ;;  %v7882_v5 = vld [vmem:[%s9589_s5 + $0x888] ss:$16 sps:$4 sm:$0xff]  }
 0x30e   : > { %6010 = vmatpush1.bf16.msra.mxu1 %v7807_v6  ;;  %5970 = vmatprep.subr.bf16.mxu0 %v7812_v9  ;;  %v7878_v2 = vld [vmem:[%s9589_s5 + $0x86c] ss:$16 sps:$4 sm:$0xff]   ;;  %v7885_v6 = vld [vmem:[%s9589_s5 + $0xa88] ss:$16 sps:$4 sm:$0xff]  }
 0x30f   : > { %6011 = vmatprep.subr.bf16.mxu1 %v7815_v10  ;;  %v7881_v3 = vld [vmem:[%s9589_s5 + $0xa6c] ss:$16 sps:$4 sm:$0xff]  }
 0x310   : > { %v7887_v31 = vld [vmem:[%s9589_s5 + $0xa8c] ss:$16 sps:$4 sm:$0xff]  }
 0x311   : > { %5971 = vmatpush1.bf16.msra.mxu0 %v7810_v11  ;;  %v7890_v9 = vld [vmem:[%s9589_s5 + $0x8ac] ss:$16 sps:$4 sm:$0xff]   ;;  %v7888_v11 = vld [vmem:[%s9589_s5 + $0x8a8] ss:$16 sps:$4 sm:$0xff]  }
 0x312   : > { %6012 = vmatpush1.bf16.msra.mxu1 %v7813_v12  ;;  %5972 = vmatprep.subr.bf16.mxu0 %v7818_v13  ;;  %v7893_v10 = vld [vmem:[%s9589_s5 + $0xaac] ss:$16 sps:$4 sm:$0xff]   ;;  %v7891_v12 = vld [vmem:[%s9589_s5 + $0xaa8] ss:$16 sps:$4 sm:$0xff]  }
 0x313   : > { %6013 = vmatprep.subr.bf16.mxu1 %v7821_v14  ;;  %v7896_v13 = vld [vmem:[%s9589_s5 + $0x8cc] ss:$16 sps:$4 sm:$0xff]  }
 0x314   : > { %v7899_v14 = vld [vmem:[%s9589_s5 + $0xacc] ss:$16 sps:$4 sm:$0xff]  }
 0x315   : > { %5973 = vmatpush1.bf16.msra.mxu0 %v7816_v15 }
 0x316   : > { %6014 = vmatpush1.bf16.msra.mxu1 %v7819_v16  ;;  %5974 = vmatprep.subr.bf16.mxu0 %v7824_v19 }
 0x317   : > { %6015 = vmatprep.subr.bf16.mxu1 %v7827_v20 }
 0x319   : > { %5975 = vmatpush1.bf16.msra.mxu0 %v7822_v21 }
 0x31a   : > { %6016 = vmatpush1.bf16.msra.mxu1 %v7825_v22  ;;  %5976 = vmatprep.subr.bf16.mxu0 %v7830_v28 }
 0x31b   : > { %6017 = vmatprep.subr.bf16.mxu1 %v7833_v29 }
 0x31d   : > { %5977 = vmatpush1.bf16.msra.mxu0 %v7828_v35  ;;  %v7894_v35 = vld [vmem:[%s9589_s5 + $0x8c8] ss:$16 sps:$4 sm:$0xff]  }
 0x31e   : > { %6018 = vmatpush1.bf16.msra.mxu1 %v7831_v30  ;;  %5978 = vmatprep.subr.bf16.mxu0 %v7836_v7  ;;  %v7897_v30 = vld [vmem:[%s9589_s5 + $0xac8] ss:$16 sps:$4 sm:$0xff]  }
 0x31f   : > { %6019 = vmatprep.subr.bf16.mxu1 %v7839_v8 }
 0x321   : > { %5979 = vmatpush1.bf16.msra.mxu0 %v7834_v44 }
 0x322   : > { %6020 = vmatpush1.bf16.msra.mxu1 %v7837_v32  ;;  %5980 = vmatprep.subr.bf16.mxu0 %v7842_v33  ;;  %v7900_v33 = vld [vmem:[%s9589_s5 + $0x8e8] ss:$16 sps:$4 sm:$0xff]  }
 0x323   : > { %6021 = vmatprep.subr.bf16.mxu1 %v7845_v37  ;;  %v7903_v37 = vld [vmem:[%s9589_s5 + $0xae8] ss:$16 sps:$4 sm:$0xff]  }
 0x325   : > { %5981 = vmatpush1.bf16.msra.mxu0 %v7840_v38  ;;  %v7908_v38 = vld [vmem:[%s9589_s5 + $0x90c] ss:$16 sps:$4 sm:$0xff]  }
 0x326   : > { %6022 = vmatpush1.bf16.msra.mxu1 %v7843_v34  ;;  %5982 = vmatprep.subr.bf16.mxu0 %v7848_v36  ;;  %v7911_v34 = vld [vmem:[%s9589_s5 + $0xb0c] ss:$16 sps:$4 sm:$0xff]   ;;  %v7906_v36 = vld [vmem:[%s9589_s5 + $0x908] ss:$16 sps:$4 sm:$0xff]  }
 0x327   : > { %6023 = vmatprep.subr.bf16.mxu1 %v7851_v43  ;;  %v7909_v43 = vld [vmem:[%s9589_s5 + $0xb08] ss:$16 sps:$4 sm:$0xff]  }
 0x329   : > { %5983 = vmatpush1.bf16.msra.mxu0 %v7846_v45  ;;  %v7914_v45 = vld [vmem:[%s9589_s5 + $0x92c] ss:$16 sps:$4 sm:$0xff]  }
 0x32a   : > { %6024 = vmatpush1.bf16.msra.mxu1 %v7849_v46  ;;  %5984 = vmatprep.subr.bf16.mxu0 %v7854_v50  ;;  %v7917_v46 = vld [vmem:[%s9589_s5 + $0xb2c] ss:$16 sps:$4 sm:$0xff]   ;;  %v7912_v50 = vld [vmem:[%s9589_s5 + $0x928] ss:$16 sps:$4 sm:$0xff]  }
 0x32b   : > { %6025 = vmatprep.subr.bf16.mxu1 %v7857_v51  ;;  %v7915_v51 = vld [vmem:[%s9589_s5 + $0xb28] ss:$16 sps:$4 sm:$0xff]  }
 0x32d   : > { %5985 = vmatpush1.bf16.msra.mxu0 %v7852_v59  ;;  %v7920_v59 = vld [vmem:[%s9589_s5 + $0x94c] ss:$16 sps:$4 sm:$0xff]  }
 0x32e   : > { %6026 = vmatpush1.bf16.msra.mxu1 %v7855_v62  ;;  %6036 = vmatprep.subr.bf16.mxu0 %v7860_v53  ;;  %v7923_v62 = vld [vmem:[%s9589_s5 + $0xb4c] ss:$16 sps:$4 sm:$0xff]   ;;  %v7918_v53 = vld [vmem:[%s9589_s5 + $0x948] ss:$16 sps:$4 sm:$0xff]  }
 0x32f   : > { %6077 = vmatprep.subr.bf16.mxu1 %v7863_v54  ;;  %v7921_v54 = vld [vmem:[%s9589_s5 + $0xb48] ss:$16 sps:$4 sm:$0xff]  }
 0x330   : > { %5987 = vmatmul.mubr.bf16.vlgmr.msra.gmra.mrb[24].mxu0 %v9758_v17  ;;  %v7870_v17 = vld [vmem:[%s9589_s5 + $0x848] ss:$16 sps:$4 sm:$0xff]  }
 0x331   : > { %6028 = vmatmul.mubr.bf16.vlgmr.msra.gmra.mrb[24].mxu1 %v9762_v18  ;;  %6037 = vmatpush1.bf16.msra.mxu0 %v7858_v55  ;;  %v7873_v18 = vld [vmem:[%s9589_s5 + $0xa48] ss:$16 sps:$4 sm:$0xff]   ;;  %v7926_v55 = vld [vmem:[%s9589_s5 + $0x96c] ss:$16 sps:$4 sm:$0xff]  }
 0x332   : > { %6078 = vmatpush1.bf16.msra.mxu1 %v7861_v56  ;;  %6038 = vmatprep.subr.bf16.mxu0 %v7866_v57  ;;  %v7929_v56 = vld [vmem:[%s9589_s5 + $0xb6c] ss:$16 sps:$4 sm:$0xff]   ;;  %v7924_v57 = vld [vmem:[%s9589_s5 + $0x968] ss:$16 sps:$4 sm:$0xff]  }
 0x333   : > { %6079 = vmatprep.subr.bf16.mxu1 %v7869_v58  ;;  %6068 = vmatprep.mubr.bf16.mxu0 %v9776_v25  ;;  %v7879_v25 = vld [vmem:[%s9589_s5 + $0xa68] ss:$16 sps:$4 sm:$0xff]  }
 0x334   : > { %6109 = vmatprep.mubr.bf16.mxu1 %v9780_v26  ;;  %v7884_v26 = vld [vmem:[%s9589_s5 + $0x88c] ss:$16 sps:$4 sm:$0xff]   ;;  %v7927_v58 = vld [vmem:[%s9589_s5 + $0xb68] ss:$16 sps:$4 sm:$0xff]  }
 0x335   : > { %6039 = vmatpush1.bf16.msra.mxu0 %v7864_v48  ;;  %v7932_v48 = vld [vmem:[%s9589_s5 + $0x98c] ss:$16 sps:$4 sm:$0xff]  }
 0x336   : > { %6080 = vmatpush1.bf16.msra.mxu1 %v7867_v63  ;;  %6040 = vmatprep.subr.bf16.mxu0 %v7872_v52  ;;  %v7935_v63 = vld [vmem:[%s9589_s5 + $0xb8c] ss:$16 sps:$4 sm:$0xff]   ;;  %v7930_v52 = vld [vmem:[%s9589_s5 + $0x988] ss:$16 sps:$4 sm:$0xff]  }
 0x337   : > { %6081 = vmatprep.subr.bf16.mxu1 %v7875_v0  ;;  %v7933_v0 = vld [vmem:[%s9589_s5 + $0xb88] ss:$16 sps:$4 sm:$0xff]  }
 0x339   : > { %6041 = vmatpush1.bf16.msra.mxu0 %v7870_v17  ;;  %v7938_v17 = vld [vmem:[%s9589_s5 + $0x9ac] ss:$16 sps:$4 sm:$0xff]  }
 0x33a   : > { %6082 = vmatpush1.bf16.msra.mxu1 %v7873_v18  ;;  %6042 = vmatprep.subr.bf16.mxu0 %v7878_v2  ;;  %v7941_v18 = vld [vmem:[%s9589_s5 + $0xbac] ss:$16 sps:$4 sm:$0xff]   ;;  %v7936_v2 = vld [vmem:[%s9589_s5 + $0x9a8] ss:$16 sps:$4 sm:$0xff]  }
 0x33b   : > { %6083 = vmatprep.subr.bf16.mxu1 %v7881_v3  ;;  %v7939_v3 = vld [vmem:[%s9589_s5 + $0xba8] ss:$16 sps:$4 sm:$0xff]  }
 0x33d   : > { %6043 = vmatpush1.bf16.msra.mxu0 %v7876_v27  ;;  %v7944_v27 = vld [vmem:[%s9589_s5 + $0x9cc] ss:$16 sps:$4 sm:$0xff]  }
 0x33e   : > { %6084 = vmatpush1.bf16.msra.mxu1 %v7879_v25  ;;  %6044 = vmatprep.subr.bf16.mxu0 %v7884_v26  ;;  %v7947_v25 = vld [vmem:[%s9589_s5 + $0xbcc] ss:$16 sps:$4 sm:$0xff]   ;;  %v7942_v26 = vld [vmem:[%s9589_s5 + $0x9c8] ss:$16 sps:$4 sm:$0xff]  }
 0x33f   : > { %6085 = vmatprep.subr.bf16.mxu1 %v7887_v31  ;;  %v7945_v31 = vld [vmem:[%s9589_s5 + $0xbc8] ss:$16 sps:$4 sm:$0xff]  }
 0x341   : > { %6045 = vmatpush1.bf16.msra.mxu0 %v7882_v5  ;;  %v7950_v5 = vld [vmem:[%s9589_s5 + $0x9ec] ss:$16 sps:$4 sm:$0xff]  }
 0x342   : > { %6086 = vmatpush1.bf16.msra.mxu1 %v7885_v6  ;;  %6046 = vmatprep.subr.bf16.mxu0 %v7890_v9  ;;  %v7953_v6 = vld [vmem:[%s9589_s5 + $0xbec] ss:$16 sps:$4 sm:$0xff]   ;;  %v7948_v9 = vld [vmem:[%s9589_s5 + $0x9e8] ss:$16 sps:$4 sm:$0xff]  }
 0x343   : > { %6087 = vmatprep.subr.bf16.mxu1 %v7893_v10  ;;  %v5742_v15 = vpop.f32.mrb[12].mxu0  ;;  %v7951_v10 = vld [vmem:[%s9589_s5 + $0xbe8] ss:$16 sps:$4 sm:$0xff]  }
 0x344   : > { %v5783_v16 = vpop.f32.mrb[12].mxu1  ;;  %v5743_v19 = vadd.f32 %v5742_v15, %v10144_v1  ;;  %v5744_v20 = vpop.f32.mrb[13].mxu0  ;;  %v7902_v1 = vld [vmem:[%s9589_s5 + $0x8ec] ss:$16 sps:$4 sm:$0xff]  }
 0x345   : > { %v5785_v21 = vpop.f32.mrb[13].mxu1  ;;  %v5745_v22 = vadd.f32 %v5744_v20, %v10148_v4  ;;  %v5746_v28 = vpop.f32.mrb[14].mxu0  ;;  %6047 = vmatpush1.bf16.msra.mxu0 %v7888_v11  ;;  %v7905_v4 = vld [vmem:[%s9589_s5 + $0xaec] ss:$16 sps:$4 sm:$0xff]   ;;  %v7963_v20 = vld [vmem:[%s9589_s5 + $0xe28] ss:$16 sps:$4 sm:$0xff]  }
 0x346   : > { %v5787_v29 = vpop.f32.mrb[14].mxu1  ;;  %6088 = vmatpush1.bf16.msra.mxu1 %v7891_v12  ;;  %v10218_v7 = vadd.f32 %v5783_v16, %v5743_v19  ;;  %v5747_v8 = vpop.f32.mrb[15].mxu0  ;;  %6048 = vmatprep.subr.bf16.mxu0 %v7896_v13  ;;  %v7956_v11 = vld [vmem:[%s9589_s5 + $0xc0c] ss:$16 sps:$4 sm:$0xff]   ;;  %v7954_v13 = vld [vmem:[%s9589_s5 + $0xc08] ss:$16 sps:$4 sm:$0xff]  }
 0x347   : > { %v5788_v44 = vpop.f32.mrb[15].mxu1  ;;  %6089 = vmatprep.subr.bf16.mxu1 %v7899_v14  ;;  %v10222_v32 = vadd.f32 %v5785_v21, %v5745_v22  ;;  %v7959_v12 = vld [vmem:[%s9589_s5 + $0xe0c] ss:$16 sps:$4 sm:$0xff]   ;;  %v7957_v14 = vld [vmem:[%s9589_s5 + $0xe08] ss:$16 sps:$4 sm:$0xff]  }
 0x348   : > { %v7962_v15 = vld [vmem:[%s9589_s5 + $0xc2c] ss:$16 sps:$4 sm:$0xff]   ;;  %v7960_v19 = vld [vmem:[%s9589_s5 + $0xc28] ss:$16 sps:$4 sm:$0xff]  }
 0x349   : > { %6049 = vmatpush1.bf16.msra.mxu0 %v7894_v35  ;;  %v7965_v16 = vld [vmem:[%s9589_s5 + $0xe2c] ss:$16 sps:$4 sm:$0xff]   ;;  %v7972_v35 = vld [vmem:[%s9589_s5 + $0xc68] ss:$16 sps:$4 sm:$0xff]  }
 0x34a   : > { %6090 = vmatpush1.bf16.msra.mxu1 %v7897_v30  ;;  %6050 = vmatprep.subr.bf16.mxu0 %v7902_v1  ;;  %v7968_v21 = vld [vmem:[%s9589_s5 + $0xc4c] ss:$16 sps:$4 sm:$0xff]   ;;  %v7978_v8 = vld [vmem:[%s9589_s5 + $0xc88] ss:$16 sps:$4 sm:$0xff]  }
 0x34b   : > { %6091 = vmatprep.subr.bf16.mxu1 %v7905_v4  ;;  %v7971_v22 = vld [vmem:[%s9589_s5 + $0xe4c] ss:$16 sps:$4 sm:$0xff]   ;;  %v7981_v44 = vld [vmem:[%s9589_s5 + $0xe88] ss:$16 sps:$4 sm:$0xff]  }
 0x34c   : > { %v7974_v28 = vld [vmem:[%s9589_s5 + $0xc6c] ss:$16 sps:$4 sm:$0xff]  }
 0x34d   : > { %6051 = vmatpush1.bf16.msra.mxu0 %v7900_v33  ;;  %v7977_v29 = vld [vmem:[%s9589_s5 + $0xe6c] ss:$16 sps:$4 sm:$0xff]   ;;  %v7984_v33 = vld [vmem:[%s9589_s5 + $0xca8] ss:$16 sps:$4 sm:$0xff]  }
 0x34e   : > { %6092 = vmatpush1.bf16.msra.mxu1 %v7903_v37  ;;  %6052 = vmatprep.subr.bf16.mxu0 %v7908_v38  ;;  %v7983_v30 = vld [vmem:[%s9589_s5 + $0xe8c] ss:$16 sps:$4 sm:$0xff]   ;;  %v7987_v37 = vld [vmem:[%s9589_s5 + $0xea8] ss:$16 sps:$4 sm:$0xff]  }
 0x34f   : > { %6093 = vmatprep.subr.bf16.mxu1 %v7911_v34  ;;  %v7986_v1 = vld [vmem:[%s9589_s5 + $0xcac] ss:$16 sps:$4 sm:$0xff]  }
 0x350   : > { %v7989_v4 = vld [vmem:[%s9589_s5 + $0xeac] ss:$16 sps:$4 sm:$0xff]  }
 0x351   : > { %6053 = vmatpush1.bf16.msra.mxu0 %v7906_v36  ;;  %v7992_v38 = vld [vmem:[%s9589_s5 + $0xccc] ss:$16 sps:$4 sm:$0xff]  }
 0x352   : > { %6094 = vmatpush1.bf16.msra.mxu1 %v7909_v43  ;;  %6054 = vmatprep.subr.bf16.mxu0 %v7914_v45  ;;  %v7995_v34 = vld [vmem:[%s9589_s5 + $0xecc] ss:$16 sps:$4 sm:$0xff]  }
 0x353   : > { %6095 = vmatprep.subr.bf16.mxu1 %v7917_v46 }
 0x355   : > { %6055 = vmatpush1.bf16.msra.mxu0 %v7912_v50 }
 0x356   : > { %6096 = vmatpush1.bf16.msra.mxu1 %v7915_v51  ;;  %6056 = vmatprep.subr.bf16.mxu0 %v7920_v59  ;;  %v7990_v51 = vld [vmem:[%s9589_s5 + $0xcc8] ss:$16 sps:$4 sm:$0xff]   ;;  %v1538_v59 = vld [vmem:[%s9587_s4] sm:$0xff] }
 0x357   : > { %6097 = vmatprep.subr.bf16.mxu1 %v7923_v62 }
 0x359   : > { %6057 = vmatpush1.bf16.msra.mxu0 %v7918_v53  ;;  %v1539_v53 = vld [vmem:[%s9587_s4 + $0x8] sm:$0xff] }
 0x35a   : > { %6098 = vmatpush1.bf16.msra.mxu1 %v7921_v54  ;;  %6058 = vmatprep.subr.bf16.mxu0 %v7926_v55 }
 0x35b   : > { %6099 = vmatprep.subr.bf16.mxu1 %v7929_v56  ;;  %v7993_v56 = vld [vmem:[%s9589_s5 + $0xec8] ss:$16 sps:$4 sm:$0xff]  }
 0x35d   : > { %6059 = vmatpush1.bf16.msra.mxu0 %v7924_v57 }
 0x35e   : > { %6100 = vmatpush1.bf16.msra.mxu1 %v7927_v58  ;;  %6060 = vmatprep.subr.bf16.mxu0 %v7932_v48  ;;  %v7998_v48 = vld [vmem:[%s9589_s5 + $0xcec] ss:$16 sps:$4 sm:$0xff]  }
 0x35f   : > { %6101 = vmatprep.subr.bf16.mxu1 %v7935_v63 }
 0x361   : > { %6061 = vmatpush1.bf16.msra.mxu0 %v7930_v52  ;;  %v10297_v52 = vld [vmem:[%s9587_s4 + $0x10] sm:$0xff] }
 0x362   : > { %6102 = vmatpush1.bf16.msra.mxu1 %v7933_v0  ;;  %6062 = vmatprep.subr.bf16.mxu0 %v7938_v17  ;;  %v10300_v0 = vld [vmem:[%s9587_s4 + $0x18] sm:$0xff] }
 0x363   : > { %6103 = vmatprep.subr.bf16.mxu1 %v7941_v18 }
 0x365   : > { %6063 = vmatpush1.bf16.msra.mxu0 %v7936_v2  ;;  %v7996_v2 = vld [vmem:[%s9589_s5 + $0xce8] ss:$16 sps:$4 sm:$0xff]  }
 0x366   : > { %6104 = vmatpush1.bf16.msra.mxu1 %v7939_v3  ;;  %6064 = vmatprep.subr.bf16.mxu0 %v7944_v27  ;;  %v7999_v3 = vld [vmem:[%s9589_s5 + $0xee8] ss:$16 sps:$4 sm:$0xff]   ;;  %v8004_v27 = vld [vmem:[%s9589_s5 + $0xd0c] ss:$16 sps:$4 sm:$0xff]  }
 0x367   : > { %6105 = vmatprep.subr.bf16.mxu1 %v7947_v25  ;;  %v8007_v25 = vld [vmem:[%s9589_s5 + $0xf0c] ss:$16 sps:$4 sm:$0xff]  }
 0x369   : > { %6065 = vmatpush1.bf16.msra.mxu0 %v7942_v26  ;;  %v8002_v26 = vld [vmem:[%s9589_s5 + $0xd08] ss:$16 sps:$4 sm:$0xff]  }
 0x36a   : > { %6106 = vmatpush1.bf16.msra.mxu1 %v7945_v31  ;;  %6066 = vmatprep.subr.bf16.mxu0 %v7950_v5  ;;  %v8005_v31 = vld [vmem:[%s9589_s5 + $0xf08] ss:$16 sps:$4 sm:$0xff]   ;;  %v8010_v5 = vld [vmem:[%s9589_s5 + $0xd2c] ss:$16 sps:$4 sm:$0xff]  }
 0x36b   : > { %6107 = vmatprep.subr.bf16.mxu1 %v7953_v6  ;;  %v8013_v6 = vld [vmem:[%s9589_s5 + $0xf2c] ss:$16 sps:$4 sm:$0xff]  }
 0x36d   : > { %6067 = vmatpush1.bf16.msra.mxu0 %v7948_v9  ;;  %v8008_v9 = vld [vmem:[%s9589_s5 + $0xd28] ss:$16 sps:$4 sm:$0xff]  }
 0x36e   : > { %6108 = vmatpush1.bf16.msra.mxu1 %v7951_v10  ;;  %6118 = vmatprep.subr.bf16.mxu0 %v7956_v11  ;;  %v8011_v10 = vld [vmem:[%s9589_s5 + $0xf28] ss:$16 sps:$4 sm:$0xff]   ;;  %v8016_v11 = vld [vmem:[%s9589_s5 + $0xd4c] ss:$16 sps:$4 sm:$0xff]  }
 0x36f   : > { %6159 = vmatprep.subr.bf16.mxu1 %v7959_v12  ;;  %v8019_v12 = vld [vmem:[%s9589_s5 + $0xf4c] ss:$16 sps:$4 sm:$0xff]  }
 0x370   : > { %6069 = vmatmul.mubr.bf16.vlgmr.msra.gmra.mrb[28].mxu0 %v9850_v39  ;;  %v7966_v39 = vld [vmem:[%s9589_s5 + $0xc48] ss:$16 sps:$4 sm:$0xff]  }
 0x371   : > { %6110 = vmatmul.mubr.bf16.vlgmr.msra.gmra.mrb[28].mxu1 %v9854_v40  ;;  %6119 = vmatpush1.bf16.msra.mxu0 %v7954_v13  ;;  %v7969_v40 = vld [vmem:[%s9589_s5 + $0xe48] ss:$16 sps:$4 sm:$0xff]  }
 0x372   : > { %6160 = vmatpush1.bf16.msra.mxu1 %v7957_v14  ;;  %6120 = vmatprep.subr.bf16.mxu0 %v7962_v15  ;;  %v8014_v13 = vld [vmem:[%s9589_s5 + $0xd48] ss:$16 sps:$4 sm:$0xff]   ;;  %v8022_v15 = vld [vmem:[%s9589_s5 + $0xd6c] ss:$16 sps:$4 sm:$0xff]  }
 0x373   : > { %6161 = vmatprep.subr.bf16.mxu1 %v7965_v16  ;;  %6150 = vmatprep.mubr.bf16.mxu0 %v9866_v23  ;;  %v7975_v23 = vld [vmem:[%s9589_s5 + $0xe68] ss:$16 sps:$4 sm:$0xff]   ;;  %v8025_v16 = vld [vmem:[%s9589_s5 + $0xf6c] ss:$16 sps:$4 sm:$0xff]  }
 0x374   : > { %6191 = vmatprep.mubr.bf16.mxu1 %v9870_v24  ;;  %v7980_v24 = vld [vmem:[%s9589_s5 + $0xc8c] ss:$16 sps:$4 sm:$0xff]   ;;  %v8017_v14 = vld [vmem:[%s9589_s5 + $0xf48] ss:$16 sps:$4 sm:$0xff]  }
 0x375   : > { %6121 = vmatpush1.bf16.msra.mxu0 %v7960_v19  ;;  %v8020_v19 = vld [vmem:[%s9589_s5 + $0xd68] ss:$16 sps:$4 sm:$0xff]  }
 0x376   : > { %6162 = vmatpush1.bf16.msra.mxu1 %v7963_v20  ;;  %6122 = vmatprep.subr.bf16.mxu0 %v7968_v21  ;;  %v8023_v20 = vld [vmem:[%s9589_s5 + $0xf68] ss:$16 sps:$4 sm:$0xff]   ;;  %v8028_v21 = vld [vmem:[%s9589_s5 + $0xd8c] ss:$16 sps:$4 sm:$0xff]  }
 0x377   : > { %6163 = vmatprep.subr.bf16.mxu1 %v7971_v22  ;;  %v8031_v22 = vld [vmem:[%s9589_s5 + $0xf8c] ss:$16 sps:$4 sm:$0xff]  }
 0x379   : > { %6123 = vmatpush1.bf16.msra.mxu0 %v7966_v39  ;;  %v8026_v39 = vld [vmem:[%s9589_s5 + $0xd88] ss:$16 sps:$4 sm:$0xff]  }
 0x37a   : > { %6164 = vmatpush1.bf16.msra.mxu1 %v7969_v40  ;;  %6124 = vmatprep.subr.bf16.mxu0 %v7974_v28  ;;  %v8029_v40 = vld [vmem:[%s9589_s5 + $0xf88] ss:$16 sps:$4 sm:$0xff]   ;;  %v8034_v28 = vld [vmem:[%s9589_s5 + $0xdac] ss:$16 sps:$4 sm:$0xff]  }
 0x37b   : > { %6165 = vmatprep.subr.bf16.mxu1 %v7977_v29  ;;  %v8037_v29 = vld [vmem:[%s9589_s5 + $0xfac] ss:$16 sps:$4 sm:$0xff]  }
 0x37d   : > { %6125 = vmatpush1.bf16.msra.mxu0 %v7972_v35  ;;  %v8032_v35 = vld [vmem:[%s9589_s5 + $0xda8] ss:$16 sps:$4 sm:$0xff]  }
 0x37e   : > { %6166 = vmatpush1.bf16.msra.mxu1 %v7975_v23  ;;  %6126 = vmatprep.subr.bf16.mxu0 %v7980_v24  ;;  %v8035_v23 = vld [vmem:[%s9589_s5 + $0xfa8] ss:$16 sps:$4 sm:$0xff]   ;;  %v8040_v24 = vld [vmem:[%s9589_s5 + $0xdcc] ss:$16 sps:$4 sm:$0xff]  }
 0x37f   : > { %6167 = vmatprep.subr.bf16.mxu1 %v7983_v30  ;;  %v8043_v30 = vld [vmem:[%s9589_s5 + $0xfcc] ss:$16 sps:$4 sm:$0xff]  }
 0x381   : > { %6127 = vmatpush1.bf16.msra.mxu0 %v7978_v8  ;;  %v8038_v8 = vld [vmem:[%s9589_s5 + $0xdc8] ss:$16 sps:$4 sm:$0xff]  }
 0x382   : > { %6168 = vmatpush1.bf16.msra.mxu1 %v7981_v44  ;;  %6128 = vmatprep.subr.bf16.mxu0 %v7986_v1  ;;  %v8041_v44 = vld [vmem:[%s9589_s5 + $0xfc8] ss:$16 sps:$4 sm:$0xff]   ;;  %v8046_v1 = vld [vmem:[%s9589_s5 + $0xdec] ss:$16 sps:$4 sm:$0xff]  }
 0x383   : > { %6169 = vmatprep.subr.bf16.mxu1 %v7989_v4  ;;  %v5824_v36 = vpop.f32.mrb[16].mxu0  ;;  %v8049_v4 = vld [vmem:[%s9589_s5 + $0xfec] ss:$16 sps:$4 sm:$0xff]  }
 0x384   : > { %v5865_v43 = vpop.f32.mrb[16].mxu1  ;;  %v5825_v45 = vadd.f32 %v5824_v36, %v10218_v7  ;;  %v5826_v46 = vpop.f32.mrb[17].mxu0  ;;  %v8050_v36 = vld [vmem:[%s9589_s5 + $0x1008] ss:$16 sps:$4 sm:$0xff]  }
 0x385   : > { %v5867_v50 = vpop.f32.mrb[17].mxu1  ;;  %v5827_v62 = vadd.f32 %v5826_v46, %v10222_v32  ;;  %v5828_v54 = vpop.f32.mrb[18].mxu0  ;;  %6129 = vmatpush1.bf16.msra.mxu0 %v7984_v33  ;;  %v8001_v32 = vld [vmem:[%s9589_s5 + $0xeec] ss:$16 sps:$4 sm:$0xff]   ;;  %v8044_v33 = vld [vmem:[%s9589_s5 + $0xde8] ss:$16 sps:$4 sm:$0xff]  }
 0x386   : > { %v5869_v55 = vpop.f32.mrb[18].mxu1  ;;  %6170 = vmatpush1.bf16.msra.mxu1 %v7987_v37  ;;  %v5866_v57 = vadd.f32 %v5865_v43, %v5825_v45  ;;  %v5829_v7 = vpop.f32.mrb[19].mxu0  ;;  %6130 = vmatprep.subr.bf16.mxu0 %v7992_v38  ;;  %v8047_v37 = vld [vmem:[%s9589_s5 + $0xfe8] ss:$16 sps:$4 sm:$0xff]   ;;  %v8052_v38 = vld [vmem:[%s9589_s5 + $0x100c] ss:$16 sps:$4 sm:$0xff]  }
 0x387   : > { %v5870_v58 = vpop.f32.mrb[19].mxu1  ;;  %6171 = vmatprep.subr.bf16.mxu1 %v7995_v34  ;;  %v5868_v63 = vadd.f32 %v5867_v50, %v5827_v62  ;;  %v8055_v34 = vld [vmem:[%s9589_s5 + $0x120c] ss:$16 sps:$4 sm:$0xff]   ;;  %v8053_v43 = vld [vmem:[%s9589_s5 + $0x1208] ss:$16 sps:$4 sm:$0xff]  }
 0x388   : > { %v6282_v17 = vadd.f32 %v5866_v57, %v1538_v59  ;;  %v8058_v45 = vld [vmem:[%s9589_s5 + $0x102c] ss:$16 sps:$4 sm:$0xff]   ;;  %v8056_v50 = vld [vmem:[%s9589_s5 + $0x1028] ss:$16 sps:$4 sm:$0xff]  }
 0x389   : > { %v6283_v18 = vadd.f32 %v5868_v63, %v1539_v53  ;;  %6131 = vmatpush1.bf16.msra.mxu0 %v7990_v51  ;;  %v8061_v46 = vld [vmem:[%s9589_s5 + $0x122c] ss:$16 sps:$4 sm:$0xff]   ;;  %v8059_v51 = vld [vmem:[%s9589_s5 + $0x1228] ss:$16 sps:$4 sm:$0xff]  }
 0x38a   : > { %6172 = vmatpush1.bf16.msra.mxu1 %v7993_v56  ;;  %6132 = vmatprep.subr.bf16.mxu0 %v7998_v48  ;;  %6286 = vst [vmem:[%s9587_s4] sm:$0xff] %v6282_v17  ;;  %v8064_v59 = vld [vmem:[%s9589_s5 + $0x104c] ss:$16 sps:$4 sm:$0xff]   ;;  %v8068_v55 = vld [vmem:[%s9589_s5 + $0x1068] ss:$16 sps:$4 sm:$0xff]  }
 0x38b   : > { %6173 = vmatprep.subr.bf16.mxu1 %v8001_v32  ;;  %6287 = vst [vmem:[%s9587_s4 + $0x8] sm:$0xff] %v6283_v18  ;;  %v8067_v62 = vld [vmem:[%s9589_s5 + $0x124c] ss:$16 sps:$4 sm:$0xff]   ;;  %v8074_v57 = vld [vmem:[%s9589_s5 + $0x1088] ss:$16 sps:$4 sm:$0xff]  }
 0x38c   : > { %v8070_v53 = vld [vmem:[%s9589_s5 + $0x106c] ss:$16 sps:$4 sm:$0xff]   ;;  %v8077_v7 = vld [vmem:[%s9589_s5 + $0x1288] ss:$16 sps:$4 sm:$0xff]  }
 0x38d   : > { %6133 = vmatpush1.bf16.msra.mxu0 %v7996_v2  ;;  %v8073_v54 = vld [vmem:[%s9589_s5 + $0x126c] ss:$16 sps:$4 sm:$0xff]   ;;  %v8080_v32 = vld [vmem:[%s9589_s5 + $0x10a8] ss:$16 sps:$4 sm:$0xff]  }
 0x38e   : > { %6174 = vmatpush1.bf16.msra.mxu1 %v7999_v3  ;;  %6134 = vmatprep.subr.bf16.mxu0 %v8004_v27  ;;  %v8079_v56 = vld [vmem:[%s9589_s5 + $0x128c] ss:$16 sps:$4 sm:$0xff]   ;;  %v8083_v63 = vld [vmem:[%s9589_s5 + $0x12a8] ss:$16 sps:$4 sm:$0xff]  }
 0x38f   : > { %6175 = vmatprep.subr.bf16.mxu1 %v8007_v25  ;;  %v8082_v58 = vld [vmem:[%s9589_s5 + $0x10ac] ss:$16 sps:$4 sm:$0xff]  }
 0x390   : > { %v8085_v48 = vld [vmem:[%s9589_s5 + $0x12ac] ss:$16 sps:$4 sm:$0xff]  }
 0x391   : > { %6135 = vmatpush1.bf16.msra.mxu0 %v8002_v26  ;;  %v8088_v17 = vld [vmem:[%s9589_s5 + $0x10cc] ss:$16 sps:$4 sm:$0xff]  }
 0x392   : > { %6176 = vmatpush1.bf16.msra.mxu1 %v8005_v31  ;;  %6136 = vmatprep.subr.bf16.mxu0 %v8010_v5  ;;  %v8091_v18 = vld [vmem:[%s9589_s5 + $0x12cc] ss:$16 sps:$4 sm:$0xff]  }
 0x393   : > { %6177 = vmatprep.subr.bf16.mxu1 %v8013_v6 }
 0x395   : > { %6137 = vmatpush1.bf16.msra.mxu0 %v8008_v9  ;;  %v8086_v9 = vld [vmem:[%s9589_s5 + $0x10c8] ss:$16 sps:$4 sm:$0xff]  }
 0x396   : > { %6178 = vmatpush1.bf16.msra.mxu1 %v8011_v10  ;;  %6138 = vmatprep.subr.bf16.mxu0 %v8016_v11  ;;  %v8089_v10 = vld [vmem:[%s9589_s5 + $0x12c8] ss:$16 sps:$4 sm:$0xff]  }
 0x397   : > { %6179 = vmatprep.subr.bf16.mxu1 %v8019_v12 }
 0x399   : > { %6139 = vmatpush1.bf16.msra.mxu0 %v8014_v13  ;;  %v8094_v13 = vld [vmem:[%s9589_s5 + $0x10ec] ss:$16 sps:$4 sm:$0xff]  }
 0x39a   : > { %6180 = vmatpush1.bf16.msra.mxu1 %v8017_v14  ;;  %6140 = vmatprep.subr.bf16.mxu0 %v8022_v15  ;;  %v8097_v14 = vld [vmem:[%s9589_s5 + $0x12ec] ss:$16 sps:$4 sm:$0xff]   ;;  %v8092_v15 = vld [vmem:[%s9589_s5 + $0x10e8] ss:$16 sps:$4 sm:$0xff]  }
 0x39b   : > { %6181 = vmatprep.subr.bf16.mxu1 %v8025_v16  ;;  %v8095_v16 = vld [vmem:[%s9589_s5 + $0x12e8] ss:$16 sps:$4 sm:$0xff]  }
 0x39d   : > { %6141 = vmatpush1.bf16.msra.mxu0 %v8020_v19  ;;  %v8100_v19 = vld [vmem:[%s9589_s5 + $0x110c] ss:$16 sps:$4 sm:$0xff]  }
 0x39e   : > { %6182 = vmatpush1.bf16.msra.mxu1 %v8023_v20  ;;  %6142 = vmatprep.subr.bf16.mxu0 %v8028_v21  ;;  %v8103_v20 = vld [vmem:[%s9589_s5 + $0x130c] ss:$16 sps:$4 sm:$0xff]   ;;  %v8098_v21 = vld [vmem:[%s9589_s5 + $0x1108] ss:$16 sps:$4 sm:$0xff]  }
 0x39f   : > { %6183 = vmatprep.subr.bf16.mxu1 %v8031_v22  ;;  %v8101_v22 = vld [vmem:[%s9589_s5 + $0x1308] ss:$16 sps:$4 sm:$0xff]  }
 0x3a1   : > { %6143 = vmatpush1.bf16.msra.mxu0 %v8026_v39  ;;  %v8106_v39 = vld [vmem:[%s9589_s5 + $0x112c] ss:$16 sps:$4 sm:$0xff]  }
 0x3a2   : > { %6184 = vmatpush1.bf16.msra.mxu1 %v8029_v40  ;;  %6144 = vmatprep.subr.bf16.mxu0 %v8034_v28  ;;  %v8109_v40 = vld [vmem:[%s9589_s5 + $0x132c] ss:$16 sps:$4 sm:$0xff]   ;;  %v8104_v28 = vld [vmem:[%s9589_s5 + $0x1128] ss:$16 sps:$4 sm:$0xff]  }
 0x3a3   : > { %6185 = vmatprep.subr.bf16.mxu1 %v8037_v29  ;;  %v8107_v29 = vld [vmem:[%s9589_s5 + $0x1328] ss:$16 sps:$4 sm:$0xff]  }
 0x3a5   : > { %6145 = vmatpush1.bf16.msra.mxu0 %v8032_v35  ;;  %v8112_v35 = vld [vmem:[%s9589_s5 + $0x114c] ss:$16 sps:$4 sm:$0xff]  }
 0x3a6   : > { %6186 = vmatpush1.bf16.msra.mxu1 %v8035_v23  ;;  %6146 = vmatprep.subr.bf16.mxu0 %v8040_v24  ;;  %v8115_v23 = vld [vmem:[%s9589_s5 + $0x134c] ss:$16 sps:$4 sm:$0xff]   ;;  %v8110_v24 = vld [vmem:[%s9589_s5 + $0x1148] ss:$16 sps:$4 sm:$0xff]  }
 0x3a7   : > { %6187 = vmatprep.subr.bf16.mxu1 %v8043_v30  ;;  %v8113_v30 = vld [vmem:[%s9589_s5 + $0x1348] ss:$16 sps:$4 sm:$0xff]  }
 0x3a9   : > { %6147 = vmatpush1.bf16.msra.mxu0 %v8038_v8  ;;  %v8118_v8 = vld [vmem:[%s9589_s5 + $0x116c] ss:$16 sps:$4 sm:$0xff]  }
 0x3aa   : > { %6188 = vmatpush1.bf16.msra.mxu1 %v8041_v44  ;;  %6148 = vmatprep.subr.bf16.mxu0 %v8046_v1  ;;  %v8121_v44 = vld [vmem:[%s9589_s5 + $0x136c] ss:$16 sps:$4 sm:$0xff]   ;;  %v8116_v1 = vld [vmem:[%s9589_s5 + $0x1168] ss:$16 sps:$4 sm:$0xff]  }
 0x3ab   : > { %6189 = vmatprep.subr.bf16.mxu1 %v8049_v4  ;;  %v8119_v4 = vld [vmem:[%s9589_s5 + $0x1368] ss:$16 sps:$4 sm:$0xff]  }
 0x3ad   : > { %6149 = vmatpush1.bf16.msra.mxu0 %v8044_v33  ;;  %v8124_v33 = vld [vmem:[%s9589_s5 + $0x118c] ss:$16 sps:$4 sm:$0xff]  }
 0x3ae   : > { %6190 = vmatpush1.bf16.msra.mxu1 %v8047_v37  ;;  %6200 = vmatprep.subr.bf16.mxu0 %v8052_v38  ;;  %v8127_v37 = vld [vmem:[%s9589_s5 + $0x138c] ss:$16 sps:$4 sm:$0xff]   ;;  %v8122_v38 = vld [vmem:[%s9589_s5 + $0x1188] ss:$16 sps:$4 sm:$0xff]  }
 0x3af   : > { %6241 = vmatprep.subr.bf16.mxu1 %v8055_v34  ;;  %v8125_v34 = vld [vmem:[%s9589_s5 + $0x1388] ss:$16 sps:$4 sm:$0xff]  }
 0x3b0   : > { %6151 = vmatmul.mubr.bf16.vlgmr.msra.gmra.mrb[32].mxu0 %v9941_v60  ;;  %v8062_v60 = vld [vmem:[%s9589_s5 + $0x1048] ss:$16 sps:$4 sm:$0xff]  }
 0x3b1   : > { %6192 = vmatmul.mubr.bf16.vlgmr.msra.gmra.mrb[32].mxu1 %v9945_v61  ;;  %6201 = vmatpush1.bf16.msra.mxu0 %v8050_v36  ;;  %v8065_v61 = vld [vmem:[%s9589_s5 + $0x1248] ss:$16 sps:$4 sm:$0xff]   ;;  %v8130_v36 = vld [vmem:[%s9589_s5 + $0x11ac] ss:$16 sps:$4 sm:$0xff]  }
 0x3b2   : > { %6242 = vmatpush1.bf16.msra.mxu1 %v8053_v43  ;;  %6202 = vmatprep.subr.bf16.mxu0 %v8058_v45  ;;  %v8133_v43 = vld [vmem:[%s9589_s5 + $0x13ac] ss:$16 sps:$4 sm:$0xff]   ;;  %v8128_v45 = vld [vmem:[%s9589_s5 + $0x11a8] ss:$16 sps:$4 sm:$0xff]  }
 0x3b3   : > { %6243 = vmatprep.subr.bf16.mxu1 %v8061_v46  ;;  %6232 = vmatprep.mubr.bf16.mxu0 %v9956_v41  ;;  %v8071_v41 = vld [vmem:[%s9589_s5 + $0x1268] ss:$16 sps:$4 sm:$0xff]  }
 0x3b4   : > { %6273 = vmatprep.mubr.bf16.mxu1 %v9960_v42  ;;  %v8076_v42 = vld [vmem:[%s9589_s5 + $0x108c] ss:$16 sps:$4 sm:$0xff]   ;;  %v8131_v46 = vld [vmem:[%s9589_s5 + $0x13a8] ss:$16 sps:$4 sm:$0xff]  }
 0x3b5   : > { %6203 = vmatpush1.bf16.msra.mxu0 %v8056_v50  ;;  %v8136_v50 = vld [vmem:[%s9589_s5 + $0x11cc] ss:$16 sps:$4 sm:$0xff]  }
 0x3b6   : > { %6244 = vmatpush1.bf16.msra.mxu1 %v8059_v51  ;;  %6204 = vmatprep.subr.bf16.mxu0 %v8064_v59  ;;  %v8139_v51 = vld [vmem:[%s9589_s5 + $0x13cc] ss:$16 sps:$4 sm:$0xff]   ;;  %v8134_v59 = vld [vmem:[%s9589_s5 + $0x11c8] ss:$16 sps:$4 sm:$0xff]  }
 0x3b7   : > { %6245 = vmatprep.subr.bf16.mxu1 %v8067_v62  ;;  %v8137_v62 = vld [vmem:[%s9589_s5 + $0x13c8] ss:$16 sps:$4 sm:$0xff]  }
 0x3b9   : > { %6205 = vmatpush1.bf16.msra.mxu0 %v8062_v60  ;;  %v8142_v60 = vld [vmem:[%s9589_s5 + $0x11ec] ss:$16 sps:$4 sm:$0xff]  }
 0x3ba   : > { %6246 = vmatpush1.bf16.msra.mxu1 %v8065_v61  ;;  %6206 = vmatprep.subr.bf16.mxu0 %v8070_v53  ;;  %v8145_v61 = vld [vmem:[%s9589_s5 + $0x13ec] ss:$16 sps:$4 sm:$0xff]   ;;  %v8140_v53 = vld [vmem:[%s9589_s5 + $0x11e8] ss:$16 sps:$4 sm:$0xff]  }
 0x3bb   : > { %6247 = vmatprep.subr.bf16.mxu1 %v8073_v54  ;;  %v8143_v54 = vld [vmem:[%s9589_s5 + $0x13e8] ss:$16 sps:$4 sm:$0xff]  }
 0x3bd   : > { %6207 = vmatpush1.bf16.msra.mxu0 %v8068_v55 }
 0x3be   : > { %6248 = vmatpush1.bf16.msra.mxu1 %v8071_v41  ;;  %6208 = vmatprep.subr.bf16.mxu0 %v8076_v42 }
 0x3bf   : > { %6249 = vmatprep.subr.bf16.mxu1 %v8079_v56 }
 0x3c1   : > { %6209 = vmatpush1.bf16.msra.mxu0 %v8074_v57 }
 0x3c2   : > { %6250 = vmatpush1.bf16.msra.mxu1 %v8077_v7  ;;  %6210 = vmatprep.subr.bf16.mxu0 %v8082_v58 }
 0x3c3   : > { %6251 = vmatprep.subr.bf16.mxu1 %v8085_v48  ;;  %v5906_v2 = vpop.f32.mrb[20].mxu0 }
 0x3c4   : > { %v5947_v3 = vpop.f32.mrb[20].mxu1  ;;  %v5908_v25 = vpop.f32.mrb[21].mxu0 }
 0x3c5   : > { %v10368_v27 = vadd.f32 %v5947_v3, %v5906_v2  ;;  %v5949_v26 = vpop.f32.mrb[21].mxu1  ;;  %v5910_v5 = vpop.f32.mrb[22].mxu0  ;;  %6211 = vmatpush1.bf16.msra.mxu0 %v8080_v32 }
 0x3c6   : > { %v10370_v31 = vadd.f32 %v5949_v26, %v5908_v25  ;;  %v5951_v6 = vpop.f32.mrb[22].mxu1  ;;  %6252 = vmatpush1.bf16.msra.mxu1 %v8083_v63  ;;  %v5911_v11 = vpop.f32.mrb[23].mxu0  ;;  %6212 = vmatprep.subr.bf16.mxu0 %v8088_v17 }
 0x3c7   : > { %v5952_v12 = vpop.f32.mrb[23].mxu1  ;;  %6253 = vmatprep.subr.bf16.mxu1 %v8091_v18 }
 0x3c9   : > { %6213 = vmatpush1.bf16.msra.mxu0 %v8086_v9 }
 0x3ca   : > { %6254 = vmatpush1.bf16.msra.mxu1 %v8089_v10  ;;  %6214 = vmatprep.subr.bf16.mxu0 %v8094_v13 }
 0x3cb   : > { %6255 = vmatprep.subr.bf16.mxu1 %v8097_v14 }
 0x3cd   : > { %6215 = vmatpush1.bf16.msra.mxu0 %v8092_v15 }
 0x3ce   : > { %6256 = vmatpush1.bf16.msra.mxu1 %v8095_v16  ;;  %6216 = vmatprep.subr.bf16.mxu0 %v8100_v19 }
 0x3cf   : > { %6257 = vmatprep.subr.bf16.mxu1 %v8103_v20 }
 0x3d1   : > { %6217 = vmatpush1.bf16.msra.mxu0 %v8098_v21 }
 0x3d2   : > { %6258 = vmatpush1.bf16.msra.mxu1 %v8101_v22  ;;  %6218 = vmatprep.subr.bf16.mxu0 %v8106_v39 }
 0x3d3   : > { %6259 = vmatprep.subr.bf16.mxu1 %v8109_v40 }
 0x3d5   : > { %6219 = vmatpush1.bf16.msra.mxu0 %v8104_v28 }
 0x3d6   : > { %6260 = vmatpush1.bf16.msra.mxu1 %v8107_v29  ;;  %6220 = vmatprep.subr.bf16.mxu0 %v8112_v35 }
 0x3d7   : > { %6261 = vmatprep.subr.bf16.mxu1 %v8115_v23 }
 0x3d9   : > { %6221 = vmatpush1.bf16.msra.mxu0 %v8110_v24 }
 0x3da   : > { %6262 = vmatpush1.bf16.msra.mxu1 %v8113_v30  ;;  %6222 = vmatprep.subr.bf16.mxu0 %v8118_v8 }
 0x3db   : > { %6263 = vmatprep.subr.bf16.mxu1 %v8121_v44 }
 0x3dd   : > { %6223 = vmatpush1.bf16.msra.mxu0 %v8116_v1 }
 0x3de   : > { %6264 = vmatpush1.bf16.msra.mxu1 %v8119_v4  ;;  %6224 = vmatprep.subr.bf16.mxu0 %v8124_v33 }
 0x3df   : > { %6265 = vmatprep.subr.bf16.mxu1 %v8127_v37 }
 0x3e1   : > { %6225 = vmatpush1.bf16.msra.mxu0 %v8122_v38 }
 0x3e2   : > { %6266 = vmatpush1.bf16.msra.mxu1 %v8125_v34  ;;  %6226 = vmatprep.subr.bf16.mxu0 %v8130_v36  ;;  %v6300_v36 = vlaneseq (!%p7103_p13) }
 0x3e3   : > { %6267 = vmatprep.subr.bf16.mxu1 %v8133_v43 }
 0x3e4   : > { %v6301_v43 = vshrl.u32 (!%p7103_p13), %v6300_v36, 7 }
 0x3e5   : > { %6227 = vmatpush1.bf16.msra.mxu0 %v8128_v45  ;;  %v6298_v45 = vld [vmem:[%s1522_s12] sm:$0xf] (!%p7103_p13) }
 0x3e6   : > { %6268 = vmatpush1.bf16.msra.mxu1 %v8131_v46  ;;  %6228 = vmatprep.subr.bf16.mxu0 %v8136_v50  ;;  %v6302_v46 = vsub.s32 (!%p7103_p13), 0, %v6301_v43  ;;  %v6310_v50 = vsub.s32 (!%p7103_p13), 2, %v6301_v43 }
 0x3e7   : > { %6269 = vmatprep.subr.bf16.mxu1 %v8139_v51  ;;  %v6314_v51 = vsub.s32 (!%p7103_p13), 3, %v6301_v43 }
 0x3e9   : > { %6229 = vmatpush1.bf16.msra.mxu0 %v8134_v59  ;;  %v6295_v59 = vld [vmem:[%s9587_s4 + $0x8] sm:$0xff] (!%p7103_p13) }
 0x3ea   : > { %6270 = vmatpush1.bf16.msra.mxu1 %v8137_v62  ;;  %6230 = vmatprep.subr.bf16.mxu0 %v8142_v60 }
 0x3eb   : > { %6271 = vmatprep.subr.bf16.mxu1 %v8145_v61  ;;  %v6303_v61 = vrot.slane (!%p7103_p13), %v6298_v45, %v6302_v46 }
 0x3ed   : > { %6231 = vmatpush1.bf16.msra.mxu0 %v8140_v53 }
 0x3ee   : > { %6272 = vmatpush1.bf16.msra.mxu1 %v8143_v54  ;;  %v6311_v54 = vrot.slane (!%p7103_p13), %v6298_v45, %v6310_v50 }
 0x3f0   : > { %6233 = vmatmul.mubr.bf16.vlgmr.msra.gmra.mrb[36].mxu0 %v10034_v47 }
 0x3f1   : > { %6274 = vmatmul.mubr.bf16.vlgmr.msra.gmra.mrb[36].mxu1 %v10038_v49 }
 0x403   : > { %v5988_v55 = vpop.f32.mrb[24].mxu0 }
 0x404   : > { %v6029_v41 = vpop.f32.mrb[24].mxu1  ;;  %v5989_v42 = vadd.f32 %v5988_v55, %v10368_v27  ;;  %v5990_v56 = vpop.f32.mrb[25].mxu0  ;;  %v6315_v55 = vrot.slane (!%p7103_p13), %v6298_v45, %v6314_v51 }
 0x405   : > { %v6031_v57 = vpop.f32.mrb[25].mxu1  ;;  %v5991_v7 = vadd.f32 %v5990_v56, %v10370_v31  ;;  %v5992_v58 = vpop.f32.mrb[26].mxu0 }
 0x406   : > { %v6033_v48 = vpop.f32.mrb[26].mxu1  ;;  %v6030_v32 = vadd.f32 %v6029_v41, %v5989_v42  ;;  %v5993_v63 = vpop.f32.mrb[27].mxu0 }
 0x407   : > { %v6034_v17 = vpop.f32.mrb[27].mxu1  ;;  %v6032_v18 = vadd.f32 %v6031_v57, %v5991_v7 }
 0x443   : > { %v6070_v2 = vpop.f32.mrb[28].mxu0 }
 0x444   : > { %v6111_v3 = vpop.f32.mrb[28].mxu1  ;;  %v6071_v25 = vadd.f32 %v6070_v2, %v6030_v32  ;;  %v6072_v47 = vpop.f32.mrb[29].mxu0 }
 0x445   : > { %v6113_v26 = vpop.f32.mrb[29].mxu1  ;;  %v6073_v49 = vadd.f32 %v6072_v47, %v6032_v18  ;;  %v6074_v5 = vpop.f32.mrb[30].mxu0 }
 0x446   : > { %v6115_v6 = vpop.f32.mrb[30].mxu1  ;;  %v6112_v9 = vadd.f32 %v6111_v3, %v6071_v25  ;;  %v6075_v27 = vpop.f32.mrb[31].mxu0 }
 0x447   : > { %v6116_v10 = vpop.f32.mrb[31].mxu1  ;;  %v6114_v11 = vadd.f32 %v6113_v26, %v6073_v49 }
 0x483   : > { %v6152_v12 = vpop.f32.mrb[32].mxu0 }
 0x484   : > { %v6193_v31 = vpop.f32.mrb[32].mxu1  ;;  %v6153_v13 = vadd.f32 %v6152_v12, %v6112_v9  ;;  %v6154_v14 = vpop.f32.mrb[33].mxu0 }
 0x485   : > { %v6195_v15 = vpop.f32.mrb[33].mxu1  ;;  %v6155_v16 = vadd.f32 %v6154_v14, %v6114_v11  ;;  %v6156_v19 = vpop.f32.mrb[34].mxu0 }
 0x486   : > { %v6197_v20 = vpop.f32.mrb[34].mxu1  ;;  %v6194_v21 = vadd.f32 %v6193_v31, %v6153_v13  ;;  %v6157_v22 = vpop.f32.mrb[35].mxu0 }
 0x487   : > { %v6198_v39 = vpop.f32.mrb[35].mxu1  ;;  %v6196_v40 = vadd.f32 %v6195_v15, %v6155_v16 }
 0x4c3   : > { %v6234_v28 = vpop.f32.mrb[36].mxu0 }
 0x4c4   : > { %v6275_v29 = vpop.f32.mrb[36].mxu1  ;;  %v6235_v35 = vadd.f32 %v6234_v28, %v6194_v21  ;;  %v6236_v23 = vpop.f32.mrb[37].mxu0 }
 0x4c5   : > { %v6277_v24 = vpop.f32.mrb[37].mxu1  ;;  %v6237_v30 = vadd.f32 %v6236_v23, %v6196_v40  ;;  %v6238_v8 = vpop.f32.mrb[38].mxu0  ;;  %6293 = sbr.rel (%p7103_p13) target bundleno = 1240 (0x4d8), region = 63 }
 0x4c6   : > { %v6279_v44 = vpop.f32.mrb[38].mxu1  ;;  %v6276_v1 = vadd.f32 %v6275_v29, %v6235_v35  ;;  %v6239_v4 = vpop.f32.mrb[39].mxu0 }
 0x4c7   : > { %v6280_v33 = vpop.f32.mrb[39].mxu1  ;;  %v6278_v37 = vadd.f32 %v6277_v24, %v6237_v30 }
 0x4c8   : > { %v6284_v38 = vadd.f32 %v6276_v1, %v10297_v52  ;;  %v6294_v52 = vld [vmem:[%s9587_s4] sm:$0xff] (!%p7103_p13) }
 0x4c9   : > { %v6285_v34 = vadd.f32 %v6278_v37, %v10300_v0  ;;  %v6306_v0 = vsub.s32 (!%p7103_p13), 1, %v6301_v43  ;;  %v6320_v41 = vadd.f32 (!%p7103_p13), %v6303_v61, %v6294_v52 }
 0x4ca   : > { %6288 = vst [vmem:[%s9587_s4 + $0x10] sm:$0xff] %v6284_v38 }
 0x4cb   : > { %6289 = vst [vmem:[%s9587_s4 + $0x18] sm:$0xff] %v6285_v34  ;;  %v6307_v53 = vrot.slane (!%p7103_p13), %v6298_v45, %v6306_v0  ;;  %v6324_v7 = vmax.f32 (!%p7103_p13), %v6320_v41, 0.0 }
 0x4cd   : > { %v6321_v42 = vadd.f32 %v6307_v53, %v6295_v59  ;;  %6328 = vst [vmem:[%s9587_s4] sm:$0xff] %v6324_v7 }
 0x4cf   : > { %v6325_v58 = vmax.f32 %v6321_v42, 0.0 }
 0x4d1   : > { %v6296_v62 = vld [vmem:[%s9587_s4 + $0x10] sm:$0xff]  ;;  %6329 = vst [vmem:[%s9587_s4 + $0x8] sm:$0xff] %v6325_v58 }
 0x4d2   : > { %v6297_v60 = vld [vmem:[%s9587_s4 + $0x18] sm:$0xff]  ;;  %v6322_v56 = vadd.f32 %v6311_v54, %v6296_v62 }
 0x4d3   : > { %v6323_v57 = vadd.f32 %v6315_v55, %v6297_v60 }
 0x4d4   : > { %v6326_v48 = vmax.f32 %v6322_v56, 0.0 }
 0x4d5   : > { %v6327_v32 = vmax.f32 %v6323_v57, 0.0 }
 0x4d6   : > { %6330 = vst [vmem:[%s9587_s4 + $0x10] sm:$0xff] %v6326_v48 }
 0x4d7   : > { %6331 = vst [vmem:[%s9587_s4 + $0x18] sm:$0xff] %v6327_v32 }
 0x4d8 PF: > { %s13_s18 = sadd.s32 1, %s8200_s18   ;;  %s10457_s12 = smov %s8180_s13 }
 0x4d9   : > { %p10_p0 = scmp.ge.s32.totalorder %s13_s18, 6   ;;  %s10458_s13 = smov %s8274_s25 }
 0x4da   : > { %s10459_s14 = smov %s8192_s16  ;;  %s10460_s15 = smov %s8196_s17 }
 0x4db   : > { %s10461_s16 = smov %s10464_s19  ;;  %s10462_s17 = smov %s10468_s20 }
 0x4dc   :  { %12 = sbr.rel (!%p10_p0) target bundleno = 4 (0x4), region = 104 }

</bundles_post_ra>
